<compile_context>
chip_gen: v7x
topology: tpu7x:2x2x1
jax: 0.10.0
libtpu: 0.0.40
codegen_flags: <defaults>
</compile_context>

<pallas_src>
import jax
import jax.numpy as jnp
from jax.experimental import pallas as pl
from jax.experimental.pallas import tpu as pltpu


def _spec(shape):
    n = len(shape)
    # index_map receives (grid_i, *scalar_prefetch_refs); absorb them all.
    return pl.BlockSpec(shape, lambda *_, n=n: (0,) * n)


# ---------------------------------------------------------------------------
# Fused kernel: gather + LSTM encode + masked mean pool + score MLP + focal loss
# ---------------------------------------------------------------------------
def ranker_kernel(q_idx_ref, ctx_idx_ref,                      # scalar prefetch (SMEM)
                  emb_ref, valid_ref, inv_len_ref, row_mask_ref,
                  w_ih_ref, w_hh_ref, b_lstm_ref, w1_hbm_ref,
                  b1_ref, w2_ref, b2_ref, y_ref,
                  scores_ref, loss_ref,
                  a_buf, q_buf, x_buf, w1_vmem, w1_sem):
    # emb_ref:     (V, 1, H)    f32   embedding table (VMEM resident)
    # valid_ref:   (S, B, 1)    f32   1.0 where masks == 0
    # inv_len_ref: (B, 1)       f32   1 / max(length, 1)
    # row_mask_ref:(B, 1)       f32   1.0 for real batch rows, 0 for padding
    # w_ih_ref: (2H,4H) bf16, w_hh_ref: (H,4H) bf16, b_lstm_ref: (1,4H) f32
    # w1_hbm_ref: (4H,F1) bf16 in HBM, b1: (1,F1), w2: (1,F1), b2: (1,1) f32
    # y_ref:       (B, 1)       f32   labels (padded rows masked in loss)
    S, B, _ = valid_ref.shape
    H = emb_ref.shape[2]

    # --- start the largest weight DMA now; wait right before the MLP matmul --
    w1_cp = pltpu.make_async_copy(w1_hbm_ref, w1_vmem, w1_sem)
    w1_cp.start()

    # --- fused embedding gather (dynamic leading-axis loads, SMEM indices) ---
    for b in range(B):
        q_buf[pl.ds(b, 1), :] = emb_ref[q_idx_ref[b]]          # (1, H)
    for r in range(S * B):
        a_buf[pl.ds(r, 1), :] = emb_ref[ctx_idx_ref[r]]        # (1, H)

    q = q_buf[...]                                             # (B, H) f32
    w_ih = w_ih_ref[...]                                       # (2H, 4H) bf16
    w_hh = w_hh_ref[...]                                       # (H, 4H)  bf16
    b_lstm = b_lstm_ref[...]                                   # (1, 4H)  f32
    valid = valid_ref[...]                                     # (S, B, 1)

    # --- batched input projection (off the serial chain), bf16 MXU / f32 acc -
    a_proj = jnp.dot(a_buf[...].astype(jnp.bfloat16), w_ih[0:H],
                     preferred_element_type=jnp.float32)       # (S*B, 4H)
    q_proj = jnp.dot(q.astype(jnp.bfloat16), w_ih[H:2 * H],
                     preferred_element_type=jnp.float32)       # (B, 4H)

    # --- hoisted per-step prologue: mask, +q_proj, +bias (one batched op) ----
    x_buf[...] = ((a_proj.reshape(S, B, 4 * H) + q_proj[None]) * valid
                  + b_lstm[None])                              # (S, B, 4H)

    # --- LSTM recurrence, statically unrolled; only h@W_hh + gates on chain --
    h = jnp.zeros((B, H), jnp.float32)
    c = jnp.zeros((B, H), jnp.float32)
    acc = jnp.zeros((B, H), jnp.float32)
    for t in range(S):
        gates = x_buf[t] + jnp.dot(h.astype(jnp.bfloat16), w_hh,
                                   preferred_element_type=jnp.float32)
        i_g = jax.nn.sigmoid(gates[:, 0:H])
        f_g = jax.nn.sigmoid(gates[:, H:2 * H])
        g_g = jnp.tanh(gates[:, 2 * H:3 * H])
        o_g = jax.nn.sigmoid(gates[:, 3 * H:4 * H])
        c = f_g * c + i_g * g_g
        h = o_g * jnp.tanh(c)
        acc = acc + h * valid[t]                               # zero padded pos

    p = acc * inv_len_ref[...]                                 # (B, H) mean pool

    # --- score MLP: concat features -> one 4H-deep matmul --------------------
    feat = jnp.concatenate([q, p, q - p, q * p], axis=1)       # (B, 4H)

    w1_cp.wait()                                               # w1 now in VMEM
    h1 = (jnp.dot(feat.astype(jnp.bfloat16), w1_vmem[...],
                  preferred_element_type=jnp.float32)
          + b1_ref[...])                                       # (B, F1)
    # Dropout(0.1) is identity in eval mode; LeakyReLU slope 0.01.
    h1 = jnp.where(h1 >= 0.0, h1, 0.01 * h1)

    # (F1,1) head as broadcast-multiply + lane reduction (avoids N=1 matmul).
    logits = jnp.sum(h1 * w2_ref[...], axis=1, keepdims=True) + b2_ref[...]
    s = jax.nn.sigmoid(logits)                                 # (B, 1)
    scores_ref[...] = s

    # --- FocalLoss(alpha=1, gamma=2, logits=False, reduce=sum) ---------------
    y = y_ref[...]                                             # (B, 1)
    pt = y * s + (1.0 - y) * (1.0 - s)                         # = exp(-BCE)
    bce = -jnp.maximum(jnp.log(pt), -100.0)                    # torch log clamp
    loss_ref[...] = jnp.sum(row_mask_ref[...] * (1.0 - pt) ** 2 * bce
                            ).reshape(1, 1)


def ranker_pallas(q_idx, ctx_idx, emb3, valid_tm, inv_len, row_mask,
                  w_ih, w_hh, b_lstm, w1, b1, w2_row, b2, labels):
    S, B, _ = valid_tm.shape
    H = emb3.shape[2]
    F1 = b1.shape[1]
    grid_spec = pltpu.PrefetchScalarGridSpec(
        num_scalar_prefetch=2,
        grid=(1,),
        in_specs=[
            _spec(emb3.shape), _spec(valid_tm.shape), _spec(inv_len.shape),
            _spec(row_mask.shape), _spec(w_ih.shape), _spec(w_hh.shape),
            _spec(b_lstm.shape),
            pl.BlockSpec(memory_space=pl.ANY),                 # w1 stays in HBM
            _spec(b1.shape), _spec(w2_row.shape), _spec(b2.shape),
            _spec(labels.shape)],
        out_specs=(_spec((B, 1)), _spec((1, 1))),
        scratch_shapes=[
            pltpu.VMEM((S * B, H), jnp.float32),               # gathered A rows
            pltpu.VMEM((B, H), jnp.float32),                   # gathered Q rows
            pltpu.VMEM((S, B, 4 * H), jnp.float32),            # hoisted gate inputs
            pltpu.VMEM((4 * H, F1), jnp.bfloat16),             # w1 landing buffer
            pltpu.SemaphoreType.DMA,                           # w1 DMA semaphore
        ])
    scores, loss = pl.pallas_call(
        ranker_kernel,
        out_shape=(jax.ShapeDtypeStruct((B, 1), jnp.float32),
                   jax.ShapeDtypeStruct((1, 1), jnp.float32)),
        grid_spec=grid_spec,
    )(q_idx, ctx_idx, emb3, valid_tm, inv_len, row_mask,
      w_ih, w_hh, b_lstm, w1, b1, w2_row, b2, labels)
    return scores, loss


# ---------------------------------------------------------------------------
# Full Ranker forward (only padding / mask prep in JAX; everything else fused)
# ---------------------------------------------------------------------------
@jax.jit
def ranker_forward(questions, contexts, masks, labels, embeddings, params):
    B, S = contexts.shape
    B_pad = max(8, -(-B // 8) * 8)                             # sublane align
    pad = B_pad - B

    q_idx = jnp.pad(questions.astype(jnp.int32), (0, pad))
    ctx = jnp.pad(contexts.astype(jnp.int32), ((0, pad), (0, 0)))
    masks_p = jnp.pad(masks, ((0, pad), (0, 0)), constant_values=1)
    labels_p = jnp.pad(labels.astype(jnp.float32), (0, pad))

    ctx_idx = ctx.T.reshape(-1)                                # time-major (S*B_pad,)
    emb3 = embeddings[:, None, :]                              # (V, 1, H)

    valid = (masks_p == 0).astype(jnp.float32)                 # (B_pad, S)
    valid_tm = valid.T[:, :, None]                             # (S, B_pad, 1)
    lengths = jnp.sum(valid, axis=1, keepdims=True)            # (B_pad, 1)
    inv_len = 1.0 / jnp.maximum(lengths, 1.0)                  # clamp >= 1
    row_mask = (jnp.arange(B_pad) < B).astype(jnp.float32)[:, None]

    scores, loss = ranker_pallas(
        q_idx, ctx_idx, emb3, valid_tm, inv_len, row_mask,
        params["w_ih"].astype(jnp.bfloat16),
        params["w_hh"].astype(jnp.bfloat16),
        params["b_lstm"],
        params["w1"].astype(jnp.bfloat16),
        params["b1"],
        params["w2"].reshape(1, -1),
        params["b2"],
        labels_p[:, None])
    return scores[:B, 0], loss[0, 0]


if __name__ == "__main__":
    B, S, H, V, F1 = 4, 8, 128, 64, 1024

    key = jax.random.PRNGKey(0)
    keys = jax.random.split(key, 10)

    embeddings = jax.random.normal(keys[0], (V, H), jnp.float32) * 0.5
    questions = jax.random.randint(keys[1], (B,), 0, V)
    contexts = jax.random.randint(keys[2], (B, S), 0, V)

    lengths = jnp.array([8, 5, 3, 6], jnp.int32)
    pos = jnp.arange(S)[None, :]
    masks = (pos >= lengths[:, None]).astype(jnp.int32)        # 0 = valid prefix

    labels = jax.random.bernoulli(keys[3], 0.5, (B,)).astype(jnp.float32)

    params = {
        # LSTM(input_size=2H, hidden_size=H), gate order i,f,g,o, (x @ W) layout
        "w_ih": jax.random.normal(keys[4], (2 * H, 4 * H), jnp.float32) * 0.05,
        "w_hh": jax.random.normal(keys[5], (H, 4 * H), jnp.float32) * 0.05,
        "b_lstm": jax.random.normal(keys[6], (1, 4 * H), jnp.float32) * 0.05,
        # score_net: Linear(4H, 1024) -> LeakyReLU -> Linear(1024, 1)
        "w1": jax.random.normal(keys[7], (4 * H, F1), jnp.float32) * 0.02,
        "b1": jnp.zeros((1, F1), jnp.float32),
        "w2": jax.random.normal(keys[8], (F1, 1), jnp.float32) * 0.02,
        "b2": jnp.zeros((1, 1), jnp.float32),
    }

    scores, loss = ranker_forward(questions, contexts, masks, labels,
                                  embeddings, params)
    jax.block_until_ready((scores, loss))
    assert scores.shape == (B,)
    assert bool(jnp.all(jnp.isfinite(scores)))
    assert bool(jnp.isfinite(loss))
    print("KERNEL_OK")
</pallas_src>

<mosaic_0001>
module attributes {stable_mosaic.version = 11 : i64} {
  func.func @ranker_kernel(%arg0: i32, %arg1: memref<8xi32, #tpu.memory_space<smem>>, %arg2: memref<64xi32, #tpu.memory_space<smem>>, %arg3: memref<64x1x128xf32, #tpu.memory_space<vmem>>, %arg4: memref<8x8x1xf32, #tpu.memory_space<vmem>>, %arg5: memref<8x1xf32, #tpu.memory_space<vmem>>, %arg6: memref<8x1xf32, #tpu.memory_space<vmem>>, %arg7: memref<256x512xbf16, #tpu.memory_space<vmem>>, %arg8: memref<128x512xbf16, #tpu.memory_space<vmem>>, %arg9: memref<1x512xf32, #tpu.memory_space<vmem>>, %arg10: memref<512x1024xbf16, #tpu.memory_space<any>>, %arg11: memref<1x1024xf32, #tpu.memory_space<vmem>>, %arg12: memref<1x1024xf32, #tpu.memory_space<vmem>>, %arg13: memref<1x1xf32, #tpu.memory_space<vmem>>, %arg14: memref<8x1xf32, #tpu.memory_space<vmem>>, %arg15: memref<8x1xf32, #tpu.memory_space<vmem>>, %arg16: memref<1x1xf32, #tpu.memory_space<vmem>>, %arg17: memref<64x128xf32, #tpu.memory_space<vmem>>, %arg18: memref<8x128xf32, #tpu.memory_space<vmem>>, %arg19: memref<8x8x512xf32, #tpu.memory_space<vmem>>, %arg20: memref<512x1024xbf16, #tpu.memory_space<vmem>>, %arg21: memref<!tpu.dma_semaphore, #tpu.memory_space<semaphore_mem>>) attributes {dimension_semantics = [#tpu.dimension_semantics<arbitrary>], iteration_bounds = array<i64: 1>, scalar_prefetch = 2 : i64, scratch_operands = 5 : i64, tpu.core_type = #tpu.core_type<tc>, window_params = [{pipeline_mode = #tpu.pipeline_mode<synchronous>, transform_indices = @transform_0, window_bounds = array<i64: 64, 1, 128>}, {pipeline_mode = #tpu.pipeline_mode<synchronous>, transform_indices = @transform_1, window_bounds = array<i64: 8, 8, 1>}, {pipeline_mode = #tpu.pipeline_mode<synchronous>, transform_indices = @transform_2, window_bounds = array<i64: 8, 1>}, {pipeline_mode = #tpu.pipeline_mode<synchronous>, transform_indices = @transform_3, window_bounds = array<i64: 8, 1>}, {pipeline_mode = #tpu.pipeline_mode<synchronous>, transform_indices = @transform_4, window_bounds = array<i64: 256, 512>}, {pipeline_mode = #tpu.pipeline_mode<synchronous>, transform_indices = @transform_5, window_bounds = array<i64: 128, 512>}, {pipeline_mode = #tpu.pipeline_mode<synchronous>, transform_indices = @transform_6, window_bounds = array<i64: 1, 512>}, {}, {pipeline_mode = #tpu.pipeline_mode<synchronous>, transform_indices = @transform_8, window_bounds = array<i64: 1, 1024>}, {pipeline_mode = #tpu.pipeline_mode<synchronous>, transform_indices = @transform_9, window_bounds = array<i64: 1, 1024>}, {pipeline_mode = #tpu.pipeline_mode<synchronous>, transform_indices = @transform_10, window_bounds = array<i64: 1, 1>}, {pipeline_mode = #tpu.pipeline_mode<synchronous>, transform_indices = @transform_11, window_bounds = array<i64: 8, 1>}, {pipeline_mode = #tpu.pipeline_mode<synchronous>, transform_indices = @transform_12, window_bounds = array<i64: 8, 1>}, {pipeline_mode = #tpu.pipeline_mode<synchronous>, transform_indices = @transform_13, window_bounds = array<i64: 1, 1>}]} {
    tpu.enqueue_dma source(%arg10 : memref<512x1024xbf16, #tpu.memory_space<any>>) target(%arg20 : memref<512x1024xbf16, #tpu.memory_space<vmem>>) target_semaphore(%arg21 : memref<!tpu.dma_semaphore, #tpu.memory_space<semaphore_mem>>)
    %c0 = arith.constant 0 : index
    %0 = memref.load %arg1[%c0] : memref<8xi32, #tpu.memory_space<smem>>
    %1 = arith.index_cast %0 : i32 to index
    %c0_0 = arith.constant 0 : index
    %c0_1 = arith.constant 0 : index
    %2 = vector.load %arg3[%1, %c0_0, %c0_1] : memref<64x1x128xf32, #tpu.memory_space<vmem>>, vector<1x1x128xf32>
    %3 = vector.shape_cast %2 : vector<1x1x128xf32> to vector<1x128xf32>
    %c0_2 = arith.constant 0 : index
    %c0_3 = arith.constant 0 : index
    %4 = vector.load %arg18[%c0_2, %c0_3] : memref<8x128xf32, #tpu.memory_space<vmem>>, vector<1x128xf32>
    tpu.vector_store %arg18[%c0_2, %c0_3], %3 {strides = array<i32>} : memref<8x128xf32, #tpu.memory_space<vmem>>, vector<1x128xf32>,
    %c1 = arith.constant 1 : index
    %5 = memref.load %arg1[%c1] : memref<8xi32, #tpu.memory_space<smem>>
    %6 = arith.index_cast %5 : i32 to index
    %c0_4 = arith.constant 0 : index
    %c0_5 = arith.constant 0 : index
    %7 = vector.load %arg3[%6, %c0_4, %c0_5] : memref<64x1x128xf32, #tpu.memory_space<vmem>>, vector<1x1x128xf32>
    %8 = vector.shape_cast %7 : vector<1x1x128xf32> to vector<1x128xf32>
    %c1_6 = arith.constant 1 : index
    %c0_7 = arith.constant 0 : index
    %9 = vector.load %arg18[%c1_6, %c0_7] : memref<8x128xf32, #tpu.memory_space<vmem>>, vector<1x128xf32>
    tpu.vector_store %arg18[%c1_6, %c0_7], %8 {strides = array<i32>} : memref<8x128xf32, #tpu.memory_space<vmem>>, vector<1x128xf32>,
    %c2 = arith.constant 2 : index
    %10 = memref.load %arg1[%c2] : memref<8xi32, #tpu.memory_space<smem>>
    %11 = arith.index_cast %10 : i32 to index
    %c0_8 = arith.constant 0 : index
    %c0_9 = arith.constant 0 : index
    %12 = vector.load %arg3[%11, %c0_8, %c0_9] : memref<64x1x128xf32, #tpu.memory_space<vmem>>, vector<1x1x128xf32>
    %13 = vector.shape_cast %12 : vector<1x1x128xf32> to vector<1x128xf32>
    %c2_10 = arith.constant 2 : index
    %c0_11 = arith.constant 0 : index
    %14 = vector.load %arg18[%c2_10, %c0_11] : memref<8x128xf32, #tpu.memory_space<vmem>>, vector<1x128xf32>
    tpu.vector_store %arg18[%c2_10, %c0_11], %13 {strides = array<i32>} : memref<8x128xf32, #tpu.memory_space<vmem>>, vector<1x128xf32>,
    %c3 = arith.constant 3 : index
    %15 = memref.load %arg1[%c3] : memref<8xi32, #tpu.memory_space<smem>>
    %16 = arith.index_cast %15 : i32 to index
    %c0_12 = arith.constant 0 : index
    %c0_13 = arith.constant 0 : index
    %17 = vector.load %arg3[%16, %c0_12, %c0_13] : memref<64x1x128xf32, #tpu.memory_space<vmem>>, vector<1x1x128xf32>
    %18 = vector.shape_cast %17 : vector<1x1x128xf32> to vector<1x128xf32>
    %c3_14 = arith.constant 3 : index
    %c0_15 = arith.constant 0 : index
    %19 = vector.load %arg18[%c3_14, %c0_15] : memref<8x128xf32, #tpu.memory_space<vmem>>, vector<1x128xf32>
    tpu.vector_store %arg18[%c3_14, %c0_15], %18 {strides = array<i32>} : memref<8x128xf32, #tpu.memory_space<vmem>>, vector<1x128xf32>,
    %c4 = arith.constant 4 : index
    %20 = memref.load %arg1[%c4] : memref<8xi32, #tpu.memory_space<smem>>
    %21 = arith.index_cast %20 : i32 to index
    %c0_16 = arith.constant 0 : index
    %c0_17 = arith.constant 0 : index
    %22 = vector.load %arg3[%21, %c0_16, %c0_17] : memref<64x1x128xf32, #tpu.memory_space<vmem>>, vector<1x1x128xf32>
    %23 = vector.shape_cast %22 : vector<1x1x128xf32> to vector<1x128xf32>
    %c4_18 = arith.constant 4 : index
    %c0_19 = arith.constant 0 : index
    %24 = vector.load %arg18[%c4_18, %c0_19] : memref<8x128xf32, #tpu.memory_space<vmem>>, vector<1x128xf32>
    tpu.vector_store %arg18[%c4_18, %c0_19], %23 {strides = array<i32>} : memref<8x128xf32, #tpu.memory_space<vmem>>, vector<1x128xf32>,
    %c5 = arith.constant 5 : index
    %25 = memref.load %arg1[%c5] : memref<8xi32, #tpu.memory_space<smem>>
    %26 = arith.index_cast %25 : i32 to index
    %c0_20 = arith.constant 0 : index
    %c0_21 = arith.constant 0 : index
    %27 = vector.load %arg3[%26, %c0_20, %c0_21] : memref<64x1x128xf32, #tpu.memory_space<vmem>>, vector<1x1x128xf32>
    %28 = vector.shape_cast %27 : vector<1x1x128xf32> to vector<1x128xf32>
    %c5_22 = arith.constant 5 : index
    %c0_23 = arith.constant 0 : index
    %29 = vector.load %arg18[%c5_22, %c0_23] : memref<8x128xf32, #tpu.memory_space<vmem>>, vector<1x128xf32>
    tpu.vector_store %arg18[%c5_22, %c0_23], %28 {strides = array<i32>} : memref<8x128xf32, #tpu.memory_space<vmem>>, vector<1x128xf32>,
    %c6 = arith.constant 6 : index
    %30 = memref.load %arg1[%c6] : memref<8xi32, #tpu.memory_space<smem>>
    %31 = arith.index_cast %30 : i32 to index
    %c0_24 = arith.constant 0 : index
    %c0_25 = arith.constant 0 : index
    %32 = vector.load %arg3[%31, %c0_24, %c0_25] : memref<64x1x128xf32, #tpu.memory_space<vmem>>, vector<1x1x128xf32>
    %33 = vector.shape_cast %32 : vector<1x1x128xf32> to vector<1x128xf32>
    %c6_26 = arith.constant 6 : index
    %c0_27 = arith.constant 0 : index
    %34 = vector.load %arg18[%c6_26, %c0_27] : memref<8x128xf32, #tpu.memory_space<vmem>>, vector<1x128xf32>
    tpu.vector_store %arg18[%c6_26, %c0_27], %33 {strides = array<i32>} : memref<8x128xf32, #tpu.memory_space<vmem>>, vector<1x128xf32>,
    %c7 = arith.constant 7 : index
    %35 = memref.load %arg1[%c7] : memref<8xi32, #tpu.memory_space<smem>>
    %36 = arith.index_cast %35 : i32 to index
    %c0_28 = arith.constant 0 : index
    %c0_29 = arith.constant 0 : index
    %37 = vector.load %arg3[%36, %c0_28, %c0_29] : memref<64x1x128xf32, #tpu.memory_space<vmem>>, vector<1x1x128xf32>
    %38 = vector.shape_cast %37 : vector<1x1x128xf32> to vector<1x128xf32>
    %c7_30 = arith.constant 7 : index
    %c0_31 = arith.constant 0 : index
    %39 = vector.load %arg18[%c7_30, %c0_31] : memref<8x128xf32, #tpu.memory_space<vmem>>, vector<1x128xf32>
    tpu.vector_store %arg18[%c7_30, %c0_31], %38 {strides = array<i32>} : memref<8x128xf32, #tpu.memory_space<vmem>>, vector<1x128xf32>,
    %c0_32 = arith.constant 0 : index
    %40 = memref.load %arg2[%c0_32] : memref<64xi32, #tpu.memory_space<smem>>
    %41 = arith.index_cast %40 : i32 to index
    %c0_33 = arith.constant 0 : index
    %c0_34 = arith.constant 0 : index
    %42 = vector.load %arg3[%41, %c0_33, %c0_34] : memref<64x1x128xf32, #tpu.memory_space<vmem>>, vector<1x1x128xf32>
    %43 = vector.shape_cast %42 : vector<1x1x128xf32> to vector<1x128xf32>
    %c0_35 = arith.constant 0 : index
    %c0_36 = arith.constant 0 : index
    %44 = vector.load %arg17[%c0_35, %c0_36] : memref<64x128xf32, #tpu.memory_space<vmem>>, vector<1x128xf32>
    tpu.vector_store %arg17[%c0_35, %c0_36], %43 {strides = array<i32>} : memref<64x128xf32, #tpu.memory_space<vmem>>, vector<1x128xf32>,
    %c1_37 = arith.constant 1 : index
    %45 = memref.load %arg2[%c1_37] : memref<64xi32, #tpu.memory_space<smem>>
    %46 = arith.index_cast %45 : i32 to index
    %c0_38 = arith.constant 0 : index
    %c0_39 = arith.constant 0 : index
    %47 = vector.load %arg3[%46, %c0_38, %c0_39] : memref<64x1x128xf32, #tpu.memory_space<vmem>>, vector<1x1x128xf32>
    %48 = vector.shape_cast %47 : vector<1x1x128xf32> to vector<1x128xf32>
    %c1_40 = arith.constant 1 : index
    %c0_41 = arith.constant 0 : index
    %49 = vector.load %arg17[%c1_40, %c0_41] : memref<64x128xf32, #tpu.memory_space<vmem>>, vector<1x128xf32>
    tpu.vector_store %arg17[%c1_40, %c0_41], %48 {strides = array<i32>} : memref<64x128xf32, #tpu.memory_space<vmem>>, vector<1x128xf32>,
    %c2_42 = arith.constant 2 : index
    %50 = memref.load %arg2[%c2_42] : memref<64xi32, #tpu.memory_space<smem>>
    %51 = arith.index_cast %50 : i32 to index
    %c0_43 = arith.constant 0 : index
    %c0_44 = arith.constant 0 : index
    %52 = vector.load %arg3[%51, %c0_43, %c0_44] : memref<64x1x128xf32, #tpu.memory_space<vmem>>, vector<1x1x128xf32>
    %53 = vector.shape_cast %52 : vector<1x1x128xf32> to vector<1x128xf32>
    %c2_45 = arith.constant 2 : index
    %c0_46 = arith.constant 0 : index
    %54 = vector.load %arg17[%c2_45, %c0_46] : memref<64x128xf32, #tpu.memory_space<vmem>>, vector<1x128xf32>
    tpu.vector_store %arg17[%c2_45, %c0_46], %53 {strides = array<i32>} : memref<64x128xf32, #tpu.memory_space<vmem>>, vector<1x128xf32>,
    %c3_47 = arith.constant 3 : index
    %55 = memref.load %arg2[%c3_47] : memref<64xi32, #tpu.memory_space<smem>>
    %56 = arith.index_cast %55 : i32 to index
    %c0_48 = arith.constant 0 : index
    %c0_49 = arith.constant 0 : index
    %57 = vector.load %arg3[%56, %c0_48, %c0_49] : memref<64x1x128xf32, #tpu.memory_space<vmem>>, vector<1x1x128xf32>
    %58 = vector.shape_cast %57 : vector<1x1x128xf32> to vector<1x128xf32>
    %c3_50 = arith.constant 3 : index
    %c0_51 = arith.constant 0 : index
    %59 = vector.load %arg17[%c3_50, %c0_51] : memref<64x128xf32, #tpu.memory_space<vmem>>, vector<1x128xf32>
    tpu.vector_store %arg17[%c3_50, %c0_51], %58 {strides = array<i32>} : memref<64x128xf32, #tpu.memory_space<vmem>>, vector<1x128xf32>,
    %c4_52 = arith.constant 4 : index
    %60 = memref.load %arg2[%c4_52] : memref<64xi32, #tpu.memory_space<smem>>
    %61 = arith.index_cast %60 : i32 to index
    %c0_53 = arith.constant 0 : index
    %c0_54 = arith.constant 0 : index
    %62 = vector.load %arg3[%61, %c0_53, %c0_54] : memref<64x1x128xf32, #tpu.memory_space<vmem>>, vector<1x1x128xf32>
    %63 = vector.shape_cast %62 : vector<1x1x128xf32> to vector<1x128xf32>
    %c4_55 = arith.constant 4 : index
    %c0_56 = arith.constant 0 : index
    %64 = vector.load %arg17[%c4_55, %c0_56] : memref<64x128xf32, #tpu.memory_space<vmem>>, vector<1x128xf32>
    tpu.vector_store %arg17[%c4_55, %c0_56], %63 {strides = array<i32>} : memref<64x128xf32, #tpu.memory_space<vmem>>, vector<1x128xf32>,
    %c5_57 = arith.constant 5 : index
    %65 = memref.load %arg2[%c5_57] : memref<64xi32, #tpu.memory_space<smem>>
    %66 = arith.index_cast %65 : i32 to index
    %c0_58 = arith.constant 0 : index
    %c0_59 = arith.constant 0 : index
    %67 = vector.load %arg3[%66, %c0_58, %c0_59] : memref<64x1x128xf32, #tpu.memory_space<vmem>>, vector<1x1x128xf32>
    %68 = vector.shape_cast %67 : vector<1x1x128xf32> to vector<1x128xf32>
    %c5_60 = arith.constant 5 : index
    %c0_61 = arith.constant 0 : index
    %69 = vector.load %arg17[%c5_60, %c0_61] : memref<64x128xf32, #tpu.memory_space<vmem>>, vector<1x128xf32>
    tpu.vector_store %arg17[%c5_60, %c0_61], %68 {strides = array<i32>} : memref<64x128xf32, #tpu.memory_space<vmem>>, vector<1x128xf32>,
    %c6_62 = arith.constant 6 : index
    %70 = memref.load %arg2[%c6_62] : memref<64xi32, #tpu.memory_space<smem>>
    %71 = arith.index_cast %70 : i32 to index
    %c0_63 = arith.constant 0 : index
    %c0_64 = arith.constant 0 : index
    %72 = vector.load %arg3[%71, %c0_63, %c0_64] : memref<64x1x128xf32, #tpu.memory_space<vmem>>, vector<1x1x128xf32>
    %73 = vector.shape_cast %72 : vector<1x1x128xf32> to vector<1x128xf32>
    %c6_65 = arith.constant 6 : index
    %c0_66 = arith.constant 0 : index
    %74 = vector.load %arg17[%c6_65, %c0_66] : memref<64x128xf32, #tpu.memory_space<vmem>>, vector<1x128xf32>
    tpu.vector_store %arg17[%c6_65, %c0_66], %73 {strides = array<i32>} : memref<64x128xf32, #tpu.memory_space<vmem>>, vector<1x128xf32>,
    %c7_67 = arith.constant 7 : index
    %75 = memref.load %arg2[%c7_67] : memref<64xi32, #tpu.memory_space<smem>>
    %76 = arith.index_cast %75 : i32 to index
    %c0_68 = arith.constant 0 : index
    %c0_69 = arith.constant 0 : index
    %77 = vector.load %arg3[%76, %c0_68, %c0_69] : memref<64x1x128xf32, #tpu.memory_space<vmem>>, vector<1x1x128xf32>
    %78 = vector.shape_cast %77 : vector<1x1x128xf32> to vector<1x128xf32>
    %c7_70 = arith.constant 7 : index
    %c0_71 = arith.constant 0 : index
    %79 = vector.load %arg17[%c7_70, %c0_71] : memref<64x128xf32, #tpu.memory_space<vmem>>, vector<1x128xf32>
    tpu.vector_store %arg17[%c7_70, %c0_71], %78 {strides = array<i32>} : memref<64x128xf32, #tpu.memory_space<vmem>>, vector<1x128xf32>,
    %c8 = arith.constant 8 : index
    %80 = memref.load %arg2[%c8] : memref<64xi32, #tpu.memory_space<smem>>
    %81 = arith.index_cast %80 : i32 to index
    %c0_72 = arith.constant 0 : index
    %c0_73 = arith.constant 0 : index
    %82 = vector.load %arg3[%81, %c0_72, %c0_73] : memref<64x1x128xf32, #tpu.memory_space<vmem>>, vector<1x1x128xf32>
    %83 = vector.shape_cast %82 : vector<1x1x128xf32> to vector<1x128xf32>
    %c8_74 = arith.constant 8 : index
    %c0_75 = arith.constant 0 : index
    %84 = vector.load %arg17[%c8_74, %c0_75] : memref<64x128xf32, #tpu.memory_space<vmem>>, vector<1x128xf32>
    tpu.vector_store %arg17[%c8_74, %c0_75], %83 {strides = array<i32>} : memref<64x128xf32, #tpu.memory_space<vmem>>, vector<1x128xf32>,
    %c9 = arith.constant 9 : index
    %85 = memref.load %arg2[%c9] : memref<64xi32, #tpu.memory_space<smem>>
    %86 = arith.index_cast %85 : i32 to index
    %c0_76 = arith.constant 0 : index
    %c0_77 = arith.constant 0 : index
    %87 = vector.load %arg3[%86, %c0_76, %c0_77] : memref<64x1x128xf32, #tpu.memory_space<vmem>>, vector<1x1x128xf32>
    %88 = vector.shape_cast %87 : vector<1x1x128xf32> to vector<1x128xf32>
    %c9_78 = arith.constant 9 : index
    %c0_79 = arith.constant 0 : index
    %89 = vector.load %arg17[%c9_78, %c0_79] : memref<64x128xf32, #tpu.memory_space<vmem>>, vector<1x128xf32>
    tpu.vector_store %arg17[%c9_78, %c0_79], %88 {strides = array<i32>} : memref<64x128xf32, #tpu.memory_space<vmem>>, vector<1x128xf32>,
    %c10 = arith.constant 10 : index
    %90 = memref.load %arg2[%c10] : memref<64xi32, #tpu.memory_space<smem>>
    %91 = arith.index_cast %90 : i32 to index
    %c0_80 = arith.constant 0 : index
    %c0_81 = arith.constant 0 : index
    %92 = vector.load %arg3[%91, %c0_80, %c0_81] : memref<64x1x128xf32, #tpu.memory_space<vmem>>, vector<1x1x128xf32>
    %93 = vector.shape_cast %92 : vector<1x1x128xf32> to vector<1x128xf32>
    %c10_82 = arith.constant 10 : index
    %c0_83 = arith.constant 0 : index
    %94 = vector.load %arg17[%c10_82, %c0_83] : memref<64x128xf32, #tpu.memory_space<vmem>>, vector<1x128xf32>
    tpu.vector_store %arg17[%c10_82, %c0_83], %93 {strides = array<i32>} : memref<64x128xf32, #tpu.memory_space<vmem>>, vector<1x128xf32>,
    %c11 = arith.constant 11 : index
    %95 = memref.load %arg2[%c11] : memref<64xi32, #tpu.memory_space<smem>>
    %96 = arith.index_cast %95 : i32 to index
    %c0_84 = arith.constant 0 : index
    %c0_85 = arith.constant 0 : index
    %97 = vector.load %arg3[%96, %c0_84, %c0_85] : memref<64x1x128xf32, #tpu.memory_space<vmem>>, vector<1x1x128xf32>
    %98 = vector.shape_cast %97 : vector<1x1x128xf32> to vector<1x128xf32>
    %c11_86 = arith.constant 11 : index
    %c0_87 = arith.constant 0 : index
    %99 = vector.load %arg17[%c11_86, %c0_87] : memref<64x128xf32, #tpu.memory_space<vmem>>, vector<1x128xf32>
    tpu.vector_store %arg17[%c11_86, %c0_87], %98 {strides = array<i32>} : memref<64x128xf32, #tpu.memory_space<vmem>>, vector<1x128xf32>,
    %c12 = arith.constant 12 : index
    %100 = memref.load %arg2[%c12] : memref<64xi32, #tpu.memory_space<smem>>
    %101 = arith.index_cast %100 : i32 to index
    %c0_88 = arith.constant 0 : index
    %c0_89 = arith.constant 0 : index
    %102 = vector.load %arg3[%101, %c0_88, %c0_89] : memref<64x1x128xf32, #tpu.memory_space<vmem>>, vector<1x1x128xf32>
    %103 = vector.shape_cast %102 : vector<1x1x128xf32> to vector<1x128xf32>
    %c12_90 = arith.constant 12 : index
    %c0_91 = arith.constant 0 : index
    %104 = vector.load %arg17[%c12_90, %c0_91] : memref<64x128xf32, #tpu.memory_space<vmem>>, vector<1x128xf32>
    tpu.vector_store %arg17[%c12_90, %c0_91], %103 {strides = array<i32>} : memref<64x128xf32, #tpu.memory_space<vmem>>, vector<1x128xf32>,
    %c13 = arith.constant 13 : index
    %105 = memref.load %arg2[%c13] : memref<64xi32, #tpu.memory_space<smem>>
    %106 = arith.index_cast %105 : i32 to index
    %c0_92 = arith.constant 0 : index
    %c0_93 = arith.constant 0 : index
    %107 = vector.load %arg3[%106, %c0_92, %c0_93] : memref<64x1x128xf32, #tpu.memory_space<vmem>>, vector<1x1x128xf32>
    %108 = vector.shape_cast %107 : vector<1x1x128xf32> to vector<1x128xf32>
    %c13_94 = arith.constant 13 : index
    %c0_95 = arith.constant 0 : index
    %109 = vector.load %arg17[%c13_94, %c0_95] : memref<64x128xf32, #tpu.memory_space<vmem>>, vector<1x128xf32>
    tpu.vector_store %arg17[%c13_94, %c0_95], %108 {strides = array<i32>} : memref<64x128xf32, #tpu.memory_space<vmem>>, vector<1x128xf32>,
    %c14 = arith.constant 14 : index
    %110 = memref.load %arg2[%c14] : memref<64xi32, #tpu.memory_space<smem>>
    %111 = arith.index_cast %110 : i32 to index
    %c0_96 = arith.constant 0 : index
    %c0_97 = arith.constant 0 : index
    %112 = vector.load %arg3[%111, %c0_96, %c0_97] : memref<64x1x128xf32, #tpu.memory_space<vmem>>, vector<1x1x128xf32>
    %113 = vector.shape_cast %112 : vector<1x1x128xf32> to vector<1x128xf32>
    %c14_98 = arith.constant 14 : index
    %c0_99 = arith.constant 0 : index
    %114 = vector.load %arg17[%c14_98, %c0_99] : memref<64x128xf32, #tpu.memory_space<vmem>>, vector<1x128xf32>
    tpu.vector_store %arg17[%c14_98, %c0_99], %113 {strides = array<i32>} : memref<64x128xf32, #tpu.memory_space<vmem>>, vector<1x128xf32>,
    %c15 = arith.constant 15 : index
    %115 = memref.load %arg2[%c15] : memref<64xi32, #tpu.memory_space<smem>>
    %116 = arith.index_cast %115 : i32 to index
    %c0_100 = arith.constant 0 : index
    %c0_101 = arith.constant 0 : index
    %117 = vector.load %arg3[%116, %c0_100, %c0_101] : memref<64x1x128xf32, #tpu.memory_space<vmem>>, vector<1x1x128xf32>
    %118 = vector.shape_cast %117 : vector<1x1x128xf32> to vector<1x128xf32>
    %c15_102 = arith.constant 15 : index
    %c0_103 = arith.constant 0 : index
    %119 = vector.load %arg17[%c15_102, %c0_103] : memref<64x128xf32, #tpu.memory_space<vmem>>, vector<1x128xf32>
    tpu.vector_store %arg17[%c15_102, %c0_103], %118 {strides = array<i32>} : memref<64x128xf32, #tpu.memory_space<vmem>>, vector<1x128xf32>,
    %c16 = arith.constant 16 : index
    %120 = memref.load %arg2[%c16] : memref<64xi32, #tpu.memory_space<smem>>
    %121 = arith.index_cast %120 : i32 to index
    %c0_104 = arith.constant 0 : index
    %c0_105 = arith.constant 0 : index
    %122 = vector.load %arg3[%121, %c0_104, %c0_105] : memref<64x1x128xf32, #tpu.memory_space<vmem>>, vector<1x1x128xf32>
    %123 = vector.shape_cast %122 : vector<1x1x128xf32> to vector<1x128xf32>
    %c16_106 = arith.constant 16 : index
    %c0_107 = arith.constant 0 : index
    %124 = vector.load %arg17[%c16_106, %c0_107] : memref<64x128xf32, #tpu.memory_space<vmem>>, vector<1x128xf32>
    tpu.vector_store %arg17[%c16_106, %c0_107], %123 {strides = array<i32>} : memref<64x128xf32, #tpu.memory_space<vmem>>, vector<1x128xf32>,
    %c17 = arith.constant 17 : index
    %125 = memref.load %arg2[%c17] : memref<64xi32, #tpu.memory_space<smem>>
    %126 = arith.index_cast %125 : i32 to index
    %c0_108 = arith.constant 0 : index
    %c0_109 = arith.constant 0 : index
    %127 = vector.load %arg3[%126, %c0_108, %c0_109] : memref<64x1x128xf32, #tpu.memory_space<vmem>>, vector<1x1x128xf32>
    %128 = vector.shape_cast %127 : vector<1x1x128xf32> to vector<1x128xf32>
    %c17_110 = arith.constant 17 : index
    %c0_111 = arith.constant 0 : index
    %129 = vector.load %arg17[%c17_110, %c0_111] : memref<64x128xf32, #tpu.memory_space<vmem>>, vector<1x128xf32>
    tpu.vector_store %arg17[%c17_110, %c0_111], %128 {strides = array<i32>} : memref<64x128xf32, #tpu.memory_space<vmem>>, vector<1x128xf32>,
    %c18 = arith.constant 18 : index
    %130 = memref.load %arg2[%c18] : memref<64xi32, #tpu.memory_space<smem>>
    %131 = arith.index_cast %130 : i32 to index
    %c0_112 = arith.constant 0 : index
    %c0_113 = arith.constant 0 : index
    %132 = vector.load %arg3[%131, %c0_112, %c0_113] : memref<64x1x128xf32, #tpu.memory_space<vmem>>, vector<1x1x128xf32>
    %133 = vector.shape_cast %132 : vector<1x1x128xf32> to vector<1x128xf32>
    %c18_114 = arith.constant 18 : index
    %c0_115 = arith.constant 0 : index
    %134 = vector.load %arg17[%c18_114, %c0_115] : memref<64x128xf32, #tpu.memory_space<vmem>>, vector<1x128xf32>
    tpu.vector_store %arg17[%c18_114, %c0_115], %133 {strides = array<i32>} : memref<64x128xf32, #tpu.memory_space<vmem>>, vector<1x128xf32>,
    %c19 = arith.constant 19 : index
    %135 = memref.load %arg2[%c19] : memref<64xi32, #tpu.memory_space<smem>>
    %136 = arith.index_cast %135 : i32 to index
    %c0_116 = arith.constant 0 : index
    %c0_117 = arith.constant 0 : index
    %137 = vector.load %arg3[%136, %c0_116, %c0_117] : memref<64x1x128xf32, #tpu.memory_space<vmem>>, vector<1x1x128xf32>
    %138 = vector.shape_cast %137 : vector<1x1x128xf32> to vector<1x128xf32>
    %c19_118 = arith.constant 19 : index
    %c0_119 = arith.constant 0 : index
    %139 = vector.load %arg17[%c19_118, %c0_119] : memref<64x128xf32, #tpu.memory_space<vmem>>, vector<1x128xf32>
    tpu.vector_store %arg17[%c19_118, %c0_119], %138 {strides = array<i32>} : memref<64x128xf32, #tpu.memory_space<vmem>>, vector<1x128xf32>,
    %c20 = arith.constant 20 : index
    %140 = memref.load %arg2[%c20] : memref<64xi32, #tpu.memory_space<smem>>
    %141 = arith.index_cast %140 : i32 to index
    %c0_120 = arith.constant 0 : index
    %c0_121 = arith.constant 0 : index
    %142 = vector.load %arg3[%141, %c0_120, %c0_121] : memref<64x1x128xf32, #tpu.memory_space<vmem>>, vector<1x1x128xf32>
    %143 = vector.shape_cast %142 : vector<1x1x128xf32> to vector<1x128xf32>
    %c20_122 = arith.constant 20 : index
    %c0_123 = arith.constant 0 : index
    %144 = vector.load %arg17[%c20_122, %c0_123] : memref<64x128xf32, #tpu.memory_space<vmem>>, vector<1x128xf32>
    tpu.vector_store %arg17[%c20_122, %c0_123], %143 {strides = array<i32>} : memref<64x128xf32, #tpu.memory_space<vmem>>, vector<1x128xf32>,
    %c21 = arith.constant 21 : index
    %145 = memref.load %arg2[%c21] : memref<64xi32, #tpu.memory_space<smem>>
    %146 = arith.index_cast %145 : i32 to index
    %c0_124 = arith.constant 0 : index
    %c0_125 = arith.constant 0 : index
    %147 = vector.load %arg3[%146, %c0_124, %c0_125] : memref<64x1x128xf32, #tpu.memory_space<vmem>>, vector<1x1x128xf32>
    %148 = vector.shape_cast %147 : vector<1x1x128xf32> to vector<1x128xf32>
    %c21_126 = arith.constant 21 : index
    %c0_127 = arith.constant 0 : index
    %149 = vector.load %arg17[%c21_126, %c0_127] : memref<64x128xf32, #tpu.memory_space<vmem>>, vector<1x128xf32>
    tpu.vector_store %arg17[%c21_126, %c0_127], %148 {strides = array<i32>} : memref<64x128xf32, #tpu.memory_space<vmem>>, vector<1x128xf32>,
    %c22 = arith.constant 22 : index
    %150 = memref.load %arg2[%c22] : memref<64xi32, #tpu.memory_space<smem>>
    %151 = arith.index_cast %150 : i32 to index
    %c0_128 = arith.constant 0 : index
    %c0_129 = arith.constant 0 : index
    %152 = vector.load %arg3[%151, %c0_128, %c0_129] : memref<64x1x128xf32, #tpu.memory_space<vmem>>, vector<1x1x128xf32>
    %153 = vector.shape_cast %152 : vector<1x1x128xf32> to vector<1x128xf32>
    %c22_130 = arith.constant 22 : index
    %c0_131 = arith.constant 0 : index
    %154 = vector.load %arg17[%c22_130, %c0_131] : memref<64x128xf32, #tpu.memory_space<vmem>>, vector<1x128xf32>
    tpu.vector_store %arg17[%c22_130, %c0_131], %153 {strides = array<i32>} : memref<64x128xf32, #tpu.memory_space<vmem>>, vector<1x128xf32>,
    %c23 = arith.constant 23 : index
    %155 = memref.load %arg2[%c23] : memref<64xi32, #tpu.memory_space<smem>>
    %156 = arith.index_cast %155 : i32 to index
    %c0_132 = arith.constant 0 : index
    %c0_133 = arith.constant 0 : index
    %157 = vector.load %arg3[%156, %c0_132, %c0_133] : memref<64x1x128xf32, #tpu.memory_space<vmem>>, vector<1x1x128xf32>
    %158 = vector.shape_cast %157 : vector<1x1x128xf32> to vector<1x128xf32>
    %c23_134 = arith.constant 23 : index
    %c0_135 = arith.constant 0 : index
    %159 = vector.load %arg17[%c23_134, %c0_135] : memref<64x128xf32, #tpu.memory_space<vmem>>, vector<1x128xf32>
    tpu.vector_store %arg17[%c23_134, %c0_135], %158 {strides = array<i32>} : memref<64x128xf32, #tpu.memory_space<vmem>>, vector<1x128xf32>,
    %c24 = arith.constant 24 : index
    %160 = memref.load %arg2[%c24] : memref<64xi32, #tpu.memory_space<smem>>
    %161 = arith.index_cast %160 : i32 to index
    %c0_136 = arith.constant 0 : index
    %c0_137 = arith.constant 0 : index
    %162 = vector.load %arg3[%161, %c0_136, %c0_137] : memref<64x1x128xf32, #tpu.memory_space<vmem>>, vector<1x1x128xf32>
    %163 = vector.shape_cast %162 : vector<1x1x128xf32> to vector<1x128xf32>
    %c24_138 = arith.constant 24 : index
    %c0_139 = arith.constant 0 : index
    %164 = vector.load %arg17[%c24_138, %c0_139] : memref<64x128xf32, #tpu.memory_space<vmem>>, vector<1x128xf32>
    tpu.vector_store %arg17[%c24_138, %c0_139], %163 {strides = array<i32>} : memref<64x128xf32, #tpu.memory_space<vmem>>, vector<1x128xf32>,
    %c25 = arith.constant 25 : index
    %165 = memref.load %arg2[%c25] : memref<64xi32, #tpu.memory_space<smem>>
    %166 = arith.index_cast %165 : i32 to index
    %c0_140 = arith.constant 0 : index
    %c0_141 = arith.constant 0 : index
    %167 = vector.load %arg3[%166, %c0_140, %c0_141] : memref<64x1x128xf32, #tpu.memory_space<vmem>>, vector<1x1x128xf32>
    %168 = vector.shape_cast %167 : vector<1x1x128xf32> to vector<1x128xf32>
    %c25_142 = arith.constant 25 : index
    %c0_143 = arith.constant 0 : index
    %169 = vector.load %arg17[%c25_142, %c0_143] : memref<64x128xf32, #tpu.memory_space<vmem>>, vector<1x128xf32>
    tpu.vector_store %arg17[%c25_142, %c0_143], %168 {strides = array<i32>} : memref<64x128xf32, #tpu.memory_space<vmem>>, vector<1x128xf32>,
    %c26 = arith.constant 26 : index
    %170 = memref.load %arg2[%c26] : memref<64xi32, #tpu.memory_space<smem>>
    %171 = arith.index_cast %170 : i32 to index
    %c0_144 = arith.constant 0 : index
    %c0_145 = arith.constant 0 : index
    %172 = vector.load %arg3[%171, %c0_144, %c0_145] : memref<64x1x128xf32, #tpu.memory_space<vmem>>, vector<1x1x128xf32>
    %173 = vector.shape_cast %172 : vector<1x1x128xf32> to vector<1x128xf32>
    %c26_146 = arith.constant 26 : index
    %c0_147 = arith.constant 0 : index
    %174 = vector.load %arg17[%c26_146, %c0_147] : memref<64x128xf32, #tpu.memory_space<vmem>>, vector<1x128xf32>
    tpu.vector_store %arg17[%c26_146, %c0_147], %173 {strides = array<i32>} : memref<64x128xf32, #tpu.memory_space<vmem>>, vector<1x128xf32>,
    %c27 = arith.constant 27 : index
    %175 = memref.load %arg2[%c27] : memref<64xi32, #tpu.memory_space<smem>>
    %176 = arith.index_cast %175 : i32 to index
    %c0_148 = arith.constant 0 : index
    %c0_149 = arith.constant 0 : index
    %177 = vector.load %arg3[%176, %c0_148, %c0_149] : memref<64x1x128xf32, #tpu.memory_space<vmem>>, vector<1x1x128xf32>
    %178 = vector.shape_cast %177 : vector<1x1x128xf32> to vector<1x128xf32>
    %c27_150 = arith.constant 27 : index
    %c0_151 = arith.constant 0 : index
    %179 = vector.load %arg17[%c27_150, %c0_151] : memref<64x128xf32, #tpu.memory_space<vmem>>, vector<1x128xf32>
    tpu.vector_store %arg17[%c27_150, %c0_151], %178 {strides = array<i32>} : memref<64x128xf32, #tpu.memory_space<vmem>>, vector<1x128xf32>,
    %c28 = arith.constant 28 : index
    %180 = memref.load %arg2[%c28] : memref<64xi32, #tpu.memory_space<smem>>
    %181 = arith.index_cast %180 : i32 to index
    %c0_152 = arith.constant 0 : index
    %c0_153 = arith.constant 0 : index
    %182 = vector.load %arg3[%181, %c0_152, %c0_153] : memref<64x1x128xf32, #tpu.memory_space<vmem>>, vector<1x1x128xf32>
    %183 = vector.shape_cast %182 : vector<1x1x128xf32> to vector<1x128xf32>
    %c28_154 = arith.constant 28 : index
    %c0_155 = arith.constant 0 : index
    %184 = vector.load %arg17[%c28_154, %c0_155] : memref<64x128xf32, #tpu.memory_space<vmem>>, vector<1x128xf32>
    tpu.vector_store %arg17[%c28_154, %c0_155], %183 {strides = array<i32>} : memref<64x128xf32, #tpu.memory_space<vmem>>, vector<1x128xf32>,
    %c29 = arith.constant 29 : index
    %185 = memref.load %arg2[%c29] : memref<64xi32, #tpu.memory_space<smem>>
    %186 = arith.index_cast %185 : i32 to index
    %c0_156 = arith.constant 0 : index
    %c0_157 = arith.constant 0 : index
    %187 = vector.load %arg3[%186, %c0_156, %c0_157] : memref<64x1x128xf32, #tpu.memory_space<vmem>>, vector<1x1x128xf32>
    %188 = vector.shape_cast %187 : vector<1x1x128xf32> to vector<1x128xf32>
    %c29_158 = arith.constant 29 : index
    %c0_159 = arith.constant 0 : index
    %189 = vector.load %arg17[%c29_158, %c0_159] : memref<64x128xf32, #tpu.memory_space<vmem>>, vector<1x128xf32>
    tpu.vector_store %arg17[%c29_158, %c0_159], %188 {strides = array<i32>} : memref<64x128xf32, #tpu.memory_space<vmem>>, vector<1x128xf32>,
    %c30 = arith.constant 30 : index
    %190 = memref.load %arg2[%c30] : memref<64xi32, #tpu.memory_space<smem>>
    %191 = arith.index_cast %190 : i32 to index
    %c0_160 = arith.constant 0 : index
    %c0_161 = arith.constant 0 : index
    %192 = vector.load %arg3[%191, %c0_160, %c0_161] : memref<64x1x128xf32, #tpu.memory_space<vmem>>, vector<1x1x128xf32>
    %193 = vector.shape_cast %192 : vector<1x1x128xf32> to vector<1x128xf32>
    %c30_162 = arith.constant 30 : index
    %c0_163 = arith.constant 0 : index
    %194 = vector.load %arg17[%c30_162, %c0_163] : memref<64x128xf32, #tpu.memory_space<vmem>>, vector<1x128xf32>
    tpu.vector_store %arg17[%c30_162, %c0_163], %193 {strides = array<i32>} : memref<64x128xf32, #tpu.memory_space<vmem>>, vector<1x128xf32>,
    %c31 = arith.constant 31 : index
    %195 = memref.load %arg2[%c31] : memref<64xi32, #tpu.memory_space<smem>>
    %196 = arith.index_cast %195 : i32 to index
    %c0_164 = arith.constant 0 : index
    %c0_165 = arith.constant 0 : index
    %197 = vector.load %arg3[%196, %c0_164, %c0_165] : memref<64x1x128xf32, #tpu.memory_space<vmem>>, vector<1x1x128xf32>
    %198 = vector.shape_cast %197 : vector<1x1x128xf32> to vector<1x128xf32>
    %c31_166 = arith.constant 31 : index
    %c0_167 = arith.constant 0 : index
    %199 = vector.load %arg17[%c31_166, %c0_167] : memref<64x128xf32, #tpu.memory_space<vmem>>, vector<1x128xf32>
    tpu.vector_store %arg17[%c31_166, %c0_167], %198 {strides = array<i32>} : memref<64x128xf32, #tpu.memory_space<vmem>>, vector<1x128xf32>,
    %c32 = arith.constant 32 : index
    %200 = memref.load %arg2[%c32] : memref<64xi32, #tpu.memory_space<smem>>
    %201 = arith.index_cast %200 : i32 to index
    %c0_168 = arith.constant 0 : index
    %c0_169 = arith.constant 0 : index
    %202 = vector.load %arg3[%201, %c0_168, %c0_169] : memref<64x1x128xf32, #tpu.memory_space<vmem>>, vector<1x1x128xf32>
    %203 = vector.shape_cast %202 : vector<1x1x128xf32> to vector<1x128xf32>
    %c32_170 = arith.constant 32 : index
    %c0_171 = arith.constant 0 : index
    %204 = vector.load %arg17[%c32_170, %c0_171] : memref<64x128xf32, #tpu.memory_space<vmem>>, vector<1x128xf32>
    tpu.vector_store %arg17[%c32_170, %c0_171], %203 {strides = array<i32>} : memref<64x128xf32, #tpu.memory_space<vmem>>, vector<1x128xf32>,
    %c33 = arith.constant 33 : index
    %205 = memref.load %arg2[%c33] : memref<64xi32, #tpu.memory_space<smem>>
    %206 = arith.index_cast %205 : i32 to index
    %c0_172 = arith.constant 0 : index
    %c0_173 = arith.constant 0 : index
    %207 = vector.load %arg3[%206, %c0_172, %c0_173] : memref<64x1x128xf32, #tpu.memory_space<vmem>>, vector<1x1x128xf32>
    %208 = vector.shape_cast %207 : vector<1x1x128xf32> to vector<1x128xf32>
    %c33_174 = arith.constant 33 : index
    %c0_175 = arith.constant 0 : index
    %209 = vector.load %arg17[%c33_174, %c0_175] : memref<64x128xf32, #tpu.memory_space<vmem>>, vector<1x128xf32>
    tpu.vector_store %arg17[%c33_174, %c0_175], %208 {strides = array<i32>} : memref<64x128xf32, #tpu.memory_space<vmem>>, vector<1x128xf32>,
    %c34 = arith.constant 34 : index
    %210 = memref.load %arg2[%c34] : memref<64xi32, #tpu.memory_space<smem>>
    %211 = arith.index_cast %210 : i32 to index
    %c0_176 = arith.constant 0 : index
    %c0_177 = arith.constant 0 : index
    %212 = vector.load %arg3[%211, %c0_176, %c0_177] : memref<64x1x128xf32, #tpu.memory_space<vmem>>, vector<1x1x128xf32>
    %213 = vector.shape_cast %212 : vector<1x1x128xf32> to vector<1x128xf32>
    %c34_178 = arith.constant 34 : index
    %c0_179 = arith.constant 0 : index
    %214 = vector.load %arg17[%c34_178, %c0_179] : memref<64x128xf32, #tpu.memory_space<vmem>>, vector<1x128xf32>
    tpu.vector_store %arg17[%c34_178, %c0_179], %213 {strides = array<i32>} : memref<64x128xf32, #tpu.memory_space<vmem>>, vector<1x128xf32>,
    %c35 = arith.constant 35 : index
    %215 = memref.load %arg2[%c35] : memref<64xi32, #tpu.memory_space<smem>>
    %216 = arith.index_cast %215 : i32 to index
    %c0_180 = arith.constant 0 : index
    %c0_181 = arith.constant 0 : index
    %217 = vector.load %arg3[%216, %c0_180, %c0_181] : memref<64x1x128xf32, #tpu.memory_space<vmem>>, vector<1x1x128xf32>
    %218 = vector.shape_cast %217 : vector<1x1x128xf32> to vector<1x128xf32>
    %c35_182 = arith.constant 35 : index
    %c0_183 = arith.constant 0 : index
    %219 = vector.load %arg17[%c35_182, %c0_183] : memref<64x128xf32, #tpu.memory_space<vmem>>, vector<1x128xf32>
    tpu.vector_store %arg17[%c35_182, %c0_183], %218 {strides = array<i32>} : memref<64x128xf32, #tpu.memory_space<vmem>>, vector<1x128xf32>,
    %c36 = arith.constant 36 : index
    %220 = memref.load %arg2[%c36] : memref<64xi32, #tpu.memory_space<smem>>
    %221 = arith.index_cast %220 : i32 to index
    %c0_184 = arith.constant 0 : index
    %c0_185 = arith.constant 0 : index
    %222 = vector.load %arg3[%221, %c0_184, %c0_185] : memref<64x1x128xf32, #tpu.memory_space<vmem>>, vector<1x1x128xf32>
    %223 = vector.shape_cast %222 : vector<1x1x128xf32> to vector<1x128xf32>
    %c36_186 = arith.constant 36 : index
    %c0_187 = arith.constant 0 : index
    %224 = vector.load %arg17[%c36_186, %c0_187] : memref<64x128xf32, #tpu.memory_space<vmem>>, vector<1x128xf32>
    tpu.vector_store %arg17[%c36_186, %c0_187], %223 {strides = array<i32>} : memref<64x128xf32, #tpu.memory_space<vmem>>, vector<1x128xf32>,
    %c37 = arith.constant 37 : index
    %225 = memref.load %arg2[%c37] : memref<64xi32, #tpu.memory_space<smem>>
    %226 = arith.index_cast %225 : i32 to index
    %c0_188 = arith.constant 0 : index
    %c0_189 = arith.constant 0 : index
    %227 = vector.load %arg3[%226, %c0_188, %c0_189] : memref<64x1x128xf32, #tpu.memory_space<vmem>>, vector<1x1x128xf32>
    %228 = vector.shape_cast %227 : vector<1x1x128xf32> to vector<1x128xf32>
    %c37_190 = arith.constant 37 : index
    %c0_191 = arith.constant 0 : index
    %229 = vector.load %arg17[%c37_190, %c0_191] : memref<64x128xf32, #tpu.memory_space<vmem>>, vector<1x128xf32>
    tpu.vector_store %arg17[%c37_190, %c0_191], %228 {strides = array<i32>} : memref<64x128xf32, #tpu.memory_space<vmem>>, vector<1x128xf32>,
    %c38 = arith.constant 38 : index
    %230 = memref.load %arg2[%c38] : memref<64xi32, #tpu.memory_space<smem>>
    %231 = arith.index_cast %230 : i32 to index
    %c0_192 = arith.constant 0 : index
    %c0_193 = arith.constant 0 : index
    %232 = vector.load %arg3[%231, %c0_192, %c0_193] : memref<64x1x128xf32, #tpu.memory_space<vmem>>, vector<1x1x128xf32>
    %233 = vector.shape_cast %232 : vector<1x1x128xf32> to vector<1x128xf32>
    %c38_194 = arith.constant 38 : index
    %c0_195 = arith.constant 0 : index
    %234 = vector.load %arg17[%c38_194, %c0_195] : memref<64x128xf32, #tpu.memory_space<vmem>>, vector<1x128xf32>
    tpu.vector_store %arg17[%c38_194, %c0_195], %233 {strides = array<i32>} : memref<64x128xf32, #tpu.memory_space<vmem>>, vector<1x128xf32>,
    %c39 = arith.constant 39 : index
    %235 = memref.load %arg2[%c39] : memref<64xi32, #tpu.memory_space<smem>>
    %236 = arith.index_cast %235 : i32 to index
    %c0_196 = arith.constant 0 : index
    %c0_197 = arith.constant 0 : index
    %237 = vector.load %arg3[%236, %c0_196, %c0_197] : memref<64x1x128xf32, #tpu.memory_space<vmem>>, vector<1x1x128xf32>
    %238 = vector.shape_cast %237 : vector<1x1x128xf32> to vector<1x128xf32>
    %c39_198 = arith.constant 39 : index
    %c0_199 = arith.constant 0 : index
    %239 = vector.load %arg17[%c39_198, %c0_199] : memref<64x128xf32, #tpu.memory_space<vmem>>, vector<1x128xf32>
    tpu.vector_store %arg17[%c39_198, %c0_199], %238 {strides = array<i32>} : memref<64x128xf32, #tpu.memory_space<vmem>>, vector<1x128xf32>,
    %c40 = arith.constant 40 : index
    %240 = memref.load %arg2[%c40] : memref<64xi32, #tpu.memory_space<smem>>
    %241 = arith.index_cast %240 : i32 to index
    %c0_200 = arith.constant 0 : index
    %c0_201 = arith.constant 0 : index
    %242 = vector.load %arg3[%241, %c0_200, %c0_201] : memref<64x1x128xf32, #tpu.memory_space<vmem>>, vector<1x1x128xf32>
    %243 = vector.shape_cast %242 : vector<1x1x128xf32> to vector<1x128xf32>
    %c40_202 = arith.constant 40 : index
    %c0_203 = arith.constant 0 : index
    %244 = vector.load %arg17[%c40_202, %c0_203] : memref<64x128xf32, #tpu.memory_space<vmem>>, vector<1x128xf32>
    tpu.vector_store %arg17[%c40_202, %c0_203], %243 {strides = array<i32>} : memref<64x128xf32, #tpu.memory_space<vmem>>, vector<1x128xf32>,
    %c41 = arith.constant 41 : index
    %245 = memref.load %arg2[%c41] : memref<64xi32, #tpu.memory_space<smem>>
    %246 = arith.index_cast %245 : i32 to index
    %c0_204 = arith.constant 0 : index
    %c0_205 = arith.constant 0 : index
    %247 = vector.load %arg3[%246, %c0_204, %c0_205] : memref<64x1x128xf32, #tpu.memory_space<vmem>>, vector<1x1x128xf32>
    %248 = vector.shape_cast %247 : vector<1x1x128xf32> to vector<1x128xf32>
    %c41_206 = arith.constant 41 : index
    %c0_207 = arith.constant 0 : index
    %249 = vector.load %arg17[%c41_206, %c0_207] : memref<64x128xf32, #tpu.memory_space<vmem>>, vector<1x128xf32>
    tpu.vector_store %arg17[%c41_206, %c0_207], %248 {strides = array<i32>} : memref<64x128xf32, #tpu.memory_space<vmem>>, vector<1x128xf32>,
    %c42 = arith.constant 42 : index
    %250 = memref.load %arg2[%c42] : memref<64xi32, #tpu.memory_space<smem>>
    %251 = arith.index_cast %250 : i32 to index
    %c0_208 = arith.constant 0 : index
    %c0_209 = arith.constant 0 : index
    %252 = vector.load %arg3[%251, %c0_208, %c0_209] : memref<64x1x128xf32, #tpu.memory_space<vmem>>, vector<1x1x128xf32>
    %253 = vector.shape_cast %252 : vector<1x1x128xf32> to vector<1x128xf32>
    %c42_210 = arith.constant 42 : index
    %c0_211 = arith.constant 0 : index
    %254 = vector.load %arg17[%c42_210, %c0_211] : memref<64x128xf32, #tpu.memory_space<vmem>>, vector<1x128xf32>
    tpu.vector_store %arg17[%c42_210, %c0_211], %253 {strides = array<i32>} : memref<64x128xf32, #tpu.memory_space<vmem>>, vector<1x128xf32>,
    %c43 = arith.constant 43 : index
    %255 = memref.load %arg2[%c43] : memref<64xi32, #tpu.memory_space<smem>>
    %256 = arith.index_cast %255 : i32 to index
    %c0_212 = arith.constant 0 : index
    %c0_213 = arith.constant 0 : index
    %257 = vector.load %arg3[%256, %c0_212, %c0_213] : memref<64x1x128xf32, #tpu.memory_space<vmem>>, vector<1x1x128xf32>
    %258 = vector.shape_cast %257 : vector<1x1x128xf32> to vector<1x128xf32>
    %c43_214 = arith.constant 43 : index
    %c0_215 = arith.constant 0 : index
    %259 = vector.load %arg17[%c43_214, %c0_215] : memref<64x128xf32, #tpu.memory_space<vmem>>, vector<1x128xf32>
    tpu.vector_store %arg17[%c43_214, %c0_215], %258 {strides = array<i32>} : memref<64x128xf32, #tpu.memory_space<vmem>>, vector<1x128xf32>,
    %c44 = arith.constant 44 : index
    %260 = memref.load %arg2[%c44] : memref<64xi32, #tpu.memory_space<smem>>
    %261 = arith.index_cast %260 : i32 to index
    %c0_216 = arith.constant 0 : index
    %c0_217 = arith.constant 0 : index
    %262 = vector.load %arg3[%261, %c0_216, %c0_217] : memref<64x1x128xf32, #tpu.memory_space<vmem>>, vector<1x1x128xf32>
    %263 = vector.shape_cast %262 : vector<1x1x128xf32> to vector<1x128xf32>
    %c44_218 = arith.constant 44 : index
    %c0_219 = arith.constant 0 : index
    %264 = vector.load %arg17[%c44_218, %c0_219] : memref<64x128xf32, #tpu.memory_space<vmem>>, vector<1x128xf32>
    tpu.vector_store %arg17[%c44_218, %c0_219], %263 {strides = array<i32>} : memref<64x128xf32, #tpu.memory_space<vmem>>, vector<1x128xf32>,
    %c45 = arith.constant 45 : index
    %265 = memref.load %arg2[%c45] : memref<64xi32, #tpu.memory_space<smem>>
    %266 = arith.index_cast %265 : i32 to index
    %c0_220 = arith.constant 0 : index
    %c0_221 = arith.constant 0 : index
    %267 = vector.load %arg3[%266, %c0_220, %c0_221] : memref<64x1x128xf32, #tpu.memory_space<vmem>>, vector<1x1x128xf32>
    %268 = vector.shape_cast %267 : vector<1x1x128xf32> to vector<1x128xf32>
    %c45_222 = arith.constant 45 : index
    %c0_223 = arith.constant 0 : index
    %269 = vector.load %arg17[%c45_222, %c0_223] : memref<64x128xf32, #tpu.memory_space<vmem>>, vector<1x128xf32>
    tpu.vector_store %arg17[%c45_222, %c0_223], %268 {strides = array<i32>} : memref<64x128xf32, #tpu.memory_space<vmem>>, vector<1x128xf32>,
    %c46 = arith.constant 46 : index
    %270 = memref.load %arg2[%c46] : memref<64xi32, #tpu.memory_space<smem>>
    %271 = arith.index_cast %270 : i32 to index
    %c0_224 = arith.constant 0 : index
    %c0_225 = arith.constant 0 : index
    %272 = vector.load %arg3[%271, %c0_224, %c0_225] : memref<64x1x128xf32, #tpu.memory_space<vmem>>, vector<1x1x128xf32>
    %273 = vector.shape_cast %272 : vector<1x1x128xf32> to vector<1x128xf32>
    %c46_226 = arith.constant 46 : index
    %c0_227 = arith.constant 0 : index
    %274 = vector.load %arg17[%c46_226, %c0_227] : memref<64x128xf32, #tpu.memory_space<vmem>>, vector<1x128xf32>
    tpu.vector_store %arg17[%c46_226, %c0_227], %273 {strides = array<i32>} : memref<64x128xf32, #tpu.memory_space<vmem>>, vector<1x128xf32>,
    %c47 = arith.constant 47 : index
    %275 = memref.load %arg2[%c47] : memref<64xi32, #tpu.memory_space<smem>>
    %276 = arith.index_cast %275 : i32 to index
    %c0_228 = arith.constant 0 : index
    %c0_229 = arith.constant 0 : index
    %277 = vector.load %arg3[%276, %c0_228, %c0_229] : memref<64x1x128xf32, #tpu.memory_space<vmem>>, vector<1x1x128xf32>
    %278 = vector.shape_cast %277 : vector<1x1x128xf32> to vector<1x128xf32>
    %c47_230 = arith.constant 47 : index
    %c0_231 = arith.constant 0 : index
    %279 = vector.load %arg17[%c47_230, %c0_231] : memref<64x128xf32, #tpu.memory_space<vmem>>, vector<1x128xf32>
    tpu.vector_store %arg17[%c47_230, %c0_231], %278 {strides = array<i32>} : memref<64x128xf32, #tpu.memory_space<vmem>>, vector<1x128xf32>,
    %c48 = arith.constant 48 : index
    %280 = memref.load %arg2[%c48] : memref<64xi32, #tpu.memory_space<smem>>
    %281 = arith.index_cast %280 : i32 to index
    %c0_232 = arith.constant 0 : index
    %c0_233 = arith.constant 0 : index
    %282 = vector.load %arg3[%281, %c0_232, %c0_233] : memref<64x1x128xf32, #tpu.memory_space<vmem>>, vector<1x1x128xf32>
    %283 = vector.shape_cast %282 : vector<1x1x128xf32> to vector<1x128xf32>
    %c48_234 = arith.constant 48 : index
    %c0_235 = arith.constant 0 : index
    %284 = vector.load %arg17[%c48_234, %c0_235] : memref<64x128xf32, #tpu.memory_space<vmem>>, vector<1x128xf32>
    tpu.vector_store %arg17[%c48_234, %c0_235], %283 {strides = array<i32>} : memref<64x128xf32, #tpu.memory_space<vmem>>, vector<1x128xf32>,
    %c49 = arith.constant 49 : index
    %285 = memref.load %arg2[%c49] : memref<64xi32, #tpu.memory_space<smem>>
    %286 = arith.index_cast %285 : i32 to index
    %c0_236 = arith.constant 0 : index
    %c0_237 = arith.constant 0 : index
    %287 = vector.load %arg3[%286, %c0_236, %c0_237] : memref<64x1x128xf32, #tpu.memory_space<vmem>>, vector<1x1x128xf32>
    %288 = vector.shape_cast %287 : vector<1x1x128xf32> to vector<1x128xf32>
    %c49_238 = arith.constant 49 : index
    %c0_239 = arith.constant 0 : index
    %289 = vector.load %arg17[%c49_238, %c0_239] : memref<64x128xf32, #tpu.memory_space<vmem>>, vector<1x128xf32>
    tpu.vector_store %arg17[%c49_238, %c0_239], %288 {strides = array<i32>} : memref<64x128xf32, #tpu.memory_space<vmem>>, vector<1x128xf32>,
    %c50 = arith.constant 50 : index
    %290 = memref.load %arg2[%c50] : memref<64xi32, #tpu.memory_space<smem>>
    %291 = arith.index_cast %290 : i32 to index
    %c0_240 = arith.constant 0 : index
    %c0_241 = arith.constant 0 : index
    %292 = vector.load %arg3[%291, %c0_240, %c0_241] : memref<64x1x128xf32, #tpu.memory_space<vmem>>, vector<1x1x128xf32>
    %293 = vector.shape_cast %292 : vector<1x1x128xf32> to vector<1x128xf32>
    %c50_242 = arith.constant 50 : index
    %c0_243 = arith.constant 0 : index
    %294 = vector.load %arg17[%c50_242, %c0_243] : memref<64x128xf32, #tpu.memory_space<vmem>>, vector<1x128xf32>
    tpu.vector_store %arg17[%c50_242, %c0_243], %293 {strides = array<i32>} : memref<64x128xf32, #tpu.memory_space<vmem>>, vector<1x128xf32>,
    %c51 = arith.constant 51 : index
    %295 = memref.load %arg2[%c51] : memref<64xi32, #tpu.memory_space<smem>>
    %296 = arith.index_cast %295 : i32 to index
    %c0_244 = arith.constant 0 : index
    %c0_245 = arith.constant 0 : index
    %297 = vector.load %arg3[%296, %c0_244, %c0_245] : memref<64x1x128xf32, #tpu.memory_space<vmem>>, vector<1x1x128xf32>
    %298 = vector.shape_cast %297 : vector<1x1x128xf32> to vector<1x128xf32>
    %c51_246 = arith.constant 51 : index
    %c0_247 = arith.constant 0 : index
    %299 = vector.load %arg17[%c51_246, %c0_247] : memref<64x128xf32, #tpu.memory_space<vmem>>, vector<1x128xf32>
    tpu.vector_store %arg17[%c51_246, %c0_247], %298 {strides = array<i32>} : memref<64x128xf32, #tpu.memory_space<vmem>>, vector<1x128xf32>,
    %c52 = arith.constant 52 : index
    %300 = memref.load %arg2[%c52] : memref<64xi32, #tpu.memory_space<smem>>
    %301 = arith.index_cast %300 : i32 to index
    %c0_248 = arith.constant 0 : index
    %c0_249 = arith.constant 0 : index
    %302 = vector.load %arg3[%301, %c0_248, %c0_249] : memref<64x1x128xf32, #tpu.memory_space<vmem>>, vector<1x1x128xf32>
    %303 = vector.shape_cast %302 : vector<1x1x128xf32> to vector<1x128xf32>
    %c52_250 = arith.constant 52 : index
    %c0_251 = arith.constant 0 : index
    %304 = vector.load %arg17[%c52_250, %c0_251] : memref<64x128xf32, #tpu.memory_space<vmem>>, vector<1x128xf32>
    tpu.vector_store %arg17[%c52_250, %c0_251], %303 {strides = array<i32>} : memref<64x128xf32, #tpu.memory_space<vmem>>, vector<1x128xf32>,
    %c53 = arith.constant 53 : index
    %305 = memref.load %arg2[%c53] : memref<64xi32, #tpu.memory_space<smem>>
    %306 = arith.index_cast %305 : i32 to index
    %c0_252 = arith.constant 0 : index
    %c0_253 = arith.constant 0 : index
    %307 = vector.load %arg3[%306, %c0_252, %c0_253] : memref<64x1x128xf32, #tpu.memory_space<vmem>>, vector<1x1x128xf32>
    %308 = vector.shape_cast %307 : vector<1x1x128xf32> to vector<1x128xf32>
    %c53_254 = arith.constant 53 : index
    %c0_255 = arith.constant 0 : index
    %309 = vector.load %arg17[%c53_254, %c0_255] : memref<64x128xf32, #tpu.memory_space<vmem>>, vector<1x128xf32>
    tpu.vector_store %arg17[%c53_254, %c0_255], %308 {strides = array<i32>} : memref<64x128xf32, #tpu.memory_space<vmem>>, vector<1x128xf32>,
    %c54 = arith.constant 54 : index
    %310 = memref.load %arg2[%c54] : memref<64xi32, #tpu.memory_space<smem>>
    %311 = arith.index_cast %310 : i32 to index
    %c0_256 = arith.constant 0 : index
    %c0_257 = arith.constant 0 : index
    %312 = vector.load %arg3[%311, %c0_256, %c0_257] : memref<64x1x128xf32, #tpu.memory_space<vmem>>, vector<1x1x128xf32>
    %313 = vector.shape_cast %312 : vector<1x1x128xf32> to vector<1x128xf32>
    %c54_258 = arith.constant 54 : index
    %c0_259 = arith.constant 0 : index
    %314 = vector.load %arg17[%c54_258, %c0_259] : memref<64x128xf32, #tpu.memory_space<vmem>>, vector<1x128xf32>
    tpu.vector_store %arg17[%c54_258, %c0_259], %313 {strides = array<i32>} : memref<64x128xf32, #tpu.memory_space<vmem>>, vector<1x128xf32>,
    %c55 = arith.constant 55 : index
    %315 = memref.load %arg2[%c55] : memref<64xi32, #tpu.memory_space<smem>>
    %316 = arith.index_cast %315 : i32 to index
    %c0_260 = arith.constant 0 : index
    %c0_261 = arith.constant 0 : index
    %317 = vector.load %arg3[%316, %c0_260, %c0_261] : memref<64x1x128xf32, #tpu.memory_space<vmem>>, vector<1x1x128xf32>
    %318 = vector.shape_cast %317 : vector<1x1x128xf32> to vector<1x128xf32>
    %c55_262 = arith.constant 55 : index
    %c0_263 = arith.constant 0 : index
    %319 = vector.load %arg17[%c55_262, %c0_263] : memref<64x128xf32, #tpu.memory_space<vmem>>, vector<1x128xf32>
    tpu.vector_store %arg17[%c55_262, %c0_263], %318 {strides = array<i32>} : memref<64x128xf32, #tpu.memory_space<vmem>>, vector<1x128xf32>,
    %c56 = arith.constant 56 : index
    %320 = memref.load %arg2[%c56] : memref<64xi32, #tpu.memory_space<smem>>
    %321 = arith.index_cast %320 : i32 to index
    %c0_264 = arith.constant 0 : index
    %c0_265 = arith.constant 0 : index
    %322 = vector.load %arg3[%321, %c0_264, %c0_265] : memref<64x1x128xf32, #tpu.memory_space<vmem>>, vector<1x1x128xf32>
    %323 = vector.shape_cast %322 : vector<1x1x128xf32> to vector<1x128xf32>
    %c56_266 = arith.constant 56 : index
    %c0_267 = arith.constant 0 : index
    %324 = vector.load %arg17[%c56_266, %c0_267] : memref<64x128xf32, #tpu.memory_space<vmem>>, vector<1x128xf32>
    tpu.vector_store %arg17[%c56_266, %c0_267], %323 {strides = array<i32>} : memref<64x128xf32, #tpu.memory_space<vmem>>, vector<1x128xf32>,
    %c57 = arith.constant 57 : index
    %325 = memref.load %arg2[%c57] : memref<64xi32, #tpu.memory_space<smem>>
    %326 = arith.index_cast %325 : i32 to index
    %c0_268 = arith.constant 0 : index
    %c0_269 = arith.constant 0 : index
    %327 = vector.load %arg3[%326, %c0_268, %c0_269] : memref<64x1x128xf32, #tpu.memory_space<vmem>>, vector<1x1x128xf32>
    %328 = vector.shape_cast %327 : vector<1x1x128xf32> to vector<1x128xf32>
    %c57_270 = arith.constant 57 : index
    %c0_271 = arith.constant 0 : index
    %329 = vector.load %arg17[%c57_270, %c0_271] : memref<64x128xf32, #tpu.memory_space<vmem>>, vector<1x128xf32>
    tpu.vector_store %arg17[%c57_270, %c0_271], %328 {strides = array<i32>} : memref<64x128xf32, #tpu.memory_space<vmem>>, vector<1x128xf32>,
    %c58 = arith.constant 58 : index
    %330 = memref.load %arg2[%c58] : memref<64xi32, #tpu.memory_space<smem>>
    %331 = arith.index_cast %330 : i32 to index
    %c0_272 = arith.constant 0 : index
    %c0_273 = arith.constant 0 : index
    %332 = vector.load %arg3[%331, %c0_272, %c0_273] : memref<64x1x128xf32, #tpu.memory_space<vmem>>, vector<1x1x128xf32>
    %333 = vector.shape_cast %332 : vector<1x1x128xf32> to vector<1x128xf32>
    %c58_274 = arith.constant 58 : index
    %c0_275 = arith.constant 0 : index
    %334 = vector.load %arg17[%c58_274, %c0_275] : memref<64x128xf32, #tpu.memory_space<vmem>>, vector<1x128xf32>
    tpu.vector_store %arg17[%c58_274, %c0_275], %333 {strides = array<i32>} : memref<64x128xf32, #tpu.memory_space<vmem>>, vector<1x128xf32>,
    %c59 = arith.constant 59 : index
    %335 = memref.load %arg2[%c59] : memref<64xi32, #tpu.memory_space<smem>>
    %336 = arith.index_cast %335 : i32 to index
    %c0_276 = arith.constant 0 : index
    %c0_277 = arith.constant 0 : index
    %337 = vector.load %arg3[%336, %c0_276, %c0_277] : memref<64x1x128xf32, #tpu.memory_space<vmem>>, vector<1x1x128xf32>
    %338 = vector.shape_cast %337 : vector<1x1x128xf32> to vector<1x128xf32>
    %c59_278 = arith.constant 59 : index
    %c0_279 = arith.constant 0 : index
    %339 = vector.load %arg17[%c59_278, %c0_279] : memref<64x128xf32, #tpu.memory_space<vmem>>, vector<1x128xf32>
    tpu.vector_store %arg17[%c59_278, %c0_279], %338 {strides = array<i32>} : memref<64x128xf32, #tpu.memory_space<vmem>>, vector<1x128xf32>,
    %c60 = arith.constant 60 : index
    %340 = memref.load %arg2[%c60] : memref<64xi32, #tpu.memory_space<smem>>
    %341 = arith.index_cast %340 : i32 to index
    %c0_280 = arith.constant 0 : index
    %c0_281 = arith.constant 0 : index
    %342 = vector.load %arg3[%341, %c0_280, %c0_281] : memref<64x1x128xf32, #tpu.memory_space<vmem>>, vector<1x1x128xf32>
    %343 = vector.shape_cast %342 : vector<1x1x128xf32> to vector<1x128xf32>
    %c60_282 = arith.constant 60 : index
    %c0_283 = arith.constant 0 : index
    %344 = vector.load %arg17[%c60_282, %c0_283] : memref<64x128xf32, #tpu.memory_space<vmem>>, vector<1x128xf32>
    tpu.vector_store %arg17[%c60_282, %c0_283], %343 {strides = array<i32>} : memref<64x128xf32, #tpu.memory_space<vmem>>, vector<1x128xf32>,
    %c61 = arith.constant 61 : index
    %345 = memref.load %arg2[%c61] : memref<64xi32, #tpu.memory_space<smem>>
    %346 = arith.index_cast %345 : i32 to index
    %c0_284 = arith.constant 0 : index
    %c0_285 = arith.constant 0 : index
    %347 = vector.load %arg3[%346, %c0_284, %c0_285] : memref<64x1x128xf32, #tpu.memory_space<vmem>>, vector<1x1x128xf32>
    %348 = vector.shape_cast %347 : vector<1x1x128xf32> to vector<1x128xf32>
    %c61_286 = arith.constant 61 : index
    %c0_287 = arith.constant 0 : index
    %349 = vector.load %arg17[%c61_286, %c0_287] : memref<64x128xf32, #tpu.memory_space<vmem>>, vector<1x128xf32>
    tpu.vector_store %arg17[%c61_286, %c0_287], %348 {strides = array<i32>} : memref<64x128xf32, #tpu.memory_space<vmem>>, vector<1x128xf32>,
    %c62 = arith.constant 62 : index
    %350 = memref.load %arg2[%c62] : memref<64xi32, #tpu.memory_space<smem>>
    %351 = arith.index_cast %350 : i32 to index
    %c0_288 = arith.constant 0 : index
    %c0_289 = arith.constant 0 : index
    %352 = vector.load %arg3[%351, %c0_288, %c0_289] : memref<64x1x128xf32, #tpu.memory_space<vmem>>, vector<1x1x128xf32>
    %353 = vector.shape_cast %352 : vector<1x1x128xf32> to vector<1x128xf32>
    %c62_290 = arith.constant 62 : index
    %c0_291 = arith.constant 0 : index
    %354 = vector.load %arg17[%c62_290, %c0_291] : memref<64x128xf32, #tpu.memory_space<vmem>>, vector<1x128xf32>
    tpu.vector_store %arg17[%c62_290, %c0_291], %353 {strides = array<i32>} : memref<64x128xf32, #tpu.memory_space<vmem>>, vector<1x128xf32>,
    %c63 = arith.constant 63 : index
    %355 = memref.load %arg2[%c63] : memref<64xi32, #tpu.memory_space<smem>>
    %356 = arith.index_cast %355 : i32 to index
    %c0_292 = arith.constant 0 : index
    %c0_293 = arith.constant 0 : index
    %357 = vector.load %arg3[%356, %c0_292, %c0_293] : memref<64x1x128xf32, #tpu.memory_space<vmem>>, vector<1x1x128xf32>
    %358 = vector.shape_cast %357 : vector<1x1x128xf32> to vector<1x128xf32>
    %c63_294 = arith.constant 63 : index
    %c0_295 = arith.constant 0 : index
    %359 = vector.load %arg17[%c63_294, %c0_295] : memref<64x128xf32, #tpu.memory_space<vmem>>, vector<1x128xf32>
    tpu.vector_store %arg17[%c63_294, %c0_295], %358 {strides = array<i32>} : memref<64x128xf32, #tpu.memory_space<vmem>>, vector<1x128xf32>,
    %c0_296 = arith.constant 0 : index
    %c0_297 = arith.constant 0 : index
    %360 = vector.load %arg18[%c0_296, %c0_297] : memref<8x128xf32, #tpu.memory_space<vmem>>, vector<8x128xf32>
    %c0_298 = arith.constant 0 : index
    %c0_299 = arith.constant 0 : index
    %361 = vector.load %arg7[%c0_298, %c0_299] : memref<256x512xbf16, #tpu.memory_space<vmem>>, vector<256x512xbf16>
    %c0_300 = arith.constant 0 : index
    %c0_301 = arith.constant 0 : index
    %362 = vector.load %arg8[%c0_300, %c0_301] : memref<128x512xbf16, #tpu.memory_space<vmem>>, vector<128x512xbf16>
    %c0_302 = arith.constant 0 : index
    %c0_303 = arith.constant 0 : index
    %363 = vector.load %arg9[%c0_302, %c0_303] : memref<1x512xf32, #tpu.memory_space<vmem>>, vector<1x512xf32>
    %c0_304 = arith.constant 0 : index
    %c0_305 = arith.constant 0 : index
    %c0_306 = arith.constant 0 : index
    %364 = vector.load %arg4[%c0_304, %c0_305, %c0_306] : memref<8x8x1xf32, #tpu.memory_space<vmem>>, vector<8x8x1xf32>
    %c0_307 = arith.constant 0 : index
    %c0_308 = arith.constant 0 : index
    %365 = vector.load %arg17[%c0_307, %c0_308] : memref<64x128xf32, #tpu.memory_space<vmem>>, vector<64x128xf32>
    %366 = arith.truncf %365 : vector<64x128xf32> to vector<64x128xbf16>
    %367 = vector.extract_strided_slice %361 {offsets = [0, 0], sizes = [128, 512], strides = [1, 1]} : vector<256x512xbf16> to vector<128x512xbf16>
    %cst = arith.constant dense<0.000000e+00> : vector<64x512xf32>
    %368 = tpu.matmul %366, %367, %cst {dimension_numbers = #tpu.dot_dimension_numbers<[1], [0], [0], [1], [0, 0, 1, 1], [], []>} : vector<64x128xbf16>, vector<128x512xbf16>, vector<64x512xf32> -> vector<64x512xf32>
    %369 = arith.truncf %360 : vector<8x128xf32> to vector<8x128xbf16>
    %370 = vector.extract_strided_slice %361 {offsets = [128, 0], sizes = [128, 512], strides = [1, 1]} : vector<256x512xbf16> to vector<128x512xbf16>
    %cst_309 = arith.constant dense<0.000000e+00> : vector<8x512xf32>
    %371 = tpu.matmul %369, %370, %cst_309 {dimension_numbers = #tpu.dot_dimension_numbers<[1], [0], [0], [1], [0, 0, 1, 1], [], []>} : vector<8x128xbf16>, vector<128x512xbf16>, vector<8x512xf32> -> vector<8x512xf32>
    %372 = vector.shape_cast %368 : vector<64x512xf32> to vector<8x8x512xf32>
    %373 = vector.shape_cast %371 : vector<8x512xf32> to vector<1x8x512xf32>
    %374 = vector.broadcast %373 : vector<1x8x512xf32> to vector<8x8x512xf32>
    %375 = arith.addf %372, %374 : vector<8x8x512xf32>
    %376 = vector.broadcast %364 : vector<8x8x1xf32> to vector<8x8x512xf32>
    %377 = arith.mulf %375, %376 : vector<8x8x512xf32>
    %378 = vector.shape_cast %363 : vector<1x512xf32> to vector<1x1x512xf32>
    %379 = vector.broadcast %378 : vector<1x1x512xf32> to vector<8x8x512xf32>
    %380 = arith.addf %377, %379 : vector<8x8x512xf32>
    %c0_310 = arith.constant 0 : index
    %c0_311 = arith.constant 0 : index
    %c0_312 = arith.constant 0 : index
    %381 = vector.load %arg19[%c0_310, %c0_311, %c0_312] : memref<8x8x512xf32, #tpu.memory_space<vmem>>, vector<8x8x512xf32>
    tpu.vector_store %arg19[%c0_310, %c0_311, %c0_312], %380 {strides = array<i32>} : memref<8x8x512xf32, #tpu.memory_space<vmem>>, vector<8x8x512xf32>,
    %cst_313 = arith.constant 0.000000e+00 : f32
    %382 = vector.broadcast %cst_313 : f32 to vector<8x128xf32>
    %cst_314 = arith.constant 0.000000e+00 : f32
    %383 = vector.broadcast %cst_314 : f32 to vector<8x128xf32>
    %cst_315 = arith.constant 0.000000e+00 : f32
    %384 = vector.broadcast %cst_315 : f32 to vector<8x128xf32>
    %c0_316 = arith.constant 0 : index
    %c0_317 = arith.constant 0 : index
    %c0_318 = arith.constant 0 : index
    %385 = vector.load %arg19[%c0_316, %c0_317, %c0_318] : memref<8x8x512xf32, #tpu.memory_space<vmem>>, vector<1x8x512xf32>
    %386 = vector.shape_cast %385 : vector<1x8x512xf32> to vector<8x512xf32>
    %387 = arith.truncf %382 : vector<8x128xf32> to vector<8x128xbf16>
    %cst_319 = arith.constant dense<0.000000e+00> : vector<8x512xf32>
    %388 = tpu.matmul %387, %362, %cst_319 {dimension_numbers = #tpu.dot_dimension_numbers<[1], [0], [0], [1], [0, 0, 1, 1], [], []>} : vector<8x128xbf16>, vector<128x512xbf16>, vector<8x512xf32> -> vector<8x512xf32>
    %389 = arith.addf %386, %388 : vector<8x512xf32>
    %390 = vector.extract_strided_slice %389 {offsets = [0, 0], sizes = [8, 128], strides = [1, 1]} : vector<8x512xf32> to vector<8x128xf32>
    %391 = arith.negf %390 : vector<8x128xf32>
    %392 = math.exp %391 : vector<8x128xf32>
    %cst_320 = arith.constant 1.000000e+00 : f32
    %393 = vector.broadcast %cst_320 : f32 to vector<8x128xf32>
    %394 = arith.addf %393, %392 : vector<8x128xf32>
    %395 = arith.divf %393, %394 : vector<8x128xf32>
    %396 = vector.extract_strided_slice %389 {offsets = [0, 128], sizes = [8, 128], strides = [1, 1]} : vector<8x512xf32> to vector<8x128xf32>
    %397 = arith.negf %396 : vector<8x128xf32>
    %398 = math.exp %397 : vector<8x128xf32>
    %cst_321 = arith.constant 1.000000e+00 : f32
    %399 = vector.broadcast %cst_321 : f32 to vector<8x128xf32>
    %400 = arith.addf %399, %398 : vector<8x128xf32>
    %401 = arith.divf %399, %400 : vector<8x128xf32>
    %402 = vector.extract_strided_slice %389 {offsets = [0, 256], sizes = [8, 128], strides = [1, 1]} : vector<8x512xf32> to vector<8x128xf32>
    %403 = math.tanh %402 : vector<8x128xf32>
    %404 = vector.extract_strided_slice %389 {offsets = [0, 384], sizes = [8, 128], strides = [1, 1]} : vector<8x512xf32> to vector<8x128xf32>
    %405 = arith.negf %404 : vector<8x128xf32>
    %406 = math.exp %405 : vector<8x128xf32>
    %cst_322 = arith.constant 1.000000e+00 : f32
    %407 = vector.broadcast %cst_322 : f32 to vector<8x128xf32>
    %408 = arith.addf %407, %406 : vector<8x128xf32>
    %409 = arith.divf %407, %408 : vector<8x128xf32>
    %410 = arith.mulf %401, %383 : vector<8x128xf32>
    %411 = arith.mulf %395, %403 : vector<8x128xf32>
    %412 = arith.addf %410, %411 : vector<8x128xf32>
    %413 = math.tanh %412 : vector<8x128xf32>
    %414 = arith.mulf %409, %413 : vector<8x128xf32>
    %415 = vector.extract_strided_slice %364 {offsets = [0, 0, 0], sizes = [1, 8, 1], strides = [1, 1, 1]} : vector<8x8x1xf32> to vector<1x8x1xf32>
    %416 = vector.shape_cast %415 : vector<1x8x1xf32> to vector<8x1xf32>
    %417 = vector.broadcast %416 : vector<8x1xf32> to vector<8x128xf32>
    %418 = arith.mulf %414, %417 : vector<8x128xf32>
    %419 = arith.addf %384, %418 : vector<8x128xf32>
    %c1_323 = arith.constant 1 : index
    %c0_324 = arith.constant 0 : index
    %c0_325 = arith.constant 0 : index
    %420 = vector.load %arg19[%c1_323, %c0_324, %c0_325] : memref<8x8x512xf32, #tpu.memory_space<vmem>>, vector<1x8x512xf32>
    %421 = vector.shape_cast %420 : vector<1x8x512xf32> to vector<8x512xf32>
    %422 = arith.truncf %414 : vector<8x128xf32> to vector<8x128xbf16>
    %cst_326 = arith.constant dense<0.000000e+00> : vector<8x512xf32>
    %423 = tpu.matmul %422, %362, %cst_326 {dimension_numbers = #tpu.dot_dimension_numbers<[1], [0], [0], [1], [0, 0, 1, 1], [], []>} : vector<8x128xbf16>, vector<128x512xbf16>, vector<8x512xf32> -> vector<8x512xf32>
    %424 = arith.addf %421, %423 : vector<8x512xf32>
    %425 = vector.extract_strided_slice %424 {offsets = [0, 0], sizes = [8, 128], strides = [1, 1]} : vector<8x512xf32> to vector<8x128xf32>
    %426 = arith.negf %425 : vector<8x128xf32>
    %427 = math.exp %426 : vector<8x128xf32>
    %cst_327 = arith.constant 1.000000e+00 : f32
    %428 = vector.broadcast %cst_327 : f32 to vector<8x128xf32>
    %429 = arith.addf %428, %427 : vector<8x128xf32>
    %430 = arith.divf %428, %429 : vector<8x128xf32>
    %431 = vector.extract_strided_slice %424 {offsets = [0, 128], sizes = [8, 128], strides = [1, 1]} : vector<8x512xf32> to vector<8x128xf32>
    %432 = arith.negf %431 : vector<8x128xf32>
    %433 = math.exp %432 : vector<8x128xf32>
    %cst_328 = arith.constant 1.000000e+00 : f32
    %434 = vector.broadcast %cst_328 : f32 to vector<8x128xf32>
    %435 = arith.addf %434, %433 : vector<8x128xf32>
    %436 = arith.divf %434, %435 : vector<8x128xf32>
    %437 = vector.extract_strided_slice %424 {offsets = [0, 256], sizes = [8, 128], strides = [1, 1]} : vector<8x512xf32> to vector<8x128xf32>
    %438 = math.tanh %437 : vector<8x128xf32>
    %439 = vector.extract_strided_slice %424 {offsets = [0, 384], sizes = [8, 128], strides = [1, 1]} : vector<8x512xf32> to vector<8x128xf32>
    %440 = arith.negf %439 : vector<8x128xf32>
    %441 = math.exp %440 : vector<8x128xf32>
    %cst_329 = arith.constant 1.000000e+00 : f32
    %442 = vector.broadcast %cst_329 : f32 to vector<8x128xf32>
    %443 = arith.addf %442, %441 : vector<8x128xf32>
    %444 = arith.divf %442, %443 : vector<8x128xf32>
    %445 = arith.mulf %436, %412 : vector<8x128xf32>
    %446 = arith.mulf %430, %438 : vector<8x128xf32>
    %447 = arith.addf %445, %446 : vector<8x128xf32>
    %448 = math.tanh %447 : vector<8x128xf32>
    %449 = arith.mulf %444, %448 : vector<8x128xf32>
    %450 = vector.extract_strided_slice %364 {offsets = [1, 0, 0], sizes = [1, 8, 1], strides = [1, 1, 1]} : vector<8x8x1xf32> to vector<1x8x1xf32>
    %451 = vector.shape_cast %450 : vector<1x8x1xf32> to vector<8x1xf32>
    %452 = vector.broadcast %451 : vector<8x1xf32> to vector<8x128xf32>
    %453 = arith.mulf %449, %452 : vector<8x128xf32>
    %454 = arith.addf %419, %453 : vector<8x128xf32>
    %c2_330 = arith.constant 2 : index
    %c0_331 = arith.constant 0 : index
    %c0_332 = arith.constant 0 : index
    %455 = vector.load %arg19[%c2_330, %c0_331, %c0_332] : memref<8x8x512xf32, #tpu.memory_space<vmem>>, vector<1x8x512xf32>
    %456 = vector.shape_cast %455 : vector<1x8x512xf32> to vector<8x512xf32>
    %457 = arith.truncf %449 : vector<8x128xf32> to vector<8x128xbf16>
    %cst_333 = arith.constant dense<0.000000e+00> : vector<8x512xf32>
    %458 = tpu.matmul %457, %362, %cst_333 {dimension_numbers = #tpu.dot_dimension_numbers<[1], [0], [0], [1], [0, 0, 1, 1], [], []>} : vector<8x128xbf16>, vector<128x512xbf16>, vector<8x512xf32> -> vector<8x512xf32>
    %459 = arith.addf %456, %458 : vector<8x512xf32>
    %460 = vector.extract_strided_slice %459 {offsets = [0, 0], sizes = [8, 128], strides = [1, 1]} : vector<8x512xf32> to vector<8x128xf32>
    %461 = arith.negf %460 : vector<8x128xf32>
    %462 = math.exp %461 : vector<8x128xf32>
    %cst_334 = arith.constant 1.000000e+00 : f32
    %463 = vector.broadcast %cst_334 : f32 to vector<8x128xf32>
    %464 = arith.addf %463, %462 : vector<8x128xf32>
    %465 = arith.divf %463, %464 : vector<8x128xf32>
    %466 = vector.extract_strided_slice %459 {offsets = [0, 128], sizes = [8, 128], strides = [1, 1]} : vector<8x512xf32> to vector<8x128xf32>
    %467 = arith.negf %466 : vector<8x128xf32>
    %468 = math.exp %467 : vector<8x128xf32>
    %cst_335 = arith.constant 1.000000e+00 : f32
    %469 = vector.broadcast %cst_335 : f32 to vector<8x128xf32>
    %470 = arith.addf %469, %468 : vector<8x128xf32>
    %471 = arith.divf %469, %470 : vector<8x128xf32>
    %472 = vector.extract_strided_slice %459 {offsets = [0, 256], sizes = [8, 128], strides = [1, 1]} : vector<8x512xf32> to vector<8x128xf32>
    %473 = math.tanh %472 : vector<8x128xf32>
    %474 = vector.extract_strided_slice %459 {offsets = [0, 384], sizes = [8, 128], strides = [1, 1]} : vector<8x512xf32> to vector<8x128xf32>
    %475 = arith.negf %474 : vector<8x128xf32>
    %476 = math.exp %475 : vector<8x128xf32>
    %cst_336 = arith.constant 1.000000e+00 : f32
    %477 = vector.broadcast %cst_336 : f32 to vector<8x128xf32>
    %478 = arith.addf %477, %476 : vector<8x128xf32>
    %479 = arith.divf %477, %478 : vector<8x128xf32>
    %480 = arith.mulf %471, %447 : vector<8x128xf32>
    %481 = arith.mulf %465, %473 : vector<8x128xf32>
    %482 = arith.addf %480, %481 : vector<8x128xf32>
    %483 = math.tanh %482 : vector<8x128xf32>
    %484 = arith.mulf %479, %483 : vector<8x128xf32>
    %485 = vector.extract_strided_slice %364 {offsets = [2, 0, 0], sizes = [1, 8, 1], strides = [1, 1, 1]} : vector<8x8x1xf32> to vector<1x8x1xf32>
    %486 = vector.shape_cast %485 : vector<1x8x1xf32> to vector<8x1xf32>
    %487 = vector.broadcast %486 : vector<8x1xf32> to vector<8x128xf32>
    %488 = arith.mulf %484, %487 : vector<8x128xf32>
    %489 = arith.addf %454, %488 : vector<8x128xf32>
    %c3_337 = arith.constant 3 : index
    %c0_338 = arith.constant 0 : index
    %c0_339 = arith.constant 0 : index
    %490 = vector.load %arg19[%c3_337, %c0_338, %c0_339] : memref<8x8x512xf32, #tpu.memory_space<vmem>>, vector<1x8x512xf32>
    %491 = vector.shape_cast %490 : vector<1x8x512xf32> to vector<8x512xf32>
    %492 = arith.truncf %484 : vector<8x128xf32> to vector<8x128xbf16>
    %cst_340 = arith.constant dense<0.000000e+00> : vector<8x512xf32>
    %493 = tpu.matmul %492, %362, %cst_340 {dimension_numbers = #tpu.dot_dimension_numbers<[1], [0], [0], [1], [0, 0, 1, 1], [], []>} : vector<8x128xbf16>, vector<128x512xbf16>, vector<8x512xf32> -> vector<8x512xf32>
    %494 = arith.addf %491, %493 : vector<8x512xf32>
    %495 = vector.extract_strided_slice %494 {offsets = [0, 0], sizes = [8, 128], strides = [1, 1]} : vector<8x512xf32> to vector<8x128xf32>
    %496 = arith.negf %495 : vector<8x128xf32>
    %497 = math.exp %496 : vector<8x128xf32>
    %cst_341 = arith.constant 1.000000e+00 : f32
    %498 = vector.broadcast %cst_341 : f32 to vector<8x128xf32>
    %499 = arith.addf %498, %497 : vector<8x128xf32>
    %500 = arith.divf %498, %499 : vector<8x128xf32>
    %501 = vector.extract_strided_slice %494 {offsets = [0, 128], sizes = [8, 128], strides = [1, 1]} : vector<8x512xf32> to vector<8x128xf32>
    %502 = arith.negf %501 : vector<8x128xf32>
    %503 = math.exp %502 : vector<8x128xf32>
    %cst_342 = arith.constant 1.000000e+00 : f32
    %504 = vector.broadcast %cst_342 : f32 to vector<8x128xf32>
    %505 = arith.addf %504, %503 : vector<8x128xf32>
    %506 = arith.divf %504, %505 : vector<8x128xf32>
    %507 = vector.extract_strided_slice %494 {offsets = [0, 256], sizes = [8, 128], strides = [1, 1]} : vector<8x512xf32> to vector<8x128xf32>
    %508 = math.tanh %507 : vector<8x128xf32>
    %509 = vector.extract_strided_slice %494 {offsets = [0, 384], sizes = [8, 128], strides = [1, 1]} : vector<8x512xf32> to vector<8x128xf32>
    %510 = arith.negf %509 : vector<8x128xf32>
    %511 = math.exp %510 : vector<8x128xf32>
    %cst_343 = arith.constant 1.000000e+00 : f32
    %512 = vector.broadcast %cst_343 : f32 to vector<8x128xf32>
    %513 = arith.addf %512, %511 : vector<8x128xf32>
    %514 = arith.divf %512, %513 : vector<8x128xf32>
    %515 = arith.mulf %506, %482 : vector<8x128xf32>
    %516 = arith.mulf %500, %508 : vector<8x128xf32>
    %517 = arith.addf %515, %516 : vector<8x128xf32>
    %518 = math.tanh %517 : vector<8x128xf32>
    %519 = arith.mulf %514, %518 : vector<8x128xf32>
    %520 = vector.extract_strided_slice %364 {offsets = [3, 0, 0], sizes = [1, 8, 1], strides = [1, 1, 1]} : vector<8x8x1xf32> to vector<1x8x1xf32>
    %521 = vector.shape_cast %520 : vector<1x8x1xf32> to vector<8x1xf32>
    %522 = vector.broadcast %521 : vector<8x1xf32> to vector<8x128xf32>
    %523 = arith.mulf %519, %522 : vector<8x128xf32>
    %524 = arith.addf %489, %523 : vector<8x128xf32>
    %c4_344 = arith.constant 4 : index
    %c0_345 = arith.constant 0 : index
    %c0_346 = arith.constant 0 : index
    %525 = vector.load %arg19[%c4_344, %c0_345, %c0_346] : memref<8x8x512xf32, #tpu.memory_space<vmem>>, vector<1x8x512xf32>
    %526 = vector.shape_cast %525 : vector<1x8x512xf32> to vector<8x512xf32>
    %527 = arith.truncf %519 : vector<8x128xf32> to vector<8x128xbf16>
    %cst_347 = arith.constant dense<0.000000e+00> : vector<8x512xf32>
    %528 = tpu.matmul %527, %362, %cst_347 {dimension_numbers = #tpu.dot_dimension_numbers<[1], [0], [0], [1], [0, 0, 1, 1], [], []>} : vector<8x128xbf16>, vector<128x512xbf16>, vector<8x512xf32> -> vector<8x512xf32>
    %529 = arith.addf %526, %528 : vector<8x512xf32>
    %530 = vector.extract_strided_slice %529 {offsets = [0, 0], sizes = [8, 128], strides = [1, 1]} : vector<8x512xf32> to vector<8x128xf32>
    %531 = arith.negf %530 : vector<8x128xf32>
    %532 = math.exp %531 : vector<8x128xf32>
    %cst_348 = arith.constant 1.000000e+00 : f32
    %533 = vector.broadcast %cst_348 : f32 to vector<8x128xf32>
    %534 = arith.addf %533, %532 : vector<8x128xf32>
    %535 = arith.divf %533, %534 : vector<8x128xf32>
    %536 = vector.extract_strided_slice %529 {offsets = [0, 128], sizes = [8, 128], strides = [1, 1]} : vector<8x512xf32> to vector<8x128xf32>
    %537 = arith.negf %536 : vector<8x128xf32>
    %538 = math.exp %537 : vector<8x128xf32>
    %cst_349 = arith.constant 1.000000e+00 : f32
    %539 = vector.broadcast %cst_349 : f32 to vector<8x128xf32>
    %540 = arith.addf %539, %538 : vector<8x128xf32>
    %541 = arith.divf %539, %540 : vector<8x128xf32>
    %542 = vector.extract_strided_slice %529 {offsets = [0, 256], sizes = [8, 128], strides = [1, 1]} : vector<8x512xf32> to vector<8x128xf32>
    %543 = math.tanh %542 : vector<8x128xf32>
    %544 = vector.extract_strided_slice %529 {offsets = [0, 384], sizes = [8, 128], strides = [1, 1]} : vector<8x512xf32> to vector<8x128xf32>
    %545 = arith.negf %544 : vector<8x128xf32>
    %546 = math.exp %545 : vector<8x128xf32>
    %cst_350 = arith.constant 1.000000e+00 : f32
    %547 = vector.broadcast %cst_350 : f32 to vector<8x128xf32>
    %548 = arith.addf %547, %546 : vector<8x128xf32>
    %549 = arith.divf %547, %548 : vector<8x128xf32>
    %550 = arith.mulf %541, %517 : vector<8x128xf32>
    %551 = arith.mulf %535, %543 : vector<8x128xf32>
    %552 = arith.addf %550, %551 : vector<8x128xf32>
    %553 = math.tanh %552 : vector<8x128xf32>
    %554 = arith.mulf %549, %553 : vector<8x128xf32>
    %555 = vector.extract_strided_slice %364 {offsets = [4, 0, 0], sizes = [1, 8, 1], strides = [1, 1, 1]} : vector<8x8x1xf32> to vector<1x8x1xf32>
    %556 = vector.shape_cast %555 : vector<1x8x1xf32> to vector<8x1xf32>
    %557 = vector.broadcast %556 : vector<8x1xf32> to vector<8x128xf32>
    %558 = arith.mulf %554, %557 : vector<8x128xf32>
    %559 = arith.addf %524, %558 : vector<8x128xf32>
    %c5_351 = arith.constant 5 : index
    %c0_352 = arith.constant 0 : index
    %c0_353 = arith.constant 0 : index
    %560 = vector.load %arg19[%c5_351, %c0_352, %c0_353] : memref<8x8x512xf32, #tpu.memory_space<vmem>>, vector<1x8x512xf32>
    %561 = vector.shape_cast %560 : vector<1x8x512xf32> to vector<8x512xf32>
    %562 = arith.truncf %554 : vector<8x128xf32> to vector<8x128xbf16>
    %cst_354 = arith.constant dense<0.000000e+00> : vector<8x512xf32>
    %563 = tpu.matmul %562, %362, %cst_354 {dimension_numbers = #tpu.dot_dimension_numbers<[1], [0], [0], [1], [0, 0, 1, 1], [], []>} : vector<8x128xbf16>, vector<128x512xbf16>, vector<8x512xf32> -> vector<8x512xf32>
    %564 = arith.addf %561, %563 : vector<8x512xf32>
    %565 = vector.extract_strided_slice %564 {offsets = [0, 0], sizes = [8, 128], strides = [1, 1]} : vector<8x512xf32> to vector<8x128xf32>
    %566 = arith.negf %565 : vector<8x128xf32>
    %567 = math.exp %566 : vector<8x128xf32>
    %cst_355 = arith.constant 1.000000e+00 : f32
    %568 = vector.broadcast %cst_355 : f32 to vector<8x128xf32>
    %569 = arith.addf %568, %567 : vector<8x128xf32>
    %570 = arith.divf %568, %569 : vector<8x128xf32>
    %571 = vector.extract_strided_slice %564 {offsets = [0, 128], sizes = [8, 128], strides = [1, 1]} : vector<8x512xf32> to vector<8x128xf32>
    %572 = arith.negf %571 : vector<8x128xf32>
    %573 = math.exp %572 : vector<8x128xf32>
    %cst_356 = arith.constant 1.000000e+00 : f32
    %574 = vector.broadcast %cst_356 : f32 to vector<8x128xf32>
    %575 = arith.addf %574, %573 : vector<8x128xf32>
    %576 = arith.divf %574, %575 : vector<8x128xf32>
    %577 = vector.extract_strided_slice %564 {offsets = [0, 256], sizes = [8, 128], strides = [1, 1]} : vector<8x512xf32> to vector<8x128xf32>
    %578 = math.tanh %577 : vector<8x128xf32>
    %579 = vector.extract_strided_slice %564 {offsets = [0, 384], sizes = [8, 128], strides = [1, 1]} : vector<8x512xf32> to vector<8x128xf32>
    %580 = arith.negf %579 : vector<8x128xf32>
    %581 = math.exp %580 : vector<8x128xf32>
    %cst_357 = arith.constant 1.000000e+00 : f32
    %582 = vector.broadcast %cst_357 : f32 to vector<8x128xf32>
    %583 = arith.addf %582, %581 : vector<8x128xf32>
    %584 = arith.divf %582, %583 : vector<8x128xf32>
    %585 = arith.mulf %576, %552 : vector<8x128xf32>
    %586 = arith.mulf %570, %578 : vector<8x128xf32>
    %587 = arith.addf %585, %586 : vector<8x128xf32>
    %588 = math.tanh %587 : vector<8x128xf32>
    %589 = arith.mulf %584, %588 : vector<8x128xf32>
    %590 = vector.extract_strided_slice %364 {offsets = [5, 0, 0], sizes = [1, 8, 1], strides = [1, 1, 1]} : vector<8x8x1xf32> to vector<1x8x1xf32>
    %591 = vector.shape_cast %590 : vector<1x8x1xf32> to vector<8x1xf32>
    %592 = vector.broadcast %591 : vector<8x1xf32> to vector<8x128xf32>
    %593 = arith.mulf %589, %592 : vector<8x128xf32>
    %594 = arith.addf %559, %593 : vector<8x128xf32>
    %c6_358 = arith.constant 6 : index
    %c0_359 = arith.constant 0 : index
    %c0_360 = arith.constant 0 : index
    %595 = vector.load %arg19[%c6_358, %c0_359, %c0_360] : memref<8x8x512xf32, #tpu.memory_space<vmem>>, vector<1x8x512xf32>
    %596 = vector.shape_cast %595 : vector<1x8x512xf32> to vector<8x512xf32>
    %597 = arith.truncf %589 : vector<8x128xf32> to vector<8x128xbf16>
    %cst_361 = arith.constant dense<0.000000e+00> : vector<8x512xf32>
    %598 = tpu.matmul %597, %362, %cst_361 {dimension_numbers = #tpu.dot_dimension_numbers<[1], [0], [0], [1], [0, 0, 1, 1], [], []>} : vector<8x128xbf16>, vector<128x512xbf16>, vector<8x512xf32> -> vector<8x512xf32>
    %599 = arith.addf %596, %598 : vector<8x512xf32>
    %600 = vector.extract_strided_slice %599 {offsets = [0, 0], sizes = [8, 128], strides = [1, 1]} : vector<8x512xf32> to vector<8x128xf32>
    %601 = arith.negf %600 : vector<8x128xf32>
    %602 = math.exp %601 : vector<8x128xf32>
    %cst_362 = arith.constant 1.000000e+00 : f32
    %603 = vector.broadcast %cst_362 : f32 to vector<8x128xf32>
    %604 = arith.addf %603, %602 : vector<8x128xf32>
    %605 = arith.divf %603, %604 : vector<8x128xf32>
    %606 = vector.extract_strided_slice %599 {offsets = [0, 128], sizes = [8, 128], strides = [1, 1]} : vector<8x512xf32> to vector<8x128xf32>
    %607 = arith.negf %606 : vector<8x128xf32>
    %608 = math.exp %607 : vector<8x128xf32>
    %cst_363 = arith.constant 1.000000e+00 : f32
    %609 = vector.broadcast %cst_363 : f32 to vector<8x128xf32>
    %610 = arith.addf %609, %608 : vector<8x128xf32>
    %611 = arith.divf %609, %610 : vector<8x128xf32>
    %612 = vector.extract_strided_slice %599 {offsets = [0, 256], sizes = [8, 128], strides = [1, 1]} : vector<8x512xf32> to vector<8x128xf32>
    %613 = math.tanh %612 : vector<8x128xf32>
    %614 = vector.extract_strided_slice %599 {offsets = [0, 384], sizes = [8, 128], strides = [1, 1]} : vector<8x512xf32> to vector<8x128xf32>
    %615 = arith.negf %614 : vector<8x128xf32>
    %616 = math.exp %615 : vector<8x128xf32>
    %cst_364 = arith.constant 1.000000e+00 : f32
    %617 = vector.broadcast %cst_364 : f32 to vector<8x128xf32>
    %618 = arith.addf %617, %616 : vector<8x128xf32>
    %619 = arith.divf %617, %618 : vector<8x128xf32>
    %620 = arith.mulf %611, %587 : vector<8x128xf32>
    %621 = arith.mulf %605, %613 : vector<8x128xf32>
    %622 = arith.addf %620, %621 : vector<8x128xf32>
    %623 = math.tanh %622 : vector<8x128xf32>
    %624 = arith.mulf %619, %623 : vector<8x128xf32>
    %625 = vector.extract_strided_slice %364 {offsets = [6, 0, 0], sizes = [1, 8, 1], strides = [1, 1, 1]} : vector<8x8x1xf32> to vector<1x8x1xf32>
    %626 = vector.shape_cast %625 : vector<1x8x1xf32> to vector<8x1xf32>
    %627 = vector.broadcast %626 : vector<8x1xf32> to vector<8x128xf32>
    %628 = arith.mulf %624, %627 : vector<8x128xf32>
    %629 = arith.addf %594, %628 : vector<8x128xf32>
    %c7_365 = arith.constant 7 : index
    %c0_366 = arith.constant 0 : index
    %c0_367 = arith.constant 0 : index
    %630 = vector.load %arg19[%c7_365, %c0_366, %c0_367] : memref<8x8x512xf32, #tpu.memory_space<vmem>>, vector<1x8x512xf32>
    %631 = vector.shape_cast %630 : vector<1x8x512xf32> to vector<8x512xf32>
    %632 = arith.truncf %624 : vector<8x128xf32> to vector<8x128xbf16>
    %cst_368 = arith.constant dense<0.000000e+00> : vector<8x512xf32>
    %633 = tpu.matmul %632, %362, %cst_368 {dimension_numbers = #tpu.dot_dimension_numbers<[1], [0], [0], [1], [0, 0, 1, 1], [], []>} : vector<8x128xbf16>, vector<128x512xbf16>, vector<8x512xf32> -> vector<8x512xf32>
    %634 = arith.addf %631, %633 : vector<8x512xf32>
    %635 = vector.extract_strided_slice %634 {offsets = [0, 0], sizes = [8, 128], strides = [1, 1]} : vector<8x512xf32> to vector<8x128xf32>
    %636 = arith.negf %635 : vector<8x128xf32>
    %637 = math.exp %636 : vector<8x128xf32>
    %cst_369 = arith.constant 1.000000e+00 : f32
    %638 = vector.broadcast %cst_369 : f32 to vector<8x128xf32>
    %639 = arith.addf %638, %637 : vector<8x128xf32>
    %640 = arith.divf %638, %639 : vector<8x128xf32>
    %641 = vector.extract_strided_slice %634 {offsets = [0, 128], sizes = [8, 128], strides = [1, 1]} : vector<8x512xf32> to vector<8x128xf32>
    %642 = arith.negf %641 : vector<8x128xf32>
    %643 = math.exp %642 : vector<8x128xf32>
    %cst_370 = arith.constant 1.000000e+00 : f32
    %644 = vector.broadcast %cst_370 : f32 to vector<8x128xf32>
    %645 = arith.addf %644, %643 : vector<8x128xf32>
    %646 = arith.divf %644, %645 : vector<8x128xf32>
    %647 = vector.extract_strided_slice %634 {offsets = [0, 256], sizes = [8, 128], strides = [1, 1]} : vector<8x512xf32> to vector<8x128xf32>
    %648 = math.tanh %647 : vector<8x128xf32>
    %649 = vector.extract_strided_slice %634 {offsets = [0, 384], sizes = [8, 128], strides = [1, 1]} : vector<8x512xf32> to vector<8x128xf32>
    %650 = arith.negf %649 : vector<8x128xf32>
    %651 = math.exp %650 : vector<8x128xf32>
    %cst_371 = arith.constant 1.000000e+00 : f32
    %652 = vector.broadcast %cst_371 : f32 to vector<8x128xf32>
    %653 = arith.addf %652, %651 : vector<8x128xf32>
    %654 = arith.divf %652, %653 : vector<8x128xf32>
    %655 = arith.mulf %646, %622 : vector<8x128xf32>
    %656 = arith.mulf %640, %648 : vector<8x128xf32>
    %657 = arith.addf %655, %656 : vector<8x128xf32>
    %658 = math.tanh %657 : vector<8x128xf32>
    %659 = arith.mulf %654, %658 : vector<8x128xf32>
    %660 = vector.extract_strided_slice %364 {offsets = [7, 0, 0], sizes = [1, 8, 1], strides = [1, 1, 1]} : vector<8x8x1xf32> to vector<1x8x1xf32>
    %661 = vector.shape_cast %660 : vector<1x8x1xf32> to vector<8x1xf32>
    %662 = vector.broadcast %661 : vector<8x1xf32> to vector<8x128xf32>
    %663 = arith.mulf %659, %662 : vector<8x128xf32>
    %664 = arith.addf %629, %663 : vector<8x128xf32>
    %c0_372 = arith.constant 0 : index
    %c0_373 = arith.constant 0 : index
    %665 = vector.load %arg5[%c0_372, %c0_373] : memref<8x1xf32, #tpu.memory_space<vmem>>, vector<8x1xf32>
    %666 = vector.broadcast %665 : vector<8x1xf32> to vector<8x128xf32>
    %667 = arith.mulf %664, %666 : vector<8x128xf32>
    %668 = arith.subf %360, %667 : vector<8x128xf32>
    %669 = arith.mulf %360, %667 : vector<8x128xf32>
    %670 = tpu.concatenate %360, %667, %668, %669 in 1 : vector<8x128xf32>, vector<8x128xf32>, vector<8x128xf32>, vector<8x128xf32> -> vector<8x512xf32>
    tpu.wait_dma2 semaphore(%arg21 : memref<!tpu.dma_semaphore, #tpu.memory_space<semaphore_mem>>) src(%arg10 : memref<512x1024xbf16, #tpu.memory_space<any>>) dst(%arg20 : memref<512x1024xbf16, #tpu.memory_space<vmem>>)
    %671 = arith.truncf %670 : vector<8x512xf32> to vector<8x512xbf16>
    %c0_374 = arith.constant 0 : index
    %c0_375 = arith.constant 0 : index
    %672 = vector.load %arg20[%c0_374, %c0_375] : memref<512x1024xbf16, #tpu.memory_space<vmem>>, vector<512x1024xbf16>
    %cst_376 = arith.constant dense<0.000000e+00> : vector<8x1024xf32>
    %673 = tpu.matmul %671, %672, %cst_376 {dimension_numbers = #tpu.dot_dimension_numbers<[1], [0], [0], [1], [0, 0, 1, 1], [], []>} : vector<8x512xbf16>, vector<512x1024xbf16>, vector<8x1024xf32> -> vector<8x1024xf32>
    %c0_377 = arith.constant 0 : index
    %c0_378 = arith.constant 0 : index
    %674 = vector.load %arg11[%c0_377, %c0_378] : memref<1x1024xf32, #tpu.memory_space<vmem>>, vector<1x1024xf32>
    %675 = vector.broadcast %674 : vector<1x1024xf32> to vector<8x1024xf32>
    %676 = arith.addf %673, %675 : vector<8x1024xf32>
    %cst_379 = arith.constant 0.000000e+00 : f32
    %677 = vector.broadcast %cst_379 : f32 to vector<8x1024xf32>
    %678 = arith.cmpf oge, %676, %677 : vector<8x1024xf32>
    %cst_380 = arith.constant 0.00999999977 : f32
    %679 = vector.broadcast %cst_380 : f32 to vector<8x1024xf32>
    %680 = arith.mulf %679, %676 : vector<8x1024xf32>
    %681 = arith.select %678, %676, %680 : vector<8x1024xi1>, vector<8x1024xf32>
    %c0_381 = arith.constant 0 : index
    %c0_382 = arith.constant 0 : index
    %682 = vector.load %arg12[%c0_381, %c0_382] : memref<1x1024xf32, #tpu.memory_space<vmem>>, vector<1x1024xf32>
    %683 = vector.broadcast %682 : vector<1x1024xf32> to vector<8x1024xf32>
    %684 = arith.mulf %681, %683 : vector<8x1024xf32>
    %cst_383 = arith.constant dense<0.000000e+00> : vector<8xf32>
    %685 = vector.multi_reduction <add>, %684, %cst_383 [1] : vector<8x1024xf32> to vector<8xf32>
    %686 = vector.shape_cast %685 : vector<8xf32> to vector<8x1xf32>
    %c0_384 = arith.constant 0 : index
    %c0_385 = arith.constant 0 : index
    %687 = vector.load %arg13[%c0_384, %c0_385] : memref<1x1xf32, #tpu.memory_space<vmem>>, vector<1x1xf32>
    %688 = vector.broadcast %687 : vector<1x1xf32> to vector<8x1xf32>
    %689 = arith.addf %686, %688 : vector<8x1xf32>
    %690 = arith.negf %689 : vector<8x1xf32>
    %691 = math.exp %690 : vector<8x1xf32>
    %cst_386 = arith.constant 1.000000e+00 : f32
    %692 = vector.broadcast %cst_386 : f32 to vector<8x1xf32>
    %693 = arith.addf %692, %691 : vector<8x1xf32>
    %694 = arith.divf %692, %693 : vector<8x1xf32>
    %c0_387 = arith.constant 0 : index
    %c0_388 = arith.constant 0 : index
    %695 = vector.load %arg15[%c0_387, %c0_388] : memref<8x1xf32, #tpu.memory_space<vmem>>, vector<8x1xf32>
    tpu.vector_store %arg15[%c0_387, %c0_388], %694 {strides = array<i32>} : memref<8x1xf32, #tpu.memory_space<vmem>>, vector<8x1xf32>,
    %c0_389 = arith.constant 0 : index
    %c0_390 = arith.constant 0 : index
    %696 = vector.load %arg14[%c0_389, %c0_390] : memref<8x1xf32, #tpu.memory_space<vmem>>, vector<8x1xf32>
    %697 = arith.mulf %696, %694 : vector<8x1xf32>
    %cst_391 = arith.constant 1.000000e+00 : f32
    %698 = vector.broadcast %cst_391 : f32 to vector<8x1xf32>
    %699 = arith.subf %698, %696 : vector<8x1xf32>
    %cst_392 = arith.constant 1.000000e+00 : f32
    %700 = vector.broadcast %cst_392 : f32 to vector<8x1xf32>
    %701 = arith.subf %700, %694 : vector<8x1xf32>
    %702 = arith.mulf %699, %701 : vector<8x1xf32>
    %703 = arith.addf %697, %702 : vector<8x1xf32>
    %704 = math.log %703 : vector<8x1xf32>
    %cst_393 = arith.constant -1.000000e+02 : f32
    %705 = vector.broadcast %cst_393 : f32 to vector<8x1xf32>
    %706 = arith.maximumf %704, %705 : vector<8x1xf32>
    %cst_394 = arith.constant 0.000000e+00 : f32
    %707 = vector.broadcast %cst_394 : f32 to vector<8x1xf32>
    %708 = arith.subf %707, %706 : vector<8x1xf32>
    %c0_395 = arith.constant 0 : index
    %c0_396 = arith.constant 0 : index
    %709 = vector.load %arg6[%c0_395, %c0_396] : memref<8x1xf32, #tpu.memory_space<vmem>>, vector<8x1xf32>
    %cst_397 = arith.constant 1.000000e+00 : f32
    %710 = vector.broadcast %cst_397 : f32 to vector<8x1xf32>
    %711 = arith.subf %710, %703 : vector<8x1xf32>
    %712 = arith.mulf %711, %711 : vector<8x1xf32>
    %713 = arith.mulf %709, %712 : vector<8x1xf32>
    %714 = arith.mulf %713, %708 : vector<8x1xf32>
    %715 = vector.shape_cast %714 : vector<8x1xf32> to vector<1x8x1xf32>
    %cst_398 = arith.constant dense<0.000000e+00> : vector<1xf32>
    %716 = vector.multi_reduction <add>, %715, %cst_398 [1, 2] : vector<1x8x1xf32> to vector<1xf32>
    %717 = vector.shape_cast %716 : vector<1xf32> to vector<1x1x1xf32>
    %718 = vector.extract %717[0, 0, 0] : f32 from vector<1x1x1xf32>
    %719 = vector.broadcast %718 : f32 to vector<1x1xf32>
    %c0_399 = arith.constant 0 : index
    %c0_400 = arith.constant 0 : index
    %720 = vector.load %arg16[%c0_399, %c0_400] : memref<1x1xf32, #tpu.memory_space<vmem>>, vector<1x1xf32>
    tpu.vector_store %arg16[%c0_399, %c0_400], %719 {strides = array<i32>} : memref<1x1xf32, #tpu.memory_space<vmem>>, vector<1x1xf32>,
    return
  }
  func.func @transform_0(%arg0: i32, %arg1: memref<8xi32, #tpu.memory_space<smem>>, %arg2: memref<64xi32, #tpu.memory_space<smem>>) -> (i32, i32, i32) {
    %c0_i32 = arith.constant 0 : i32
    %c0_i32_0 = arith.constant 0 : i32
    %c0_i32_1 = arith.constant 0 : i32
    %c0_i32_2 = arith.constant 0 : i32
    return %c0_i32, %c0_i32_0, %c0_i32_1 : i32, i32, i32
  }
  func.func @transform_1(%arg0: i32, %arg1: memref<8xi32, #tpu.memory_space<smem>>, %arg2: memref<64xi32, #tpu.memory_space<smem>>) -> (i32, i32, i32) {
    %c0_i32 = arith.constant 0 : i32
    %c0_i32_0 = arith.constant 0 : i32
    %c0_i32_1 = arith.constant 0 : i32
    %c0_i32_2 = arith.constant 0 : i32
    return %c0_i32, %c0_i32_0, %c0_i32_1 : i32, i32, i32
  }
  func.func @transform_2(%arg0: i32, %arg1: memref<8xi32, #tpu.memory_space<smem>>, %arg2: memref<64xi32, #tpu.memory_space<smem>>) -> (i32, i32) {
    %c0_i32 = arith.constant 0 : i32
    %c0_i32_0 = arith.constant 0 : i32
    %c0_i32_1 = arith.constant 0 : i32
    return %c0_i32, %c0_i32_0 : i32, i32
  }
  func.func @transform_3(%arg0: i32, %arg1: memref<8xi32, #tpu.memory_space<smem>>, %arg2: memref<64xi32, #tpu.memory_space<smem>>) -> (i32, i32) {
    %c0_i32 = arith.constant 0 : i32
    %c0_i32_0 = arith.constant 0 : i32
    %c0_i32_1 = arith.constant 0 : i32
    return %c0_i32, %c0_i32_0 : i32, i32
  }
  func.func @transform_4(%arg0: i32, %arg1: memref<8xi32, #tpu.memory_space<smem>>, %arg2: memref<64xi32, #tpu.memory_space<smem>>) -> (i32, i32) {
    %c0_i32 = arith.constant 0 : i32
    %c0_i32_0 = arith.constant 0 : i32
    %c0_i32_1 = arith.constant 0 : i32
    return %c0_i32, %c0_i32_0 : i32, i32
  }
  func.func @transform_5(%arg0: i32, %arg1: memref<8xi32, #tpu.memory_space<smem>>, %arg2: memref<64xi32, #tpu.memory_space<smem>>) -> (i32, i32) {
    %c0_i32 = arith.constant 0 : i32
    %c0_i32_0 = arith.constant 0 : i32
    %c0_i32_1 = arith.constant 0 : i32
    return %c0_i32, %c0_i32_0 : i32, i32
  }
  func.func @transform_6(%arg0: i32, %arg1: memref<8xi32, #tpu.memory_space<smem>>, %arg2: memref<64xi32, #tpu.memory_space<smem>>) -> (i32, i32) {
    %c0_i32 = arith.constant 0 : i32
    %c0_i32_0 = arith.constant 0 : i32
    %c0_i32_1 = arith.constant 0 : i32
    return %c0_i32, %c0_i32_0 : i32, i32
  }
  func.func @transform_8(%arg0: i32, %arg1: memref<8xi32, #tpu.memory_space<smem>>, %arg2: memref<64xi32, #tpu.memory_space<smem>>) -> (i32, i32) {
    %c0_i32 = arith.constant 0 : i32
    %c0_i32_0 = arith.constant 0 : i32
    %c0_i32_1 = arith.constant 0 : i32
    return %c0_i32, %c0_i32_0 : i32, i32
  }
  func.func @transform_9(%arg0: i32, %arg1: memref<8xi32, #tpu.memory_space<smem>>, %arg2: memref<64xi32, #tpu.memory_space<smem>>) -> (i32, i32) {
    %c0_i32 = arith.constant 0 : i32
    %c0_i32_0 = arith.constant 0 : i32
    %c0_i32_1 = arith.constant 0 : i32
    return %c0_i32, %c0_i32_0 : i32, i32
  }
  func.func @transform_10(%arg0: i32, %arg1: memref<8xi32, #tpu.memory_space<smem>>, %arg2: memref<64xi32, #tpu.memory_space<smem>>) -> (i32, i32) {
    %c0_i32 = arith.constant 0 : i32
    %c0_i32_0 = arith.constant 0 : i32
    %c0_i32_1 = arith.constant 0 : i32
    return %c0_i32, %c0_i32_0 : i32, i32
  }
  func.func @transform_11(%arg0: i32, %arg1: memref<8xi32, #tpu.memory_space<smem>>, %arg2: memref<64xi32, #tpu.memory_space<smem>>) -> (i32, i32) {
    %c0_i32 = arith.constant 0 : i32
    %c0_i32_0 = arith.constant 0 : i32
    %c0_i32_1 = arith.constant 0 : i32
    return %c0_i32, %c0_i32_0 : i32, i32
  }
  func.func @transform_12(%arg0: i32, %arg1: memref<8xi32, #tpu.memory_space<smem>>, %arg2: memref<64xi32, #tpu.memory_space<smem>>) -> (i32, i32) {
    %c0_i32 = arith.constant 0 : i32
    %c0_i32_0 = arith.constant 0 : i32
    %c0_i32_1 = arith.constant 0 : i32
    return %c0_i32, %c0_i32_0 : i32, i32
  }
  func.func @transform_13(%arg0: i32, %arg1: memref<8xi32, #tpu.memory_space<smem>>, %arg2: memref<64xi32, #tpu.memory_space<smem>>) -> (i32, i32) {
    %c0_i32 = arith.constant 0 : i32
    %c0_i32_0 = arith.constant 0 : i32
    %c0_i32_1 = arith.constant 0 : i32
    return %c0_i32, %c0_i32_0 : i32, i32
  }
}

</mosaic_0001>

<bundles_post_ra>
// kernel: ranker_forward.1
= control target key start
LH: loop header
LB: loop body
LE: loop exit
PB: predicated region body
PF: predicated region fallthrough
CT: control target
= control target key end

     0   :  { %s11185_s0 = inlined_call_operand.vmem [shape: s32[8], index: 0, kind: input, shape index: {}]   ;;  %s11186_s2 = inlined_call_operand.vmem [shape: f32[64,1,128], index: 2, kind: input, shape index: {}]   ;;  %s11187_s3 = inlined_call_operand.vmem [shape: f32[8,8,1], index: 3, kind: input, shape index: {}]   ;;  %s11188_s4 = inlined_call_operand.vmem [shape: f32[8,1], index: 4, kind: input, shape index: {}]   ;;  %s11189_s5 = inlined_call_operand.vmem [shape: f32[8,1], index: 5, kind: input, shape index: {}]   ;;  %s11190_s6 = inlined_call_operand.vmem [shape: bf16[256,512], index: 6, kind: input, shape index: {}]   ;;  %s11191_s7 = inlined_call_operand.vmem [shape: bf16[128,512], index: 7, kind: input, shape index: {}]   ;;  %s11192_s8 = inlined_call_operand.vmem [shape: f32[1,512], index: 8, kind: input, shape index: {}]   ;;  %s11193_s9 = inlined_call_operand.vmem [shape: bf16[512,1024], index: 9, kind: input, shape index: {}]   ;;  %s11194_s10 = inlined_call_operand.vmem [shape: f32[1,1024], index: 10, kind: input, shape index: {}]   ;;  %s11195_s11 = inlined_call_operand.vmem [shape: f32[1,1024], index: 11, kind: input, shape index: {}]   ;;  %s11196_s13 = inlined_call_operand.vmem [shape: f32[8,1], index: 13, kind: input, shape index: {}]   ;;  %s11197_s14 = inlined_call_operand.vmem [shape: f32[8,1], index: 14, kind: output, shape index: {0}]   ;;  %s11198_s15 = inlined_call_operand.hbm [shape: f32[1,1], index: 15, kind: output, shape index: {1}]   ;;  %s11199_s1 = inlined_call_operand.vmem [shape: s32[64], index: 1, kind: input, shape index: {}]   ;;  %s11200_s12 = inlined_call_operand.<no memory space> [shape: f32[1,1], index: 12, kind: input, shape index: {}]  }
   0x1   :  { %11263 = sst [smem:[#allocation67_spill]] %s11189_s5  ;;  %s21_s20 = sshll.u32 %s11185_s0, 4  ;;  %v29_v0 = vstv %s11200_s12  ;;  %s22_s20 = int_to_ptr.vmem [resolvable:$true] %s21_s20 }
   0x2   :  { %11264 = sst [smem:[#allocation68_spill]] %s11194_s10  ;;  %s25_s23 = sshll.u32 %s11199_s1, 4  ;;  %30 = vst [vmem:[#allocation10] sm:$0x1] %v29_v0  ;;  %s26_s23 = int_to_ptr.vmem [resolvable:$true] %s25_s23 }
   0x3   :  { %11265 = sst [smem:[#allocation69_spill]] %s11195_s11  ;;  %s7931_s25 = scalar_lea.vmem %s22_s20, 16 }
   0x4   :  { %11266 = sst [smem:[#allocation70_spill]] %s11196_s13  ;;  %p7932_p0 = scmp.ne.s32.totalorder %s22_s20, %s7931_s25 }
   0x5   :  { %11267 = sst [smem:[#allocation71_spill]] %s11197_s14  ;;  %p7936_p1 = scmp.lt.s32.totalorder %s22_s20, %s22_s20 }
   0x6   :  { %11268 = sst [smem:[#allocation72_spill]] %s11198_s15  ;;  %p7937_p2 = scmp.lt.s32.totalorder %s7931_s25, %s7931_s25 }
   0x8   :  { %p7938_p3 = por %p7937_p2, %p7936_p1 }
   0xa   :  { %p7939_p4 = pnand %p7938_p3, %p7932_p0 }
   0xc   :  { %7942 = shalt.err (!%p7939_p4)  }
   0xd   :  { %s7983_s26 = smov [#allocation8]   ;;  %s7943_s0 = scalar_lea.vmem %s26_s23, 16 }
   0xe   :  { %24 = dma.vmem_to_smem %s22_s20, 16, %s7983_s26, [#allocation7] }
   0xf   :  { %p7944_p5 = scmp.ne.s32.totalorder %s26_s23, %s7943_s0  ;;  %p7948_p6 = scmp.lt.s32.totalorder %s26_s23, %s26_s23 }
  0x10   :  { %p7949_p7 = scmp.lt.s32.totalorder %s7943_s0, %s7943_s0 }
  0x12   :  { %p7950_p8 = por %p7949_p7, %p7948_p6 }
  0x14   :  { %p7951_p9 = pnand %p7950_p8, %p7944_p5 }
  0x16   :  { %7954 = shalt.err (!%p7951_p9)  }
  0x17   :  { %s7984_s1 = smov [#allocation9]  }
  0x18   :  { %28 = dma.vmem_to_smem %s26_s23, 16, %s7984_s1, [#allocation7] }
  0x19   :  { %7977 = dma.done.wait [#allocation7], 32 }
  0x1a   :  { %7978 = vsyncadd [#allocation7], 4294967264 }
  0x1b   :  { %32 = sfence }
  0x1c   :  { %33 = vsyncpa [#allocation12], 0  ;;  %v74_v1 = vld [vmem:[%s11193_s9] sm:$0xf]  ;;  %v78_v3 = vld [vmem:[%s11193_s9 + $0x4] sm:$0xf] }
  0x1d   :  { %v76_v2 = vld [vmem:[%s11193_s9 + $0x20] sm:$0xf]  ;;  %75 = vst [vmem:[#allocation5] sm:$0xf] %v74_v1  ;;  %v80_v4 = vld [vmem:[%s11193_s9 + $0x24] sm:$0xf] }
  0x1e   :  { %77 = vst [vmem:[#allocation5 + $0x4] sm:$0xf] %v76_v2  ;;  %v82_v5 = vld [vmem:[%s11193_s9 + $0x8] sm:$0xf]  ;;  %79 = vst [vmem:[#allocation5 + $0x8] sm:$0xf] %v78_v3 }
  0x1f   :  { %81 = vst [vmem:[#allocation5 + $0xc] sm:$0xf] %v80_v4  ;;  %83 = vst [vmem:[#allocation5 + $0x10] sm:$0xf] %v82_v5  ;;  %v84_v6 = vld [vmem:[%s11193_s9 + $0x28] sm:$0xf] }
  0x20   :  { %v86_v7 = vld [vmem:[%s11193_s9 + $0xc] sm:$0xf]  ;;  %85 = vst [vmem:[#allocation5 + $0x14] sm:$0xf] %v84_v6  ;;  %v90_v9 = vld [vmem:[%s11193_s9 + $0x10] sm:$0xf] }
  0x21   :  { %v88_v8 = vld [vmem:[%s11193_s9 + $0x2c] sm:$0xf]  ;;  %87 = vst [vmem:[#allocation5 + $0x18] sm:$0xf] %v86_v7  ;;  %v92_v10 = vld [vmem:[%s11193_s9 + $0x30] sm:$0xf] }
  0x22   :  { %89 = vst [vmem:[#allocation5 + $0x1c] sm:$0xf] %v88_v8  ;;  %v94_v11 = vld [vmem:[%s11193_s9 + $0x14] sm:$0xf]  ;;  %91 = vst [vmem:[#allocation5 + $0x20] sm:$0xf] %v90_v9 }
  0x23   :  { %93 = vst [vmem:[#allocation5 + $0x24] sm:$0xf] %v92_v10  ;;  %95 = vst [vmem:[#allocation5 + $0x28] sm:$0xf] %v94_v11  ;;  %v96_v12 = vld [vmem:[%s11193_s9 + $0x34] sm:$0xf] }
  0x24   :  { %v98_v13 = vld [vmem:[%s11193_s9 + $0x18] sm:$0xf]  ;;  %97 = vst [vmem:[#allocation5 + $0x2c] sm:$0xf] %v96_v12  ;;  %v102_v15 = vld [vmem:[%s11193_s9 + $0x1c] sm:$0xf] }
  0x25   :  { %v100_v14 = vld [vmem:[%s11193_s9 + $0x38] sm:$0xf]  ;;  %99 = vst [vmem:[#allocation5 + $0x30] sm:$0xf] %v98_v13  ;;  %v104_v16 = vld [vmem:[%s11193_s9 + $0x3c] sm:$0xff]  }
  0x26   :  { %101 = vst [vmem:[#allocation5 + $0x34] sm:$0xf] %v100_v14  ;;  %v108_v17 = vld [vmem:[%s11193_s9 + $0x60] sm:$0xf]  ;;  %103 = vst [vmem:[#allocation5 + $0x38] sm:$0xf] %v102_v15 }
  0x27   :  { %105 = vst [vmem:[#allocation5 + $0x3c] sm:$0xff] %v104_v16   ;;  %109 = vst [vmem:[#allocation5 + $0x44] sm:$0xf] %v108_v17  ;;  %v110_v18 = vld [vmem:[%s11193_s9 + $0x44] sm:$0xf]  ;;  %v136_v31 = vld [vmem:[%s11193_s9 + $0x7c] sm:$0xff]  }
  0x28   :  { %v112_v19 = vld [vmem:[%s11193_s9 + $0x64] sm:$0xf]  ;;  %v114_v20 = vld [vmem:[%s11193_s9 + $0x48] sm:$0xf]  ;;  %111 = vst [vmem:[#allocation5 + $0x48] sm:$0xf] %v110_v18 }
  0x29   :  { %113 = vst [vmem:[#allocation5 + $0x4c] sm:$0xf] %v112_v19  ;;  %115 = vst [vmem:[#allocation5 + $0x50] sm:$0xf] %v114_v20  ;;  %v116_v21 = vld [vmem:[%s11193_s9 + $0x68] sm:$0xf] }
  0x2a   :  { %v118_v22 = vld [vmem:[%s11193_s9 + $0x4c] sm:$0xf]  ;;  %117 = vst [vmem:[#allocation5 + $0x54] sm:$0xf] %v116_v21  ;;  %v122_v24 = vld [vmem:[%s11193_s9 + $0x50] sm:$0xf] }
  0x2b   :  { %v120_v23 = vld [vmem:[%s11193_s9 + $0x6c] sm:$0xf]  ;;  %119 = vst [vmem:[#allocation5 + $0x58] sm:$0xf] %v118_v22  ;;  %v124_v25 = vld [vmem:[%s11193_s9 + $0x70] sm:$0xf] }
  0x2c   :  { %121 = vst [vmem:[#allocation5 + $0x5c] sm:$0xf] %v120_v23  ;;  %v126_v26 = vld [vmem:[%s11193_s9 + $0x54] sm:$0xf]  ;;  %123 = vst [vmem:[#allocation5 + $0x60] sm:$0xf] %v122_v24 }
  0x2d   :  { %125 = vst [vmem:[#allocation5 + $0x64] sm:$0xf] %v124_v25  ;;  %127 = vst [vmem:[#allocation5 + $0x68] sm:$0xf] %v126_v26  ;;  %v128_v27 = vld [vmem:[%s11193_s9 + $0x74] sm:$0xf] }
  0x2e   :  { %v130_v28 = vld [vmem:[%s11193_s9 + $0x58] sm:$0xf]  ;;  %129 = vst [vmem:[#allocation5 + $0x6c] sm:$0xf] %v128_v27  ;;  %v134_v30 = vld [vmem:[%s11193_s9 + $0x5c] sm:$0xf] }
  0x2f   :  { %v132_v29 = vld [vmem:[%s11193_s9 + $0x78] sm:$0xf]  ;;  %131 = vst [vmem:[#allocation5 + $0x70] sm:$0xf] %v130_v28  ;;  %v140_v32 = vld [vmem:[%s11193_s9 + $0xa0] sm:$0xf] }
  0x30   :  { %133 = vst [vmem:[#allocation5 + $0x74] sm:$0xf] %v132_v29  ;;  %135 = vst [vmem:[#allocation5 + $0x78] sm:$0xf] %v134_v30  ;;  %v142_v33 = vld [vmem:[%s11193_s9 + $0x84] sm:$0xf] }
  0x31   :  { %137 = vst [vmem:[#allocation5 + $0x7c] sm:$0xff] %v136_v31   ;;  %141 = vst [vmem:[#allocation5 + $0x84] sm:$0xf] %v140_v32  ;;  %v144_v34 = vld [vmem:[%s11193_s9 + $0xa4] sm:$0xf]  ;;  %v168_v46 = vld [vmem:[%s11193_s9 + $0xbc] sm:$0xff]  }
  0x32   :  { %v146_v35 = vld [vmem:[%s11193_s9 + $0x88] sm:$0xf]  ;;  %143 = vst [vmem:[#allocation5 + $0x88] sm:$0xf] %v142_v33  ;;  %145 = vst [vmem:[#allocation5 + $0x8c] sm:$0xf] %v144_v34 }
  0x33   :  { %147 = vst [vmem:[#allocation5 + $0x90] sm:$0xf] %v146_v35  ;;  %v148_v36 = vld [vmem:[%s11193_s9 + $0xa8] sm:$0xf]  ;;  %v150_v37 = vld [vmem:[%s11193_s9 + $0x8c] sm:$0xf] }
  0x34   :  { %v152_v38 = vld [vmem:[%s11193_s9 + $0xac] sm:$0xf]  ;;  %149 = vst [vmem:[#allocation5 + $0x94] sm:$0xf] %v148_v36  ;;  %151 = vst [vmem:[#allocation5 + $0x98] sm:$0xf] %v150_v37 }
  0x35   :  { %153 = vst [vmem:[#allocation5 + $0x9c] sm:$0xf] %v152_v38  ;;  %v154_v39 = vld [vmem:[%s11193_s9 + $0x90] sm:$0xf]  ;;  %v158_v41 = vld [vmem:[%s11193_s9 + $0x94] sm:$0xf] }
  0x36   :  { %v156_v40 = vld [vmem:[%s11193_s9 + $0xb0] sm:$0xf]  ;;  %155 = vst [vmem:[#allocation5 + $0xa0] sm:$0xf] %v154_v39  ;;  %159 = vst [vmem:[#allocation5 + $0xa8] sm:$0xf] %v158_v41 }
  0x37   :  { %157 = vst [vmem:[#allocation5 + $0xa4] sm:$0xf] %v156_v40  ;;  %v160_v42 = vld [vmem:[%s11193_s9 + $0xb4] sm:$0xf]  ;;  %v162_v43 = vld [vmem:[%s11193_s9 + $0x98] sm:$0xf] }
  0x38   :  { %v164_v44 = vld [vmem:[%s11193_s9 + $0xb8] sm:$0xf]  ;;  %161 = vst [vmem:[#allocation5 + $0xac] sm:$0xf] %v160_v42  ;;  %163 = vst [vmem:[#allocation5 + $0xb0] sm:$0xf] %v162_v43 }
  0x39   :  { %165 = vst [vmem:[#allocation5 + $0xb4] sm:$0xf] %v164_v44  ;;  %v166_v45 = vld [vmem:[%s11193_s9 + $0x9c] sm:$0xf]  ;;  %v172_v47 = vld [vmem:[%s11193_s9 + $0xe0] sm:$0xf] }
  0x3a   :  { %167 = vst [vmem:[#allocation5 + $0xb8] sm:$0xf] %v166_v45  ;;  %169 = vst [vmem:[#allocation5 + $0xbc] sm:$0xff] %v168_v46   ;;  %v174_v48 = vld [vmem:[%s11193_s9 + $0xc4] sm:$0xf]  ;;  %v200_v61 = vld [vmem:[%s11193_s9 + $0xfc] sm:$0xff]  }
  0x3b   :  { %173 = vst [vmem:[#allocation5 + $0xc4] sm:$0xf] %v172_v47  ;;  %v176_v49 = vld [vmem:[%s11193_s9 + $0xe4] sm:$0xf]  ;;  %v178_v50 = vld [vmem:[%s11193_s9 + $0xc8] sm:$0xf] }
  0x3c   :  { %175 = vst [vmem:[#allocation5 + $0xc8] sm:$0xf] %v174_v48  ;;  %177 = vst [vmem:[#allocation5 + $0xcc] sm:$0xf] %v176_v49  ;;  %v180_v51 = vld [vmem:[%s11193_s9 + $0xe8] sm:$0xf] }
  0x3d   :  { %179 = vst [vmem:[#allocation5 + $0xd0] sm:$0xf] %v178_v50  ;;  %v182_v52 = vld [vmem:[%s11193_s9 + $0xcc] sm:$0xf]  ;;  %181 = vst [vmem:[#allocation5 + $0xd4] sm:$0xf] %v180_v51 }
  0x3e   :  { %v184_v53 = vld [vmem:[%s11193_s9 + $0xec] sm:$0xf]  ;;  %183 = vst [vmem:[#allocation5 + $0xd8] sm:$0xf] %v182_v52  ;;  %v186_v54 = vld [vmem:[%s11193_s9 + $0xd0] sm:$0xf] }
  0x3f   :  { %185 = vst [vmem:[#allocation5 + $0xdc] sm:$0xf] %v184_v53  ;;  %v188_v55 = vld [vmem:[%s11193_s9 + $0xf0] sm:$0xf]  ;;  %v190_v56 = vld [vmem:[%s11193_s9 + $0xd4] sm:$0xf] }
  0x40   :  { %187 = vst [vmem:[#allocation5 + $0xe0] sm:$0xf] %v186_v54  ;;  %189 = vst [vmem:[#allocation5 + $0xe4] sm:$0xf] %v188_v55  ;;  %v192_v57 = vld [vmem:[%s11193_s9 + $0xf4] sm:$0xf] }
  0x41   :  { %191 = vst [vmem:[#allocation5 + $0xe8] sm:$0xf] %v190_v56  ;;  %v194_v58 = vld [vmem:[%s11193_s9 + $0xd8] sm:$0xf]  ;;  %193 = vst [vmem:[#allocation5 + $0xec] sm:$0xf] %v192_v57 }
  0x42   :  { %v196_v59 = vld [vmem:[%s11193_s9 + $0xf8] sm:$0xf]  ;;  %195 = vst [vmem:[#allocation5 + $0xf0] sm:$0xf] %v194_v58  ;;  %v198_v60 = vld [vmem:[%s11193_s9 + $0xdc] sm:$0xf] }
  0x43   :  { %197 = vst [vmem:[#allocation5 + $0xf4] sm:$0xf] %v196_v59  ;;  %v204_v62 = vld [vmem:[%s11193_s9 + $0x120] sm:$0xf]  ;;  %199 = vst [vmem:[#allocation5 + $0xf8] sm:$0xf] %v198_v60 }
  0x44   :  { %201 = vst [vmem:[#allocation5 + $0xfc] sm:$0xff] %v200_v61   ;;  %205 = vst [vmem:[#allocation5 + $0x104] sm:$0xf] %v204_v62  ;;  %v206_v63 = vld [vmem:[%s11193_s9 + $0x104] sm:$0xf]  ;;  %v232_v12 = vld [vmem:[%s11193_s9 + $0x13c] sm:$0xff]  }
  0x45   :  { %v208_v0 = vld [vmem:[%s11193_s9 + $0x124] sm:$0xf]  ;;  %v210_v1 = vld [vmem:[%s11193_s9 + $0x108] sm:$0xf]  ;;  %207 = vst [vmem:[#allocation5 + $0x108] sm:$0xf] %v206_v63 }
  0x46   :  { %209 = vst [vmem:[#allocation5 + $0x10c] sm:$0xf] %v208_v0  ;;  %211 = vst [vmem:[#allocation5 + $0x110] sm:$0xf] %v210_v1  ;;  %v212_v2 = vld [vmem:[%s11193_s9 + $0x128] sm:$0xf] }
  0x47   :  { %v214_v3 = vld [vmem:[%s11193_s9 + $0x10c] sm:$0xf]  ;;  %213 = vst [vmem:[#allocation5 + $0x114] sm:$0xf] %v212_v2  ;;  %v218_v5 = vld [vmem:[%s11193_s9 + $0x110] sm:$0xf] }
  0x48   :  { %v216_v4 = vld [vmem:[%s11193_s9 + $0x12c] sm:$0xf]  ;;  %215 = vst [vmem:[#allocation5 + $0x118] sm:$0xf] %v214_v3  ;;  %v220_v6 = vld [vmem:[%s11193_s9 + $0x130] sm:$0xf] }
  0x49   :  { %217 = vst [vmem:[#allocation5 + $0x11c] sm:$0xf] %v216_v4  ;;  %v222_v7 = vld [vmem:[%s11193_s9 + $0x114] sm:$0xf]  ;;  %219 = vst [vmem:[#allocation5 + $0x120] sm:$0xf] %v218_v5 }
  0x4a   :  { %221 = vst [vmem:[#allocation5 + $0x124] sm:$0xf] %v220_v6  ;;  %223 = vst [vmem:[#allocation5 + $0x128] sm:$0xf] %v222_v7  ;;  %v224_v8 = vld [vmem:[%s11193_s9 + $0x134] sm:$0xf] }
  0x4b   :  { %v226_v9 = vld [vmem:[%s11193_s9 + $0x118] sm:$0xf]  ;;  %225 = vst [vmem:[#allocation5 + $0x12c] sm:$0xf] %v224_v8  ;;  %v230_v11 = vld [vmem:[%s11193_s9 + $0x11c] sm:$0xf] }
  0x4c   :  { %v228_v10 = vld [vmem:[%s11193_s9 + $0x138] sm:$0xf]  ;;  %227 = vst [vmem:[#allocation5 + $0x130] sm:$0xf] %v226_v9  ;;  %v236_v13 = vld [vmem:[%s11193_s9 + $0x160] sm:$0xf] }
  0x4d   :  { %229 = vst [vmem:[#allocation5 + $0x134] sm:$0xf] %v228_v10  ;;  %231 = vst [vmem:[#allocation5 + $0x138] sm:$0xf] %v230_v11  ;;  %v238_v14 = vld [vmem:[%s11193_s9 + $0x144] sm:$0xf] }
  0x4e   :  { %233 = vst [vmem:[#allocation5 + $0x13c] sm:$0xff] %v232_v12   ;;  %237 = vst [vmem:[#allocation5 + $0x144] sm:$0xf] %v236_v13  ;;  %v240_v15 = vld [vmem:[%s11193_s9 + $0x164] sm:$0xf]  ;;  %v264_v27 = vld [vmem:[%s11193_s9 + $0x17c] sm:$0xff]  }
  0x4f   :  { %v242_v16 = vld [vmem:[%s11193_s9 + $0x148] sm:$0xf]  ;;  %239 = vst [vmem:[#allocation5 + $0x148] sm:$0xf] %v238_v14  ;;  %241 = vst [vmem:[#allocation5 + $0x14c] sm:$0xf] %v240_v15 }
  0x50   :  { %243 = vst [vmem:[#allocation5 + $0x150] sm:$0xf] %v242_v16  ;;  %v244_v17 = vld [vmem:[%s11193_s9 + $0x168] sm:$0xf]  ;;  %v246_v18 = vld [vmem:[%s11193_s9 + $0x14c] sm:$0xf] }
  0x51   :  { %v248_v19 = vld [vmem:[%s11193_s9 + $0x16c] sm:$0xf]  ;;  %245 = vst [vmem:[#allocation5 + $0x154] sm:$0xf] %v244_v17  ;;  %247 = vst [vmem:[#allocation5 + $0x158] sm:$0xf] %v246_v18 }
  0x52   :  { %249 = vst [vmem:[#allocation5 + $0x15c] sm:$0xf] %v248_v19  ;;  %v250_v20 = vld [vmem:[%s11193_s9 + $0x150] sm:$0xf]  ;;  %v254_v22 = vld [vmem:[%s11193_s9 + $0x154] sm:$0xf] }
  0x53   :  { %v252_v21 = vld [vmem:[%s11193_s9 + $0x170] sm:$0xf]  ;;  %251 = vst [vmem:[#allocation5 + $0x160] sm:$0xf] %v250_v20  ;;  %255 = vst [vmem:[#allocation5 + $0x168] sm:$0xf] %v254_v22 }
  0x54   :  { %253 = vst [vmem:[#allocation5 + $0x164] sm:$0xf] %v252_v21  ;;  %v256_v23 = vld [vmem:[%s11193_s9 + $0x174] sm:$0xf]  ;;  %v258_v24 = vld [vmem:[%s11193_s9 + $0x158] sm:$0xf] }
  0x55   :  { %v260_v25 = vld [vmem:[%s11193_s9 + $0x178] sm:$0xf]  ;;  %257 = vst [vmem:[#allocation5 + $0x16c] sm:$0xf] %v256_v23  ;;  %259 = vst [vmem:[#allocation5 + $0x170] sm:$0xf] %v258_v24 }
  0x56   :  { %261 = vst [vmem:[#allocation5 + $0x174] sm:$0xf] %v260_v25  ;;  %v262_v26 = vld [vmem:[%s11193_s9 + $0x15c] sm:$0xf]  ;;  %v268_v28 = vld [vmem:[%s11193_s9 + $0x1a0] sm:$0xf] }
  0x57   :  { %263 = vst [vmem:[#allocation5 + $0x178] sm:$0xf] %v262_v26  ;;  %265 = vst [vmem:[#allocation5 + $0x17c] sm:$0xff] %v264_v27   ;;  %v270_v29 = vld [vmem:[%s11193_s9 + $0x184] sm:$0xf]  ;;  %v296_v42 = vld [vmem:[%s11193_s9 + $0x1bc] sm:$0xff]  }
  0x58   :  { %269 = vst [vmem:[#allocation5 + $0x184] sm:$0xf] %v268_v28  ;;  %v272_v30 = vld [vmem:[%s11193_s9 + $0x1a4] sm:$0xf]  ;;  %v274_v31 = vld [vmem:[%s11193_s9 + $0x188] sm:$0xf] }
  0x59   :  { %271 = vst [vmem:[#allocation5 + $0x188] sm:$0xf] %v270_v29  ;;  %273 = vst [vmem:[#allocation5 + $0x18c] sm:$0xf] %v272_v30  ;;  %v276_v32 = vld [vmem:[%s11193_s9 + $0x1a8] sm:$0xf] }
  0x5a   :  { %275 = vst [vmem:[#allocation5 + $0x190] sm:$0xf] %v274_v31  ;;  %v278_v33 = vld [vmem:[%s11193_s9 + $0x18c] sm:$0xf]  ;;  %277 = vst [vmem:[#allocation5 + $0x194] sm:$0xf] %v276_v32 }
  0x5b   :  { %v280_v34 = vld [vmem:[%s11193_s9 + $0x1ac] sm:$0xf]  ;;  %279 = vst [vmem:[#allocation5 + $0x198] sm:$0xf] %v278_v33  ;;  %v282_v35 = vld [vmem:[%s11193_s9 + $0x190] sm:$0xf] }
  0x5c   :  { %281 = vst [vmem:[#allocation5 + $0x19c] sm:$0xf] %v280_v34  ;;  %v284_v36 = vld [vmem:[%s11193_s9 + $0x1b0] sm:$0xf]  ;;  %v286_v37 = vld [vmem:[%s11193_s9 + $0x194] sm:$0xf] }
  0x5d   :  { %283 = vst [vmem:[#allocation5 + $0x1a0] sm:$0xf] %v282_v35  ;;  %285 = vst [vmem:[#allocation5 + $0x1a4] sm:$0xf] %v284_v36  ;;  %v288_v38 = vld [vmem:[%s11193_s9 + $0x1b4] sm:$0xf] }
  0x5e   :  { %287 = vst [vmem:[#allocation5 + $0x1a8] sm:$0xf] %v286_v37  ;;  %v290_v39 = vld [vmem:[%s11193_s9 + $0x198] sm:$0xf]  ;;  %289 = vst [vmem:[#allocation5 + $0x1ac] sm:$0xf] %v288_v38 }
  0x5f   :  { %v292_v40 = vld [vmem:[%s11193_s9 + $0x1b8] sm:$0xf]  ;;  %291 = vst [vmem:[#allocation5 + $0x1b0] sm:$0xf] %v290_v39  ;;  %v294_v41 = vld [vmem:[%s11193_s9 + $0x19c] sm:$0xf] }
  0x60   :  { %293 = vst [vmem:[#allocation5 + $0x1b4] sm:$0xf] %v292_v40  ;;  %v300_v43 = vld [vmem:[%s11193_s9 + $0x1e0] sm:$0xf]  ;;  %295 = vst [vmem:[#allocation5 + $0x1b8] sm:$0xf] %v294_v41 }
  0x61   :  { %297 = vst [vmem:[#allocation5 + $0x1bc] sm:$0xff] %v296_v42   ;;  %301 = vst [vmem:[#allocation5 + $0x1c4] sm:$0xf] %v300_v43  ;;  %v302_v44 = vld [vmem:[%s11193_s9 + $0x1c4] sm:$0xf]  ;;  %v328_v57 = vld [vmem:[%s11193_s9 + $0x1fc] sm:$0xff]  }
  0x62   :  { %v304_v45 = vld [vmem:[%s11193_s9 + $0x1e4] sm:$0xf]  ;;  %v306_v46 = vld [vmem:[%s11193_s9 + $0x1c8] sm:$0xf]  ;;  %303 = vst [vmem:[#allocation5 + $0x1c8] sm:$0xf] %v302_v44 }
  0x63   :  { %305 = vst [vmem:[#allocation5 + $0x1cc] sm:$0xf] %v304_v45  ;;  %307 = vst [vmem:[#allocation5 + $0x1d0] sm:$0xf] %v306_v46  ;;  %v308_v47 = vld [vmem:[%s11193_s9 + $0x1e8] sm:$0xf] }
  0x64   :  { %v310_v48 = vld [vmem:[%s11193_s9 + $0x1cc] sm:$0xf]  ;;  %309 = vst [vmem:[#allocation5 + $0x1d4] sm:$0xf] %v308_v47  ;;  %v314_v50 = vld [vmem:[%s11193_s9 + $0x1d0] sm:$0xf] }
  0x65   :  { %v312_v49 = vld [vmem:[%s11193_s9 + $0x1ec] sm:$0xf]  ;;  %311 = vst [vmem:[#allocation5 + $0x1d8] sm:$0xf] %v310_v48  ;;  %v316_v51 = vld [vmem:[%s11193_s9 + $0x1f0] sm:$0xf] }
  0x66   :  { %313 = vst [vmem:[#allocation5 + $0x1dc] sm:$0xf] %v312_v49  ;;  %v318_v52 = vld [vmem:[%s11193_s9 + $0x1d4] sm:$0xf]  ;;  %315 = vst [vmem:[#allocation5 + $0x1e0] sm:$0xf] %v314_v50 }
  0x67   :  { %317 = vst [vmem:[#allocation5 + $0x1e4] sm:$0xf] %v316_v51  ;;  %319 = vst [vmem:[#allocation5 + $0x1e8] sm:$0xf] %v318_v52  ;;  %v320_v53 = vld [vmem:[%s11193_s9 + $0x1f4] sm:$0xf] }
  0x68   :  { %v322_v54 = vld [vmem:[%s11193_s9 + $0x1d8] sm:$0xf]  ;;  %321 = vst [vmem:[#allocation5 + $0x1ec] sm:$0xf] %v320_v53  ;;  %v326_v56 = vld [vmem:[%s11193_s9 + $0x1dc] sm:$0xf] }
  0x69   :  { %v324_v55 = vld [vmem:[%s11193_s9 + $0x1f8] sm:$0xf]  ;;  %323 = vst [vmem:[#allocation5 + $0x1f0] sm:$0xf] %v322_v54  ;;  %v332_v58 = vld [vmem:[%s11193_s9 + $0x220] sm:$0xf] }
  0x6a   :  { %325 = vst [vmem:[#allocation5 + $0x1f4] sm:$0xf] %v324_v55  ;;  %327 = vst [vmem:[#allocation5 + $0x1f8] sm:$0xf] %v326_v56  ;;  %v334_v59 = vld [vmem:[%s11193_s9 + $0x204] sm:$0xf] }
  0x6b   :  { %329 = vst [vmem:[#allocation5 + $0x1fc] sm:$0xff] %v328_v57   ;;  %333 = vst [vmem:[#allocation5 + $0x204] sm:$0xf] %v332_v58  ;;  %v336_v60 = vld [vmem:[%s11193_s9 + $0x224] sm:$0xf]  ;;  %v360_v8 = vld [vmem:[%s11193_s9 + $0x23c] sm:$0xff]  }
  0x6c   :  { %v338_v61 = vld [vmem:[%s11193_s9 + $0x208] sm:$0xf]  ;;  %335 = vst [vmem:[#allocation5 + $0x208] sm:$0xf] %v334_v59  ;;  %337 = vst [vmem:[#allocation5 + $0x20c] sm:$0xf] %v336_v60 }
  0x6d   :  { %339 = vst [vmem:[#allocation5 + $0x210] sm:$0xf] %v338_v61  ;;  %v340_v62 = vld [vmem:[%s11193_s9 + $0x228] sm:$0xf]  ;;  %v342_v63 = vld [vmem:[%s11193_s9 + $0x20c] sm:$0xf] }
  0x6e   :  { %v344_v0 = vld [vmem:[%s11193_s9 + $0x22c] sm:$0xf]  ;;  %341 = vst [vmem:[#allocation5 + $0x214] sm:$0xf] %v340_v62  ;;  %343 = vst [vmem:[#allocation5 + $0x218] sm:$0xf] %v342_v63 }
  0x6f   :  { %345 = vst [vmem:[#allocation5 + $0x21c] sm:$0xf] %v344_v0  ;;  %v346_v1 = vld [vmem:[%s11193_s9 + $0x210] sm:$0xf]  ;;  %v350_v3 = vld [vmem:[%s11193_s9 + $0x214] sm:$0xf] }
  0x70   :  { %v348_v2 = vld [vmem:[%s11193_s9 + $0x230] sm:$0xf]  ;;  %347 = vst [vmem:[#allocation5 + $0x220] sm:$0xf] %v346_v1  ;;  %351 = vst [vmem:[#allocation5 + $0x228] sm:$0xf] %v350_v3 }
  0x71   :  { %349 = vst [vmem:[#allocation5 + $0x224] sm:$0xf] %v348_v2  ;;  %v352_v4 = vld [vmem:[%s11193_s9 + $0x234] sm:$0xf]  ;;  %v354_v5 = vld [vmem:[%s11193_s9 + $0x218] sm:$0xf] }
  0x72   :  { %v356_v6 = vld [vmem:[%s11193_s9 + $0x238] sm:$0xf]  ;;  %353 = vst [vmem:[#allocation5 + $0x22c] sm:$0xf] %v352_v4  ;;  %355 = vst [vmem:[#allocation5 + $0x230] sm:$0xf] %v354_v5 }
  0x73   :  { %357 = vst [vmem:[#allocation5 + $0x234] sm:$0xf] %v356_v6  ;;  %v358_v7 = vld [vmem:[%s11193_s9 + $0x21c] sm:$0xf]  ;;  %v364_v9 = vld [vmem:[%s11193_s9 + $0x260] sm:$0xf] }
  0x74   :  { %359 = vst [vmem:[#allocation5 + $0x238] sm:$0xf] %v358_v7  ;;  %361 = vst [vmem:[#allocation5 + $0x23c] sm:$0xff] %v360_v8   ;;  %v366_v10 = vld [vmem:[%s11193_s9 + $0x244] sm:$0xf]  ;;  %v392_v23 = vld [vmem:[%s11193_s9 + $0x27c] sm:$0xff]  }
  0x75   :  { %365 = vst [vmem:[#allocation5 + $0x244] sm:$0xf] %v364_v9  ;;  %v368_v11 = vld [vmem:[%s11193_s9 + $0x264] sm:$0xf]  ;;  %v370_v12 = vld [vmem:[%s11193_s9 + $0x248] sm:$0xf] }
  0x76   :  { %367 = vst [vmem:[#allocation5 + $0x248] sm:$0xf] %v366_v10  ;;  %369 = vst [vmem:[#allocation5 + $0x24c] sm:$0xf] %v368_v11  ;;  %v372_v13 = vld [vmem:[%s11193_s9 + $0x268] sm:$0xf] }
  0x77   :  { %371 = vst [vmem:[#allocation5 + $0x250] sm:$0xf] %v370_v12  ;;  %v374_v14 = vld [vmem:[%s11193_s9 + $0x24c] sm:$0xf]  ;;  %373 = vst [vmem:[#allocation5 + $0x254] sm:$0xf] %v372_v13 }
  0x78   :  { %v376_v15 = vld [vmem:[%s11193_s9 + $0x26c] sm:$0xf]  ;;  %375 = vst [vmem:[#allocation5 + $0x258] sm:$0xf] %v374_v14  ;;  %v378_v16 = vld [vmem:[%s11193_s9 + $0x250] sm:$0xf] }
  0x79   :  { %377 = vst [vmem:[#allocation5 + $0x25c] sm:$0xf] %v376_v15  ;;  %v380_v17 = vld [vmem:[%s11193_s9 + $0x270] sm:$0xf]  ;;  %v382_v18 = vld [vmem:[%s11193_s9 + $0x254] sm:$0xf] }
  0x7a   :  { %379 = vst [vmem:[#allocation5 + $0x260] sm:$0xf] %v378_v16  ;;  %381 = vst [vmem:[#allocation5 + $0x264] sm:$0xf] %v380_v17  ;;  %v384_v19 = vld [vmem:[%s11193_s9 + $0x274] sm:$0xf] }
  0x7b   :  { %383 = vst [vmem:[#allocation5 + $0x268] sm:$0xf] %v382_v18  ;;  %v386_v20 = vld [vmem:[%s11193_s9 + $0x258] sm:$0xf]  ;;  %385 = vst [vmem:[#allocation5 + $0x26c] sm:$0xf] %v384_v19 }
  0x7c   :  { %v388_v21 = vld [vmem:[%s11193_s9 + $0x278] sm:$0xf]  ;;  %387 = vst [vmem:[#allocation5 + $0x270] sm:$0xf] %v386_v20  ;;  %v390_v22 = vld [vmem:[%s11193_s9 + $0x25c] sm:$0xf] }
  0x7d   :  { %389 = vst [vmem:[#allocation5 + $0x274] sm:$0xf] %v388_v21  ;;  %v396_v24 = vld [vmem:[%s11193_s9 + $0x2a0] sm:$0xf]  ;;  %391 = vst [vmem:[#allocation5 + $0x278] sm:$0xf] %v390_v22 }
  0x7e   :  { %393 = vst [vmem:[#allocation5 + $0x27c] sm:$0xff] %v392_v23   ;;  %397 = vst [vmem:[#allocation5 + $0x284] sm:$0xf] %v396_v24  ;;  %v398_v25 = vld [vmem:[%s11193_s9 + $0x284] sm:$0xf]  ;;  %v424_v38 = vld [vmem:[%s11193_s9 + $0x2bc] sm:$0xff]  }
  0x7f   :  { %v400_v26 = vld [vmem:[%s11193_s9 + $0x2a4] sm:$0xf]  ;;  %v402_v27 = vld [vmem:[%s11193_s9 + $0x288] sm:$0xf]  ;;  %399 = vst [vmem:[#allocation5 + $0x288] sm:$0xf] %v398_v25 }
  0x80   :  { %401 = vst [vmem:[#allocation5 + $0x28c] sm:$0xf] %v400_v26  ;;  %403 = vst [vmem:[#allocation5 + $0x290] sm:$0xf] %v402_v27  ;;  %v404_v28 = vld [vmem:[%s11193_s9 + $0x2a8] sm:$0xf] }
  0x81   :  { %v406_v29 = vld [vmem:[%s11193_s9 + $0x28c] sm:$0xf]  ;;  %405 = vst [vmem:[#allocation5 + $0x294] sm:$0xf] %v404_v28  ;;  %v410_v31 = vld [vmem:[%s11193_s9 + $0x290] sm:$0xf] }
  0x82   :  { %v408_v30 = vld [vmem:[%s11193_s9 + $0x2ac] sm:$0xf]  ;;  %407 = vst [vmem:[#allocation5 + $0x298] sm:$0xf] %v406_v29  ;;  %v412_v32 = vld [vmem:[%s11193_s9 + $0x2b0] sm:$0xf] }
  0x83   :  { %409 = vst [vmem:[#allocation5 + $0x29c] sm:$0xf] %v408_v30  ;;  %v414_v33 = vld [vmem:[%s11193_s9 + $0x294] sm:$0xf]  ;;  %411 = vst [vmem:[#allocation5 + $0x2a0] sm:$0xf] %v410_v31 }
  0x84   :  { %413 = vst [vmem:[#allocation5 + $0x2a4] sm:$0xf] %v412_v32  ;;  %415 = vst [vmem:[#allocation5 + $0x2a8] sm:$0xf] %v414_v33  ;;  %v416_v34 = vld [vmem:[%s11193_s9 + $0x2b4] sm:$0xf] }
  0x85   :  { %v418_v35 = vld [vmem:[%s11193_s9 + $0x298] sm:$0xf]  ;;  %417 = vst [vmem:[#allocation5 + $0x2ac] sm:$0xf] %v416_v34  ;;  %v422_v37 = vld [vmem:[%s11193_s9 + $0x29c] sm:$0xf] }
  0x86   :  { %v420_v36 = vld [vmem:[%s11193_s9 + $0x2b8] sm:$0xf]  ;;  %419 = vst [vmem:[#allocation5 + $0x2b0] sm:$0xf] %v418_v35  ;;  %v428_v39 = vld [vmem:[%s11193_s9 + $0x2e0] sm:$0xf] }
  0x87   :  { %421 = vst [vmem:[#allocation5 + $0x2b4] sm:$0xf] %v420_v36  ;;  %423 = vst [vmem:[#allocation5 + $0x2b8] sm:$0xf] %v422_v37  ;;  %v430_v40 = vld [vmem:[%s11193_s9 + $0x2c4] sm:$0xf] }
  0x88   :  { %425 = vst [vmem:[#allocation5 + $0x2bc] sm:$0xff] %v424_v38   ;;  %429 = vst [vmem:[#allocation5 + $0x2c4] sm:$0xf] %v428_v39  ;;  %v432_v41 = vld [vmem:[%s11193_s9 + $0x2e4] sm:$0xf]  ;;  %v456_v53 = vld [vmem:[%s11193_s9 + $0x2fc] sm:$0xff]  }
  0x89   :  { %v434_v42 = vld [vmem:[%s11193_s9 + $0x2c8] sm:$0xf]  ;;  %431 = vst [vmem:[#allocation5 + $0x2c8] sm:$0xf] %v430_v40  ;;  %433 = vst [vmem:[#allocation5 + $0x2cc] sm:$0xf] %v432_v41 }
  0x8a   :  { %435 = vst [vmem:[#allocation5 + $0x2d0] sm:$0xf] %v434_v42  ;;  %v436_v43 = vld [vmem:[%s11193_s9 + $0x2e8] sm:$0xf]  ;;  %v438_v44 = vld [vmem:[%s11193_s9 + $0x2cc] sm:$0xf] }
  0x8b   :  { %v440_v45 = vld [vmem:[%s11193_s9 + $0x2ec] sm:$0xf]  ;;  %437 = vst [vmem:[#allocation5 + $0x2d4] sm:$0xf] %v436_v43  ;;  %439 = vst [vmem:[#allocation5 + $0x2d8] sm:$0xf] %v438_v44 }
  0x8c   :  { %441 = vst [vmem:[#allocation5 + $0x2dc] sm:$0xf] %v440_v45  ;;  %v442_v46 = vld [vmem:[%s11193_s9 + $0x2d0] sm:$0xf]  ;;  %v446_v48 = vld [vmem:[%s11193_s9 + $0x2d4] sm:$0xf] }
  0x8d   :  { %v444_v47 = vld [vmem:[%s11193_s9 + $0x2f0] sm:$0xf]  ;;  %443 = vst [vmem:[#allocation5 + $0x2e0] sm:$0xf] %v442_v46  ;;  %447 = vst [vmem:[#allocation5 + $0x2e8] sm:$0xf] %v446_v48 }
  0x8e   :  { %445 = vst [vmem:[#allocation5 + $0x2e4] sm:$0xf] %v444_v47  ;;  %v448_v49 = vld [vmem:[%s11193_s9 + $0x2f4] sm:$0xf]  ;;  %v450_v50 = vld [vmem:[%s11193_s9 + $0x2d8] sm:$0xf] }
  0x8f   :  { %v452_v51 = vld [vmem:[%s11193_s9 + $0x2f8] sm:$0xf]  ;;  %449 = vst [vmem:[#allocation5 + $0x2ec] sm:$0xf] %v448_v49  ;;  %451 = vst [vmem:[#allocation5 + $0x2f0] sm:$0xf] %v450_v50 }
  0x90   :  { %453 = vst [vmem:[#allocation5 + $0x2f4] sm:$0xf] %v452_v51  ;;  %v454_v52 = vld [vmem:[%s11193_s9 + $0x2dc] sm:$0xf]  ;;  %v460_v54 = vld [vmem:[%s11193_s9 + $0x320] sm:$0xf] }
  0x91   :  { %455 = vst [vmem:[#allocation5 + $0x2f8] sm:$0xf] %v454_v52  ;;  %457 = vst [vmem:[#allocation5 + $0x2fc] sm:$0xff] %v456_v53   ;;  %v462_v55 = vld [vmem:[%s11193_s9 + $0x304] sm:$0xf]  ;;  %v488_v4 = vld [vmem:[%s11193_s9 + $0x33c] sm:$0xff]  }
  0x92   :  { %461 = vst [vmem:[#allocation5 + $0x304] sm:$0xf] %v460_v54  ;;  %v464_v56 = vld [vmem:[%s11193_s9 + $0x324] sm:$0xf]  ;;  %v466_v57 = vld [vmem:[%s11193_s9 + $0x308] sm:$0xf] }
  0x93   :  { %463 = vst [vmem:[#allocation5 + $0x308] sm:$0xf] %v462_v55  ;;  %465 = vst [vmem:[#allocation5 + $0x30c] sm:$0xf] %v464_v56  ;;  %v468_v58 = vld [vmem:[%s11193_s9 + $0x328] sm:$0xf] }
  0x94   :  { %467 = vst [vmem:[#allocation5 + $0x310] sm:$0xf] %v466_v57  ;;  %v470_v59 = vld [vmem:[%s11193_s9 + $0x30c] sm:$0xf]  ;;  %469 = vst [vmem:[#allocation5 + $0x314] sm:$0xf] %v468_v58 }
  0x95   :  { %v472_v60 = vld [vmem:[%s11193_s9 + $0x32c] sm:$0xf]  ;;  %471 = vst [vmem:[#allocation5 + $0x318] sm:$0xf] %v470_v59  ;;  %v474_v61 = vld [vmem:[%s11193_s9 + $0x310] sm:$0xf] }
  0x96   :  { %473 = vst [vmem:[#allocation5 + $0x31c] sm:$0xf] %v472_v60  ;;  %v476_v62 = vld [vmem:[%s11193_s9 + $0x330] sm:$0xf]  ;;  %v478_v63 = vld [vmem:[%s11193_s9 + $0x314] sm:$0xf] }
  0x97   :  { %475 = vst [vmem:[#allocation5 + $0x320] sm:$0xf] %v474_v61  ;;  %477 = vst [vmem:[#allocation5 + $0x324] sm:$0xf] %v476_v62  ;;  %v480_v0 = vld [vmem:[%s11193_s9 + $0x334] sm:$0xf] }
  0x98   :  { %479 = vst [vmem:[#allocation5 + $0x328] sm:$0xf] %v478_v63  ;;  %v482_v1 = vld [vmem:[%s11193_s9 + $0x318] sm:$0xf]  ;;  %481 = vst [vmem:[#allocation5 + $0x32c] sm:$0xf] %v480_v0 }
  0x99   :  { %v484_v2 = vld [vmem:[%s11193_s9 + $0x338] sm:$0xf]  ;;  %483 = vst [vmem:[#allocation5 + $0x330] sm:$0xf] %v482_v1  ;;  %v486_v3 = vld [vmem:[%s11193_s9 + $0x31c] sm:$0xf] }
  0x9a   :  { %485 = vst [vmem:[#allocation5 + $0x334] sm:$0xf] %v484_v2  ;;  %v492_v5 = vld [vmem:[%s11193_s9 + $0x360] sm:$0xf]  ;;  %487 = vst [vmem:[#allocation5 + $0x338] sm:$0xf] %v486_v3 }
  0x9b   :  { %489 = vst [vmem:[#allocation5 + $0x33c] sm:$0xff] %v488_v4   ;;  %493 = vst [vmem:[#allocation5 + $0x344] sm:$0xf] %v492_v5  ;;  %v494_v6 = vld [vmem:[%s11193_s9 + $0x344] sm:$0xf]  ;;  %v520_v19 = vld [vmem:[%s11193_s9 + $0x37c] sm:$0xff]  }
  0x9c   :  { %v496_v7 = vld [vmem:[%s11193_s9 + $0x364] sm:$0xf]  ;;  %v498_v8 = vld [vmem:[%s11193_s9 + $0x348] sm:$0xf]  ;;  %495 = vst [vmem:[#allocation5 + $0x348] sm:$0xf] %v494_v6 }
  0x9d   :  { %497 = vst [vmem:[#allocation5 + $0x34c] sm:$0xf] %v496_v7  ;;  %499 = vst [vmem:[#allocation5 + $0x350] sm:$0xf] %v498_v8  ;;  %v500_v9 = vld [vmem:[%s11193_s9 + $0x368] sm:$0xf] }
  0x9e   :  { %v502_v10 = vld [vmem:[%s11193_s9 + $0x34c] sm:$0xf]  ;;  %501 = vst [vmem:[#allocation5 + $0x354] sm:$0xf] %v500_v9  ;;  %v506_v12 = vld [vmem:[%s11193_s9 + $0x350] sm:$0xf] }
  0x9f   :  { %v504_v11 = vld [vmem:[%s11193_s9 + $0x36c] sm:$0xf]  ;;  %503 = vst [vmem:[#allocation5 + $0x358] sm:$0xf] %v502_v10  ;;  %v508_v13 = vld [vmem:[%s11193_s9 + $0x370] sm:$0xf] }
  0xa0   :  { %505 = vst [vmem:[#allocation5 + $0x35c] sm:$0xf] %v504_v11  ;;  %v510_v14 = vld [vmem:[%s11193_s9 + $0x354] sm:$0xf]  ;;  %507 = vst [vmem:[#allocation5 + $0x360] sm:$0xf] %v506_v12 }
  0xa1   :  { %509 = vst [vmem:[#allocation5 + $0x364] sm:$0xf] %v508_v13  ;;  %511 = vst [vmem:[#allocation5 + $0x368] sm:$0xf] %v510_v14  ;;  %v512_v15 = vld [vmem:[%s11193_s9 + $0x374] sm:$0xf] }
  0xa2   :  { %v514_v16 = vld [vmem:[%s11193_s9 + $0x358] sm:$0xf]  ;;  %513 = vst [vmem:[#allocation5 + $0x36c] sm:$0xf] %v512_v15  ;;  %v518_v18 = vld [vmem:[%s11193_s9 + $0x35c] sm:$0xf] }
  0xa3   :  { %v516_v17 = vld [vmem:[%s11193_s9 + $0x378] sm:$0xf]  ;;  %515 = vst [vmem:[#allocation5 + $0x370] sm:$0xf] %v514_v16  ;;  %v524_v20 = vld [vmem:[%s11193_s9 + $0x3a0] sm:$0xf] }
  0xa4   :  { %517 = vst [vmem:[#allocation5 + $0x374] sm:$0xf] %v516_v17  ;;  %519 = vst [vmem:[#allocation5 + $0x378] sm:$0xf] %v518_v18  ;;  %v526_v21 = vld [vmem:[%s11193_s9 + $0x384] sm:$0xf] }
  0xa5   :  { %521 = vst [vmem:[#allocation5 + $0x37c] sm:$0xff] %v520_v19   ;;  %525 = vst [vmem:[#allocation5 + $0x384] sm:$0xf] %v524_v20  ;;  %v528_v22 = vld [vmem:[%s11193_s9 + $0x3a4] sm:$0xf]  ;;  %v552_v34 = vld [vmem:[%s11193_s9 + $0x3bc] sm:$0xff]  }
  0xa6   :  { %v530_v23 = vld [vmem:[%s11193_s9 + $0x388] sm:$0xf]  ;;  %527 = vst [vmem:[#allocation5 + $0x388] sm:$0xf] %v526_v21  ;;  %529 = vst [vmem:[#allocation5 + $0x38c] sm:$0xf] %v528_v22 }
  0xa7   :  { %531 = vst [vmem:[#allocation5 + $0x390] sm:$0xf] %v530_v23  ;;  %v532_v24 = vld [vmem:[%s11193_s9 + $0x3a8] sm:$0xf]  ;;  %v534_v25 = vld [vmem:[%s11193_s9 + $0x38c] sm:$0xf] }
  0xa8   :  { %v536_v26 = vld [vmem:[%s11193_s9 + $0x3ac] sm:$0xf]  ;;  %533 = vst [vmem:[#allocation5 + $0x394] sm:$0xf] %v532_v24  ;;  %535 = vst [vmem:[#allocation5 + $0x398] sm:$0xf] %v534_v25 }
  0xa9   :  { %537 = vst [vmem:[#allocation5 + $0x39c] sm:$0xf] %v536_v26  ;;  %v538_v27 = vld [vmem:[%s11193_s9 + $0x390] sm:$0xf]  ;;  %v542_v29 = vld [vmem:[%s11193_s9 + $0x394] sm:$0xf] }
  0xaa   :  { %v540_v28 = vld [vmem:[%s11193_s9 + $0x3b0] sm:$0xf]  ;;  %539 = vst [vmem:[#allocation5 + $0x3a0] sm:$0xf] %v538_v27  ;;  %543 = vst [vmem:[#allocation5 + $0x3a8] sm:$0xf] %v542_v29 }
  0xab   :  { %541 = vst [vmem:[#allocation5 + $0x3a4] sm:$0xf] %v540_v28  ;;  %v544_v30 = vld [vmem:[%s11193_s9 + $0x3b4] sm:$0xf]  ;;  %v546_v31 = vld [vmem:[%s11193_s9 + $0x398] sm:$0xf] }
  0xac   :  { %v548_v32 = vld [vmem:[%s11193_s9 + $0x3b8] sm:$0xf]  ;;  %545 = vst [vmem:[#allocation5 + $0x3ac] sm:$0xf] %v544_v30  ;;  %547 = vst [vmem:[#allocation5 + $0x3b0] sm:$0xf] %v546_v31 }
  0xad   :  { %549 = vst [vmem:[#allocation5 + $0x3b4] sm:$0xf] %v548_v32  ;;  %v550_v33 = vld [vmem:[%s11193_s9 + $0x39c] sm:$0xf]  ;;  %v556_v35 = vld [vmem:[%s11193_s9 + $0x3e0] sm:$0xf] }
  0xae   :  { %551 = vst [vmem:[#allocation5 + $0x3b8] sm:$0xf] %v550_v33  ;;  %553 = vst [vmem:[#allocation5 + $0x3bc] sm:$0xff] %v552_v34   ;;  %v558_v36 = vld [vmem:[%s11193_s9 + $0x3c4] sm:$0xf]  ;;  %v584_v49 = vld [vmem:[%s11193_s9 + $0x3fc] sm:$0xff]  }
  0xaf   :  { %557 = vst [vmem:[#allocation5 + $0x3c4] sm:$0xf] %v556_v35  ;;  %v560_v37 = vld [vmem:[%s11193_s9 + $0x3e4] sm:$0xf]  ;;  %v562_v38 = vld [vmem:[%s11193_s9 + $0x3c8] sm:$0xf] }
  0xb0   :  { %559 = vst [vmem:[#allocation5 + $0x3c8] sm:$0xf] %v558_v36  ;;  %561 = vst [vmem:[#allocation5 + $0x3cc] sm:$0xf] %v560_v37  ;;  %v564_v39 = vld [vmem:[%s11193_s9 + $0x3e8] sm:$0xf] }
  0xb1   :  { %563 = vst [vmem:[#allocation5 + $0x3d0] sm:$0xf] %v562_v38  ;;  %v566_v40 = vld [vmem:[%s11193_s9 + $0x3cc] sm:$0xf]  ;;  %565 = vst [vmem:[#allocation5 + $0x3d4] sm:$0xf] %v564_v39 }
  0xb2   :  { %v568_v41 = vld [vmem:[%s11193_s9 + $0x3ec] sm:$0xf]  ;;  %567 = vst [vmem:[#allocation5 + $0x3d8] sm:$0xf] %v566_v40  ;;  %v570_v42 = vld [vmem:[%s11193_s9 + $0x3d0] sm:$0xf] }
  0xb3   :  { %569 = vst [vmem:[#allocation5 + $0x3dc] sm:$0xf] %v568_v41  ;;  %v572_v43 = vld [vmem:[%s11193_s9 + $0x3f0] sm:$0xf]  ;;  %v574_v44 = vld [vmem:[%s11193_s9 + $0x3d4] sm:$0xf] }
  0xb4   :  { %571 = vst [vmem:[#allocation5 + $0x3e0] sm:$0xf] %v570_v42  ;;  %573 = vst [vmem:[#allocation5 + $0x3e4] sm:$0xf] %v572_v43  ;;  %v576_v45 = vld [vmem:[%s11193_s9 + $0x3f4] sm:$0xf] }
  0xb5   :  { %575 = vst [vmem:[#allocation5 + $0x3e8] sm:$0xf] %v574_v44  ;;  %v578_v46 = vld [vmem:[%s11193_s9 + $0x3d8] sm:$0xf]  ;;  %577 = vst [vmem:[#allocation5 + $0x3ec] sm:$0xf] %v576_v45 }
  0xb6   :  { %v580_v47 = vld [vmem:[%s11193_s9 + $0x3f8] sm:$0xf]  ;;  %579 = vst [vmem:[#allocation5 + $0x3f0] sm:$0xf] %v578_v46  ;;  %v582_v48 = vld [vmem:[%s11193_s9 + $0x3dc] sm:$0xf] }
  0xb7   :  { %581 = vst [vmem:[#allocation5 + $0x3f4] sm:$0xf] %v580_v47  ;;  %v588_v50 = vld [vmem:[%s11193_s9 + $0x420] sm:$0xf]  ;;  %583 = vst [vmem:[#allocation5 + $0x3f8] sm:$0xf] %v582_v48 }
  0xb8   :  { %585 = vst [vmem:[#allocation5 + $0x3fc] sm:$0xff] %v584_v49   ;;  %589 = vst [vmem:[#allocation5 + $0x404] sm:$0xf] %v588_v50  ;;  %v590_v51 = vld [vmem:[%s11193_s9 + $0x404] sm:$0xf]  ;;  %v616_v0 = vld [vmem:[%s11193_s9 + $0x43c] sm:$0xff]  }
  0xb9   :  { %v592_v52 = vld [vmem:[%s11193_s9 + $0x424] sm:$0xf]  ;;  %v594_v53 = vld [vmem:[%s11193_s9 + $0x408] sm:$0xf]  ;;  %591 = vst [vmem:[#allocation5 + $0x408] sm:$0xf] %v590_v51 }
  0xba   :  { %593 = vst [vmem:[#allocation5 + $0x40c] sm:$0xf] %v592_v52  ;;  %595 = vst [vmem:[#allocation5 + $0x410] sm:$0xf] %v594_v53  ;;  %v596_v54 = vld [vmem:[%s11193_s9 + $0x428] sm:$0xf] }
  0xbb   :  { %v598_v55 = vld [vmem:[%s11193_s9 + $0x40c] sm:$0xf]  ;;  %597 = vst [vmem:[#allocation5 + $0x414] sm:$0xf] %v596_v54  ;;  %v602_v57 = vld [vmem:[%s11193_s9 + $0x410] sm:$0xf] }
  0xbc   :  { %v600_v56 = vld [vmem:[%s11193_s9 + $0x42c] sm:$0xf]  ;;  %599 = vst [vmem:[#allocation5 + $0x418] sm:$0xf] %v598_v55  ;;  %v604_v58 = vld [vmem:[%s11193_s9 + $0x430] sm:$0xf] }
  0xbd   :  { %601 = vst [vmem:[#allocation5 + $0x41c] sm:$0xf] %v600_v56  ;;  %v606_v59 = vld [vmem:[%s11193_s9 + $0x414] sm:$0xf]  ;;  %603 = vst [vmem:[#allocation5 + $0x420] sm:$0xf] %v602_v57 }
  0xbe   :  { %605 = vst [vmem:[#allocation5 + $0x424] sm:$0xf] %v604_v58  ;;  %607 = vst [vmem:[#allocation5 + $0x428] sm:$0xf] %v606_v59  ;;  %v608_v60 = vld [vmem:[%s11193_s9 + $0x434] sm:$0xf] }
  0xbf   :  { %v610_v61 = vld [vmem:[%s11193_s9 + $0x418] sm:$0xf]  ;;  %609 = vst [vmem:[#allocation5 + $0x42c] sm:$0xf] %v608_v60  ;;  %v614_v63 = vld [vmem:[%s11193_s9 + $0x41c] sm:$0xf] }
  0xc0   :  { %v612_v62 = vld [vmem:[%s11193_s9 + $0x438] sm:$0xf]  ;;  %611 = vst [vmem:[#allocation5 + $0x430] sm:$0xf] %v610_v61  ;;  %v620_v1 = vld [vmem:[%s11193_s9 + $0x460] sm:$0xf] }
  0xc1   :  { %613 = vst [vmem:[#allocation5 + $0x434] sm:$0xf] %v612_v62  ;;  %615 = vst [vmem:[#allocation5 + $0x438] sm:$0xf] %v614_v63  ;;  %v622_v2 = vld [vmem:[%s11193_s9 + $0x444] sm:$0xf] }
  0xc2   :  { %617 = vst [vmem:[#allocation5 + $0x43c] sm:$0xff] %v616_v0   ;;  %621 = vst [vmem:[#allocation5 + $0x444] sm:$0xf] %v620_v1  ;;  %v624_v3 = vld [vmem:[%s11193_s9 + $0x464] sm:$0xf]  ;;  %v648_v15 = vld [vmem:[%s11193_s9 + $0x47c] sm:$0xff]  }
  0xc3   :  { %v626_v4 = vld [vmem:[%s11193_s9 + $0x448] sm:$0xf]  ;;  %623 = vst [vmem:[#allocation5 + $0x448] sm:$0xf] %v622_v2  ;;  %625 = vst [vmem:[#allocation5 + $0x44c] sm:$0xf] %v624_v3 }
  0xc4   :  { %627 = vst [vmem:[#allocation5 + $0x450] sm:$0xf] %v626_v4  ;;  %v628_v5 = vld [vmem:[%s11193_s9 + $0x468] sm:$0xf]  ;;  %v630_v6 = vld [vmem:[%s11193_s9 + $0x44c] sm:$0xf] }
  0xc5   :  { %v632_v7 = vld [vmem:[%s11193_s9 + $0x46c] sm:$0xf]  ;;  %629 = vst [vmem:[#allocation5 + $0x454] sm:$0xf] %v628_v5  ;;  %631 = vst [vmem:[#allocation5 + $0x458] sm:$0xf] %v630_v6 }
  0xc6   :  { %633 = vst [vmem:[#allocation5 + $0x45c] sm:$0xf] %v632_v7  ;;  %v634_v8 = vld [vmem:[%s11193_s9 + $0x450] sm:$0xf]  ;;  %v638_v10 = vld [vmem:[%s11193_s9 + $0x454] sm:$0xf] }
  0xc7   :  { %v636_v9 = vld [vmem:[%s11193_s9 + $0x470] sm:$0xf]  ;;  %635 = vst [vmem:[#allocation5 + $0x460] sm:$0xf] %v634_v8  ;;  %639 = vst [vmem:[#allocation5 + $0x468] sm:$0xf] %v638_v10 }
  0xc8   :  { %637 = vst [vmem:[#allocation5 + $0x464] sm:$0xf] %v636_v9  ;;  %v640_v11 = vld [vmem:[%s11193_s9 + $0x474] sm:$0xf]  ;;  %v642_v12 = vld [vmem:[%s11193_s9 + $0x458] sm:$0xf] }
  0xc9   :  { %v644_v13 = vld [vmem:[%s11193_s9 + $0x478] sm:$0xf]  ;;  %641 = vst [vmem:[#allocation5 + $0x46c] sm:$0xf] %v640_v11  ;;  %643 = vst [vmem:[#allocation5 + $0x470] sm:$0xf] %v642_v12 }
  0xca   :  { %645 = vst [vmem:[#allocation5 + $0x474] sm:$0xf] %v644_v13  ;;  %v646_v14 = vld [vmem:[%s11193_s9 + $0x45c] sm:$0xf]  ;;  %v652_v16 = vld [vmem:[%s11193_s9 + $0x4a0] sm:$0xf] }
  0xcb   :  { %647 = vst [vmem:[#allocation5 + $0x478] sm:$0xf] %v646_v14  ;;  %649 = vst [vmem:[#allocation5 + $0x47c] sm:$0xff] %v648_v15   ;;  %v654_v17 = vld [vmem:[%s11193_s9 + $0x484] sm:$0xf]  ;;  %v680_v30 = vld [vmem:[%s11193_s9 + $0x4bc] sm:$0xff]  }
  0xcc   :  { %653 = vst [vmem:[#allocation5 + $0x484] sm:$0xf] %v652_v16  ;;  %v656_v18 = vld [vmem:[%s11193_s9 + $0x4a4] sm:$0xf]  ;;  %v658_v19 = vld [vmem:[%s11193_s9 + $0x488] sm:$0xf] }
  0xcd   :  { %655 = vst [vmem:[#allocation5 + $0x488] sm:$0xf] %v654_v17  ;;  %657 = vst [vmem:[#allocation5 + $0x48c] sm:$0xf] %v656_v18  ;;  %v660_v20 = vld [vmem:[%s11193_s9 + $0x4a8] sm:$0xf] }
  0xce   :  { %659 = vst [vmem:[#allocation5 + $0x490] sm:$0xf] %v658_v19  ;;  %v662_v21 = vld [vmem:[%s11193_s9 + $0x48c] sm:$0xf]  ;;  %661 = vst [vmem:[#allocation5 + $0x494] sm:$0xf] %v660_v20 }
  0xcf   :  { %v664_v22 = vld [vmem:[%s11193_s9 + $0x4ac] sm:$0xf]  ;;  %663 = vst [vmem:[#allocation5 + $0x498] sm:$0xf] %v662_v21  ;;  %v666_v23 = vld [vmem:[%s11193_s9 + $0x490] sm:$0xf] }
  0xd0   :  { %665 = vst [vmem:[#allocation5 + $0x49c] sm:$0xf] %v664_v22  ;;  %v668_v24 = vld [vmem:[%s11193_s9 + $0x4b0] sm:$0xf]  ;;  %v670_v25 = vld [vmem:[%s11193_s9 + $0x494] sm:$0xf] }
  0xd1   :  { %667 = vst [vmem:[#allocation5 + $0x4a0] sm:$0xf] %v666_v23  ;;  %669 = vst [vmem:[#allocation5 + $0x4a4] sm:$0xf] %v668_v24  ;;  %v672_v26 = vld [vmem:[%s11193_s9 + $0x4b4] sm:$0xf] }
  0xd2   :  { %671 = vst [vmem:[#allocation5 + $0x4a8] sm:$0xf] %v670_v25  ;;  %v674_v27 = vld [vmem:[%s11193_s9 + $0x498] sm:$0xf]  ;;  %673 = vst [vmem:[#allocation5 + $0x4ac] sm:$0xf] %v672_v26 }
  0xd3   :  { %v676_v28 = vld [vmem:[%s11193_s9 + $0x4b8] sm:$0xf]  ;;  %675 = vst [vmem:[#allocation5 + $0x4b0] sm:$0xf] %v674_v27  ;;  %v678_v29 = vld [vmem:[%s11193_s9 + $0x49c] sm:$0xf] }
  0xd4   :  { %677 = vst [vmem:[#allocation5 + $0x4b4] sm:$0xf] %v676_v28  ;;  %v684_v31 = vld [vmem:[%s11193_s9 + $0x4e0] sm:$0xf]  ;;  %679 = vst [vmem:[#allocation5 + $0x4b8] sm:$0xf] %v678_v29 }
  0xd5   :  { %681 = vst [vmem:[#allocation5 + $0x4bc] sm:$0xff] %v680_v30   ;;  %685 = vst [vmem:[#allocation5 + $0x4c4] sm:$0xf] %v684_v31  ;;  %v686_v32 = vld [vmem:[%s11193_s9 + $0x4c4] sm:$0xf]  ;;  %v712_v45 = vld [vmem:[%s11193_s9 + $0x4fc] sm:$0xff]  }
  0xd6   :  { %v688_v33 = vld [vmem:[%s11193_s9 + $0x4e4] sm:$0xf]  ;;  %v690_v34 = vld [vmem:[%s11193_s9 + $0x4c8] sm:$0xf]  ;;  %687 = vst [vmem:[#allocation5 + $0x4c8] sm:$0xf] %v686_v32 }
  0xd7   :  { %689 = vst [vmem:[#allocation5 + $0x4cc] sm:$0xf] %v688_v33  ;;  %691 = vst [vmem:[#allocation5 + $0x4d0] sm:$0xf] %v690_v34  ;;  %v692_v35 = vld [vmem:[%s11193_s9 + $0x4e8] sm:$0xf] }
  0xd8   :  { %v694_v36 = vld [vmem:[%s11193_s9 + $0x4cc] sm:$0xf]  ;;  %693 = vst [vmem:[#allocation5 + $0x4d4] sm:$0xf] %v692_v35  ;;  %v698_v38 = vld [vmem:[%s11193_s9 + $0x4d0] sm:$0xf] }
  0xd9   :  { %v696_v37 = vld [vmem:[%s11193_s9 + $0x4ec] sm:$0xf]  ;;  %695 = vst [vmem:[#allocation5 + $0x4d8] sm:$0xf] %v694_v36  ;;  %v700_v39 = vld [vmem:[%s11193_s9 + $0x4f0] sm:$0xf] }
  0xda   :  { %697 = vst [vmem:[#allocation5 + $0x4dc] sm:$0xf] %v696_v37  ;;  %v702_v40 = vld [vmem:[%s11193_s9 + $0x4d4] sm:$0xf]  ;;  %699 = vst [vmem:[#allocation5 + $0x4e0] sm:$0xf] %v698_v38 }
  0xdb   :  { %701 = vst [vmem:[#allocation5 + $0x4e4] sm:$0xf] %v700_v39  ;;  %703 = vst [vmem:[#allocation5 + $0x4e8] sm:$0xf] %v702_v40  ;;  %v704_v41 = vld [vmem:[%s11193_s9 + $0x4f4] sm:$0xf] }
  0xdc   :  { %v706_v42 = vld [vmem:[%s11193_s9 + $0x4d8] sm:$0xf]  ;;  %705 = vst [vmem:[#allocation5 + $0x4ec] sm:$0xf] %v704_v41  ;;  %v710_v44 = vld [vmem:[%s11193_s9 + $0x4dc] sm:$0xf] }
  0xdd   :  { %v708_v43 = vld [vmem:[%s11193_s9 + $0x4f8] sm:$0xf]  ;;  %707 = vst [vmem:[#allocation5 + $0x4f0] sm:$0xf] %v706_v42  ;;  %v716_v46 = vld [vmem:[%s11193_s9 + $0x520] sm:$0xf] }
  0xde   :  { %709 = vst [vmem:[#allocation5 + $0x4f4] sm:$0xf] %v708_v43  ;;  %711 = vst [vmem:[#allocation5 + $0x4f8] sm:$0xf] %v710_v44  ;;  %v718_v47 = vld [vmem:[%s11193_s9 + $0x504] sm:$0xf] }
  0xdf   :  { %713 = vst [vmem:[#allocation5 + $0x4fc] sm:$0xff] %v712_v45   ;;  %717 = vst [vmem:[#allocation5 + $0x504] sm:$0xf] %v716_v46  ;;  %v720_v48 = vld [vmem:[%s11193_s9 + $0x524] sm:$0xf]  ;;  %v744_v60 = vld [vmem:[%s11193_s9 + $0x53c] sm:$0xff]  }
  0xe0   :  { %v722_v49 = vld [vmem:[%s11193_s9 + $0x508] sm:$0xf]  ;;  %719 = vst [vmem:[#allocation5 + $0x508] sm:$0xf] %v718_v47  ;;  %721 = vst [vmem:[#allocation5 + $0x50c] sm:$0xf] %v720_v48 }
  0xe1   :  { %723 = vst [vmem:[#allocation5 + $0x510] sm:$0xf] %v722_v49  ;;  %v724_v50 = vld [vmem:[%s11193_s9 + $0x528] sm:$0xf]  ;;  %v726_v51 = vld [vmem:[%s11193_s9 + $0x50c] sm:$0xf] }
  0xe2   :  { %v728_v52 = vld [vmem:[%s11193_s9 + $0x52c] sm:$0xf]  ;;  %725 = vst [vmem:[#allocation5 + $0x514] sm:$0xf] %v724_v50  ;;  %727 = vst [vmem:[#allocation5 + $0x518] sm:$0xf] %v726_v51 }
  0xe3   :  { %729 = vst [vmem:[#allocation5 + $0x51c] sm:$0xf] %v728_v52  ;;  %v730_v53 = vld [vmem:[%s11193_s9 + $0x510] sm:$0xf]  ;;  %v734_v55 = vld [vmem:[%s11193_s9 + $0x514] sm:$0xf] }
  0xe4   :  { %v732_v54 = vld [vmem:[%s11193_s9 + $0x530] sm:$0xf]  ;;  %731 = vst [vmem:[#allocation5 + $0x520] sm:$0xf] %v730_v53  ;;  %735 = vst [vmem:[#allocation5 + $0x528] sm:$0xf] %v734_v55 }
  0xe5   :  { %733 = vst [vmem:[#allocation5 + $0x524] sm:$0xf] %v732_v54  ;;  %v736_v56 = vld [vmem:[%s11193_s9 + $0x534] sm:$0xf]  ;;  %v738_v57 = vld [vmem:[%s11193_s9 + $0x518] sm:$0xf] }
  0xe6   :  { %v740_v58 = vld [vmem:[%s11193_s9 + $0x538] sm:$0xf]  ;;  %737 = vst [vmem:[#allocation5 + $0x52c] sm:$0xf] %v736_v56  ;;  %739 = vst [vmem:[#allocation5 + $0x530] sm:$0xf] %v738_v57 }
  0xe7   :  { %741 = vst [vmem:[#allocation5 + $0x534] sm:$0xf] %v740_v58  ;;  %v742_v59 = vld [vmem:[%s11193_s9 + $0x51c] sm:$0xf]  ;;  %v748_v61 = vld [vmem:[%s11193_s9 + $0x560] sm:$0xf] }
  0xe8   :  { %743 = vst [vmem:[#allocation5 + $0x538] sm:$0xf] %v742_v59  ;;  %745 = vst [vmem:[#allocation5 + $0x53c] sm:$0xff] %v744_v60   ;;  %v750_v62 = vld [vmem:[%s11193_s9 + $0x544] sm:$0xf]  ;;  %v776_v11 = vld [vmem:[%s11193_s9 + $0x57c] sm:$0xff]  }
  0xe9   :  { %749 = vst [vmem:[#allocation5 + $0x544] sm:$0xf] %v748_v61  ;;  %v752_v63 = vld [vmem:[%s11193_s9 + $0x564] sm:$0xf]  ;;  %v754_v0 = vld [vmem:[%s11193_s9 + $0x548] sm:$0xf] }
  0xea   :  { %751 = vst [vmem:[#allocation5 + $0x548] sm:$0xf] %v750_v62  ;;  %753 = vst [vmem:[#allocation5 + $0x54c] sm:$0xf] %v752_v63  ;;  %v756_v1 = vld [vmem:[%s11193_s9 + $0x568] sm:$0xf] }
  0xeb   :  { %755 = vst [vmem:[#allocation5 + $0x550] sm:$0xf] %v754_v0  ;;  %v758_v2 = vld [vmem:[%s11193_s9 + $0x54c] sm:$0xf]  ;;  %757 = vst [vmem:[#allocation5 + $0x554] sm:$0xf] %v756_v1 }
  0xec   :  { %v760_v3 = vld [vmem:[%s11193_s9 + $0x56c] sm:$0xf]  ;;  %759 = vst [vmem:[#allocation5 + $0x558] sm:$0xf] %v758_v2  ;;  %v762_v4 = vld [vmem:[%s11193_s9 + $0x550] sm:$0xf] }
  0xed   :  { %761 = vst [vmem:[#allocation5 + $0x55c] sm:$0xf] %v760_v3  ;;  %v764_v5 = vld [vmem:[%s11193_s9 + $0x570] sm:$0xf]  ;;  %v766_v6 = vld [vmem:[%s11193_s9 + $0x554] sm:$0xf] }
  0xee   :  { %763 = vst [vmem:[#allocation5 + $0x560] sm:$0xf] %v762_v4  ;;  %765 = vst [vmem:[#allocation5 + $0x564] sm:$0xf] %v764_v5  ;;  %v768_v7 = vld [vmem:[%s11193_s9 + $0x574] sm:$0xf] }
  0xef   :  { %767 = vst [vmem:[#allocation5 + $0x568] sm:$0xf] %v766_v6  ;;  %v770_v8 = vld [vmem:[%s11193_s9 + $0x558] sm:$0xf]  ;;  %769 = vst [vmem:[#allocation5 + $0x56c] sm:$0xf] %v768_v7 }
  0xf0   :  { %v772_v9 = vld [vmem:[%s11193_s9 + $0x578] sm:$0xf]  ;;  %771 = vst [vmem:[#allocation5 + $0x570] sm:$0xf] %v770_v8  ;;  %v774_v10 = vld [vmem:[%s11193_s9 + $0x55c] sm:$0xf] }
  0xf1   :  { %773 = vst [vmem:[#allocation5 + $0x574] sm:$0xf] %v772_v9  ;;  %v780_v12 = vld [vmem:[%s11193_s9 + $0x5a0] sm:$0xf]  ;;  %775 = vst [vmem:[#allocation5 + $0x578] sm:$0xf] %v774_v10 }
  0xf2   :  { %777 = vst [vmem:[#allocation5 + $0x57c] sm:$0xff] %v776_v11   ;;  %781 = vst [vmem:[#allocation5 + $0x584] sm:$0xf] %v780_v12  ;;  %v782_v13 = vld [vmem:[%s11193_s9 + $0x584] sm:$0xf]  ;;  %v808_v26 = vld [vmem:[%s11193_s9 + $0x5bc] sm:$0xff]  }
  0xf3   :  { %v784_v14 = vld [vmem:[%s11193_s9 + $0x5a4] sm:$0xf]  ;;  %v786_v15 = vld [vmem:[%s11193_s9 + $0x588] sm:$0xf]  ;;  %783 = vst [vmem:[#allocation5 + $0x588] sm:$0xf] %v782_v13 }
  0xf4   :  { %785 = vst [vmem:[#allocation5 + $0x58c] sm:$0xf] %v784_v14  ;;  %787 = vst [vmem:[#allocation5 + $0x590] sm:$0xf] %v786_v15  ;;  %v788_v16 = vld [vmem:[%s11193_s9 + $0x5a8] sm:$0xf] }
  0xf5   :  { %v790_v17 = vld [vmem:[%s11193_s9 + $0x58c] sm:$0xf]  ;;  %789 = vst [vmem:[#allocation5 + $0x594] sm:$0xf] %v788_v16  ;;  %v794_v19 = vld [vmem:[%s11193_s9 + $0x590] sm:$0xf] }
  0xf6   :  { %v792_v18 = vld [vmem:[%s11193_s9 + $0x5ac] sm:$0xf]  ;;  %791 = vst [vmem:[#allocation5 + $0x598] sm:$0xf] %v790_v17  ;;  %v796_v20 = vld [vmem:[%s11193_s9 + $0x5b0] sm:$0xf] }
  0xf7   :  { %793 = vst [vmem:[#allocation5 + $0x59c] sm:$0xf] %v792_v18  ;;  %v798_v21 = vld [vmem:[%s11193_s9 + $0x594] sm:$0xf]  ;;  %795 = vst [vmem:[#allocation5 + $0x5a0] sm:$0xf] %v794_v19 }
  0xf8   :  { %797 = vst [vmem:[#allocation5 + $0x5a4] sm:$0xf] %v796_v20  ;;  %799 = vst [vmem:[#allocation5 + $0x5a8] sm:$0xf] %v798_v21  ;;  %v800_v22 = vld [vmem:[%s11193_s9 + $0x5b4] sm:$0xf] }
  0xf9   :  { %v802_v23 = vld [vmem:[%s11193_s9 + $0x598] sm:$0xf]  ;;  %801 = vst [vmem:[#allocation5 + $0x5ac] sm:$0xf] %v800_v22  ;;  %v806_v25 = vld [vmem:[%s11193_s9 + $0x59c] sm:$0xf] }
  0xfa   :  { %v804_v24 = vld [vmem:[%s11193_s9 + $0x5b8] sm:$0xf]  ;;  %803 = vst [vmem:[#allocation5 + $0x5b0] sm:$0xf] %v802_v23  ;;  %v812_v27 = vld [vmem:[%s11193_s9 + $0x5e0] sm:$0xf] }
  0xfb   :  { %805 = vst [vmem:[#allocation5 + $0x5b4] sm:$0xf] %v804_v24  ;;  %807 = vst [vmem:[#allocation5 + $0x5b8] sm:$0xf] %v806_v25  ;;  %v814_v28 = vld [vmem:[%s11193_s9 + $0x5c4] sm:$0xf] }
  0xfc   :  { %809 = vst [vmem:[#allocation5 + $0x5bc] sm:$0xff] %v808_v26   ;;  %813 = vst [vmem:[#allocation5 + $0x5c4] sm:$0xf] %v812_v27  ;;  %v816_v29 = vld [vmem:[%s11193_s9 + $0x5e4] sm:$0xf]  ;;  %v840_v41 = vld [vmem:[%s11193_s9 + $0x5fc] sm:$0xff]  }
  0xfd   :  { %v818_v30 = vld [vmem:[%s11193_s9 + $0x5c8] sm:$0xf]  ;;  %815 = vst [vmem:[#allocation5 + $0x5c8] sm:$0xf] %v814_v28  ;;  %817 = vst [vmem:[#allocation5 + $0x5cc] sm:$0xf] %v816_v29 }
  0xfe   :  { %819 = vst [vmem:[#allocation5 + $0x5d0] sm:$0xf] %v818_v30  ;;  %v820_v31 = vld [vmem:[%s11193_s9 + $0x5e8] sm:$0xf]  ;;  %v822_v32 = vld [vmem:[%s11193_s9 + $0x5cc] sm:$0xf] }
  0xff   :  { %v824_v33 = vld [vmem:[%s11193_s9 + $0x5ec] sm:$0xf]  ;;  %821 = vst [vmem:[#allocation5 + $0x5d4] sm:$0xf] %v820_v31  ;;  %823 = vst [vmem:[#allocation5 + $0x5d8] sm:$0xf] %v822_v32 }
 0x100   :  { %825 = vst [vmem:[#allocation5 + $0x5dc] sm:$0xf] %v824_v33  ;;  %v826_v34 = vld [vmem:[%s11193_s9 + $0x5d0] sm:$0xf]  ;;  %v830_v36 = vld [vmem:[%s11193_s9 + $0x5d4] sm:$0xf] }
 0x101   :  { %v828_v35 = vld [vmem:[%s11193_s9 + $0x5f0] sm:$0xf]  ;;  %827 = vst [vmem:[#allocation5 + $0x5e0] sm:$0xf] %v826_v34  ;;  %831 = vst [vmem:[#allocation5 + $0x5e8] sm:$0xf] %v830_v36 }
 0x102   :  { %829 = vst [vmem:[#allocation5 + $0x5e4] sm:$0xf] %v828_v35  ;;  %v832_v37 = vld [vmem:[%s11193_s9 + $0x5f4] sm:$0xf]  ;;  %v834_v38 = vld [vmem:[%s11193_s9 + $0x5d8] sm:$0xf] }
 0x103   :  { %v836_v39 = vld [vmem:[%s11193_s9 + $0x5f8] sm:$0xf]  ;;  %833 = vst [vmem:[#allocation5 + $0x5ec] sm:$0xf] %v832_v37  ;;  %835 = vst [vmem:[#allocation5 + $0x5f0] sm:$0xf] %v834_v38 }
 0x104   :  { %837 = vst [vmem:[#allocation5 + $0x5f4] sm:$0xf] %v836_v39  ;;  %v838_v40 = vld [vmem:[%s11193_s9 + $0x5dc] sm:$0xf]  ;;  %v844_v42 = vld [vmem:[%s11193_s9 + $0x620] sm:$0xf] }
 0x105   :  { %839 = vst [vmem:[#allocation5 + $0x5f8] sm:$0xf] %v838_v40  ;;  %841 = vst [vmem:[#allocation5 + $0x5fc] sm:$0xff] %v840_v41   ;;  %v846_v43 = vld [vmem:[%s11193_s9 + $0x604] sm:$0xf]  ;;  %v872_v56 = vld [vmem:[%s11193_s9 + $0x63c] sm:$0xff]  }
 0x106   :  { %845 = vst [vmem:[#allocation5 + $0x604] sm:$0xf] %v844_v42  ;;  %v848_v44 = vld [vmem:[%s11193_s9 + $0x624] sm:$0xf]  ;;  %v850_v45 = vld [vmem:[%s11193_s9 + $0x608] sm:$0xf] }
 0x107   :  { %847 = vst [vmem:[#allocation5 + $0x608] sm:$0xf] %v846_v43  ;;  %849 = vst [vmem:[#allocation5 + $0x60c] sm:$0xf] %v848_v44  ;;  %v852_v46 = vld [vmem:[%s11193_s9 + $0x628] sm:$0xf] }
 0x108   :  { %851 = vst [vmem:[#allocation5 + $0x610] sm:$0xf] %v850_v45  ;;  %v854_v47 = vld [vmem:[%s11193_s9 + $0x60c] sm:$0xf]  ;;  %853 = vst [vmem:[#allocation5 + $0x614] sm:$0xf] %v852_v46 }
 0x109   :  { %v856_v48 = vld [vmem:[%s11193_s9 + $0x62c] sm:$0xf]  ;;  %855 = vst [vmem:[#allocation5 + $0x618] sm:$0xf] %v854_v47  ;;  %v858_v49 = vld [vmem:[%s11193_s9 + $0x610] sm:$0xf] }
 0x10a   :  { %857 = vst [vmem:[#allocation5 + $0x61c] sm:$0xf] %v856_v48  ;;  %v860_v50 = vld [vmem:[%s11193_s9 + $0x630] sm:$0xf]  ;;  %v862_v51 = vld [vmem:[%s11193_s9 + $0x614] sm:$0xf] }
 0x10b   :  { %859 = vst [vmem:[#allocation5 + $0x620] sm:$0xf] %v858_v49  ;;  %861 = vst [vmem:[#allocation5 + $0x624] sm:$0xf] %v860_v50  ;;  %v864_v52 = vld [vmem:[%s11193_s9 + $0x634] sm:$0xf] }
 0x10c   :  { %863 = vst [vmem:[#allocation5 + $0x628] sm:$0xf] %v862_v51  ;;  %v866_v53 = vld [vmem:[%s11193_s9 + $0x618] sm:$0xf]  ;;  %865 = vst [vmem:[#allocation5 + $0x62c] sm:$0xf] %v864_v52 }
 0x10d   :  { %v868_v54 = vld [vmem:[%s11193_s9 + $0x638] sm:$0xf]  ;;  %867 = vst [vmem:[#allocation5 + $0x630] sm:$0xf] %v866_v53  ;;  %v870_v55 = vld [vmem:[%s11193_s9 + $0x61c] sm:$0xf] }
 0x10e   :  { %869 = vst [vmem:[#allocation5 + $0x634] sm:$0xf] %v868_v54  ;;  %v876_v57 = vld [vmem:[%s11193_s9 + $0x660] sm:$0xf]  ;;  %871 = vst [vmem:[#allocation5 + $0x638] sm:$0xf] %v870_v55 }
 0x10f   :  { %873 = vst [vmem:[#allocation5 + $0x63c] sm:$0xff] %v872_v56   ;;  %877 = vst [vmem:[#allocation5 + $0x644] sm:$0xf] %v876_v57  ;;  %v878_v58 = vld [vmem:[%s11193_s9 + $0x644] sm:$0xf]  ;;  %v904_v7 = vld [vmem:[%s11193_s9 + $0x67c] sm:$0xff]  }
 0x110   :  { %v880_v59 = vld [vmem:[%s11193_s9 + $0x664] sm:$0xf]  ;;  %v882_v60 = vld [vmem:[%s11193_s9 + $0x648] sm:$0xf]  ;;  %879 = vst [vmem:[#allocation5 + $0x648] sm:$0xf] %v878_v58 }
 0x111   :  { %881 = vst [vmem:[#allocation5 + $0x64c] sm:$0xf] %v880_v59  ;;  %883 = vst [vmem:[#allocation5 + $0x650] sm:$0xf] %v882_v60  ;;  %v884_v61 = vld [vmem:[%s11193_s9 + $0x668] sm:$0xf] }
 0x112   :  { %v886_v62 = vld [vmem:[%s11193_s9 + $0x64c] sm:$0xf]  ;;  %885 = vst [vmem:[#allocation5 + $0x654] sm:$0xf] %v884_v61  ;;  %v890_v0 = vld [vmem:[%s11193_s9 + $0x650] sm:$0xf] }
 0x113   :  { %v888_v63 = vld [vmem:[%s11193_s9 + $0x66c] sm:$0xf]  ;;  %887 = vst [vmem:[#allocation5 + $0x658] sm:$0xf] %v886_v62  ;;  %v892_v1 = vld [vmem:[%s11193_s9 + $0x670] sm:$0xf] }
 0x114   :  { %889 = vst [vmem:[#allocation5 + $0x65c] sm:$0xf] %v888_v63  ;;  %v894_v2 = vld [vmem:[%s11193_s9 + $0x654] sm:$0xf]  ;;  %891 = vst [vmem:[#allocation5 + $0x660] sm:$0xf] %v890_v0 }
 0x115   :  { %893 = vst [vmem:[#allocation5 + $0x664] sm:$0xf] %v892_v1  ;;  %895 = vst [vmem:[#allocation5 + $0x668] sm:$0xf] %v894_v2  ;;  %v896_v3 = vld [vmem:[%s11193_s9 + $0x674] sm:$0xf] }
 0x116   :  { %v898_v4 = vld [vmem:[%s11193_s9 + $0x658] sm:$0xf]  ;;  %897 = vst [vmem:[#allocation5 + $0x66c] sm:$0xf] %v896_v3  ;;  %v902_v6 = vld [vmem:[%s11193_s9 + $0x65c] sm:$0xf] }
 0x117   :  { %v900_v5 = vld [vmem:[%s11193_s9 + $0x678] sm:$0xf]  ;;  %899 = vst [vmem:[#allocation5 + $0x670] sm:$0xf] %v898_v4  ;;  %v908_v8 = vld [vmem:[%s11193_s9 + $0x6a0] sm:$0xf] }
 0x118   :  { %901 = vst [vmem:[#allocation5 + $0x674] sm:$0xf] %v900_v5  ;;  %903 = vst [vmem:[#allocation5 + $0x678] sm:$0xf] %v902_v6  ;;  %v910_v9 = vld [vmem:[%s11193_s9 + $0x684] sm:$0xf] }
 0x119   :  { %905 = vst [vmem:[#allocation5 + $0x67c] sm:$0xff] %v904_v7   ;;  %909 = vst [vmem:[#allocation5 + $0x684] sm:$0xf] %v908_v8  ;;  %v912_v10 = vld [vmem:[%s11193_s9 + $0x6a4] sm:$0xf]  ;;  %v936_v22 = vld [vmem:[%s11193_s9 + $0x6bc] sm:$0xff]  }
 0x11a   :  { %v914_v11 = vld [vmem:[%s11193_s9 + $0x688] sm:$0xf]  ;;  %911 = vst [vmem:[#allocation5 + $0x688] sm:$0xf] %v910_v9  ;;  %913 = vst [vmem:[#allocation5 + $0x68c] sm:$0xf] %v912_v10 }
 0x11b   :  { %915 = vst [vmem:[#allocation5 + $0x690] sm:$0xf] %v914_v11  ;;  %v916_v12 = vld [vmem:[%s11193_s9 + $0x6a8] sm:$0xf]  ;;  %v918_v13 = vld [vmem:[%s11193_s9 + $0x68c] sm:$0xf] }
 0x11c   :  { %v920_v14 = vld [vmem:[%s11193_s9 + $0x6ac] sm:$0xf]  ;;  %917 = vst [vmem:[#allocation5 + $0x694] sm:$0xf] %v916_v12  ;;  %919 = vst [vmem:[#allocation5 + $0x698] sm:$0xf] %v918_v13 }
 0x11d   :  { %921 = vst [vmem:[#allocation5 + $0x69c] sm:$0xf] %v920_v14  ;;  %v922_v15 = vld [vmem:[%s11193_s9 + $0x690] sm:$0xf]  ;;  %v926_v17 = vld [vmem:[%s11193_s9 + $0x694] sm:$0xf] }
 0x11e   :  { %v924_v16 = vld [vmem:[%s11193_s9 + $0x6b0] sm:$0xf]  ;;  %923 = vst [vmem:[#allocation5 + $0x6a0] sm:$0xf] %v922_v15  ;;  %927 = vst [vmem:[#allocation5 + $0x6a8] sm:$0xf] %v926_v17 }
 0x11f   :  { %925 = vst [vmem:[#allocation5 + $0x6a4] sm:$0xf] %v924_v16  ;;  %v928_v18 = vld [vmem:[%s11193_s9 + $0x6b4] sm:$0xf]  ;;  %v930_v19 = vld [vmem:[%s11193_s9 + $0x698] sm:$0xf] }
 0x120   :  { %v932_v20 = vld [vmem:[%s11193_s9 + $0x6b8] sm:$0xf]  ;;  %929 = vst [vmem:[#allocation5 + $0x6ac] sm:$0xf] %v928_v18  ;;  %931 = vst [vmem:[#allocation5 + $0x6b0] sm:$0xf] %v930_v19 }
 0x121   :  { %933 = vst [vmem:[#allocation5 + $0x6b4] sm:$0xf] %v932_v20  ;;  %v934_v21 = vld [vmem:[%s11193_s9 + $0x69c] sm:$0xf]  ;;  %v940_v23 = vld [vmem:[%s11193_s9 + $0x6e0] sm:$0xf] }
 0x122   :  { %935 = vst [vmem:[#allocation5 + $0x6b8] sm:$0xf] %v934_v21  ;;  %937 = vst [vmem:[#allocation5 + $0x6bc] sm:$0xff] %v936_v22   ;;  %v942_v24 = vld [vmem:[%s11193_s9 + $0x6c4] sm:$0xf]  ;;  %v968_v37 = vld [vmem:[%s11193_s9 + $0x6fc] sm:$0xff]  }
 0x123   :  { %941 = vst [vmem:[#allocation5 + $0x6c4] sm:$0xf] %v940_v23  ;;  %v944_v25 = vld [vmem:[%s11193_s9 + $0x6e4] sm:$0xf]  ;;  %v946_v26 = vld [vmem:[%s11193_s9 + $0x6c8] sm:$0xf] }
 0x124   :  { %943 = vst [vmem:[#allocation5 + $0x6c8] sm:$0xf] %v942_v24  ;;  %945 = vst [vmem:[#allocation5 + $0x6cc] sm:$0xf] %v944_v25  ;;  %v948_v27 = vld [vmem:[%s11193_s9 + $0x6e8] sm:$0xf] }
 0x125   :  { %947 = vst [vmem:[#allocation5 + $0x6d0] sm:$0xf] %v946_v26  ;;  %v950_v28 = vld [vmem:[%s11193_s9 + $0x6cc] sm:$0xf]  ;;  %949 = vst [vmem:[#allocation5 + $0x6d4] sm:$0xf] %v948_v27 }
 0x126   :  { %v952_v29 = vld [vmem:[%s11193_s9 + $0x6ec] sm:$0xf]  ;;  %951 = vst [vmem:[#allocation5 + $0x6d8] sm:$0xf] %v950_v28  ;;  %v954_v30 = vld [vmem:[%s11193_s9 + $0x6d0] sm:$0xf] }
 0x127   :  { %953 = vst [vmem:[#allocation5 + $0x6dc] sm:$0xf] %v952_v29  ;;  %v956_v31 = vld [vmem:[%s11193_s9 + $0x6f0] sm:$0xf]  ;;  %v958_v32 = vld [vmem:[%s11193_s9 + $0x6d4] sm:$0xf] }
 0x128   :  { %955 = vst [vmem:[#allocation5 + $0x6e0] sm:$0xf] %v954_v30  ;;  %957 = vst [vmem:[#allocation5 + $0x6e4] sm:$0xf] %v956_v31  ;;  %v960_v33 = vld [vmem:[%s11193_s9 + $0x6f4] sm:$0xf] }
 0x129   :  { %959 = vst [vmem:[#allocation5 + $0x6e8] sm:$0xf] %v958_v32  ;;  %v962_v34 = vld [vmem:[%s11193_s9 + $0x6d8] sm:$0xf]  ;;  %961 = vst [vmem:[#allocation5 + $0x6ec] sm:$0xf] %v960_v33 }
 0x12a   :  { %v964_v35 = vld [vmem:[%s11193_s9 + $0x6f8] sm:$0xf]  ;;  %963 = vst [vmem:[#allocation5 + $0x6f0] sm:$0xf] %v962_v34  ;;  %v966_v36 = vld [vmem:[%s11193_s9 + $0x6dc] sm:$0xf] }
 0x12b   :  { %965 = vst [vmem:[#allocation5 + $0x6f4] sm:$0xf] %v964_v35  ;;  %v972_v38 = vld [vmem:[%s11193_s9 + $0x720] sm:$0xf]  ;;  %967 = vst [vmem:[#allocation5 + $0x6f8] sm:$0xf] %v966_v36 }
 0x12c   :  { %969 = vst [vmem:[#allocation5 + $0x6fc] sm:$0xff] %v968_v37   ;;  %973 = vst [vmem:[#allocation5 + $0x704] sm:$0xf] %v972_v38  ;;  %v974_v39 = vld [vmem:[%s11193_s9 + $0x704] sm:$0xf]  ;;  %v1000_v52 = vld [vmem:[%s11193_s9 + $0x73c] sm:$0xff]  }
 0x12d   :  { %v976_v40 = vld [vmem:[%s11193_s9 + $0x724] sm:$0xf]  ;;  %v978_v41 = vld [vmem:[%s11193_s9 + $0x708] sm:$0xf]  ;;  %975 = vst [vmem:[#allocation5 + $0x708] sm:$0xf] %v974_v39 }
 0x12e   :  { %977 = vst [vmem:[#allocation5 + $0x70c] sm:$0xf] %v976_v40  ;;  %979 = vst [vmem:[#allocation5 + $0x710] sm:$0xf] %v978_v41  ;;  %v980_v42 = vld [vmem:[%s11193_s9 + $0x728] sm:$0xf] }
 0x12f   :  { %v982_v43 = vld [vmem:[%s11193_s9 + $0x70c] sm:$0xf]  ;;  %981 = vst [vmem:[#allocation5 + $0x714] sm:$0xf] %v980_v42  ;;  %v986_v45 = vld [vmem:[%s11193_s9 + $0x710] sm:$0xf] }
 0x130   :  { %v984_v44 = vld [vmem:[%s11193_s9 + $0x72c] sm:$0xf]  ;;  %983 = vst [vmem:[#allocation5 + $0x718] sm:$0xf] %v982_v43  ;;  %v988_v46 = vld [vmem:[%s11193_s9 + $0x730] sm:$0xf] }
 0x131   :  { %985 = vst [vmem:[#allocation5 + $0x71c] sm:$0xf] %v984_v44  ;;  %v990_v47 = vld [vmem:[%s11193_s9 + $0x714] sm:$0xf]  ;;  %987 = vst [vmem:[#allocation5 + $0x720] sm:$0xf] %v986_v45 }
 0x132   :  { %989 = vst [vmem:[#allocation5 + $0x724] sm:$0xf] %v988_v46  ;;  %991 = vst [vmem:[#allocation5 + $0x728] sm:$0xf] %v990_v47  ;;  %v992_v48 = vld [vmem:[%s11193_s9 + $0x734] sm:$0xf] }
 0x133   :  { %v994_v49 = vld [vmem:[%s11193_s9 + $0x718] sm:$0xf]  ;;  %993 = vst [vmem:[#allocation5 + $0x72c] sm:$0xf] %v992_v48  ;;  %v998_v51 = vld [vmem:[%s11193_s9 + $0x71c] sm:$0xf] }
 0x134   :  { %v996_v50 = vld [vmem:[%s11193_s9 + $0x738] sm:$0xf]  ;;  %995 = vst [vmem:[#allocation5 + $0x730] sm:$0xf] %v994_v49  ;;  %v1004_v53 = vld [vmem:[%s11193_s9 + $0x760] sm:$0xf] }
 0x135   :  { %997 = vst [vmem:[#allocation5 + $0x734] sm:$0xf] %v996_v50  ;;  %999 = vst [vmem:[#allocation5 + $0x738] sm:$0xf] %v998_v51  ;;  %v1006_v54 = vld [vmem:[%s11193_s9 + $0x744] sm:$0xf] }
 0x136   :  { %1001 = vst [vmem:[#allocation5 + $0x73c] sm:$0xff] %v1000_v52   ;;  %1005 = vst [vmem:[#allocation5 + $0x744] sm:$0xf] %v1004_v53  ;;  %v1008_v55 = vld [vmem:[%s11193_s9 + $0x764] sm:$0xf]  ;;  %v1032_v3 = vld [vmem:[%s11193_s9 + $0x77c] sm:$0xff]  }
 0x137   :  { %v1010_v56 = vld [vmem:[%s11193_s9 + $0x748] sm:$0xf]  ;;  %1007 = vst [vmem:[#allocation5 + $0x748] sm:$0xf] %v1006_v54  ;;  %1009 = vst [vmem:[#allocation5 + $0x74c] sm:$0xf] %v1008_v55 }
 0x138   :  { %1011 = vst [vmem:[#allocation5 + $0x750] sm:$0xf] %v1010_v56  ;;  %v1012_v57 = vld [vmem:[%s11193_s9 + $0x768] sm:$0xf]  ;;  %v1014_v58 = vld [vmem:[%s11193_s9 + $0x74c] sm:$0xf] }
 0x139   :  { %v1016_v59 = vld [vmem:[%s11193_s9 + $0x76c] sm:$0xf]  ;;  %1013 = vst [vmem:[#allocation5 + $0x754] sm:$0xf] %v1012_v57  ;;  %1015 = vst [vmem:[#allocation5 + $0x758] sm:$0xf] %v1014_v58 }
 0x13a   :  { %1017 = vst [vmem:[#allocation5 + $0x75c] sm:$0xf] %v1016_v59  ;;  %v1018_v60 = vld [vmem:[%s11193_s9 + $0x750] sm:$0xf]  ;;  %v1022_v62 = vld [vmem:[%s11193_s9 + $0x754] sm:$0xf] }
 0x13b   :  { %v1020_v61 = vld [vmem:[%s11193_s9 + $0x770] sm:$0xf]  ;;  %1019 = vst [vmem:[#allocation5 + $0x760] sm:$0xf] %v1018_v60  ;;  %1023 = vst [vmem:[#allocation5 + $0x768] sm:$0xf] %v1022_v62 }
 0x13c   :  { %1021 = vst [vmem:[#allocation5 + $0x764] sm:$0xf] %v1020_v61  ;;  %v1024_v63 = vld [vmem:[%s11193_s9 + $0x774] sm:$0xf]  ;;  %v1026_v0 = vld [vmem:[%s11193_s9 + $0x758] sm:$0xf] }
 0x13d   :  { %v1028_v1 = vld [vmem:[%s11193_s9 + $0x778] sm:$0xf]  ;;  %1025 = vst [vmem:[#allocation5 + $0x76c] sm:$0xf] %v1024_v63  ;;  %1027 = vst [vmem:[#allocation5 + $0x770] sm:$0xf] %v1026_v0 }
 0x13e   :  { %1029 = vst [vmem:[#allocation5 + $0x774] sm:$0xf] %v1028_v1  ;;  %v1030_v2 = vld [vmem:[%s11193_s9 + $0x75c] sm:$0xf]  ;;  %v1036_v4 = vld [vmem:[%s11193_s9 + $0x7a0] sm:$0xf] }
 0x13f   :  { %1031 = vst [vmem:[#allocation5 + $0x778] sm:$0xf] %v1030_v2  ;;  %1033 = vst [vmem:[#allocation5 + $0x77c] sm:$0xff] %v1032_v3   ;;  %v1038_v5 = vld [vmem:[%s11193_s9 + $0x784] sm:$0xf]  ;;  %v1064_v18 = vld [vmem:[%s11193_s9 + $0x7bc] sm:$0xff]  }
 0x140   :  { %1037 = vst [vmem:[#allocation5 + $0x784] sm:$0xf] %v1036_v4  ;;  %v1040_v6 = vld [vmem:[%s11193_s9 + $0x7a4] sm:$0xf]  ;;  %v1042_v7 = vld [vmem:[%s11193_s9 + $0x788] sm:$0xf] }
 0x141   :  { %1039 = vst [vmem:[#allocation5 + $0x788] sm:$0xf] %v1038_v5  ;;  %1041 = vst [vmem:[#allocation5 + $0x78c] sm:$0xf] %v1040_v6  ;;  %v1044_v8 = vld [vmem:[%s11193_s9 + $0x7a8] sm:$0xf] }
 0x142   :  { %1043 = vst [vmem:[#allocation5 + $0x790] sm:$0xf] %v1042_v7  ;;  %v1046_v9 = vld [vmem:[%s11193_s9 + $0x78c] sm:$0xf]  ;;  %1045 = vst [vmem:[#allocation5 + $0x794] sm:$0xf] %v1044_v8 }
 0x143   :  { %v1048_v10 = vld [vmem:[%s11193_s9 + $0x7ac] sm:$0xf]  ;;  %1047 = vst [vmem:[#allocation5 + $0x798] sm:$0xf] %v1046_v9  ;;  %v1050_v11 = vld [vmem:[%s11193_s9 + $0x790] sm:$0xf] }
 0x144   :  { %1049 = vst [vmem:[#allocation5 + $0x79c] sm:$0xf] %v1048_v10  ;;  %v1052_v12 = vld [vmem:[%s11193_s9 + $0x7b0] sm:$0xf]  ;;  %v1054_v13 = vld [vmem:[%s11193_s9 + $0x794] sm:$0xf] }
 0x145   :  { %1051 = vst [vmem:[#allocation5 + $0x7a0] sm:$0xf] %v1050_v11  ;;  %1053 = vst [vmem:[#allocation5 + $0x7a4] sm:$0xf] %v1052_v12  ;;  %v1056_v14 = vld [vmem:[%s11193_s9 + $0x7b4] sm:$0xf] }
 0x146   :  { %1055 = vst [vmem:[#allocation5 + $0x7a8] sm:$0xf] %v1054_v13  ;;  %v1058_v15 = vld [vmem:[%s11193_s9 + $0x798] sm:$0xf]  ;;  %1057 = vst [vmem:[#allocation5 + $0x7ac] sm:$0xf] %v1056_v14 }
 0x147   :  { %v1060_v16 = vld [vmem:[%s11193_s9 + $0x7b8] sm:$0xf]  ;;  %1059 = vst [vmem:[#allocation5 + $0x7b0] sm:$0xf] %v1058_v15  ;;  %v1062_v17 = vld [vmem:[%s11193_s9 + $0x79c] sm:$0xf] }
 0x148   :  { %1061 = vst [vmem:[#allocation5 + $0x7b4] sm:$0xf] %v1060_v16  ;;  %v1068_v19 = vld [vmem:[%s11193_s9 + $0x7e0] sm:$0xf]  ;;  %1063 = vst [vmem:[#allocation5 + $0x7b8] sm:$0xf] %v1062_v17 }
 0x149   :  { %1065 = vst [vmem:[#allocation5 + $0x7bc] sm:$0xff] %v1064_v18   ;;  %1069 = vst [vmem:[#allocation5 + $0x7c4] sm:$0xf] %v1068_v19  ;;  %v1070_v20 = vld [vmem:[%s11193_s9 + $0x7c4] sm:$0xf] }
 0x14a   :  { %v1072_v21 = vld [vmem:[%s11193_s9 + $0x7e4] sm:$0xf]  ;;  %v1074_v22 = vld [vmem:[%s11193_s9 + $0x7c8] sm:$0xf]  ;;  %1071 = vst [vmem:[#allocation5 + $0x7c8] sm:$0xf] %v1070_v20 }
 0x14b   :  { %1073 = vst [vmem:[#allocation5 + $0x7cc] sm:$0xf] %v1072_v21  ;;  %1075 = vst [vmem:[#allocation5 + $0x7d0] sm:$0xf] %v1074_v22  ;;  %v1076_v23 = vld [vmem:[%s11193_s9 + $0x7e8] sm:$0xf] }
 0x14c   :  { %v1078_v24 = vld [vmem:[%s11193_s9 + $0x7cc] sm:$0xf]  ;;  %1077 = vst [vmem:[#allocation5 + $0x7d4] sm:$0xf] %v1076_v23  ;;  %v1082_v26 = vld [vmem:[%s11193_s9 + $0x7d0] sm:$0xf] }
 0x14d   :  { %v1080_v25 = vld [vmem:[%s11193_s9 + $0x7ec] sm:$0xf]  ;;  %1079 = vst [vmem:[#allocation5 + $0x7d8] sm:$0xf] %v1078_v24  ;;  %v1084_v27 = vld [vmem:[%s11193_s9 + $0x7f0] sm:$0xf] }
 0x14e   :  { %1081 = vst [vmem:[#allocation5 + $0x7dc] sm:$0xf] %v1080_v25  ;;  %v1086_v28 = vld [vmem:[%s11193_s9 + $0x7d4] sm:$0xf]  ;;  %1083 = vst [vmem:[#allocation5 + $0x7e0] sm:$0xf] %v1082_v26 }
 0x14f   :  { %1085 = vst [vmem:[#allocation5 + $0x7e4] sm:$0xf] %v1084_v27  ;;  %1087 = vst [vmem:[#allocation5 + $0x7e8] sm:$0xf] %v1086_v28  ;;  %v1088_v29 = vld [vmem:[%s11193_s9 + $0x7f4] sm:$0xf] }
 0x150   :  { %v1090_v30 = vld [vmem:[%s11193_s9 + $0x7d8] sm:$0xf]  ;;  %1089 = vst [vmem:[#allocation5 + $0x7ec] sm:$0xf] %v1088_v29  ;;  %v1094_v32 = vld [vmem:[%s11193_s9 + $0x7dc] sm:$0xf] }
 0x151   :  { %v1092_v31 = vld [vmem:[%s11193_s9 + $0x7f8] sm:$0xf]  ;;  %1091 = vst [vmem:[#allocation5 + $0x7f0] sm:$0xf] %v1090_v30  ;;  %v1096_v33 = vld [vmem:[%s11193_s9 + $0x7fc] sm:$0xf] }
 0x152   :  { %1093 = vst [vmem:[#allocation5 + $0x7f4] sm:$0xf] %v1092_v31  ;;  %1095 = vst [vmem:[#allocation5 + $0x7f8] sm:$0xf] %v1094_v32 }
 0x153   :  { %1097 = vst [vmem:[#allocation5 + $0x7fc] sm:$0xf] %v1096_v33 }
 0x154   :  { %4233 = vsyncadd [#allocation6], 32768  ;;  %v7620_v34 = vld [vmem:[%s11190_s6 + $0x4] ss:$16 sps:$4 sm:$0xff]   ;;  %v11202_v35 = vmov 0   ;;  %s9550_s20 = sld [smem:[#allocation9]] }
 0x155   :  { %4832 = vmatprep.mubr.bf16.mxu0 %v11202_v35  ;;  %4905 = vmatprep.mubr.bf16.mxu1 %v11202_v35  ;;  %v7622_v36 = vld [vmem:[%s11190_s6 + $0xc] ss:$16 sps:$4 sm:$0xff]   ;;  %v7624_v37 = vld [vmem:[%s11190_s6] ss:$16 sps:$4 sm:$0xff]   ;;  %v7625_v38 = vld [vmem:[%s11190_s6 + $0x8] ss:$16 sps:$4 sm:$0xff]  }
 0x156   :  { %7619 = vset.pattern.permute.xlu1 %v11202_v35  ;;  %7618 = vset.pattern.permute.xlu0 %v11202_v35  ;;  %v7626_v39 = vld [vmem:[%s11190_s6 + $0x24] ss:$16 sps:$4 sm:$0xff]   ;;  %v7628_v40 = vld [vmem:[%s11190_s6 + $0x2c] ss:$16 sps:$4 sm:$0xff]   ;;  %v7630_v41 = vld [vmem:[%s11190_s6 + $0x20] ss:$16 sps:$4 sm:$0xff]  }
 0x157   :  { %4800 = vmatprep.subr.bf16.mxu0 %v7620_v34  ;;  %4873 = vmatprep.subr.bf16.mxu1 %v7622_v36  ;;  %v7631_v42 = vld [vmem:[%s11190_s6 + $0x28] ss:$16 sps:$4 sm:$0xff]   ;;  %v7632_v43 = vld [vmem:[%s11190_s6 + $0x44] ss:$16 sps:$4 sm:$0xff]   ;;  %v7634_v44 = vld [vmem:[%s11190_s6 + $0x4c] ss:$16 sps:$4 sm:$0xff]  }
 0x158   :  { %4801 = vmatpush1.bf16.msra.mxu0 %v7624_v37  ;;  %4874 = vmatpush1.bf16.msra.mxu1 %v7625_v38  ;;  %v7636_v45 = vld [vmem:[%s11190_s6 + $0x40] ss:$16 sps:$4 sm:$0xff]   ;;  %v7637_v46 = vld [vmem:[%s11190_s6 + $0x48] ss:$16 sps:$4 sm:$0xff]   ;;  %s9561_s0 = sld [smem:[#allocation9 + $0x1]]  ;;  %s9566_s5 = sld [smem:[#allocation9 + $0x2]] }
 0x159   :  { %4802 = vmatprep.subr.bf16.mxu0 %v7626_v39  ;;  %4875 = vmatprep.subr.bf16.mxu1 %v7628_v40  ;;  %v7638_v47 = vld [vmem:[%s11190_s6 + $0x64] ss:$16 sps:$4 sm:$0xff]   ;;  %v7640_v48 = vld [vmem:[%s11190_s6 + $0x6c] ss:$16 sps:$4 sm:$0xff]   ;;  %s9571_s28 = sld [smem:[#allocation9 + $0x3]]  ;;  %s9573_s29 = sld [smem:[#allocation9 + $0x4]] }
 0x15a   :  { %v7642_v49 = vld [vmem:[%s11190_s6 + $0x60] ss:$16 sps:$4 sm:$0xff]   ;;  %s9578_s17 = sld [smem:[#allocation9 + $0x5]]  ;;  %v7643_v50 = vld [vmem:[%s11190_s6 + $0x68] ss:$16 sps:$4 sm:$0xff]   ;;  %s9583_s21 = sld [smem:[#allocation9 + $0x6]] }
 0x15b   :  { %v7644_v51 = vld [vmem:[%s11190_s6 + $0x84] ss:$16 sps:$4 sm:$0xff]   ;;  %s9588_s24 = sld [smem:[#allocation9 + $0x7]]  ;;  %v7646_v52 = vld [vmem:[%s11190_s6 + $0x8c] ss:$16 sps:$4 sm:$0xff]   ;;  %s9593_s9 = sld [smem:[#allocation9 + $0x8]] }
 0x15c   :  { %4803 = vmatpush1.bf16.msra.mxu0 %v7630_v41  ;;  %4876 = vmatpush1.bf16.msra.mxu1 %v7631_v42  ;;  %v7648_v53 = vld [vmem:[%s11190_s6 + $0x80] ss:$16 sps:$4 sm:$0xff]   ;;  %s4267_s16 = scalar_lea.vmem %s11186_s2, %s9550_s20  ;;  %v7649_v54 = vld [vmem:[%s11190_s6 + $0x88] ss:$16 sps:$4 sm:$0xff]   ;;  %s9609_s26 = sld [smem:[#allocation9 + $0x9]] }
 0x15d   :  { %4804 = vmatprep.subr.bf16.mxu0 %v7632_v43  ;;  %4877 = vmatprep.subr.bf16.mxu1 %v7634_v44  ;;  %v7650_v55 = vld [vmem:[%s11190_s6 + $0xa4] ss:$16 sps:$4 sm:$0xff]   ;;  %s9618_s15 = sld [smem:[#allocation9 + $0xa]]  ;;  %v7652_v56 = vld [vmem:[%s11190_s6 + $0xac] ss:$16 sps:$4 sm:$0xff]   ;;  %s9638_s18 = sld [smem:[#allocation9 + $0xb]] }
 0x15e   :  { %s4271_s25 = scalar_lea.vmem %s11186_s2, %s9561_s0  ;;  %s4275_s30 = scalar_lea.vmem %s11186_s2, %s9566_s5  ;;  %v7654_v57 = vld [vmem:[%s11190_s6 + $0xa0] ss:$16 sps:$4 sm:$0xff]   ;;  %v7655_v58 = vld [vmem:[%s11190_s6 + $0xa8] ss:$16 sps:$4 sm:$0xff]   ;;  %v7656_v59 = vld [vmem:[%s11190_s6 + $0xc4] ss:$16 sps:$4 sm:$0xff]  }
 0x15f   :  { %s4279_s23 = scalar_lea.vmem %s11186_s2, %s9571_s28  ;;  %s4283_s12 = scalar_lea.vmem %s11186_s2, %s9573_s29  ;;  %v7658_v60 = vld [vmem:[%s11190_s6 + $0xcc] ss:$16 sps:$4 sm:$0xff]   ;;  %v4268_v61 = vld [vmem:[%s4267_s16] sm:$0x1]  ;;  %v7661_v2 = vld [vmem:[%s11190_s6 + $0xc8] ss:$16 sps:$4 sm:$0xff]  }
 0x160   :  { %4805 = vmatpush1.bf16.msra.mxu0 %v7636_v45  ;;  %4878 = vmatpush1.bf16.msra.mxu1 %v7637_v46  ;;  %s4287_s11 = scalar_lea.vmem %s11186_s2, %s9578_s17  ;;  %s4291_s14 = scalar_lea.vmem %s11186_s2, %s9583_s21  ;;  %v7660_v62 = vld [vmem:[%s11190_s6 + $0xc0] ss:$16 sps:$4 sm:$0xff]   ;;  %4269 = vst [vmem:[#allocation2] sm:$0x1] %v4268_v61  ;;  %v7662_v3 = vld [vmem:[%s11190_s6 + $0xe4] ss:$16 sps:$4 sm:$0xff]  }
 0x161   :  { %4806 = vmatprep.subr.bf16.mxu0 %v7638_v47  ;;  %4879 = vmatprep.subr.bf16.mxu1 %v7640_v48  ;;  %s9647_s29 = sld [smem:[#allocation9 + $0xc]]  ;;  %s4295_s5 = scalar_lea.vmem %s11186_s2, %s9588_s24  ;;  %v4272_v63 = vld [vmem:[%s4271_s25] sm:$0x1]  ;;  %v7664_v11 = vld [vmem:[%s11190_s6 + $0xec] ss:$16 sps:$4 sm:$0xff]  }
 0x162   :  { %s4299_s21 = scalar_lea.vmem %s11186_s2, %s9593_s9  ;;  %v4276_v0 = vld [vmem:[%s4275_s30] sm:$0x1]  ;;  %s4303_s22 = scalar_lea.vmem %s11186_s2, %s9609_s26  ;;  %4273 = vst [vmem:[#allocation2 + $0x1] sm:$0x1] %v4272_v63  ;;  %v7667_v15 = vld [vmem:[%s11190_s6 + $0xe8] ss:$16 sps:$4 sm:$0xff]  }
 0x163   :  { %v4280_v1 = vld [vmem:[%s4279_s23] sm:$0x1]  ;;  %4277 = vst [vmem:[#allocation2 + $0x2] sm:$0x1] %v4276_v0  ;;  %s4307_s23 = scalar_lea.vmem %s11186_s2, %s9618_s15  ;;  %s7415_s19 = sld [smem:[#allocation9 + $0xe]] }
 0x164   :  { %4807 = vmatpush1.bf16.msra.mxu0 %v7642_v49  ;;  %4880 = vmatpush1.bf16.msra.mxu1 %v7643_v50  ;;  %4281 = vst [vmem:[#allocation2 + $0x3] sm:$0x1] %v4280_v1  ;;  %v4284_v4 = vld [vmem:[%s4283_s12] sm:$0x1]  ;;  %s4311_s12 = scalar_lea.vmem %s11186_s2, %s9638_s18  ;;  %s7416_s18 = sld [smem:[#allocation9 + $0xf]] }
 0x165   :  { %4808 = vmatprep.subr.bf16.mxu0 %v7644_v51  ;;  %4881 = vmatprep.subr.bf16.mxu1 %v7646_v52  ;;  %v4288_v5 = vld [vmem:[%s4287_s11] sm:$0x1]  ;;  %4285 = vst [vmem:[#allocation2 + $0x4] sm:$0x1] %v4284_v4  ;;  %s7417_s16 = sld [smem:[#allocation9 + $0x10]]  ;;  %s7421_s28 = sld [smem:[#allocation9 + $0x14]] }
 0x166   :  { %v4292_v6 = vld [vmem:[%s4291_s14] sm:$0x1]  ;;  %4289 = vst [vmem:[#allocation2 + $0x5] sm:$0x1] %v4288_v5  ;;  %s7414_s14 = sld [smem:[#allocation9 + $0xd]]  ;;  %s9720_s17 = sld [smem:[#allocation9 + $0x17]] }
 0x167   :  { %4293 = vst [vmem:[#allocation2 + $0x6] sm:$0x1] %v4292_v6  ;;  %v4296_v7 = vld [vmem:[%s4295_s5] sm:$0x1]  ;;  %s4315_s20 = scalar_lea.vmem %s11186_s2, %s9647_s29  ;;  %v7670_v16 = vld [vmem:[%s11190_s6 + $0x104] ss:$16 sps:$4 sm:$0xff]  }
 0x168   :  { %4809 = vmatpush1.bf16.msra.mxu0 %v7648_v53  ;;  %4882 = vmatpush1.bf16.msra.mxu1 %v7649_v54  ;;  %v4300_v8 = vld [vmem:[%s4299_s21] sm:$0x1]  ;;  %4297 = vst [vmem:[#allocation2 + $0x7] sm:$0x1] %v4296_v7  ;;  %s7418_s29 = sld [smem:[#allocation9 + $0x11]]  ;;  %s7420_s5 = sld [smem:[#allocation9 + $0x13]] }
 0x169   :  { %4810 = vmatprep.subr.bf16.mxu0 %v7650_v55  ;;  %4883 = vmatprep.subr.bf16.mxu1 %v7652_v56  ;;  %v4304_v9 = vld [vmem:[%s4303_s22] sm:$0x1]  ;;  %4301 = vst [vmem:[#allocation2 + $0x8] sm:$0x1] %v4300_v8  ;;  %v7673_v17 = vld [vmem:[%s11190_s6 + $0x10c] ss:$16 sps:$4 sm:$0xff]   ;;  %s4323_s26 = scalar_lea.vmem %s11186_s2, %s7415_s19 }
 0x16a   :  { %4305 = vst [vmem:[#allocation2 + $0x9] sm:$0x1] %v4304_v9  ;;  %v4308_v10 = vld [vmem:[%s4307_s23] sm:$0x1]  ;;  %s4327_s27 = scalar_lea.vmem %s11186_s2, %s7416_s18  ;;  %s7422_s22 = sld [smem:[#allocation9 + $0x15]] }
 0x16b   :  { %4309 = vst [vmem:[#allocation2 + $0xa] sm:$0x1] %v4308_v10  ;;  %v4312_v12 = vld [vmem:[%s4311_s12] sm:$0x1]  ;;  %s7419_s12 = sld [smem:[#allocation9 + $0x12]]  ;;  %s4331_s21 = scalar_lea.vmem %s11186_s2, %s7417_s16 }
 0x16c   :  { %4811 = vmatpush1.bf16.msra.mxu0 %v7654_v57  ;;  %4884 = vmatpush1.bf16.msra.mxu1 %v7655_v58  ;;  %v7666_v13 = vld [vmem:[%s11190_s6 + $0xe0] ss:$16 sps:$4 sm:$0xff]   ;;  %4313 = vst [vmem:[#allocation2 + $0xb] sm:$0x1] %v4312_v12  ;;  %s4319_s30 = scalar_lea.vmem %s11186_s2, %s7414_s14  ;;  %s9718_s18 = sld [smem:[#allocation9 + $0x16]] }
 0x16d   :  { %4812 = vmatprep.subr.bf16.mxu0 %v7656_v59  ;;  %4885 = vmatprep.subr.bf16.mxu1 %v7658_v60  ;;  %v4316_v14 = vld [vmem:[%s4315_s20] sm:$0x1]  ;;  %s9722_s24 = sld [smem:[#allocation9 + $0x18]]  ;;  %s9724_s1 = sld [smem:[#allocation9 + $0x19]]  ;;  %v7671_v26 = vld [vmem:[%s11190_s6 + $0x108] ss:$16 sps:$4 sm:$0xff]  }
 0x16e   :  { %4317 = vst [vmem:[#allocation2 + $0xc] sm:$0x1] %v4316_v14  ;;  %v4320_v18 = vld [vmem:[%s4319_s30] sm:$0x1]  ;;  %s4335_s13 = scalar_lea.vmem %s11186_s2, %s7418_s29  ;;  %s9729_s30 = sld [smem:[#allocation9 + $0x1a]] }
 0x16f   :  { %4321 = vst [vmem:[#allocation2 + $0xd] sm:$0x1] %v4320_v18  ;;  %v4324_v19 = vld [vmem:[%s4323_s26] sm:$0x1]  ;;  %s4343_s11 = scalar_lea.vmem %s11186_s2, %s7420_s5  ;;  %s9734_s26 = sld [smem:[#allocation9 + $0x1b]] }
 0x170   :  { %4813 = vmatpush1.bf16.msra.mxu0 %v7660_v62  ;;  %4886 = vmatpush1.bf16.msra.mxu1 %v7661_v2  ;;  %4325 = vst [vmem:[#allocation2 + $0xe] sm:$0x1] %v4324_v19  ;;  %v4328_v20 = vld [vmem:[%s4327_s27] sm:$0x1]  ;;  %s9745_s5 = sld [smem:[#allocation9 + $0x1c]]  ;;  %s4351_s9 = scalar_lea.vmem %s11186_s2, %s7422_s22 }
 0x171   :  { %4814 = vmatprep.subr.bf16.mxu0 %v7662_v3  ;;  %4887 = vmatprep.subr.bf16.mxu1 %v7664_v11  ;;  %4329 = vst [vmem:[#allocation2 + $0xf] sm:$0x1] %v4328_v20  ;;  %v4332_v21 = vld [vmem:[%s4331_s21] sm:$0x1]  ;;  %s4339_s25 = scalar_lea.vmem %s11186_s2, %s7419_s12  ;;  %s4347_s21 = scalar_lea.vmem %s11186_s2, %s7421_s28  ;;  %v7676_v28 = vld [vmem:[%s11190_s6 + $0x124] ss:$16 sps:$4 sm:$0xff]  }
 0x172   :  { %4333 = vst [vmem:[#allocation2 + $0x10] sm:$0x1] %v4332_v21  ;;  %v4336_v22 = vld [vmem:[%s4335_s13] sm:$0x1]  ;;  %s4355_s23 = scalar_lea.vmem %s11186_s2, %s9718_s18  ;;  %s4359_s10 = scalar_lea.vmem %s11186_s2, %s9720_s17  ;;  %v7679_v33 = vld [vmem:[%s11190_s6 + $0x12c] ss:$16 sps:$4 sm:$0xff]  }
 0x173   :  { %4337 = vst [vmem:[#allocation2 + $0x11] sm:$0x1] %v4336_v22  ;;  %v4340_v23 = vld [vmem:[%s4339_s25] sm:$0x1]  ;;  %s9753_s25 = sld [smem:[#allocation9 + $0x1d]]  ;;  %s4363_s20 = scalar_lea.vmem %s11186_s2, %s9722_s24 }
 0x174   :  { %4815 = vmatpush1.bf16.msra.mxu0 %v7666_v13  ;;  %4888 = vmatpush1.bf16.msra.mxu1 %v7667_v15  ;;  %v4628_v24 = vld [vmem:[#allocation2] sm:$0xff]  ;;  %4341 = vst [vmem:[#allocation2 + $0x12] sm:$0x1] %v4340_v23  ;;  %s4367_s18 = scalar_lea.vmem %s11186_s2, %s9724_s1  ;;  %v7677_v38 = vld [vmem:[%s11190_s6 + $0x128] ss:$16 sps:$4 sm:$0xff]   ;;  %s4371_s24 = scalar_lea.vmem %s11186_s2, %s9729_s30 }
 0x175   :  { %5107 = vmatprep.subr.bf16.mxu0 %v7670_v16  ;;  %5148 = vmatprep.subr.bf16.mxu1 %v7673_v17  ;;  %v7668_v25 = vld [vmem:[%s11190_s6 + $0x100] ss:$16 sps:$4 sm:$0xff]   ;;  %s9784_s29 = sld [smem:[#allocation9 + $0x1e]]  ;;  %s9790_s15 = sld [smem:[#allocation9 + $0x1f]]  ;;  %v7682_v42 = vld [vmem:[%s11190_s6 + $0x144] ss:$16 sps:$4 sm:$0xff]  }
 0x176   :  { %v4344_v27 = vld [vmem:[%s4343_s11] sm:$0x1]  ;;  %s4375_s11 = scalar_lea.vmem %s11186_s2, %s9734_s26  ;;  %s4379_s22 = scalar_lea.vmem %s11186_s2, %s9745_s5  ;;  %v7685_v45 = vld [vmem:[%s11190_s6 + $0x14c] ss:$16 sps:$4 sm:$0xff]   ;;  %v7683_v48 = vld [vmem:[%s11190_s6 + $0x148] ss:$16 sps:$4 sm:$0xff]  }
 0x177   :  { %4345 = vst [vmem:[#allocation2 + $0x13] sm:$0x1] %v4344_v27  ;;  %v4348_v29 = vld [vmem:[%s4347_s21] sm:$0x1]  ;;  %s9799_s12 = sld [smem:[#allocation9 + $0x20]]  ;;  %s9808_s0 = sld [smem:[#allocation9 + $0x21]] }
 0x178   :  { %v4629_v30 = vld [vmem:[#allocation2 + $0x8] sm:$0xff]  ;;  %4349 = vst [vmem:[#allocation2 + $0x14] sm:$0x1] %v4348_v29  ;;  %v4352_v31 = vld [vmem:[%s4351_s9] sm:$0x1]  ;;  %s9818_s16 = sld [smem:[#allocation9 + $0x22]] }
 0x179   :  { %v4636_v32 = vpack.c.bf16 %v4629_v30, %v4628_v24  ;;  %4353 = vst [vmem:[#allocation2 + $0x15] sm:$0x1] %v4352_v31  ;;  %v4356_v34 = vld [vmem:[%s4355_s23] sm:$0x1]  ;;  %s4383_s21 = scalar_lea.vmem %s11186_s2, %s9753_s25  ;;  %s9820_s9 = sld [smem:[#allocation9 + $0x23]] }
 0x17a   :  { %v4360_v36 = vld [vmem:[%s4359_s10] sm:$0x1]  ;;  %4357 = vst [vmem:[#allocation2 + $0x16] sm:$0x1] %v4356_v34  ;;  %v7688_v49 = vld [vmem:[%s11190_s6 + $0x164] ss:$16 sps:$4 sm:$0xff]  }
 0x17b   :  { %v7674_v37 = vld [vmem:[%s11190_s6 + $0x120] ss:$16 sps:$4 sm:$0xff]   ;;  %4361 = vst [vmem:[#allocation2 + $0x17] sm:$0x1] %v4360_v36  ;;  %4833 = vmatmul.mubr.bf16.vlgmr.msra.gmra.mrb[0].mxu0 %v4636_v32  ;;  %4906 = vmatmul.mubr.bf16.vlgmr.msra.gmra.mrb[0].mxu1 %v4636_v32  ;;  %s9825_s1 = sld [smem:[#allocation9 + $0x24]]  ;;  %s9827_s23 = sld [smem:[#allocation9 + $0x25]] }
 0x17c   :  { %v4364_v39 = vld [vmem:[%s4363_s20] sm:$0x1]  ;;  %5108 = vmatpush1.bf16.msra.mxu0 %v7668_v25  ;;  %5149 = vmatpush1.bf16.msra.mxu1 %v7671_v26  ;;  %s4387_s27 = scalar_lea.vmem %s11186_s2, %s9784_s29  ;;  %v7691_v50 = vld [vmem:[%s11190_s6 + $0x16c] ss:$16 sps:$4 sm:$0xff]   ;;  %s9842_s19 = sld [smem:[#allocation9 + $0x27]] }
 0x17d   :  { %v4368_v40 = vld [vmem:[%s4367_s18] sm:$0x1]  ;;  %4365 = vst [vmem:[#allocation2 + $0x18] sm:$0x1] %v4364_v39  ;;  %5109 = vmatprep.subr.bf16.mxu0 %v7676_v28  ;;  %5150 = vmatprep.subr.bf16.mxu1 %v7679_v33  ;;  %v7689_v54 = vld [vmem:[%s11190_s6 + $0x168] ss:$16 sps:$4 sm:$0xff]   ;;  %s4399_s10 = scalar_lea.vmem %s11186_s2, %s9808_s0 }
 0x17e   :  { %4369 = vst [vmem:[#allocation2 + $0x19] sm:$0x1] %v4368_v40  ;;  %v4372_v41 = vld [vmem:[%s4371_s24] sm:$0x1]  ;;  %4842 = vmatprep.mubr.bf16.mxu0 %v11202_v35  ;;  %4915 = vmatprep.mubr.bf16.mxu1 %v11202_v35  ;;  %s9854_s28 = sld [smem:[#allocation9 + $0x28]]  ;;  %s9888_s30 = sld [smem:[#allocation9 + $0x2a]] }
 0x17f   :  { %4373 = vst [vmem:[#allocation2 + $0x1a] sm:$0x1] %v4372_v41  ;;  %v4376_v43 = vld [vmem:[%s4375_s11] sm:$0x1]  ;;  %v7694_v57 = vld [vmem:[%s11190_s6 + $0x184] ss:$16 sps:$4 sm:$0xff]  }
 0x180   :  { %4377 = vst [vmem:[#allocation2 + $0x1b] sm:$0x1] %v4376_v43  ;;  %v4380_v44 = vld [vmem:[%s4379_s22] sm:$0x1]  ;;  %5110 = vmatpush1.bf16.msra.mxu0 %v7674_v37  ;;  %5151 = vmatpush1.bf16.msra.mxu1 %v7677_v38  ;;  %s9836_s22 = sld [smem:[#allocation9 + $0x26]]  ;;  %s9897_s20 = sld [smem:[#allocation9 + $0x2b]] }
 0x181   :  { %4381 = vst [vmem:[#allocation2 + $0x1c] sm:$0x1] %v4380_v44  ;;  %v4384_v46 = vld [vmem:[%s4383_s21] sm:$0x1]  ;;  %s4391_s21 = scalar_lea.vmem %s11186_s2, %s9790_s15  ;;  %5111 = vmatprep.subr.bf16.mxu0 %v7682_v42  ;;  %5152 = vmatprep.subr.bf16.mxu1 %v7685_v45  ;;  %s4395_s15 = scalar_lea.vmem %s11186_s2, %s9799_s12  ;;  %v7697_v58 = vld [vmem:[%s11190_s6 + $0x18c] ss:$16 sps:$4 sm:$0xff]  }
 0x182   :  { %v7680_v47 = vld [vmem:[%s11190_s6 + $0x140] ss:$16 sps:$4 sm:$0xff]   ;;  %4385 = vst [vmem:[#allocation2 + $0x1d] sm:$0x1] %v4384_v46  ;;  %s4403_s12 = scalar_lea.vmem %s11186_s2, %s9818_s16  ;;  %s4411_s17 = scalar_lea.vmem %s11186_s2, %s9825_s1  ;;  %v7695_v1 = vld [vmem:[%s11190_s6 + $0x188] ss:$16 sps:$4 sm:$0xff]  }
 0x183   :  { %v4388_v51 = vld [vmem:[%s4387_s27] sm:$0x1]  ;;  %s9860_s27 = sld [smem:[#allocation9 + $0x29]]  ;;  %s4423_s26 = scalar_lea.vmem %s11186_s2, %s9842_s19  ;;  %v4630_v2 = vld [vmem:[#allocation2 + $0x10] sm:$0xff]  ;;  %v7703_v10 = vld [vmem:[%s11190_s6 + $0x1ac] ss:$16 sps:$4 sm:$0xff]  }
 0x184   :  { %4389 = vst [vmem:[#allocation2 + $0x1e] sm:$0x1] %v4388_v51  ;;  %v4392_v52 = vld [vmem:[%s4391_s21] sm:$0x1]  ;;  %5112 = vmatpush1.bf16.msra.mxu0 %v7680_v47  ;;  %5153 = vmatpush1.bf16.msra.mxu1 %v7683_v48  ;;  %s4407_s21 = scalar_lea.vmem %s11186_s2, %s9820_s9  ;;  %s4427_s0 = scalar_lea.vmem %s11186_s2, %s9854_s28  ;;  %v7700_v5 = vld [vmem:[%s11190_s6 + $0x1a4] ss:$16 sps:$4 sm:$0xff]  }
 0x185   :  { %v7686_v53 = vld [vmem:[%s11190_s6 + $0x160] ss:$16 sps:$4 sm:$0xff]   ;;  %4393 = vst [vmem:[#allocation2 + $0x1f] sm:$0x1] %v4392_v52  ;;  %5113 = vmatprep.subr.bf16.mxu0 %v7688_v49  ;;  %5154 = vmatprep.subr.bf16.mxu1 %v7691_v50  ;;  %s9906_s5 = sld [smem:[#allocation9 + $0x2c]]  ;;  %s9917_s28 = sld [smem:[#allocation9 + $0x2e]] }
 0x186   :  { %v4396_v55 = vld [vmem:[%s4395_s15] sm:$0x1]  ;;  %s4415_s15 = scalar_lea.vmem %s11186_s2, %s9827_s23  ;;  %s9927_s14 = sld [smem:[#allocation9 + $0x30]]  ;;  %v7701_v11 = vld [vmem:[%s11190_s6 + $0x1a8] ss:$16 sps:$4 sm:$0xff]  }
 0x187   :  { %4397 = vst [vmem:[#allocation2 + $0x20] sm:$0x1] %v4396_v55  ;;  %v4400_v56 = vld [vmem:[%s4399_s10] sm:$0x1]  ;;  %s4419_s10 = scalar_lea.vmem %s11186_s2, %s9836_s22  ;;  %s4435_s23 = scalar_lea.vmem %s11186_s2, %s9888_s30  ;;  %v7706_v13 = vld [vmem:[%s11190_s6 + $0x1c4] ss:$16 sps:$4 sm:$0xff]  }
 0x188   :  { %4401 = vst [vmem:[#allocation2 + $0x21] sm:$0x1] %v4400_v56  ;;  %v4404_v59 = vld [vmem:[%s4403_s12] sm:$0x1]  ;;  %5114 = vmatpush1.bf16.msra.mxu0 %v7686_v53  ;;  %5155 = vmatpush1.bf16.msra.mxu1 %v7689_v54  ;;  %s9936_s29 = sld [smem:[#allocation9 + $0x31]]  ;;  %s9942_s19 = sld [smem:[#allocation9 + $0x32]] }
 0x189   :  { %v4408_v60 = vld [vmem:[%s4407_s21] sm:$0x1]  ;;  %4405 = vst [vmem:[#allocation2 + $0x22] sm:$0x1] %v4404_v59  ;;  %s4431_s16 = scalar_lea.vmem %s11186_s2, %s9860_s27  ;;  %5115 = vmatprep.subr.bf16.mxu0 %v7694_v57  ;;  %5156 = vmatprep.subr.bf16.mxu1 %v7697_v58  ;;  %s9922_s27 = sld [smem:[#allocation9 + $0x2f]] }
 0x18a   :  { %4409 = vst [vmem:[#allocation2 + $0x23] sm:$0x1] %v4408_v60  ;;  %v4412_v61 = vld [vmem:[%s4411_s17] sm:$0x1]  ;;  %s9912_s17 = sld [smem:[#allocation9 + $0x2d]]  ;;  %s9968_s21 = sld [smem:[#allocation9 + $0x34]] }
 0x18b   :  { %v4416_v62 = vld [vmem:[%s4415_s15] sm:$0x1]  ;;  %4413 = vst [vmem:[#allocation2 + $0x24] sm:$0x1] %v4412_v61  ;;  %s4443_s9 = scalar_lea.vmem %s11186_s2, %s9906_s5  ;;  %s9953_s15 = sld [smem:[#allocation9 + $0x33]] }
 0x18c   :  { %v7692_v63 = vld [vmem:[%s11190_s6 + $0x180] ss:$16 sps:$4 sm:$0xff]   ;;  %4417 = vst [vmem:[#allocation2 + $0x25] sm:$0x1] %v4416_v62  ;;  %v4631_v6 = vld [vmem:[#allocation2 + $0x18] sm:$0xff]  ;;  %5157 = vmatpush1.bf16.msra.mxu1 %v7695_v1  ;;  %s9974_s13 = sld [smem:[#allocation9 + $0x35]] }
 0x18d   :  { %v4420_v0 = vld [vmem:[%s4419_s10] sm:$0x1]  ;;  %v4637_v9 = vpack.c.bf16 %v4631_v6, %v4630_v2  ;;  %5116 = vmatpush1.bf16.msra.mxu0 %v7692_v63  ;;  %v7707_v16 = vld [vmem:[%s11190_s6 + $0x1c8] ss:$16 sps:$4 sm:$0xff]   ;;  %v7709_v17 = vld [vmem:[%s11190_s6 + $0x1cc] ss:$16 sps:$4 sm:$0xff]   ;;  %5158 = vmatprep.subr.bf16.mxu1 %v7703_v10 }
 0x18e   :  { %4421 = vst [vmem:[#allocation2 + $0x26] sm:$0x1] %v4420_v0  ;;  %v4424_v3 = vld [vmem:[%s4423_s26] sm:$0x1]  ;;  %5117 = vmatprep.subr.bf16.mxu0 %v7700_v5  ;;  %v7712_v21 = vld [vmem:[%s11190_s6 + $0x1e4] ss:$16 sps:$4 sm:$0xff]   ;;  %s4463_s12 = scalar_lea.vmem %s11186_s2, %s9936_s29 }
 0x18f   :  { %4425 = vst [vmem:[#allocation2 + $0x27] sm:$0x1] %v4424_v3  ;;  %v4428_v4 = vld [vmem:[%s4427_s0] sm:$0x1]  ;;  %4843 = vmatmul.mubr.bf16.gmra.mrb[4].mxu0 %v4637_v9  ;;  %4916 = vmatmul.mubr.bf16.gmra.mrb[4].mxu1 %v4637_v9  ;;  %s4439_s0 = scalar_lea.vmem %s11186_s2, %s9897_s20  ;;  %s4459_s20 = scalar_lea.vmem %s11186_s2, %s9927_s14  ;;  %v7713_v26 = vld [vmem:[%s11190_s6 + $0x1e8] ss:$16 sps:$4 sm:$0xff]  }
 0x190   :  { %4429 = vst [vmem:[#allocation2 + $0x28] sm:$0x1] %v4428_v4  ;;  %v4432_v7 = vld [vmem:[%s4431_s16] sm:$0x1]  ;;  %4852 = vmatprep.mubr.bf16.mxu0 %v11202_v35  ;;  %4925 = vmatprep.mubr.bf16.mxu1 %v11202_v35  ;;  %s4447_s26 = scalar_lea.vmem %s11186_s2, %s9912_s17  ;;  %s4455_s16 = scalar_lea.vmem %s11186_s2, %s9922_s27  ;;  %v7715_v28 = vld [vmem:[%s11190_s6 + $0x1ec] ss:$16 sps:$4 sm:$0xff]  }
 0x191   :  { %v7698_v8 = vld [vmem:[%s11190_s6 + $0x1a0] ss:$16 sps:$4 sm:$0xff]   ;;  %4433 = vst [vmem:[#allocation2 + $0x29] sm:$0x1] %v4432_v7  ;;  %5159 = vmatpush1.bf16.msra.mxu1 %v7701_v11  ;;  %s9991_s1 = sld [smem:[#allocation9 + $0x36]]  ;;  %s10000_s22 = sld [smem:[#allocation9 + $0x37]] }
 0x192   :  { %v4436_v12 = vld [vmem:[%s4435_s23] sm:$0x1]  ;;  %5118 = vmatpush1.bf16.msra.mxu0 %v7698_v8  ;;  %5160 = vmatprep.subr.bf16.mxu1 %v7709_v17  ;;  %s4471_s17 = scalar_lea.vmem %s11186_s2, %s9953_s15  ;;  %s4475_s24 = scalar_lea.vmem %s11186_s2, %s9968_s21  ;;  %v10029_v32 = vld [vmem:[%s11191_s7 + $0x4] ss:$16 sps:$4 sm:$0xff]   ;;  %v10044_v34 = vld [vmem:[%s11191_s7 + $0xc] ss:$16 sps:$4 sm:$0xff]  }
 0x193   :  { %4437 = vst [vmem:[#allocation2 + $0x2a] sm:$0x1] %v4436_v12  ;;  %v4440_v14 = vld [vmem:[%s4439_s0] sm:$0x1]  ;;  %s4451_s0 = scalar_lea.vmem %s11186_s2, %s9917_s28  ;;  %5119 = vmatprep.subr.bf16.mxu0 %v7706_v13  ;;  %s10018_s11 = sld [smem:[#allocation9 + $0x39]]  ;;  %11269 = vst [vmem:[#allocation17_spill] sm:$0xff] %v10029_v32 }
 0x194   :  { %v7704_v15 = vld [vmem:[%s11190_s6 + $0x1c0] ss:$16 sps:$4 sm:$0xff]   ;;  %4441 = vst [vmem:[#allocation2 + $0x2b] sm:$0x1] %v4440_v14  ;;  %s4479_s10 = scalar_lea.vmem %s11186_s2, %s9974_s13  ;;  %s10031_s21 = sld [smem:[#allocation9 + $0x3b]]  ;;  %11270 = vst [vmem:[#allocation18_spill] sm:$0xff] %v10044_v34 }
 0x195   :  { %v4444_v18 = vld [vmem:[%s4443_s9] sm:$0x1]  ;;  %5161 = vmatpush1.bf16.msra.mxu1 %v7707_v16  ;;  %s10033_s23 = sld [smem:[#allocation9 + $0x3c]]  ;;  %s10050_s25 = sld [smem:[#allocation9 + $0x3e]]  ;;  %v10130_v61 = vld [vmem:[%s11191_s7 + $0x8] ss:$16 sps:$4 sm:$0xff]  }
 0x196   :  { %4445 = vst [vmem:[#allocation2 + $0x2c] sm:$0x1] %v4444_v18  ;;  %v4448_v19 = vld [vmem:[%s4447_s26] sm:$0x1]  ;;  %s4467_s26 = scalar_lea.vmem %s11186_s2, %s9942_s19  ;;  %5120 = vmatpush1.bf16.msra.mxu0 %v7704_v15  ;;  %5162 = vmatprep.subr.bf16.mxu1 %v7715_v28  ;;  %s10064_s28 = sld [smem:[#allocation8]]  ;;  %v4622_v3 = vld [vmem:[%s11187_s3 + $0x10] sm:$0xff] }
 0x197   :  { %4449 = vst [vmem:[#allocation2 + $0x2d] sm:$0x1] %v4448_v19  ;;  %v4452_v20 = vld [vmem:[%s4451_s0] sm:$0x1]  ;;  %5121 = vmatprep.subr.bf16.mxu0 %v7712_v21  ;;  %s4483_s13 = scalar_lea.vmem %s11186_s2, %s9991_s1  ;;  %s10070_s27 = sld [smem:[#allocation8 + $0x1]]  ;;  %5233 = vperm.xlu1 %7619, %v4622_v3   ;;  %v4623_v9 = vld [vmem:[%s11187_s3 + $0x18] sm:$0xff] }
 0x198   :  { %4453 = vst [vmem:[#allocation2 + $0x2e] sm:$0x1] %v4452_v20  ;;  %v4456_v22 = vld [vmem:[%s4455_s16] sm:$0x1]  ;;  %s10009_s16 = sld [smem:[#allocation9 + $0x38]]  ;;  %s7397_s9 = sld [smem:[#allocation8 + $0x3]] }
 0x199   :  { %v4460_v23 = vld [vmem:[%s4459_s20] sm:$0x1]  ;;  %4457 = vst [vmem:[#allocation2 + $0x2f] sm:$0x1] %v4456_v22  ;;  %5163 = vmatpush1.bf16.msra.mxu1 %v7713_v26  ;;  %s10057_s20 = sld [smem:[#allocation9 + $0x3f]]  ;;  %s4495_s15 = scalar_lea.vmem %s11186_s2, %s10018_s11  ;;  %v4621_v10 = vld [vmem:[%s11187_s3 + $0x8] sm:$0xff] }
 0x19a   :  { %v7710_v24 = vld [vmem:[%s11190_s6 + $0x1e0] ss:$16 sps:$4 sm:$0xff]   ;;  %4461 = vst [vmem:[#allocation2 + $0x30] sm:$0x1] %v4460_v23  ;;  %5583 = vmatprep.subr.bf16.mxu1 %v10044_v34  ;;  %s4503_s11 = scalar_lea.vmem %s11186_s2, %s10031_s21  ;;  %v10135_v62 = vld [vmem:[%s11191_s7 + $0x24] ss:$16 sps:$4 sm:$0xff]  }
 0x19b   :  { %v4464_v25 = vld [vmem:[%s4463_s12] sm:$0x1]  ;;  %s10024_s12 = sld [smem:[#allocation9 + $0x3a]]  ;;  %5122 = vmatpush1.bf16.msra.mxu0 %v7710_v24  ;;  %s4507_s0 = scalar_lea.vmem %s11186_s2, %s10033_s23  ;;  %v10142_v0 = vld [vmem:[%s11191_s7 + $0x2c] ss:$16 sps:$4 sm:$0xff]   ;;  %5238 = vperm.xlu1 %7619, %v4623_v9   ;;  %v4626_v22 = vld [vmem:[%s11187_s3 + $0x30] sm:$0xff] }
 0x19c   :  { %4465 = vst [vmem:[#allocation2 + $0x31] sm:$0x1] %v4464_v25  ;;  %v4468_v27 = vld [vmem:[%s4467_s26] sm:$0x1]  ;;  %s10039_s26 = sld [smem:[#allocation9 + $0x3d]]  ;;  %5542 = vmatprep.subr.bf16.mxu0 %v10029_v32  ;;  %s4515_s23 = scalar_lea.vmem %s11186_s2, %s10050_s25  ;;  %v4625_v15 = vld [vmem:[%s11187_s3 + $0x28] sm:$0xff] }
 0x19d   :  { %4469 = vst [vmem:[#allocation2 + $0x32] sm:$0x1] %v4468_v27  ;;  %v4472_v29 = vld [vmem:[%s4471_s17] sm:$0x1]  ;;  %s4487_s17 = scalar_lea.vmem %s11186_s2, %s10000_s22  ;;  %s4239_s25 = scalar_lea.vmem %s11186_s2, %s10070_s27  ;;  %v10156_v2 = vld [vmem:[%s11191_s7 + $0x28] ss:$16 sps:$4 sm:$0xff]  }
 0x19e   :  { %v4632_v30 = vld [vmem:[#allocation2 + $0x20] sm:$0xff]  ;;  %4473 = vst [vmem:[#allocation2 + $0x33] sm:$0x1] %v4472_v29  ;;  %s4491_s19 = scalar_lea.vmem %s11186_s2, %s10009_s16  ;;  %s4235_s16 = scalar_lea.vmem %s11186_s2, %s10064_s28  ;;  %v10174_v6 = vld [vmem:[%s11191_s7 + $0x4c] ss:$16 sps:$4 sm:$0xff]  }
 0x19f   :  { %v4476_v31 = vld [vmem:[%s4475_s24] sm:$0x1]  ;;  %s4519_s24 = scalar_lea.vmem %s11186_s2, %s10057_s20  ;;  %s4247_s28 = scalar_lea.vmem %s11186_s2, %s7397_s9  ;;  %v10169_v5 = vld [vmem:[%s11191_s7 + $0x44] ss:$16 sps:$4 sm:$0xff]   ;;  %v10188_v8 = vld [vmem:[%s11191_s7 + $0x48] ss:$16 sps:$4 sm:$0xff]   ;;  %5248 = vperm.xlu1 %7619, %v4625_v15  }
 0x1a0   :  { %4477 = vst [vmem:[#allocation2 + $0x34] sm:$0x1] %v4476_v31  ;;  %v4480_v33 = vld [vmem:[%s4479_s10] sm:$0x1]  ;;  %v4633_v37 = vld [vmem:[#allocation2 + $0x28] sm:$0xff]  ;;  %v4627_v21 = vld [vmem:[%s11187_s3 + $0x38] sm:$0xff] }
 0x1a1   :  { %4481 = vst [vmem:[#allocation2 + $0x35] sm:$0x1] %v4480_v33  ;;  %v4484_v36 = vld [vmem:[%s4483_s13] sm:$0x1]  ;;  %v4638_v39 = vpack.c.bf16 %v4633_v37, %v4632_v30  ;;  %s4499_s6 = scalar_lea.vmem %s11186_s2, %s10024_s12  ;;  %s7401_s13 = sld [smem:[#allocation8 + $0x7]] }
 0x1a2   :  { %4485 = vst [vmem:[#allocation2 + $0x36] sm:$0x1] %v4484_v36  ;;  %v4488_v38 = vld [vmem:[%s4487_s17] sm:$0x1]  ;;  %s4511_s30 = scalar_lea.vmem %s11186_s2, %s10039_s26  ;;  %s7396_s17 = sld [smem:[#allocation8 + $0x2]] }
 0x1a3   :  { %4489 = vst [vmem:[#allocation2 + $0x37] sm:$0x1] %v4488_v38  ;;  %v4492_v40 = vld [vmem:[%s4491_s19] sm:$0x1]  ;;  %4853 = vmatmul.mubr.bf16.gmra.mrb[8].mxu0 %v4638_v39  ;;  %4926 = vmatmul.mubr.bf16.gmra.mrb[8].mxu1 %v4638_v39  ;;  %v10201_v11 = vld [vmem:[%s11191_s7 + $0x64] ss:$16 sps:$4 sm:$0xff]  }
 0x1a4   :  { %4493 = vst [vmem:[#allocation2 + $0x38] sm:$0x1] %v4492_v40  ;;  %v4496_v41 = vld [vmem:[%s4495_s15] sm:$0x1]  ;;  %4862 = vmatprep.mubr.bf16.mxu0 %v11202_v35  ;;  %4935 = vmatprep.mubr.bf16.mxu1 %v11202_v35  ;;  %s7398_s15 = sld [smem:[#allocation8 + $0x4]]  ;;  %11272 = vst [vmem:[#allocation20_spill] sm:$0xff] %v10201_v11 }
 0x1a5   :  { %4497 = vst [vmem:[#allocation2 + $0x39] sm:$0x1] %v4496_v41  ;;  %v4500_v42 = vld [vmem:[%s4499_s6] sm:$0x1]  ;;  %s7399_s6 = sld [smem:[#allocation8 + $0x5]]  ;;  %5258 = vperm.xlu1 %7619, %v4627_v21  }
 0x1a6   :  { %4501 = vst [vmem:[#allocation2 + $0x3a] sm:$0x1] %v4500_v42  ;;  %v4504_v43 = vld [vmem:[%s4503_s11] sm:$0x1]  ;;  %s7400_s11 = sld [smem:[#allocation8 + $0x6]] }
 0x1a7   :  { %v4508_v44 = vld [vmem:[%s4507_s0] sm:$0x1]  ;;  %4505 = vst [vmem:[#allocation2 + $0x3b] sm:$0x1] %v4504_v43  ;;  %v10206_v12 = vld [vmem:[%s11191_s7 + $0x6c] ss:$16 sps:$4 sm:$0xff]  }
 0x1a8   :  { %4509 = vst [vmem:[#allocation2 + $0x3c] sm:$0x1] %v4508_v44  ;;  %v4512_v45 = vld [vmem:[%s4511_s30] sm:$0x1]  ;;  %s4243_s0 = scalar_lea.vmem %s11186_s2, %s7396_s17  ;;  %11273 = vst [vmem:[#allocation21_spill] sm:$0xff] %v10206_v12 }
 0x1a9   :  { %4513 = vst [vmem:[#allocation2 + $0x3d] sm:$0x1] %v4512_v45  ;;  %v4516_v46 = vld [vmem:[%s4515_s23] sm:$0x1]  ;;  %v10218_v14 = vld [vmem:[%s11191_s7 + $0x68] ss:$16 sps:$4 sm:$0xff]  }
 0x1aa   :  { %4517 = vst [vmem:[#allocation2 + $0x3e] sm:$0x1] %v4516_v46  ;;  %v4520_v47 = vld [vmem:[%s4519_s24] sm:$0x1]  ;;  %s4251_s27 = scalar_lea.vmem %s11186_s2, %s7398_s15  ;;  %v4634_v52 = vld [vmem:[#allocation2 + $0x30] sm:$0xff]  ;;  %s4263_s15 = scalar_lea.vmem %s11186_s2, %s7401_s13  ;;  %11275 = vst [vmem:[#allocation23_spill] sm:$0xff] %v10218_v14 }
 0x1ab   :  { %4521 = vst [vmem:[#allocation2 + $0x3f] sm:$0x1] %v4520_v47  ;;  %v4236_v48 = vld [vmem:[%s4235_s16] sm:$0x1]  ;;  %s4255_s19 = scalar_lea.vmem %s11186_s2, %s7399_s6  ;;  %v10231_v17 = vld [vmem:[%s11191_s7 + $0x84] ss:$16 sps:$4 sm:$0xff]  }
 0x1ac   :  { %4237 = vst [vmem:[#allocation3] sm:$0x1] %v4236_v48  ;;  %v4240_v49 = vld [vmem:[%s4239_s25] sm:$0x1]  ;;  %s4259_s24 = scalar_lea.vmem %s11186_s2, %s7400_s11  ;;  %11276 = vst [vmem:[#allocation24_spill] sm:$0xff] %v10231_v17 }
 0x1ad   :  { %4241 = vst [vmem:[#allocation3 + $0x1] sm:$0x1] %v4240_v49  ;;  %v4244_v50 = vld [vmem:[%s4243_s0] sm:$0x1]  ;;  %v10236_v18 = vld [vmem:[%s11191_s7 + $0x8c] ss:$16 sps:$4 sm:$0xff]  }
 0x1ae   :  { %4245 = vst [vmem:[#allocation3 + $0x2] sm:$0x1] %v4244_v50  ;;  %v4248_v51 = vld [vmem:[%s4247_s28] sm:$0x1]  ;;  %11277 = vst [vmem:[#allocation25_spill] sm:$0xff] %v10236_v18 }
 0x1af   :  { %4249 = vst [vmem:[#allocation3 + $0x3] sm:$0x1] %v4248_v51  ;;  %v4252_v53 = vld [vmem:[%s4251_s27] sm:$0x1]  ;;  %v10248_v20 = vld [vmem:[%s11191_s7 + $0x88] ss:$16 sps:$4 sm:$0xff]  }
 0x1b0   :  { %4253 = vst [vmem:[#allocation3 + $0x4] sm:$0x1] %v4252_v53  ;;  %v4256_v54 = vld [vmem:[%s4255_s19] sm:$0x1]  ;;  %11279 = vst [vmem:[#allocation27_spill] sm:$0xff] %v10248_v20 }
 0x1b1   :  { %4257 = vst [vmem:[#allocation3 + $0x5] sm:$0x1] %v4256_v54  ;;  %v4260_v56 = vld [vmem:[%s4259_s24] sm:$0x1]  ;;  %v10261_v23 = vld [vmem:[%s11191_s7 + $0xa4] ss:$16 sps:$4 sm:$0xff]  }
 0x1b2   :  { %v4635_v55 = vld [vmem:[#allocation2 + $0x38] sm:$0xff]  ;;  %4261 = vst [vmem:[#allocation3 + $0x6] sm:$0x1] %v4260_v56  ;;  %v4264_v58 = vld [vmem:[%s4263_s15] sm:$0x1]  ;;  %11280 = vst [vmem:[#allocation28_spill] sm:$0xff] %v10261_v23 }
 0x1b3   :  { %v4639_v57 = vpack.c.bf16 %v4635_v55, %v4634_v52  ;;  %4265 = vst [vmem:[#allocation3 + $0x7] sm:$0x1] %v4264_v58  ;;  %v10125_v59 = vld [vmem:[%s11191_s7] ss:$16 sps:$4 sm:$0xff]   ;;  %v10266_v24 = vld [vmem:[%s11191_s7 + $0xac] ss:$16 sps:$4 sm:$0xff]  }
 0x1b4   :  { %v10149_v1 = vld [vmem:[%s11191_s7 + $0x20] ss:$16 sps:$4 sm:$0xff]   ;;  %11281 = vst [vmem:[#allocation29_spill] sm:$0xff] %v10266_v24  ;;  %v10278_v26 = vld [vmem:[%s11191_s7 + $0xa8] ss:$16 sps:$4 sm:$0xff]  }
 0x1b5   :  { %4863 = vmatmul.mubr.bf16.gmra.mrb[12].mxu0 %v4639_v57  ;;  %4936 = vmatmul.mubr.bf16.gmra.mrb[12].mxu1 %v4639_v57  ;;  %v4620_v4 = vld [vmem:[%s11187_s3] sm:$0xff]  ;;  %11283 = vst [vmem:[#allocation31_spill] sm:$0xff] %v10278_v26  ;;  %v10293_v29 = vld [vmem:[%s11191_s7 + $0xcc] ss:$16 sps:$4 sm:$0xff]   ;;  %v10305_v31 = vld [vmem:[%s11191_s7 + $0xc8] ss:$16 sps:$4 sm:$0xff]  }
 0x1b6   :  { %5139 = vmatprep.mubr.bf16.mxu0 %v11202_v35  ;;  %5180 = vmatprep.mubr.bf16.mxu1 %v11202_v35  ;;  %v10181_v7 = vld [vmem:[%s11191_s7 + $0x40] ss:$16 sps:$4 sm:$0xff]   ;;  %v10288_v28 = vld [vmem:[%s11191_s7 + $0xc4] ss:$16 sps:$4 sm:$0xff]   ;;  %11285 = vst [vmem:[#allocation33_spill] sm:$0xff] %v10293_v29  ;;  %11287 = vst [vmem:[#allocation35_spill] sm:$0xff] %v10305_v31 }
 0x1b7   :  { %5223 = vperm.xlu0 %7618, %v4620_v4   ;;  %v10211_v13 = vld [vmem:[%s11191_s7 + $0x60] ss:$16 sps:$4 sm:$0xff]   ;;  %11284 = vst [vmem:[#allocation32_spill] sm:$0xff] %v10288_v28  ;;  %v10312_v33 = vld [vmem:[%s11191_s7 + $0xe4] ss:$16 sps:$4 sm:$0xff]  }
 0x1b8   :  { %11274 = vst [vmem:[#allocation22_spill] sm:$0xff] %v10211_v13  ;;  %v4624_v16 = vld [vmem:[%s11187_s3 + $0x20] sm:$0xff]  ;;  %11288 = vst [vmem:[#allocation36_spill] sm:$0xff] %v10312_v33  ;;  %v10317_v36 = vld [vmem:[%s11191_s7 + $0xec] ss:$16 sps:$4 sm:$0xff]  }
 0x1b9   :  { %v10241_v19 = vld [vmem:[%s11191_s7 + $0x80] ss:$16 sps:$4 sm:$0xff]   ;;  %11289 = vst [vmem:[#allocation37_spill] sm:$0xff] %v10317_v36  ;;  %v10329_v38 = vld [vmem:[%s11191_s7 + $0xe8] ss:$16 sps:$4 sm:$0xff]  }
 0x1ba   :  { %v4522_v60 = vld [vmem:[#allocation3] sm:$0xff]  ;;  %11278 = vst [vmem:[#allocation26_spill] sm:$0xff] %v10241_v19  ;;  %11291 = vst [vmem:[#allocation39_spill] sm:$0xff] %v10329_v38 }
 0x1bb   :  { %v10137_v63 = vpack.c.bf16 %v4522_v60, %v4522_v60  ;;  %5228 = vperm.xlu0 %7618, %v4621_v10   ;;  %v10273_v25 = vld [vmem:[%s11191_s7 + $0xa0] ss:$16 sps:$4 sm:$0xff]   ;;  %v5294_v10 = vlaneseq }
 0x1bc   :  { %11282 = vst [vmem:[#allocation30_spill] sm:$0xff] %v10273_v25  ;;  %v6480_v27 = vld [vmem:[%s11188_s4] sm:$0xff] }
 0x1bd   :  { %11271 = vst [vmem:[#allocation19_spill] sm:$0xff] %v10137_v63  ;;  %5140 = vmatmul.mubr.bf16.vlgmr.msra.gmra.mrb[16].mxu0 %v10137_v63  ;;  %5181 = vmatmul.mubr.bf16.vlgmr.msra.gmra.mrb[16].mxu1 %v10137_v63  ;;  %v10300_v30 = vld [vmem:[%s11191_s7 + $0xc0] ss:$16 sps:$4 sm:$0xff]  }
 0x1be   :  { %5543 = vmatpush1.bf16.msra.mxu0 %v10125_v59  ;;  %5584 = vmatpush1.bf16.msra.mxu1 %v10130_v61  ;;  %11286 = vst [vmem:[#allocation34_spill] sm:$0xff] %v10300_v30  ;;  %v10324_v37 = vld [vmem:[%s11191_s7 + $0xe0] ss:$16 sps:$4 sm:$0xff]  }
 0x1bf   :  { %5544 = vmatprep.subr.bf16.mxu0 %v10135_v62  ;;  %5585 = vmatprep.subr.bf16.mxu1 %v10142_v0  ;;  %11290 = vst [vmem:[#allocation38_spill] sm:$0xff] %v10324_v37 }
 0x1c0   :  { %5574 = vmatprep.mubr.bf16.mxu0 %v11202_v35  ;;  %5615 = vmatprep.mubr.bf16.mxu1 %v11202_v35 }
 0x1c1   :  { %5243 = vperm.xlu0 %7618, %v4624_v16  }
 0x1c2   :  { %5545 = vmatpush1.bf16.msra.mxu0 %v10149_v1  ;;  %5586 = vmatpush1.bf16.msra.mxu1 %v10156_v2 }
 0x1c3   :  { %5546 = vmatprep.subr.bf16.mxu0 %v10169_v5  ;;  %5587 = vmatprep.subr.bf16.mxu1 %v10174_v6 }
 0x1c5   :  { %5253 = vperm.xlu0 %7618, %v4626_v22  }
 0x1c6   :  { %5547 = vmatpush1.bf16.msra.mxu0 %v10181_v7  ;;  %5588 = vmatpush1.bf16.msra.mxu1 %v10188_v8 }
 0x1c7   :  { %5548 = vmatprep.subr.bf16.mxu0 %v10201_v11  ;;  %5589 = vmatprep.subr.bf16.mxu1 %v10206_v12 }
 0x1c9   :  { %6483 = vperm.xlu0 %7618, %v6480_v27  }
 0x1ca   :  { %5549 = vmatpush1.bf16.msra.mxu0 %v10211_v13  ;;  %5590 = vmatpush1.bf16.msra.mxu1 %v10218_v14 }
 0x1cb   :  { %5550 = vmatprep.subr.bf16.mxu0 %v10231_v17  ;;  %5591 = vmatprep.subr.bf16.mxu1 %v10236_v18 }
 0x1ce   :  { %5551 = vmatpush1.bf16.msra.mxu0 %v10241_v19  ;;  %5592 = vmatpush1.bf16.msra.mxu1 %v10248_v20 }
 0x1cf   :  { %5552 = vmatprep.subr.bf16.mxu0 %v10261_v23  ;;  %5593 = vmatprep.subr.bf16.mxu1 %v10266_v24 }
 0x1d2   :  { %5553 = vmatpush1.bf16.msra.mxu0 %v10273_v25  ;;  %5594 = vmatpush1.bf16.msra.mxu1 %v10278_v26 }
 0x1d3   :  { %5554 = vmatprep.subr.bf16.mxu0 %v10288_v28  ;;  %5595 = vmatprep.subr.bf16.mxu1 %v10293_v29 }
 0x1d6   :  { %5555 = vmatpush1.bf16.msra.mxu0 %v10300_v30  ;;  %5596 = vmatpush1.bf16.msra.mxu1 %v10305_v31 }
 0x1d7   :  { %5556 = vmatprep.subr.bf16.mxu0 %v10312_v33  ;;  %5597 = vmatprep.subr.bf16.mxu1 %v10317_v36 }
 0x1da   :  { %5557 = vmatpush1.bf16.msra.mxu0 %v10324_v37  ;;  %5598 = vmatpush1.bf16.msra.mxu1 %v10329_v38 }
 0x1db   :  { %5660 = vmatprep.subr.bf16.mxu0 %v10029_v32  ;;  %5701 = vmatprep.subr.bf16.mxu1 %v10044_v34 }
 0x1dd   :  { %5575 = vmatmul.mubr.bf16.vlgmr.msra.gmra.mrb[20].mxu0 %v11202_v35  ;;  %5616 = vmatmul.mubr.bf16.vlgmr.msra.gmra.mrb[20].mxu1 %v11202_v35 }
 0x1de   :  { %5661 = vmatpush1.bf16.msra.mxu0 %v10125_v59  ;;  %5702 = vmatpush1.bf16.msra.mxu1 %v10130_v61 }
 0x1df   :  { %5662 = vmatprep.subr.bf16.mxu0 %v10135_v62  ;;  %5703 = vmatprep.subr.bf16.mxu1 %v10142_v0 }
 0x1e0   :  { %5692 = vmatprep.mubr.bf16.mxu0 %v11202_v35  ;;  %5733 = vmatprep.mubr.bf16.mxu1 %v11202_v35  ;;  %v10415_v35 = vshrl.u32 %v5294_v10, 7 }
 0x1e2   :  { %5663 = vmatpush1.bf16.msra.mxu0 %v10149_v1  ;;  %5704 = vmatpush1.bf16.msra.mxu1 %v10156_v2  ;;  %11292 = vst [vmem:[#allocation40_spill] sm:$0xff] %v10415_v35  ;;  %v10435_v10 = vsub.s32 3, %v10415_v35 }
 0x1e3   :  { %5664 = vmatprep.subr.bf16.mxu0 %v10169_v5  ;;  %5705 = vmatprep.subr.bf16.mxu1 %v10174_v6 }
 0x1e4   :  { %11296 = vst [vmem:[#allocation44_spill] sm:$0xff] %v10435_v10 }
 0x1e6   :  { %5665 = vmatpush1.bf16.msra.mxu0 %v10181_v7  ;;  %5706 = vmatpush1.bf16.msra.mxu1 %v10188_v8 }
 0x1e7   :  { %5666 = vmatprep.subr.bf16.mxu0 %v10201_v11  ;;  %5707 = vmatprep.subr.bf16.mxu1 %v10206_v12 }
 0x1ea   :  { %5667 = vmatpush1.bf16.msra.mxu0 %v10211_v13  ;;  %5708 = vmatpush1.bf16.msra.mxu1 %v10218_v14 }
 0x1eb   :  { %5668 = vmatprep.subr.bf16.mxu0 %v10231_v17  ;;  %5709 = vmatprep.subr.bf16.mxu1 %v10236_v18 }
 0x1ee   :  { %5669 = vmatpush1.bf16.msra.mxu0 %v10241_v19  ;;  %5710 = vmatpush1.bf16.msra.mxu1 %v10248_v20 }
 0x1ef   :  { %5670 = vmatprep.subr.bf16.mxu0 %v10261_v23  ;;  %5711 = vmatprep.subr.bf16.mxu1 %v10266_v24 }
 0x1f2   :  { %5671 = vmatpush1.bf16.msra.mxu0 %v10273_v25  ;;  %5712 = vmatpush1.bf16.msra.mxu1 %v10278_v26 }
 0x1f3   :  { %5672 = vmatprep.subr.bf16.mxu0 %v10288_v28  ;;  %5713 = vmatprep.subr.bf16.mxu1 %v10293_v29 }
 0x1f6   :  { %5673 = vmatpush1.bf16.msra.mxu0 %v10300_v30  ;;  %5714 = vmatpush1.bf16.msra.mxu1 %v10305_v31  ;;  %v4619_v31 = vld [vmem:[%s11192_s8] sm:$0xf] }
 0x1f7   :  { %5674 = vmatprep.subr.bf16.mxu0 %v10312_v33  ;;  %5715 = vmatprep.subr.bf16.mxu1 %v10317_v36  ;;  %v10429_v36 = vsub.s32 2, %v10415_v35  ;;  %v10432_v33 = vsub.s32 1, %v10415_v35  ;;  %v10458_v23 = vrot.slane %v4619_v31, %v10435_v10 }
 0x1f9   :  { %11294 = vst [vmem:[#allocation42_spill] sm:$0xff] %v10429_v36  ;;  %11295 = vst [vmem:[#allocation43_spill] sm:$0xff] %v10432_v33  ;;  %v10452_v24 = vrot.slane %v4619_v31, %v10429_v36 }
 0x1fa   :  { %5675 = vmatpush1.bf16.msra.mxu0 %v10324_v37  ;;  %5716 = vmatpush1.bf16.msra.mxu1 %v10329_v38  ;;  %v10426_v37 = vsub.s32 0, %v10415_v35  ;;  %v10455_v35 = vrot.slane %v4619_v31, %v10432_v33 }
 0x1fb   :  { %5778 = vmatprep.subr.bf16.mxu0 %v10029_v32  ;;  %5819 = vmatprep.subr.bf16.mxu1 %v10044_v34 }
 0x1fc   :  { %11293 = vst [vmem:[#allocation41_spill] sm:$0xff] %v10426_v37  ;;  %v10449_v25 = vrot.slane %v4619_v31, %v10426_v37 }
 0x216   :  { %v10440_v30 = vpop.permute.xlu1 %5233 }
 0x236   :  { %v10405_v15 = vpop.permute.xlu0 %5223 }
 0x23a   :  { %v10442_v29 = vpop.permute.xlu0 %5228 }
 0x24e   :  { %v4834_v39 = vpop.f32.mrb[0].mxu0  ;;  %v4907_v40 = vpop.f32.mrb[0].mxu1 }
 0x24f   :  { %v4836_v41 = vpop.f32.mrb[1].mxu0  ;;  %v4909_v42 = vpop.f32.mrb[1].mxu1 }
 0x250   :  { %v4838_v43 = vpop.f32.mrb[2].mxu0  ;;  %v4911_v44 = vpop.f32.mrb[2].mxu1 }
 0x251   :  { %v4840_v45 = vpop.f32.mrb[3].mxu0  ;;  %v4913_v46 = vpop.f32.mrb[3].mxu1 }
 0x262   :  { %v10373_v47 = vpop.f32.mrb[4].mxu0  ;;  %v10375_v48 = vpop.f32.mrb[4].mxu1 }
 0x263   :  { %v10377_v49 = vpop.f32.mrb[5].mxu0  ;;  %v10379_v50 = vpop.f32.mrb[5].mxu1 }
 0x264   :  { %v10381_v51 = vpop.f32.mrb[6].mxu0  ;;  %v10383_v52 = vpop.f32.mrb[6].mxu1 }
 0x265   :  { %v10385_v53 = vpop.f32.mrb[7].mxu0  ;;  %v10387_v54 = vpop.f32.mrb[7].mxu1 }
 0x276   :  { %v10389_v55 = vpop.f32.mrb[8].mxu0  ;;  %v10391_v56 = vpop.f32.mrb[8].mxu1 }
 0x277   :  { %v10393_v57 = vpop.f32.mrb[9].mxu0  ;;  %v10395_v58 = vpop.f32.mrb[9].mxu1 }
 0x278   :  { %v10397_v60 = vpop.f32.mrb[10].mxu0  ;;  %v10399_v3 = vpop.f32.mrb[10].mxu1 }
 0x279   :  { %v10401_v4 = vpop.f32.mrb[11].mxu0  ;;  %v10403_v9 = vpop.f32.mrb[11].mxu1 }
 0x288   :  { %v10407_v16 = vpop.f32.mrb[12].mxu0  ;;  %v10409_v21 = vpop.f32.mrb[12].mxu1 }
 0x289   :  { %v10411_v22 = vpop.f32.mrb[13].mxu0  ;;  %v10413_v27 = vpop.f32.mrb[13].mxu1 }
 0x28a   :  { %v10417_v63 = vpop.f32.mrb[14].mxu0  ;;  %v10419_v34 = vpop.f32.mrb[14].mxu1 }
 0x28b   :  { %v10421_v32 = vpop.f32.mrb[15].mxu0  ;;  %v10423_v38 = vpop.f32.mrb[15].mxu1 }
 0x290   :  { %v10444_v28 = vpop.f32.mrb[16].mxu0  ;;  %v10446_v26 = vpop.f32.mrb[16].mxu1 }
 0x291   :  { %v10460_v20 = vpop.f32.mrb[17].mxu0  ;;  %v10462_v19 = vpop.f32.mrb[17].mxu1  ;;  %v10465_v18 = vadd.f32 %v10444_v28, %v4834_v39  ;;  %v10468_v17 = vadd.f32 %v10446_v26, %v4907_v40  ;;  %v5193_v37 = vadd.f32 %v10444_v28, %v4838_v43  ;;  %v5195_v36 = vadd.f32 %v10446_v26, %v4911_v44 }
 0x292   :  { %v5145_v14 = vpop.f32.mrb[18].mxu0  ;;  %v5186_v33 = vpop.f32.mrb[18].mxu1  ;;  %v10473_v13 = vadd.f32 %v10460_v20, %v4836_v41  ;;  %v10476_v31 = vadd.f32 %v10462_v19, %v4909_v42  ;;  %v5194_v10 = vadd.f32 %v10460_v20, %v4840_v45  ;;  %v5196_v39 = vadd.f32 %v10462_v19, %v4913_v46 }
 0x293   :  { %v5146_v12 = vpop.f32.mrb[19].mxu0  ;;  %v5187_v11 = vpop.f32.mrb[19].mxu1  ;;  %v5265_v40 = vmul.f32 %v10442_v29, %v5193_v37  ;;  %v5267_v43 = vmul.f32 %v10442_v29, %v5195_v36  ;;  %v5197_v36 = vadd.f32 %v10444_v28, %v10373_v47  ;;  %v5199_v37 = vadd.f32 %v10446_v26, %v10375_v48 }
 0x294   :  { %v5266_v44 = vmul.f32 %v10442_v29, %v5194_v10  ;;  %v5268_v14 = vmul.f32 %v10442_v29, %v5196_v39  ;;  %v10496_v11 = vpop.permute.xlu1 %5238  ;;  %v5198_v45 = vadd.f32 %v10460_v20, %v10377_v49  ;;  %v5200_v46 = vadd.f32 %v10462_v19, %v10379_v50 }
 0x295   :  { %v10485_v33 = vadd.f32 %v10449_v25, %v5265_v40  ;;  %v10488_v41 = vadd.f32 %v10452_v24, %v5267_v43  ;;  %11297 = vst [vmem:[#allocation45_spill] sm:$0xff] %v10496_v11  ;;  %v5201_v10 = vadd.f32 %v10444_v28, %v10381_v51  ;;  %v5203_v39 = vadd.f32 %v10446_v26, %v10383_v52 }
 0x296   :  { %v10491_v42 = vadd.f32 %v10455_v35, %v5266_v44  ;;  %v10494_v12 = vadd.f32 %v10458_v23, %v5268_v14  ;;  %v5202_v40 = vadd.f32 %v10460_v20, %v10385_v53  ;;  %v5204_v47 = vadd.f32 %v10462_v19, %v10387_v54 }
 0x297   :  { %v5269_v48 = vmul.f32 %v10440_v30, %v5197_v36  ;;  %v5271_v43 = vmul.f32 %v10440_v30, %v5199_v37  ;;  %v5270_v49 = vmul.f32 %v10440_v30, %v5198_v45  ;;  %v5272_v50 = vmul.f32 %v10440_v30, %v5200_v46  ;;  %v10534_v45 = vpop.permute.xlu0 %5243 }
 0x298   :  { %v5273_v44 = vmul.f32 %v10496_v11, %v5201_v10  ;;  %v5275_v51 = vmul.f32 %v10496_v11, %v5203_v39  ;;  %v5274_v52 = vmul.f32 %v10496_v11, %v5202_v40  ;;  %v5276_v14 = vmul.f32 %v10496_v11, %v5204_v47  ;;  %11298 = vst [vmem:[#allocation46_spill] sm:$0xff] %v10534_v45  ;;  %v10548_v47 = vpop.permute.xlu1 %5248 }
 0x299   :  { %v10523_v53 = vadd.f32 %v10449_v25, %v5269_v48  ;;  %v10526_v54 = vadd.f32 %v10452_v24, %v5271_v43  ;;  %v10529_v36 = vadd.f32 %v10455_v35, %v5270_v49  ;;  %v10532_v37 = vadd.f32 %v10458_v23, %v5272_v50  ;;  %11300 = vst [vmem:[#allocation48_spill] sm:$0xff] %v10548_v47 }
 0x29a   :  { %v10537_v46 = vadd.f32 %v10449_v25, %v5273_v44  ;;  %v10540_v10 = vadd.f32 %v10452_v24, %v5275_v51  ;;  %v10543_v39 = vadd.f32 %v10455_v35, %v5274_v52  ;;  %v10546_v40 = vadd.f32 %v10458_v23, %v5276_v14 }
 0x29b   :  { %v5205_v48 = vadd.f32 %v10444_v28, %v10389_v55  ;;  %v5207_v43 = vadd.f32 %v10446_v26, %v10391_v56  ;;  %v5206_v49 = vadd.f32 %v10460_v20, %v10393_v57  ;;  %v5208_v50 = vadd.f32 %v10462_v19, %v10395_v58 }
 0x29c   :  { %11299 = vst [vmem:[#allocation47_spill] sm:$0xff] %v10546_v40  ;;  %v5209_v44 = vadd.f32 %v10444_v28, %v10397_v60  ;;  %v5211_v51 = vadd.f32 %v10446_v26, %v10399_v3  ;;  %v5210_v52 = vadd.f32 %v10460_v20, %v10401_v4  ;;  %v5212_v55 = vadd.f32 %v10462_v19, %v10403_v9 }
 0x29d   :  { %v5277_v56 = vmul.f32 %v10534_v45, %v5205_v48  ;;  %v5279_v14 = vmul.f32 %v10534_v45, %v5207_v43  ;;  %v5278_v57 = vmul.f32 %v10534_v45, %v5206_v49  ;;  %v5280_v58 = vmul.f32 %v10534_v45, %v5208_v50  ;;  %v10586_v49 = vpop.permute.xlu0 %5253 }
 0x29e   :  { %v5281_v11 = vmul.f32 %v10548_v47, %v5209_v44  ;;  %v5283_v60 = vmul.f32 %v10548_v47, %v5211_v51  ;;  %v5282_v3 = vmul.f32 %v10548_v47, %v5210_v52  ;;  %v5284_v40 = vmul.f32 %v10548_v47, %v5212_v55  ;;  %11305 = vst [vmem:[#allocation53_spill] sm:$0xff] %v10586_v49  ;;  %v10600_v55 = vpop.permute.xlu1 %5258 }
 0x29f   :  { %v10575_v4 = vadd.f32 %v10449_v25, %v5277_v56  ;;  %v10578_v9 = vadd.f32 %v10452_v24, %v5279_v14  ;;  %v10581_v48 = vadd.f32 %v10455_v35, %v5278_v57  ;;  %v10584_v43 = vadd.f32 %v10458_v23, %v5280_v58  ;;  %11310 = vst [vmem:[#allocation58_spill] sm:$0xff] %v10600_v55 }
 0x2a0   :  { %v10589_v50 = vadd.f32 %v10449_v25, %v5281_v11  ;;  %v10592_v44 = vadd.f32 %v10452_v24, %v5283_v60  ;;  %v10595_v51 = vadd.f32 %v10455_v35, %v5282_v3  ;;  %v10598_v52 = vadd.f32 %v10458_v23, %v5284_v40 }
 0x2a1   :  { %11301 = vst [vmem:[#allocation49_spill] sm:$0xff] %v10575_v4  ;;  %11302 = vst [vmem:[#allocation50_spill] sm:$0xff] %v10578_v9  ;;  %v5213_v56 = vadd.f32 %v10444_v28, %v10407_v16  ;;  %v5215_v14 = vadd.f32 %v10446_v26, %v10409_v21  ;;  %v5214_v11 = vadd.f32 %v10460_v20, %v10411_v22 }
 0x2a2   :  { %11303 = vst [vmem:[#allocation51_spill] sm:$0xff] %v10581_v48  ;;  %11304 = vst [vmem:[#allocation52_spill] sm:$0xff] %v10584_v43  ;;  %v5216_v57 = vadd.f32 %v10462_v19, %v10413_v27  ;;  %v5217_v58 = vadd.f32 %v10444_v28, %v10417_v63  ;;  %v5219_v40 = vadd.f32 %v10446_v26, %v10419_v34 }
 0x2a3   :  { %11306 = vst [vmem:[#allocation54_spill] sm:$0xff] %v10589_v50  ;;  %11307 = vst [vmem:[#allocation55_spill] sm:$0xff] %v10592_v44  ;;  %v5218_v60 = vadd.f32 %v10460_v20, %v10421_v32  ;;  %v5220_v16 = vadd.f32 %v10462_v19, %v10423_v38  ;;  %v5285_v21 = vmul.f32 %v10586_v49, %v5213_v56 }
 0x2a4   :  { %11308 = vst [vmem:[#allocation56_spill] sm:$0xff] %v10595_v51  ;;  %11309 = vst [vmem:[#allocation57_spill] sm:$0xff] %v10598_v52  ;;  %v5287_v3 = vmul.f32 %v10586_v49, %v5215_v14  ;;  %v5286_v22 = vmul.f32 %v10586_v49, %v5214_v11  ;;  %v5288_v27 = vmul.f32 %v10586_v49, %v5216_v57 }
 0x2a5   :  { %v5289_v47 = vmul.f32 %v10600_v55, %v5217_v58  ;;  %v5291_v63 = vmul.f32 %v10600_v55, %v5219_v40  ;;  %v5290_v34 = vmul.f32 %v10600_v55, %v5218_v60  ;;  %v5292_v26 = vmul.f32 %v10600_v55, %v5220_v16 }
 0x2a6   :  { %v10627_v32 = vadd.f32 %v10449_v25, %v5285_v21  ;;  %v10630_v19 = vadd.f32 %v10452_v24, %v5287_v3  ;;  %v10633_v20 = vadd.f32 %v10455_v35, %v5286_v22  ;;  %v10636_v28 = vadd.f32 %v10458_v23, %v5288_v27 }
 0x2a7   :  { %v10639_v38 = vadd.f32 %v10449_v25, %v5289_v47  ;;  %v10642_v56 = vadd.f32 %v10452_v24, %v5291_v63  ;;  %v10645_v14 = vadd.f32 %v10455_v35, %v5290_v34  ;;  %v10648_v11 = vadd.f32 %v10458_v23, %v5292_v26 }
 0x2a8   :  { %11311 = vst [vmem:[#allocation59_spill] sm:$0xff] %v10627_v32  ;;  %11312 = vst [vmem:[#allocation60_spill] sm:$0xff] %v10630_v19  ;;  %v5261_v57 = vmul.f32 %v10405_v15, %v10465_v18  ;;  %v5263_v58 = vmul.f32 %v10405_v15, %v10468_v17  ;;  %v5262_v40 = vmul.f32 %v10405_v15, %v10473_v13 }
 0x2a9   :  { %11313 = vst [vmem:[#allocation61_spill] sm:$0xff] %v10633_v20  ;;  %11314 = vst [vmem:[#allocation62_spill] sm:$0xff] %v10636_v28  ;;  %v5264_v47 = vmul.f32 %v10405_v15, %v10476_v31 }
 0x2aa   :  { %11315 = vst [vmem:[#allocation63_spill] sm:$0xff] %v10639_v38  ;;  %11316 = vst [vmem:[#allocation64_spill] sm:$0xff] %v10642_v56  ;;  %v5314_v60 = vadd.f32 %v10449_v25, %v5261_v57  ;;  %v5316_v16 = vadd.f32 %v10452_v24, %v5263_v58  ;;  %v5315_v22 = vadd.f32 %v10455_v35, %v5262_v40 }
 0x2ab   :  { %11317 = vst [vmem:[#allocation65_spill] sm:$0xff] %v10645_v14  ;;  %11318 = vst [vmem:[#allocation66_spill] sm:$0xff] %v10648_v11  ;;  %v5317_v27 = vadd.f32 %v10458_v23, %v5264_v47 }
 0x2b0   :  { %v5576_v21 = vpop.f32.mrb[20].mxu0  ;;  %v5617_v3 = vpop.f32.mrb[20].mxu1 }
 0x2b1   :  { %v5624_v18 = vadd.f32 %v5576_v21, %v5314_v60  ;;  %v5626_v63 = vadd.f32 %v5617_v3, %v5316_v16  ;;  %v5578_v34 = vpop.f32.mrb[21].mxu0  ;;  %v5619_v17 = vpop.f32.mrb[21].mxu1 }
 0x2b2   :  { %v5625_v26 = vadd.f32 %v5578_v34, %v5315_v22  ;;  %v5627_v55 = vadd.f32 %v5619_v17, %v5317_v27  ;;  %v5580_v13 = vpop.f32.mrb[22].mxu0  ;;  %v5621_v11 = vpop.f32.mrb[22].mxu1  ;;  %v11321_v34 = vld [vmem:[#allocation21_spill] sm:$0xff]  ;;  %v11322_v17 = vld [vmem:[#allocation22_spill] sm:$0xff] }
 0x2b3   :  { %v7561_v14 = vmul.f32 -1.442695, %v5624_v18  ;;  %v5581_v31 = vpop.f32.mrb[23].mxu0  ;;  %v5622_v56 = vpop.f32.mrb[23].mxu1  ;;  %v11319_v18 = vmov 0   ;;  %v11324_v13 = vld [vmem:[#allocation24_spill] sm:$0xff] }
 0x2b4   :  { %v7562_v25 = vmul.f32 -1.442695, %v5625_v26  ;;  %v7563_v24 = vmul.f32 -1.442695, %v5627_v55  ;;  %v11323_v26 = vld [vmem:[#allocation23_spill] sm:$0xff]  ;;  %v11325_v31 = vld [vmem:[#allocation25_spill] sm:$0xff] }
 0x2b5   :  { %7764 = vpow2.f32 %v7561_v14 }
 0x2b6   :  { %7766 = vpow2.f32 %v7562_v25  ;;  %v11326_v25 = vld [vmem:[#allocation26_spill] sm:$0xff] }
 0x2b7   :  { %7768 = vpow2.f32 %v7563_v24  ;;  %v11327_v24 = vld [vmem:[#allocation27_spill] sm:$0xff] }
 0x2b8   :  { %7770 = vtanh.f32 %v5626_v63  ;;  %v11320_v63 = vld [vmem:[#allocation20_spill] sm:$0xff] }
 0x2bf   :  { %v7765_v57 = vpop.eup %7764 }
 0x2c0   :  { %v7767_v58 = vpop.eup %7766  ;;  %v5631_v35 = vadd.f32 1.0, %v7765_v57  ;;  %v11328_v57 = vld [vmem:[#allocation28_spill] sm:$0xff] }
 0x2c1   :  { %v5637_v23 = vadd.f32 1.0, %v7767_v58  ;;  %v7769_v40 = vpop.eup %7768  ;;  %v11329_v58 = vld [vmem:[#allocation29_spill] sm:$0xff] }
 0x2c2   :  { %7772 = vrcp.f32 %v5631_v35  ;;  %v7771_v47 = vpop.eup %7770  ;;  %v5644_v21 = vadd.f32 1.0, %v7769_v40  ;;  %v11330_v35 = vld [vmem:[#allocation30_spill] sm:$0xff]  ;;  %v11332_v40 = vld [vmem:[#allocation32_spill] sm:$0xff] }
 0x2c3   :  { %7774 = vrcp.f32 %v5637_v23  ;;  %v11331_v23 = vld [vmem:[#allocation31_spill] sm:$0xff] }
 0x2c4   :  { %7776 = vrcp.f32 %v5644_v21  ;;  %v11337_v21 = vld [vmem:[#allocation37_spill] sm:$0xff] }
 0x2cc   :  { %v7773_v60 = vpop.eup %7772 }
 0x2cd   :  { %v7775_v16 = vpop.eup %7774  ;;  %v5648_v11 = vmul.f32 %v7773_v60, %v7771_v47  ;;  %v11333_v47 = vld [vmem:[#allocation33_spill] sm:$0xff]  ;;  %v11334_v60 = vld [vmem:[#allocation34_spill] sm:$0xff] }
 0x2ce   :  { %v5647_v3 = vmul.f32 0.0, %v7775_v16  ;;  %v7777_v55 = vpop.eup %7776  ;;  %v11335_v16 = vld [vmem:[#allocation35_spill] sm:$0xff] }
 0x2d0   :  { %v10662_v56 = vadd.f32 %v5648_v11, %v5647_v3  ;;  %v11336_v11 = vld [vmem:[#allocation36_spill] sm:$0xff]  ;;  %v11338_v3 = vld [vmem:[#allocation38_spill] sm:$0xff] }
 0x2d2   :  { %7778 = vtanh.f32 %v10662_v56 }
 0x2dc   :  { %v7779_v14 = vpop.eup %7778 }
 0x2dd   :  { %v10665_v22 = vmul.f32 %v7779_v14, %v7777_v55  ;;  %v11339_v55 = vld [vmem:[#allocation39_spill] sm:$0xff]  ;;  %v11340_v14 = vld [vmem:[#allocation17_spill] sm:$0xff] }
 0x2df   :  { %v5659_v27 = vpack.c.bf16 %v10665_v22, %v10665_v22 }
 0x2e1   :  { %5693 = vmatmul.mubr.bf16.vlgmr.msra.gmra.mrb[24].mxu0 %v5659_v27  ;;  %5734 = vmatmul.mubr.bf16.vlgmr.msra.gmra.mrb[24].mxu1 %v5659_v27  ;;  %v11341_v27 = vld [vmem:[#allocation18_spill] sm:$0xff] }
 0x2e2   :  { %5779 = vmatpush1.bf16.msra.mxu0 %v10125_v59  ;;  %5820 = vmatpush1.bf16.msra.mxu1 %v10130_v61 }
 0x2e3   :  { %5780 = vmatprep.subr.bf16.mxu0 %v10135_v62  ;;  %5821 = vmatprep.subr.bf16.mxu1 %v10142_v0 }
 0x2e4   :  { %5810 = vmatprep.mubr.bf16.mxu0 %v11319_v18  ;;  %5851 = vmatprep.mubr.bf16.mxu1 %v11319_v18 }
 0x2e6   :  { %5781 = vmatpush1.bf16.msra.mxu0 %v10149_v1  ;;  %5822 = vmatpush1.bf16.msra.mxu1 %v10156_v2 }
 0x2e7   :  { %5782 = vmatprep.subr.bf16.mxu0 %v10169_v5  ;;  %5823 = vmatprep.subr.bf16.mxu1 %v10174_v6 }
 0x2ea   :  { %5783 = vmatpush1.bf16.msra.mxu0 %v10181_v7  ;;  %5824 = vmatpush1.bf16.msra.mxu1 %v10188_v8 }
 0x2eb   :  { %5784 = vmatprep.subr.bf16.mxu0 %v11320_v63  ;;  %5825 = vmatprep.subr.bf16.mxu1 %v11321_v34 }
 0x2ee   :  { %5785 = vmatpush1.bf16.msra.mxu0 %v11322_v17  ;;  %5826 = vmatpush1.bf16.msra.mxu1 %v11323_v26 }
 0x2ef   :  { %5786 = vmatprep.subr.bf16.mxu0 %v11324_v13  ;;  %5827 = vmatprep.subr.bf16.mxu1 %v11325_v31 }
 0x2f2   :  { %5787 = vmatpush1.bf16.msra.mxu0 %v11326_v25  ;;  %5828 = vmatpush1.bf16.msra.mxu1 %v11327_v24 }
 0x2f3   :  { %5788 = vmatprep.subr.bf16.mxu0 %v11328_v57  ;;  %5829 = vmatprep.subr.bf16.mxu1 %v11329_v58 }
 0x2f6   :  { %5789 = vmatpush1.bf16.msra.mxu0 %v11330_v35  ;;  %5830 = vmatpush1.bf16.msra.mxu1 %v11331_v23 }
 0x2f7   :  { %5790 = vmatprep.subr.bf16.mxu0 %v11332_v40  ;;  %5831 = vmatprep.subr.bf16.mxu1 %v11333_v47 }
 0x2fa   :  { %5791 = vmatpush1.bf16.msra.mxu0 %v11334_v60  ;;  %5832 = vmatpush1.bf16.msra.mxu1 %v11335_v16 }
 0x2fb   :  { %5792 = vmatprep.subr.bf16.mxu0 %v11336_v11  ;;  %5833 = vmatprep.subr.bf16.mxu1 %v11337_v21 }
 0x2fe   :  { %5793 = vmatpush1.bf16.msra.mxu0 %v11338_v3  ;;  %5834 = vmatpush1.bf16.msra.mxu1 %v11339_v55 }
 0x2ff   :  { %5896 = vmatprep.subr.bf16.mxu0 %v11340_v14  ;;  %5937 = vmatprep.subr.bf16.mxu1 %v11341_v27 }
 0x3b4   :  { %v5694_v38 = vpop.f32.mrb[24].mxu0  ;;  %v5735_v49 = vpop.f32.mrb[24].mxu1 }
 0x3b5   :  { %v5742_v28 = vadd.f32 %v5694_v38, %v10485_v33  ;;  %v5744_v20 = vadd.f32 %v5735_v49, %v10488_v41  ;;  %v5696_v19 = vpop.f32.mrb[25].mxu0  ;;  %v5737_v32 = vpop.f32.mrb[25].mxu1 }
 0x3b6   :  { %v5743_v52 = vadd.f32 %v5696_v19, %v10491_v42  ;;  %v5745_v51 = vadd.f32 %v5737_v32, %v10494_v12  ;;  %v5698_v44 = vpop.f32.mrb[26].mxu0  ;;  %v5739_v50 = vpop.f32.mrb[26].mxu1 }
 0x3b7   :  { %v7564_v45 = vmul.f32 -1.442695, %v5742_v28  ;;  %v5699_v43 = vpop.f32.mrb[27].mxu0  ;;  %v5740_v48 = vpop.f32.mrb[27].mxu1 }
 0x3b8   :  { %v7565_v14 = vmul.f32 -1.442695, %v5743_v52  ;;  %v7566_v27 = vmul.f32 -1.442695, %v5745_v51 }
 0x3b9   :  { %7780 = vpow2.f32 %v7564_v45 }
 0x3ba   :  { %7782 = vpow2.f32 %v7565_v14 }
 0x3bb   :  { %7784 = vpow2.f32 %v7566_v27 }
 0x3bc   :  { %7786 = vtanh.f32 %v5744_v20 }
 0x3c3   :  { %v7781_v9 = vpop.eup %7780 }
 0x3c4   :  { %v7783_v4 = vpop.eup %7782  ;;  %v5749_v33 = vadd.f32 1.0, %v7781_v9 }
 0x3c5   :  { %v5755_v41 = vadd.f32 1.0, %v7783_v4  ;;  %v7785_v42 = vpop.eup %7784  ;;  %v5652_v4 = vmul.f32 %v10665_v22, %v10405_v15  ;;  %v10757_v15 = vld [vmem:[%s11191_s7 + $0xc] ss:$16 sps:$4 sm:$0xff]  }
 0x3c6   :  { %7788 = vrcp.f32 %v5749_v33  ;;  %v7787_v49 = vpop.eup %7786  ;;  %v5762_v32 = vadd.f32 1.0, %v7785_v42 }
 0x3c7   :  { %7790 = vrcp.f32 %v5755_v41 }
 0x3c8   :  { %7792 = vrcp.f32 %v5762_v32 }
 0x3d0   :  { %v7789_v12 = vpop.eup %7788 }
 0x3d1   :  { %v7791_v44 = vpop.eup %7790  ;;  %v5766_v50 = vmul.f32 %v7789_v12, %v7787_v49 }
 0x3d2   :  { %v5765_v48 = vmul.f32 %v7791_v44, %v10662_v56  ;;  %v7793_v45 = vpop.eup %7792 }
 0x3d4   :  { %v10708_v43 = vadd.f32 %v5766_v50, %v5765_v48 }
 0x3d6   :  { %7794 = vtanh.f32 %v10708_v43 }
 0x3e0   :  { %v7795_v9 = vpop.eup %7794 }
 0x3e1   :  { %v5769_v51 = vmul.f32 %v7795_v9, %v7793_v45 }
 0x3e3   :  { %v5770_v52 = vmul.f32 %v5769_v51, %v10442_v29  ;;  %v5777_v19 = vpack.c.bf16 %v5769_v51, %v5769_v51  ;;  %v10751_v29 = vld [vmem:[%s11191_s7 + $0x4] ss:$16 sps:$4 sm:$0xff]  }
 0x3e5   :  { %v10714_v20 = vadd.f32 %v5770_v52, %v5652_v4  ;;  %5811 = vmatmul.mubr.bf16.vlgmr.msra.gmra.mrb[28].mxu0 %v5777_v19  ;;  %5852 = vmatmul.mubr.bf16.vlgmr.msra.gmra.mrb[28].mxu1 %v5777_v19 }
 0x3e6   :  { %5897 = vmatpush1.bf16.msra.mxu0 %v10125_v59  ;;  %5938 = vmatpush1.bf16.msra.mxu1 %v10130_v61 }
 0x3e7   :  { %5898 = vmatprep.subr.bf16.mxu0 %v10135_v62  ;;  %5939 = vmatprep.subr.bf16.mxu1 %v10142_v0 }
 0x3e8   :  { %5928 = vmatprep.mubr.bf16.mxu0 %v11319_v18  ;;  %5969 = vmatprep.mubr.bf16.mxu1 %v11319_v18 }
 0x3ea   :  { %5899 = vmatpush1.bf16.msra.mxu0 %v10149_v1  ;;  %5940 = vmatpush1.bf16.msra.mxu1 %v10156_v2 }
 0x3eb   :  { %5900 = vmatprep.subr.bf16.mxu0 %v10169_v5  ;;  %5941 = vmatprep.subr.bf16.mxu1 %v10174_v6 }
 0x3ee   :  { %5901 = vmatpush1.bf16.msra.mxu0 %v10181_v7  ;;  %5942 = vmatpush1.bf16.msra.mxu1 %v10188_v8 }
 0x3ef   :  { %5902 = vmatprep.subr.bf16.mxu0 %v11320_v63  ;;  %5943 = vmatprep.subr.bf16.mxu1 %v11321_v34 }
 0x3f2   :  { %5903 = vmatpush1.bf16.msra.mxu0 %v11322_v17  ;;  %5944 = vmatpush1.bf16.msra.mxu1 %v11323_v26 }
 0x3f3   :  { %5904 = vmatprep.subr.bf16.mxu0 %v11324_v13  ;;  %5945 = vmatprep.subr.bf16.mxu1 %v11325_v31 }
 0x3f6   :  { %5905 = vmatpush1.bf16.msra.mxu0 %v11326_v25  ;;  %5946 = vmatpush1.bf16.msra.mxu1 %v11327_v24 }
 0x3f7   :  { %5906 = vmatprep.subr.bf16.mxu0 %v11328_v57  ;;  %5947 = vmatprep.subr.bf16.mxu1 %v11329_v58 }
 0x3fa   :  { %5907 = vmatpush1.bf16.msra.mxu0 %v11330_v35  ;;  %5948 = vmatpush1.bf16.msra.mxu1 %v11331_v23 }
 0x3fb   :  { %5908 = vmatprep.subr.bf16.mxu0 %v11332_v40  ;;  %5949 = vmatprep.subr.bf16.mxu1 %v11333_v47 }
 0x3fe   :  { %5909 = vmatpush1.bf16.msra.mxu0 %v11334_v60  ;;  %5950 = vmatpush1.bf16.msra.mxu1 %v11335_v16 }
 0x3ff   :  { %5910 = vmatprep.subr.bf16.mxu0 %v11336_v11  ;;  %5951 = vmatprep.subr.bf16.mxu1 %v11337_v21 }
 0x402   :  { %5911 = vmatpush1.bf16.msra.mxu0 %v11338_v3  ;;  %5952 = vmatpush1.bf16.msra.mxu1 %v11339_v55 }
 0x403   :  { %6014 = vmatprep.subr.bf16.mxu0 %v10751_v29  ;;  %6055 = vmatprep.subr.bf16.mxu1 %v10757_v15 }
 0x4b8   :  { %v5812_v28 = vpop.f32.mrb[28].mxu0  ;;  %v5853_v38 = vpop.f32.mrb[28].mxu1 }
 0x4b9   :  { %v5860_v56 = vadd.f32 %v5812_v28, %v10523_v53  ;;  %v5862_v22 = vadd.f32 %v5853_v38, %v10526_v54  ;;  %v5814_v14 = vpop.f32.mrb[29].mxu0  ;;  %v5855_v27 = vpop.f32.mrb[29].mxu1 }
 0x4ba   :  { %v5861_v33 = vadd.f32 %v5814_v14, %v10529_v36  ;;  %v5863_v41 = vadd.f32 %v5855_v27, %v10532_v37  ;;  %v5816_v42 = vpop.f32.mrb[30].mxu0  ;;  %v5857_v49 = vpop.f32.mrb[30].mxu1 }
 0x4bb   :  { %v7567_v12 = vmul.f32 -1.442695, %v5860_v56  ;;  %v5817_v44 = vpop.f32.mrb[31].mxu0  ;;  %v5858_v50 = vpop.f32.mrb[31].mxu1 }
 0x4bc   :  { %v7568_v32 = vmul.f32 -1.442695, %v5861_v33  ;;  %v7569_v48 = vmul.f32 -1.442695, %v5863_v41  ;;  %v11343_v44 = vld [vmem:[#allocation45_spill] sm:$0xff] }
 0x4bd   :  { %7796 = vpow2.f32 %v7567_v12 }
 0x4be   :  { %7798 = vpow2.f32 %v7568_v32 }
 0x4bf   :  { %7800 = vpow2.f32 %v7569_v48 }
 0x4c0   :  { %7802 = vtanh.f32 %v5862_v22 }
 0x4c7   :  { %v7797_v45 = vpop.eup %7796 }
 0x4c8   :  { %v7799_v9 = vpop.eup %7798  ;;  %v5867_v53 = vadd.f32 1.0, %v7797_v45  ;;  %v10821_v45 = vld [vmem:[%s11191_s7] ss:$16 sps:$4 sm:$0xff]  }
 0x4c9   :  { %v5873_v54 = vadd.f32 1.0, %v7799_v9  ;;  %v7801_v36 = vpop.eup %7800  ;;  %v10827_v9 = vld [vmem:[%s11191_s7 + $0x8] ss:$16 sps:$4 sm:$0xff]  }
 0x4ca   :  { %7804 = vrcp.f32 %v5867_v53  ;;  %v7803_v51 = vpop.eup %7802  ;;  %v5880_v19 = vadd.f32 1.0, %v7801_v36  ;;  %v10833_v53 = vld [vmem:[%s11191_s7 + $0x24] ss:$16 sps:$4 sm:$0xff]   ;;  %v10847_v36 = vld [vmem:[%s11191_s7 + $0x20] ss:$16 sps:$4 sm:$0xff]  }
 0x4cb   :  { %7806 = vrcp.f32 %v5873_v54  ;;  %v10839_v54 = vld [vmem:[%s11191_s7 + $0x2c] ss:$16 sps:$4 sm:$0xff]  }
 0x4cc   :  { %7808 = vrcp.f32 %v5880_v19  ;;  %v10877_v19 = vld [vmem:[%s11191_s7 + $0x48] ss:$16 sps:$4 sm:$0xff]  }
 0x4d4   :  { %v7805_v37 = vpop.eup %7804 }
 0x4d5   :  { %v7807_v4 = vpop.eup %7806  ;;  %v5884_v52 = vmul.f32 %v7805_v37, %v7803_v51  ;;  %v10853_v51 = vld [vmem:[%s11191_s7 + $0x28] ss:$16 sps:$4 sm:$0xff]   ;;  %v10859_v37 = vld [vmem:[%s11191_s7 + $0x44] ss:$16 sps:$4 sm:$0xff]  }
 0x4d6   :  { %v5883_v28 = vmul.f32 %v7807_v4, %v10708_v43  ;;  %v7809_v56 = vpop.eup %7808  ;;  %v10865_v4 = vld [vmem:[%s11191_s7 + $0x4c] ss:$16 sps:$4 sm:$0xff]  }
 0x4d8   :  { %v10765_v38 = vadd.f32 %v5884_v52, %v5883_v28  ;;  %v10871_v52 = vld [vmem:[%s11191_s7 + $0x40] ss:$16 sps:$4 sm:$0xff]   ;;  %v10883_v28 = vld [vmem:[%s11191_s7 + $0x64] ss:$16 sps:$4 sm:$0xff]  }
 0x4da   :  { %7810 = vtanh.f32 %v10765_v38 }
 0x4e4   :  { %v7811_v14 = vpop.eup %7810 }
 0x4e5   :  { %v5887_v27 = vmul.f32 %v7811_v14, %v7809_v56  ;;  %v10895_v56 = vld [vmem:[%s11191_s7 + $0x60] ss:$16 sps:$4 sm:$0xff]   ;;  %v10901_v14 = vld [vmem:[%s11191_s7 + $0x68] ss:$16 sps:$4 sm:$0xff]  }
 0x4e7   :  { %v5888_v22 = vmul.f32 %v5887_v27, %v10440_v30  ;;  %v5895_v33 = vpack.c.bf16 %v5887_v27, %v5887_v27  ;;  %v10907_v27 = vld [vmem:[%s11191_s7 + $0x84] ss:$16 sps:$4 sm:$0xff]  }
 0x4e9   :  { %v10770_v41 = vadd.f32 %v5888_v22, %v10714_v20  ;;  %5929 = vmatmul.mubr.bf16.vlgmr.msra.gmra.mrb[32].mxu0 %v5895_v33  ;;  %5970 = vmatmul.mubr.bf16.vlgmr.msra.gmra.mrb[32].mxu1 %v5895_v33  ;;  %v10913_v22 = vld [vmem:[%s11191_s7 + $0x8c] ss:$16 sps:$4 sm:$0xff]   ;;  %v10919_v33 = vld [vmem:[%s11191_s7 + $0x80] ss:$16 sps:$4 sm:$0xff]  }
 0x4ea   :  { %6015 = vmatpush1.bf16.msra.mxu0 %v10125_v59  ;;  %6056 = vmatpush1.bf16.msra.mxu1 %v10130_v61 }
 0x4eb   :  { %6016 = vmatprep.subr.bf16.mxu0 %v10135_v62  ;;  %6057 = vmatprep.subr.bf16.mxu1 %v10142_v0 }
 0x4ec   :  { %6046 = vmatprep.mubr.bf16.mxu0 %v11319_v18  ;;  %6087 = vmatprep.mubr.bf16.mxu1 %v11319_v18 }
 0x4ee   :  { %6017 = vmatpush1.bf16.msra.mxu0 %v10149_v1  ;;  %6058 = vmatpush1.bf16.msra.mxu1 %v10156_v2 }
 0x4ef   :  { %6018 = vmatprep.subr.bf16.mxu0 %v10169_v5  ;;  %6059 = vmatprep.subr.bf16.mxu1 %v10174_v6  ;;  %v11342_v6 = vld [vmem:[#allocation47_spill] sm:$0xff] }
 0x4f2   :  { %6019 = vmatpush1.bf16.msra.mxu0 %v10181_v7  ;;  %6060 = vmatpush1.bf16.msra.mxu1 %v10188_v8 }
 0x4f3   :  { %6020 = vmatprep.subr.bf16.mxu0 %v11320_v63  ;;  %6061 = vmatprep.subr.bf16.mxu1 %v11321_v34 }
 0x4f6   :  { %6021 = vmatpush1.bf16.msra.mxu0 %v11322_v17  ;;  %6062 = vmatpush1.bf16.msra.mxu1 %v11323_v26 }
 0x4f7   :  { %6022 = vmatprep.subr.bf16.mxu0 %v11324_v13  ;;  %6063 = vmatprep.subr.bf16.mxu1 %v11325_v31 }
 0x4fa   :  { %6023 = vmatpush1.bf16.msra.mxu0 %v11326_v25  ;;  %6064 = vmatpush1.bf16.msra.mxu1 %v11327_v24 }
 0x4fb   :  { %6024 = vmatprep.subr.bf16.mxu0 %v11328_v57  ;;  %6065 = vmatprep.subr.bf16.mxu1 %v11329_v58 }
 0x4fe   :  { %6025 = vmatpush1.bf16.msra.mxu0 %v11330_v35  ;;  %6066 = vmatpush1.bf16.msra.mxu1 %v11331_v23 }
 0x4ff   :  { %6026 = vmatprep.subr.bf16.mxu0 %v11332_v40  ;;  %6067 = vmatprep.subr.bf16.mxu1 %v11333_v47 }
 0x502   :  { %6027 = vmatpush1.bf16.msra.mxu0 %v11334_v60  ;;  %6068 = vmatpush1.bf16.msra.mxu1 %v11335_v16 }
 0x503   :  { %6028 = vmatprep.subr.bf16.mxu0 %v11336_v11  ;;  %6069 = vmatprep.subr.bf16.mxu1 %v11337_v21 }
 0x506   :  { %6029 = vmatpush1.bf16.msra.mxu0 %v11338_v3  ;;  %6070 = vmatpush1.bf16.msra.mxu1 %v11339_v55 }
 0x507   :  { %6132 = vmatprep.subr.bf16.mxu0 %v10751_v29  ;;  %6173 = vmatprep.subr.bf16.mxu1 %v10757_v15 }
 0x5bc   :  { %v5930_v59 = vpop.f32.mrb[32].mxu0  ;;  %v5971_v61 = vpop.f32.mrb[32].mxu1 }
 0x5bd   :  { %v5978_v62 = vadd.f32 %v5930_v59, %v10537_v46  ;;  %v5980_v0 = vadd.f32 %v5971_v61, %v10540_v10  ;;  %v5932_v1 = vpop.f32.mrb[33].mxu0  ;;  %v5973_v2 = vpop.f32.mrb[33].mxu1  ;;  %v10931_v59 = vld [vmem:[%s11191_s7 + $0xa4] ss:$16 sps:$4 sm:$0xff]   ;;  %v10937_v61 = vld [vmem:[%s11191_s7 + $0xac] ss:$16 sps:$4 sm:$0xff]  }
 0x5be   :  { %v5979_v5 = vadd.f32 %v5932_v1, %v10543_v39  ;;  %v5981_v7 = vadd.f32 %v5973_v2, %v11342_v6  ;;  %v5934_v8 = vpop.f32.mrb[34].mxu0  ;;  %v5975_v30 = vpop.f32.mrb[34].mxu1  ;;  %v11344_v2 = vld [vmem:[#allocation49_spill] sm:$0xff] }
 0x5bf   :  { %v7570_v63 = vmul.f32 -1.442695, %v5978_v62  ;;  %v5935_v34 = vpop.f32.mrb[35].mxu0  ;;  %v5976_v17 = vpop.f32.mrb[35].mxu1  ;;  %v10943_v62 = vld [vmem:[%s11191_s7 + $0xa0] ss:$16 sps:$4 sm:$0xff]  }
 0x5c0   :  { %v7571_v26 = vmul.f32 -1.442695, %v5979_v5  ;;  %v7572_v13 = vmul.f32 -1.442695, %v5981_v7  ;;  %v11345_v5 = vld [vmem:[#allocation50_spill] sm:$0xff]  ;;  %v11346_v7 = vld [vmem:[#allocation51_spill] sm:$0xff] }
 0x5c1   :  { %7812 = vpow2.f32 %v7570_v63  ;;  %v11347_v8 = vld [vmem:[#allocation52_spill] sm:$0xff] }
 0x5c2   :  { %7814 = vpow2.f32 %v7571_v26 }
 0x5c3   :  { %7816 = vpow2.f32 %v7572_v13 }
 0x5c4   :  { %7818 = vtanh.f32 %v5980_v0  ;;  %v10949_v0 = vld [vmem:[%s11191_s7 + $0xa8] ss:$16 sps:$4 sm:$0xff]  }
 0x5cb   :  { %v7813_v31 = vpop.eup %7812 }
 0x5cc   :  { %v7815_v25 = vpop.eup %7814  ;;  %v5985_v46 = vadd.f32 1.0, %v7813_v31 }
 0x5cd   :  { %v5991_v10 = vadd.f32 1.0, %v7815_v25  ;;  %v7817_v39 = vpop.eup %7816 }
 0x5ce   :  { %7820 = vrcp.f32 %v5985_v46  ;;  %v7819_v24 = vpop.eup %7818  ;;  %v5998_v23 = vadd.f32 1.0, %v7817_v39 }
 0x5cf   :  { %7822 = vrcp.f32 %v5991_v10 }
 0x5d0   :  { %7824 = vrcp.f32 %v5998_v23 }
 0x5d8   :  { %v7821_v57 = vpop.eup %7820 }
 0x5d9   :  { %v7823_v58 = vpop.eup %7822  ;;  %v6002_v35 = vmul.f32 %v7821_v57, %v7819_v24 }
 0x5da   :  { %v6001_v43 = vmul.f32 %v7823_v58, %v10765_v38  ;;  %v7825_v42 = vpop.eup %7824  ;;  %v10889_v38 = vld [vmem:[%s11191_s7 + $0x6c] ss:$16 sps:$4 sm:$0xff]  }
 0x5dc   :  { %v10811_v20 = vadd.f32 %v6002_v35, %v6001_v43 }
 0x5de   :  { %7826 = vtanh.f32 %v10811_v20 }
 0x5e8   :  { %v7827_v49 = vpop.eup %7826 }
 0x5e9   :  { %v6005_v12 = vmul.f32 %v7827_v49, %v7825_v42 }
 0x5eb   :  { %v6006_v50 = vmul.f32 %v6005_v12, %v11343_v44  ;;  %v6013_v32 = vpack.c.bf16 %v6005_v12, %v6005_v12  ;;  %v11348_v44 = vld [vmem:[#allocation46_spill] sm:$0xff] }
 0x5ed   :  { %v10816_v48 = vadd.f32 %v6006_v50, %v10770_v41  ;;  %6047 = vmatmul.mubr.bf16.vlgmr.msra.gmra.mrb[36].mxu0 %v6013_v32  ;;  %6088 = vmatmul.mubr.bf16.vlgmr.msra.gmra.mrb[36].mxu1 %v6013_v32  ;;  %v10925_v41 = vld [vmem:[%s11191_s7 + $0x88] ss:$16 sps:$4 sm:$0xff]  }
 0x5ee   :  { %6133 = vmatpush1.bf16.msra.mxu0 %v10821_v45  ;;  %6174 = vmatpush1.bf16.msra.mxu1 %v10827_v9 }
 0x5ef   :  { %6134 = vmatprep.subr.bf16.mxu0 %v10833_v53  ;;  %6175 = vmatprep.subr.bf16.mxu1 %v10839_v54 }
 0x5f0   :  { %6164 = vmatprep.mubr.bf16.mxu0 %v11319_v18  ;;  %6205 = vmatprep.mubr.bf16.mxu1 %v11319_v18 }
 0x5f2   :  { %6135 = vmatpush1.bf16.msra.mxu0 %v10847_v36  ;;  %6176 = vmatpush1.bf16.msra.mxu1 %v10853_v51 }
 0x5f3   :  { %6136 = vmatprep.subr.bf16.mxu0 %v10859_v37  ;;  %6177 = vmatprep.subr.bf16.mxu1 %v10865_v4 }
 0x5f6   :  { %6137 = vmatpush1.bf16.msra.mxu0 %v10871_v52  ;;  %6178 = vmatpush1.bf16.msra.mxu1 %v10877_v19 }
 0x5f7   :  { %6138 = vmatprep.subr.bf16.mxu0 %v10883_v28  ;;  %6179 = vmatprep.subr.bf16.mxu1 %v10889_v38 }
 0x5fa   :  { %6139 = vmatpush1.bf16.msra.mxu0 %v10895_v56  ;;  %6180 = vmatpush1.bf16.msra.mxu1 %v10901_v14 }
 0x5fb   :  { %6140 = vmatprep.subr.bf16.mxu0 %v10907_v27  ;;  %6181 = vmatprep.subr.bf16.mxu1 %v10913_v22 }
 0x5fe   :  { %6141 = vmatpush1.bf16.msra.mxu0 %v10919_v33  ;;  %6182 = vmatpush1.bf16.msra.mxu1 %v10925_v41 }
 0x5ff   :  { %6142 = vmatprep.subr.bf16.mxu0 %v10931_v59  ;;  %6183 = vmatprep.subr.bf16.mxu1 %v10937_v61 }
 0x602   :  { %6143 = vmatpush1.bf16.msra.mxu0 %v10943_v62  ;;  %6184 = vmatpush1.bf16.msra.mxu1 %v10949_v0 }
 0x603   :  { %6144 = vmatprep.subr.bf16.mxu0 %v11332_v40  ;;  %6185 = vmatprep.subr.bf16.mxu1 %v11333_v47 }
 0x606   :  { %6145 = vmatpush1.bf16.msra.mxu0 %v11334_v60  ;;  %6186 = vmatpush1.bf16.msra.mxu1 %v11335_v16 }
 0x607   :  { %6146 = vmatprep.subr.bf16.mxu0 %v11336_v11  ;;  %6187 = vmatprep.subr.bf16.mxu1 %v11337_v21 }
 0x60a   :  { %6147 = vmatpush1.bf16.msra.mxu0 %v11338_v3  ;;  %6188 = vmatpush1.bf16.msra.mxu1 %v11339_v55 }
 0x60b   :  { %6250 = vmatprep.subr.bf16.mxu0 %v10751_v29  ;;  %6291 = vmatprep.subr.bf16.mxu1 %v10757_v15 }
 0x6c0   :  { %v6048_v1 = vpop.f32.mrb[36].mxu0  ;;  %v6089_v40 = vpop.f32.mrb[36].mxu1 }
 0x6c1   :  { %v6096_v47 = vadd.f32 %v6048_v1, %v11344_v2  ;;  %v6098_v60 = vadd.f32 %v6089_v40, %v11345_v5  ;;  %v6050_v6 = vpop.f32.mrb[37].mxu0  ;;  %v6091_v16 = vpop.f32.mrb[37].mxu1  ;;  %v11013_v40 = vld [vmem:[%s11191_s7 + $0xc0] ss:$16 sps:$4 sm:$0xff]   ;;  %v11019_v2 = vld [vmem:[%s11191_s7 + $0xc8] ss:$16 sps:$4 sm:$0xff]  }
 0x6c2   :  { %v6097_v11 = vadd.f32 %v6050_v6, %v11346_v7  ;;  %v6099_v21 = vadd.f32 %v6091_v16, %v11347_v8  ;;  %v6052_v30 = vpop.f32.mrb[38].mxu0  ;;  %v6093_v3 = vpop.f32.mrb[38].mxu1  ;;  %v11031_v5 = vld [vmem:[%s11191_s7 + $0xec] ss:$16 sps:$4 sm:$0xff]   ;;  %v11043_v6 = vld [vmem:[%s11191_s7 + $0xe8] ss:$16 sps:$4 sm:$0xff]  }
 0x6c3   :  { %v7573_v63 = vmul.f32 -1.442695, %v6096_v47  ;;  %v6053_v55 = vpop.f32.mrb[39].mxu0  ;;  %v6094_v34 = vpop.f32.mrb[39].mxu1  ;;  %v11025_v47 = vld [vmem:[%s11191_s7 + $0xe4] ss:$16 sps:$4 sm:$0xff]  }
 0x6c4   :  { %v7574_v17 = vmul.f32 -1.442695, %v6097_v11  ;;  %v7575_v26 = vmul.f32 -1.442695, %v6099_v21  ;;  %v11349_v11 = vld [vmem:[#allocation54_spill] sm:$0xff]  ;;  %v11350_v21 = vld [vmem:[#allocation55_spill] sm:$0xff] }
 0x6c5   :  { %7828 = vpow2.f32 %v7573_v63  ;;  %v11351_v55 = vld [vmem:[#allocation56_spill] sm:$0xff] }
 0x6c6   :  { %7830 = vpow2.f32 %v7574_v17  ;;  %v11352_v17 = vld [vmem:[#allocation57_spill] sm:$0xff] }
 0x6c7   :  { %7832 = vpow2.f32 %v7575_v26 }
 0x6c8   :  { %7834 = vtanh.f32 %v6098_v60  ;;  %v11037_v60 = vld [vmem:[%s11191_s7 + $0xe0] ss:$16 sps:$4 sm:$0xff]  }
 0x6cf   :  { %v7829_v13 = vpop.eup %7828 }
 0x6d0   :  { %v7831_v31 = vpop.eup %7830  ;;  %v6103_v25 = vadd.f32 1.0, %v7829_v13 }
 0x6d1   :  { %v6109_v46 = vadd.f32 1.0, %v7831_v31  ;;  %v7833_v10 = vpop.eup %7832 }
 0x6d2   :  { %7836 = vrcp.f32 %v6103_v25  ;;  %v7835_v39 = vpop.eup %7834  ;;  %v6116_v35 = vadd.f32 1.0, %v7833_v10 }
 0x6d3   :  { %7838 = vrcp.f32 %v6109_v46 }
 0x6d4   :  { %7840 = vrcp.f32 %v6116_v35 }
 0x6dc   :  { %v7837_v24 = vpop.eup %7836 }
 0x6dd   :  { %v7839_v57 = vpop.eup %7838  ;;  %v6120_v58 = vmul.f32 %v7837_v24, %v7835_v39 }
 0x6de   :  { %v6119_v23 = vmul.f32 %v7839_v57, %v10811_v20  ;;  %v7841_v42 = vpop.eup %7840  ;;  %v11001_v20 = vld [vmem:[%s11191_s7 + $0xc4] ss:$16 sps:$4 sm:$0xff]  }
 0x6e0   :  { %v10967_v43 = vadd.f32 %v6120_v58, %v6119_v23 }
 0x6e2   :  { %7842 = vtanh.f32 %v10967_v43 }
 0x6ec   :  { %v7843_v49 = vpop.eup %7842 }
 0x6ed   :  { %v6123_v12 = vmul.f32 %v7843_v49, %v7841_v42 }
 0x6ef   :  { %v6124_v50 = vmul.f32 %v6123_v12, %v11348_v44  ;;  %v6131_v32 = vpack.c.bf16 %v6123_v12, %v6123_v12 }
 0x6f1   :  { %v10972_v1 = vadd.f32 %v6124_v50, %v10816_v48  ;;  %6165 = vmatmul.mubr.bf16.vlgmr.msra.gmra.mrb[40].mxu0 %v6131_v32  ;;  %6206 = vmatmul.mubr.bf16.vlgmr.msra.gmra.mrb[40].mxu1 %v6131_v32  ;;  %v11007_v48 = vld [vmem:[%s11191_s7 + $0xcc] ss:$16 sps:$4 sm:$0xff]  }
 0x6f2   :  { %6251 = vmatpush1.bf16.msra.mxu0 %v10821_v45  ;;  %6292 = vmatpush1.bf16.msra.mxu1 %v10827_v9 }
 0x6f3   :  { %6252 = vmatprep.subr.bf16.mxu0 %v10833_v53  ;;  %6293 = vmatprep.subr.bf16.mxu1 %v10839_v54 }
 0x6f4   :  { %6282 = vmatprep.mubr.bf16.mxu0 %v11319_v18  ;;  %6323 = vmatprep.mubr.bf16.mxu1 %v11319_v18 }
 0x6f6   :  { %6253 = vmatpush1.bf16.msra.mxu0 %v10847_v36  ;;  %6294 = vmatpush1.bf16.msra.mxu1 %v10853_v51 }
 0x6f7   :  { %6254 = vmatprep.subr.bf16.mxu0 %v10859_v37  ;;  %6295 = vmatprep.subr.bf16.mxu1 %v10865_v4 }
 0x6fa   :  { %6255 = vmatpush1.bf16.msra.mxu0 %v10871_v52  ;;  %6296 = vmatpush1.bf16.msra.mxu1 %v10877_v19 }
 0x6fb   :  { %6256 = vmatprep.subr.bf16.mxu0 %v10883_v28  ;;  %6297 = vmatprep.subr.bf16.mxu1 %v10889_v38 }
 0x6fe   :  { %6257 = vmatpush1.bf16.msra.mxu0 %v10895_v56  ;;  %6298 = vmatpush1.bf16.msra.mxu1 %v10901_v14 }
 0x6ff   :  { %6258 = vmatprep.subr.bf16.mxu0 %v10907_v27  ;;  %6299 = vmatprep.subr.bf16.mxu1 %v10913_v22 }
 0x702   :  { %6259 = vmatpush1.bf16.msra.mxu0 %v10919_v33  ;;  %6300 = vmatpush1.bf16.msra.mxu1 %v10925_v41 }
 0x703   :  { %6260 = vmatprep.subr.bf16.mxu0 %v10931_v59  ;;  %6301 = vmatprep.subr.bf16.mxu1 %v10937_v61 }
 0x706   :  { %6261 = vmatpush1.bf16.msra.mxu0 %v10943_v62  ;;  %6302 = vmatpush1.bf16.msra.mxu1 %v10949_v0 }
 0x707   :  { %6262 = vmatprep.subr.bf16.mxu0 %v11001_v20  ;;  %6303 = vmatprep.subr.bf16.mxu1 %v11007_v48 }
 0x70a   :  { %6263 = vmatpush1.bf16.msra.mxu0 %v11013_v40  ;;  %6304 = vmatpush1.bf16.msra.mxu1 %v11019_v2 }
 0x70b   :  { %6264 = vmatprep.subr.bf16.mxu0 %v11025_v47  ;;  %6305 = vmatprep.subr.bf16.mxu1 %v11031_v5 }
 0x70e   :  { %6265 = vmatpush1.bf16.msra.mxu0 %v11037_v60  ;;  %6306 = vmatpush1.bf16.msra.mxu1 %v11043_v6 }
 0x70f   :  { %6368 = vmatprep.subr.bf16.mxu0 %v10751_v29  ;;  %6409 = vmatprep.subr.bf16.mxu1 %v10757_v15 }
 0x7c4   :  { %v6166_v16 = vpop.f32.mrb[40].mxu0  ;;  %v6207_v7 = vpop.f32.mrb[40].mxu1 }
 0x7c5   :  { %v6214_v8 = vadd.f32 %v6166_v16, %v11349_v11  ;;  %v6216_v30 = vadd.f32 %v6207_v7, %v11350_v21  ;;  %v6168_v3 = vpop.f32.mrb[41].mxu0  ;;  %v6209_v63 = vpop.f32.mrb[41].mxu1 }
 0x7c6   :  { %v6215_v34 = vadd.f32 %v6168_v3, %v11351_v55  ;;  %v6217_v26 = vadd.f32 %v6209_v63, %v11352_v17  ;;  %v6170_v13 = vpop.f32.mrb[42].mxu0  ;;  %v6211_v31 = vpop.f32.mrb[42].mxu1  ;;  %v11358_v55 = vld [vmem:[#allocation53_spill] sm:$0xff] }
 0x7c7   :  { %v7576_v25 = vmul.f32 -1.442695, %v6214_v8  ;;  %v6171_v46 = vpop.f32.mrb[43].mxu0  ;;  %v6212_v10 = vpop.f32.mrb[43].mxu1  ;;  %v11353_v8 = vld [vmem:[#allocation48_spill] sm:$0xff] }
 0x7c8   :  { %v7577_v29 = vmul.f32 -1.442695, %v6215_v34  ;;  %v7578_v15 = vmul.f32 -1.442695, %v6217_v26  ;;  %v11360_v10 = vld [vmem:[#allocation64_spill] sm:$0xff] }
 0x7c9   :  { %7844 = vpow2.f32 %v7576_v25  ;;  %v11359_v25 = vld [vmem:[#allocation63_spill] sm:$0xff] }
 0x7ca   :  { %7846 = vpow2.f32 %v7577_v29 }
 0x7cb   :  { %7848 = vpow2.f32 %v7578_v15 }
 0x7cc   :  { %7850 = vtanh.f32 %v6216_v30 }
 0x7d3   :  { %v7845_v39 = vpop.eup %7844 }
 0x7d4   :  { %v7847_v24 = vpop.eup %7846  ;;  %v6221_v57 = vadd.f32 1.0, %v7845_v39 }
 0x7d5   :  { %v6227_v58 = vadd.f32 1.0, %v7847_v24  ;;  %v7849_v35 = vpop.eup %7848  ;;  %v11361_v24 = vld [vmem:[#allocation65_spill] sm:$0xff] }
 0x7d6   :  { %7852 = vrcp.f32 %v6221_v57  ;;  %v7851_v23 = vpop.eup %7850  ;;  %v6234_v44 = vadd.f32 1.0, %v7849_v35 }
 0x7d7   :  { %7854 = vrcp.f32 %v6227_v58  ;;  %v11362_v58 = vld [vmem:[#allocation66_spill] sm:$0xff] }
 0x7d8   :  { %7856 = vrcp.f32 %v6234_v44 }
 0x7e0   :  { %v7853_v42 = vpop.eup %7852 }
 0x7e1   :  { %v7855_v49 = vpop.eup %7854  ;;  %v6238_v12 = vmul.f32 %v7853_v42, %v7851_v23 }
 0x7e2   :  { %v6237_v50 = vmul.f32 %v7855_v49, %v10967_v43  ;;  %v7857_v16 = vpop.eup %7856 }
 0x7e4   :  { %v11053_v32 = vadd.f32 %v6238_v12, %v6237_v50 }
 0x7e6   :  { %7858 = vtanh.f32 %v11053_v32 }
 0x7f0   :  { %v7859_v7 = vpop.eup %7858 }
 0x7f1   :  { %v6241_v11 = vmul.f32 %v7859_v7, %v7857_v16 }
 0x7f3   :  { %v6242_v21 = vmul.f32 %v6241_v11, %v11353_v8  ;;  %v6249_v30 = vpack.c.bf16 %v6241_v11, %v6241_v11 }
 0x7f5   :  { %v11058_v3 = vadd.f32 %v6242_v21, %v10972_v1  ;;  %6283 = vmatmul.mubr.bf16.vlgmr.msra.gmra.mrb[44].mxu0 %v6249_v30  ;;  %6324 = vmatmul.mubr.bf16.vlgmr.msra.gmra.mrb[44].mxu1 %v6249_v30 }
 0x7f6   :  { %6369 = vmatpush1.bf16.msra.mxu0 %v10821_v45  ;;  %6410 = vmatpush1.bf16.msra.mxu1 %v10827_v9  ;;  %v11354_v9 = vld [vmem:[#allocation59_spill] sm:$0xff] }
 0x7f7   :  { %6370 = vmatprep.subr.bf16.mxu0 %v10833_v53  ;;  %6411 = vmatprep.subr.bf16.mxu1 %v10839_v54  ;;  %v11355_v54 = vld [vmem:[#allocation60_spill] sm:$0xff] }
 0x7f8   :  { %6400 = vmatprep.mubr.bf16.mxu0 %v11319_v18  ;;  %6441 = vmatprep.mubr.bf16.mxu1 %v11319_v18 }
 0x7fa   :  { %6371 = vmatpush1.bf16.msra.mxu0 %v10847_v36  ;;  %6412 = vmatpush1.bf16.msra.mxu1 %v10853_v51 }
 0x7fb   :  { %6372 = vmatprep.subr.bf16.mxu0 %v10859_v37  ;;  %6413 = vmatprep.subr.bf16.mxu1 %v10865_v4  ;;  %v11356_v4 = vld [vmem:[#allocation61_spill] sm:$0xff] }
 0x7fe   :  { %6373 = vmatpush1.bf16.msra.mxu0 %v10871_v52  ;;  %6414 = vmatpush1.bf16.msra.mxu1 %v10877_v19  ;;  %v11357_v19 = vld [vmem:[#allocation62_spill] sm:$0xff] }
 0x7ff   :  { %6374 = vmatprep.subr.bf16.mxu0 %v10883_v28  ;;  %6415 = vmatprep.subr.bf16.mxu1 %v10889_v38 }
 0x802   :  { %6375 = vmatpush1.bf16.msra.mxu0 %v10895_v56  ;;  %6416 = vmatpush1.bf16.msra.mxu1 %v10901_v14 }
 0x803   :  { %6376 = vmatprep.subr.bf16.mxu0 %v10907_v27  ;;  %6417 = vmatprep.subr.bf16.mxu1 %v10913_v22 }
 0x806   :  { %6377 = vmatpush1.bf16.msra.mxu0 %v10919_v33  ;;  %6418 = vmatpush1.bf16.msra.mxu1 %v10925_v41 }
 0x807   :  { %6378 = vmatprep.subr.bf16.mxu0 %v10931_v59  ;;  %6419 = vmatprep.subr.bf16.mxu1 %v10937_v61 }
 0x80a   :  { %6379 = vmatpush1.bf16.msra.mxu0 %v10943_v62  ;;  %6420 = vmatpush1.bf16.msra.mxu1 %v10949_v0 }
 0x80b   :  { %6380 = vmatprep.subr.bf16.mxu0 %v11001_v20  ;;  %6421 = vmatprep.subr.bf16.mxu1 %v11007_v48 }
 0x80e   :  { %6381 = vmatpush1.bf16.msra.mxu0 %v11013_v40  ;;  %6422 = vmatpush1.bf16.msra.mxu1 %v11019_v2 }
 0x80f   :  { %6382 = vmatprep.subr.bf16.mxu0 %v11025_v47  ;;  %6423 = vmatprep.subr.bf16.mxu1 %v11031_v5 }
 0x812   :  { %6383 = vmatpush1.bf16.msra.mxu0 %v11037_v60  ;;  %6424 = vmatpush1.bf16.msra.mxu1 %v11043_v6 }
 0x8c8   :  { %v6284_v18 = vpop.f32.mrb[44].mxu0  ;;  %v6325_v45 = vpop.f32.mrb[44].mxu1 }
 0x8c9   :  { %v6332_v53 = vadd.f32 %v6284_v18, %v11354_v9  ;;  %v6334_v36 = vadd.f32 %v6325_v45, %v11355_v54  ;;  %v6286_v51 = vpop.f32.mrb[45].mxu0  ;;  %v6327_v37 = vpop.f32.mrb[45].mxu1 }
 0x8ca   :  { %v6333_v52 = vadd.f32 %v6286_v51, %v11356_v4  ;;  %v6335_v28 = vadd.f32 %v6327_v37, %v11357_v19  ;;  %v6288_v38 = vpop.f32.mrb[46].mxu0  ;;  %v6329_v56 = vpop.f32.mrb[46].mxu1  ;;  %v11363_v4 = vld [vmem:[#allocation58_spill] sm:$0xff] }
 0x8cb   :  { %v7579_v14 = vmul.f32 -1.442695, %v6332_v53  ;;  %v6289_v27 = vpop.f32.mrb[47].mxu0  ;;  %v6330_v22 = vpop.f32.mrb[47].mxu1  ;;  %v7924_v56 = vld [vmem:[#allocation3] sm:$0xff] }
 0x8cc   :  { %v7580_v33 = vmul.f32 -1.442695, %v6333_v52  ;;  %v7581_v41 = vmul.f32 -1.442695, %v6335_v28  ;;  %v6484_v28 = vpop.permute.xlu0 %6483 }
 0x8cd   :  { %7860 = vpow2.f32 %v7579_v14 }
 0x8ce   :  { %7862 = vpow2.f32 %v7580_v33 }
 0x8cf   :  { %7864 = vpow2.f32 %v7581_v41 }
 0x8d0   :  { %7866 = vtanh.f32 %v6334_v36 }
 0x8d7   :  { %v7861_v59 = vpop.eup %7860 }
 0x8d8   :  { %v7863_v61 = vpop.eup %7862  ;;  %v6339_v62 = vadd.f32 1.0, %v7861_v59 }
 0x8d9   :  { %v6345_v0 = vadd.f32 1.0, %v7863_v61  ;;  %v7865_v43 = vpop.eup %7864 }
 0x8da   :  { %7868 = vrcp.f32 %v6339_v62  ;;  %v7867_v1 = vpop.eup %7866  ;;  %v6352_v2 = vadd.f32 1.0, %v7865_v43 }
 0x8db   :  { %7870 = vrcp.f32 %v6345_v0 }
 0x8dc   :  { %7872 = vrcp.f32 %v6352_v2 }
 0x8e4   :  { %v7869_v20 = vpop.eup %7868 }
 0x8e5   :  { %v7871_v48 = vpop.eup %7870  ;;  %v6356_v40 = vmul.f32 %v7869_v20, %v7867_v1 }
 0x8e6   :  { %v6355_v47 = vmul.f32 %v7871_v48, %v11053_v32  ;;  %v7873_v60 = vpop.eup %7872 }
 0x8e8   :  { %v6357_v5 = vadd.f32 %v6356_v40, %v6355_v47 }
 0x8ea   :  { %7874 = vtanh.f32 %v6357_v5 }
 0x8f4   :  { %v7875_v6 = vpop.eup %7874 }
 0x8f5   :  { %v6359_v63 = vmul.f32 %v7875_v6, %v7873_v60 }
 0x8f7   :  { %v6360_v34 = vmul.f32 %v6359_v63, %v11358_v55  ;;  %v6367_v17 = vpack.c.bf16 %v6359_v63, %v6359_v63 }
 0x8f9   :  { %v6361_v26 = vadd.f32 %v6360_v34, %v11058_v3  ;;  %6401 = vmatmul.mubr.bf16.vlgmr.msra.gmra.mrb[48].mxu0 %v6367_v17  ;;  %6442 = vmatmul.mubr.bf16.vlgmr.msra.gmra.mrb[48].mxu1 %v6367_v17 }
 0x9cc   :  { %v6402_v13 = vpop.f32.mrb[48].mxu0  ;;  %v6443_v31 = vpop.f32.mrb[48].mxu1 }
 0x9cd   :  { %v6450_v46 = vadd.f32 %v6402_v13, %v11359_v25  ;;  %v6452_v29 = vadd.f32 %v6443_v31, %v11360_v10  ;;  %v6404_v15 = vpop.f32.mrb[49].mxu0  ;;  %v6445_v39 = vpop.f32.mrb[49].mxu1 }
 0x9ce   :  { %v6451_v57 = vadd.f32 %v6404_v15, %v11361_v24  ;;  %v6453_v35 = vadd.f32 %v6445_v39, %v11362_v58  ;;  %v6406_v23 = vpop.f32.mrb[50].mxu0  ;;  %v6447_v42 = vpop.f32.mrb[50].mxu1 }
 0x9cf   :  { %v7582_v49 = vmul.f32 -1.442695, %v6450_v46  ;;  %v6407_v12 = vpop.f32.mrb[51].mxu0  ;;  %v6448_v44 = vpop.f32.mrb[51].mxu1 }
 0x9d0   :  { %v7583_v50 = vmul.f32 -1.442695, %v6451_v57  ;;  %v7584_v32 = vmul.f32 -1.442695, %v6453_v35 }
 0x9d1   :  { %7876 = vpow2.f32 %v7582_v49 }
 0x9d2   :  { %7878 = vpow2.f32 %v7583_v50 }
 0x9d3   :  { %7880 = vpow2.f32 %v7584_v32 }
 0x9d4   :  { %7882 = vtanh.f32 %v6452_v29 }
 0x9db   :  { %v7877_v16 = vpop.eup %7876 }
 0x9dc   :  { %v7879_v7 = vpop.eup %7878  ;;  %v6457_v11 = vadd.f32 1.0, %v7877_v16 }
 0x9dd   :  { %v6463_v8 = vadd.f32 1.0, %v7879_v7  ;;  %v7881_v21 = vpop.eup %7880 }
 0x9de   :  { %7884 = vrcp.f32 %v6457_v11  ;;  %v7883_v30 = vpop.eup %7882  ;;  %v6470_v9 = vadd.f32 1.0, %v7881_v21 }
 0x9df   :  { %7886 = vrcp.f32 %v6463_v8 }
 0x9e0   :  { %7888 = vrcp.f32 %v6470_v9 }
 0x9e8   :  { %v7885_v3 = vpop.eup %7884 }
 0x9e9   :  { %v7887_v18 = vpop.eup %7886  ;;  %v6474_v45 = vmul.f32 %v7885_v3, %v7883_v30 }
 0x9ea   :  { %v6473_v53 = vmul.f32 %v7887_v18, %v6357_v5  ;;  %v7889_v36 = vpop.eup %7888 }
 0x9ec   :  { %v6475_v54 = vadd.f32 %v6474_v45, %v6473_v53 }
 0x9ee   :  { %7890 = vtanh.f32 %v6475_v54 }
 0x9f8   :  { %v7891_v51 = vpop.eup %7890 }
 0x9f9   :  { %v6477_v37 = vmul.f32 %v7891_v51, %v7889_v36 }
 0x9fb   :  { %v6478_v52 = vmul.f32 %v6477_v37, %v11363_v4 }
 0x9fd   :  { %v6479_v19 = vadd.f32 %v6478_v52, %v6361_v26 }
 0x9ff   :  { %v6486_v38 = vmul.f32 %v6484_v28, %v6479_v19 }
 0xa01   :  { %v11104_v14 = vsub.f32 %v7924_v56, %v6486_v38  ;;  %v11106_v27 = vmul.f32 %v7924_v56, %v6486_v38 }
 0xa02   :  { %7979 = dma.done.wait [#allocation6], 32768 }
 0xa03   :  { %7980 = vsyncadd [#allocation6], 4294934528  ;;  %v11108_v22 = vpack.c.bf16 %v6486_v38, %v6486_v38  ;;  %v6497_v33 = vld [vmem:[#allocation5 + $0x8] sm:$0xff]  ;;  %v6499_v41 = vld [vmem:[#allocation5 + $0x18] sm:$0xff]  ;;  %s11365_s16 = sld [smem:[#allocation68_spill]]  ;;  %s11370_s14 = sld [smem:[#allocation69_spill]] }
 0xa04   :  { %v6496_v59 = vld [vmem:[#allocation5] sm:$0xff]  ;;  %6794 = vmatprep.subr.bf16.mxu0 %v6497_v33  ;;  %6876 = vmatprep.subr.bf16.mxu1 %v6499_v41  ;;  %v6498_v61 = vld [vmem:[#allocation5 + $0x10] sm:$0xff]  ;;  %v6505_v62 = vld [vmem:[#allocation5 + $0x48] sm:$0xff]  ;;  %s11372_s25 = sld [smem:[#allocation70_spill]]  ;;  %vm7219_vm8 = vcmask 7168   ;;  %s11373_s20 = sld [smem:[#allocation71_spill]] }
 0xa05   :  { %6826 = vmatprep.mubr.bf16.mxu0 %v11108_v22  ;;  %6908 = vmatprep.mubr.bf16.mxu1 %v11108_v22  ;;  %v6507_v0 = vld [vmem:[#allocation5 + $0x58] sm:$0xff]  ;;  %v6504_v43 = vld [vmem:[#allocation5 + $0x40] sm:$0xff]  ;;  %v6506_v1 = vld [vmem:[#allocation5 + $0x50] sm:$0xff]  ;;  %s11374_s0 = sld [smem:[#allocation67_spill]]  ;;  %s7986_s12 = smov [#allocation11]   ;;  %vm7247_vm9 = vcmask 0  }
 0xa06   :  { %6795 = vmatpush1.bf16.msra.mxu0 %v6496_v59  ;;  %6877 = vmatpush1.bf16.msra.mxu1 %v6498_v61  ;;  %v6513_v20 = vld [vmem:[#allocation5 + $0x88] sm:$0xff]  ;;  %v6515_v48 = vld [vmem:[#allocation5 + $0x98] sm:$0xff]  ;;  %v6512_v40 = vld [vmem:[#allocation5 + $0x80] sm:$0xff]  ;;  %s7257_s29 = sshll.u32 %s7986_s12, 4  ;;  %s7258_s29 = int_to_ptr.vmem [resolvable:$true] %s7257_s29 }
 0xa07   :  { %6796 = vmatprep.subr.bf16.mxu0 %v6505_v62  ;;  %6878 = vmatprep.subr.bf16.mxu1 %v6507_v0  ;;  %v6514_v2 = vld [vmem:[#allocation5 + $0x90] sm:$0xff]  ;;  %v6521_v47 = vld [vmem:[#allocation5 + $0xc8] sm:$0xff]  ;;  %v6523_v5 = vld [vmem:[#allocation5 + $0xd8] sm:$0xff]  ;;  %s7955_s30 = scalar_lea.vmem %s7258_s29, 16  ;;  %s7959_s21 = scalar_lea.vmem %s7258_s29, 32 }
 0xa08   :  { %v6520_v60 = vld [vmem:[#allocation5 + $0xc0] sm:$0xff]  ;;  %v6522_v6 = vld [vmem:[#allocation5 + $0xd0] sm:$0xff]  ;;  %v6529_v63 = vld [vmem:[#allocation5 + $0x108] sm:$0xff]  ;;  %p7956_p10 = scmp.ne.s32.totalorder %s7258_s29, %s7955_s30  ;;  %p7960_p11 = scmp.lt.s32.totalorder %s7258_s29, %s7258_s29 }
 0xa09   :  { %v6531_v55 = vld [vmem:[#allocation5 + $0x118] sm:$0xff]  ;;  %v6528_v34 = vld [vmem:[#allocation5 + $0x100] sm:$0xff]  ;;  %v6530_v17 = vld [vmem:[#allocation5 + $0x110] sm:$0xff]  ;;  %p7961_p12 = scmp.lt.s32.totalorder %s7959_s21, %s7955_s30 }
 0xa0a   :  { %6797 = vmatpush1.bf16.msra.mxu0 %v6504_v43  ;;  %6879 = vmatpush1.bf16.msra.mxu1 %v6506_v1  ;;  %v6537_v26 = vld [vmem:[#allocation5 + $0x148] sm:$0xff]  ;;  %v6539_v13 = vld [vmem:[#allocation5 + $0x158] sm:$0xff]  ;;  %v6536_v31 = vld [vmem:[#allocation5 + $0x140] sm:$0xff] }
 0xa0b   :  { %6798 = vmatprep.subr.bf16.mxu0 %v6513_v20  ;;  %6880 = vmatprep.subr.bf16.mxu1 %v6515_v48  ;;  %v6538_v25 = vld [vmem:[#allocation5 + $0x150] sm:$0xff]  ;;  %v6545_v46 = vld [vmem:[#allocation5 + $0x188] sm:$0xff]  ;;  %v6547_v10 = vld [vmem:[#allocation5 + $0x198] sm:$0xff]  ;;  %v11114_v48 = vpack.c.bf16 %v11106_v27, %v11106_v27  ;;  %p7962_p13 = por %p7961_p12, %p7960_p11 }
 0xa0c   :  { %v6544_v29 = vld [vmem:[#allocation5 + $0x180] sm:$0xff]  ;;  %v6546_v15 = vld [vmem:[#allocation5 + $0x190] sm:$0xff]  ;;  %v6553_v39 = vld [vmem:[#allocation5 + $0x1c8] sm:$0xff] }
 0xa0d   :  { %v6555_v24 = vld [vmem:[#allocation5 + $0x1d8] sm:$0xff]  ;;  %v6552_v57 = vld [vmem:[#allocation5 + $0x1c0] sm:$0xff]  ;;  %v6554_v58 = vld [vmem:[#allocation5 + $0x1d0] sm:$0xff]  ;;  %p7963_p0 = pnand %p7962_p13, %p7956_p10 }
 0xa0e   :  { %6799 = vmatpush1.bf16.msra.mxu0 %v6512_v40  ;;  %6881 = vmatpush1.bf16.msra.mxu1 %v6514_v2  ;;  %v6561_v35 = vld [vmem:[#allocation5 + $0x208] sm:$0xff]  ;;  %v6563_v23 = vld [vmem:[#allocation5 + $0x218] sm:$0xff]  ;;  %v6560_v42 = vld [vmem:[#allocation5 + $0x200] sm:$0xff] }
 0xa0f   :  { %6800 = vmatprep.subr.bf16.mxu0 %v6521_v47  ;;  %6882 = vmatprep.subr.bf16.mxu1 %v6523_v5  ;;  %v6562_v49 = vld [vmem:[#allocation5 + $0x210] sm:$0xff]  ;;  %v6569_v12 = vld [vmem:[#allocation5 + $0x248] sm:$0xff]  ;;  %v6571_v44 = vld [vmem:[#allocation5 + $0x258] sm:$0xff] }
 0xa10   :  { %v6568_v50 = vld [vmem:[#allocation5 + $0x240] sm:$0xff]  ;;  %v6570_v32 = vld [vmem:[#allocation5 + $0x250] sm:$0xff]  ;;  %v6577_v16 = vld [vmem:[#allocation5 + $0x288] sm:$0xff] }
 0xa11   :  { %v6579_v7 = vld [vmem:[#allocation5 + $0x298] sm:$0xff]  ;;  %v6576_v11 = vld [vmem:[#allocation5 + $0x280] sm:$0xff]  ;;  %v6578_v8 = vld [vmem:[#allocation5 + $0x290] sm:$0xff] }
 0xa12   :  { %6801 = vmatpush1.bf16.msra.mxu0 %v6520_v60  ;;  %6883 = vmatpush1.bf16.msra.mxu1 %v6522_v6  ;;  %v6585_v21 = vld [vmem:[#allocation5 + $0x2c8] sm:$0xff]  ;;  %v6587_v30 = vld [vmem:[#allocation5 + $0x2d8] sm:$0xff]  ;;  %v6584_v3 = vld [vmem:[#allocation5 + $0x2c0] sm:$0xff] }
 0xa13   :  { %6802 = vmatprep.subr.bf16.mxu0 %v6529_v63  ;;  %6884 = vmatprep.subr.bf16.mxu1 %v6531_v55  ;;  %v6586_v18 = vld [vmem:[#allocation5 + $0x2d0] sm:$0xff]  ;;  %v6593_v45 = vld [vmem:[#allocation5 + $0x308] sm:$0xff]  ;;  %v6595_v9 = vld [vmem:[#allocation5 + $0x318] sm:$0xff] }
 0xa14   :  { %v6592_v53 = vld [vmem:[#allocation5 + $0x300] sm:$0xff]  ;;  %v6594_v54 = vld [vmem:[#allocation5 + $0x310] sm:$0xff]  ;;  %v6601_v36 = vld [vmem:[#allocation5 + $0x348] sm:$0xff] }
 0xa15   :  { %v6603_v51 = vld [vmem:[#allocation5 + $0x358] sm:$0xff]  ;;  %v6600_v37 = vld [vmem:[#allocation5 + $0x340] sm:$0xff]  ;;  %v6602_v4 = vld [vmem:[#allocation5 + $0x350] sm:$0xff] }
 0xa16   :  { %6803 = vmatpush1.bf16.msra.mxu0 %v6528_v34  ;;  %6885 = vmatpush1.bf16.msra.mxu1 %v6530_v17  ;;  %v6609_v52 = vld [vmem:[#allocation5 + $0x388] sm:$0xff]  ;;  %v6611_v19 = vld [vmem:[#allocation5 + $0x398] sm:$0xff]  ;;  %v6608_v28 = vld [vmem:[#allocation5 + $0x380] sm:$0xff] }
 0xa17   :  { %6804 = vmatprep.subr.bf16.mxu0 %v6537_v26  ;;  %6886 = vmatprep.subr.bf16.mxu1 %v6539_v13  ;;  %v6610_v38 = vld [vmem:[#allocation5 + $0x390] sm:$0xff]  ;;  %v6617_v56 = vld [vmem:[#allocation5 + $0x3c8] sm:$0xff]  ;;  %v6619_v33 = vld [vmem:[#allocation5 + $0x3d8] sm:$0xff] }
 0xa18   :  { %v6616_v41 = vld [vmem:[#allocation5 + $0x3c0] sm:$0xff]  ;;  %v6618_v59 = vld [vmem:[#allocation5 + $0x3d0] sm:$0xff]  ;;  %v6625_v61 = vld [vmem:[#allocation5 + $0x408] sm:$0xff] }
 0xa19   :  { %v6627_v62 = vld [vmem:[#allocation5 + $0x418] sm:$0xff]  ;;  %v6624_v0 = vld [vmem:[#allocation5 + $0x400] sm:$0xff]  ;;  %v6626_v43 = vld [vmem:[#allocation5 + $0x410] sm:$0xff] }
 0xa1a   :  { %6805 = vmatpush1.bf16.msra.mxu0 %v6536_v31  ;;  %6887 = vmatpush1.bf16.msra.mxu1 %v6538_v25  ;;  %v6633_v1 = vld [vmem:[#allocation5 + $0x448] sm:$0xff]  ;;  %v6635_v20 = vld [vmem:[#allocation5 + $0x458] sm:$0xff]  ;;  %v6632_v2 = vld [vmem:[#allocation5 + $0x440] sm:$0xff] }
 0xa1b   :  { %6806 = vmatprep.subr.bf16.mxu0 %v6545_v46  ;;  %6888 = vmatprep.subr.bf16.mxu1 %v6547_v10  ;;  %v11364_v40 = vld [vmem:[#allocation19_spill] sm:$0xff]  ;;  %v6641_v5 = vld [vmem:[#allocation5 + $0x488] sm:$0xff]  ;;  %v6640_v27 = vld [vmem:[#allocation5 + $0x480] sm:$0xff] }
 0xa1c   :  { %v6634_v47 = vld [vmem:[#allocation5 + $0x450] sm:$0xff]  ;;  %v6643_v60 = vld [vmem:[#allocation5 + $0x498] sm:$0xff]  ;;  %v6649_v63 = vld [vmem:[#allocation5 + $0x4c8] sm:$0xff] }
 0xa1d   :  { %v6642_v6 = vld [vmem:[#allocation5 + $0x490] sm:$0xff]  ;;  %v6651_v55 = vld [vmem:[#allocation5 + $0x4d8] sm:$0xff]  ;;  %v6648_v34 = vld [vmem:[#allocation5 + $0x4c0] sm:$0xff] }
 0xa1e   :  { %6807 = vmatpush1.bf16.msra.mxu0 %v6544_v29  ;;  %6889 = vmatpush1.bf16.msra.mxu1 %v6546_v15  ;;  %v6650_v17 = vld [vmem:[#allocation5 + $0x4d0] sm:$0xff]  ;;  %v6657_v26 = vld [vmem:[#allocation5 + $0x508] sm:$0xff]  ;;  %v6659_v13 = vld [vmem:[#allocation5 + $0x518] sm:$0xff] }
 0xa1f   :  { %6808 = vmatprep.subr.bf16.mxu0 %v6553_v39  ;;  %6890 = vmatprep.subr.bf16.mxu1 %v6555_v24  ;;  %v6656_v31 = vld [vmem:[#allocation5 + $0x500] sm:$0xff]  ;;  %v6658_v25 = vld [vmem:[#allocation5 + $0x510] sm:$0xff]  ;;  %v6665_v46 = vld [vmem:[#allocation5 + $0x548] sm:$0xff] }
 0xa20   :  { %v6667_v10 = vld [vmem:[#allocation5 + $0x558] sm:$0xff]  ;;  %v6664_v29 = vld [vmem:[#allocation5 + $0x540] sm:$0xff]  ;;  %v6666_v15 = vld [vmem:[#allocation5 + $0x550] sm:$0xff] }
 0xa21   :  { %v6673_v39 = vld [vmem:[#allocation5 + $0x588] sm:$0xff]  ;;  %v6675_v24 = vld [vmem:[#allocation5 + $0x598] sm:$0xff] }
 0xa22   :  { %6809 = vmatpush1.bf16.msra.mxu0 %v6552_v57  ;;  %6891 = vmatpush1.bf16.msra.mxu1 %v6554_v58  ;;  %v6672_v57 = vld [vmem:[#allocation5 + $0x580] sm:$0xff]  ;;  %v6674_v58 = vld [vmem:[#allocation5 + $0x590] sm:$0xff] }
 0xa23   :  { %6810 = vmatprep.subr.bf16.mxu0 %v6561_v35  ;;  %6892 = vmatprep.subr.bf16.mxu1 %v6563_v23  ;;  %v6681_v35 = vld [vmem:[#allocation5 + $0x5c8] sm:$0xff]  ;;  %v6683_v23 = vld [vmem:[#allocation5 + $0x5d8] sm:$0xff] }
 0xa26   :  { %6811 = vmatpush1.bf16.msra.mxu0 %v6560_v42  ;;  %6893 = vmatpush1.bf16.msra.mxu1 %v6562_v49  ;;  %v6680_v42 = vld [vmem:[#allocation5 + $0x5c0] sm:$0xff]  ;;  %v6682_v49 = vld [vmem:[#allocation5 + $0x5d0] sm:$0xff] }
 0xa27   :  { %6812 = vmatprep.subr.bf16.mxu0 %v6569_v12  ;;  %6894 = vmatprep.subr.bf16.mxu1 %v6571_v44  ;;  %v6689_v12 = vld [vmem:[#allocation5 + $0x608] sm:$0xff]  ;;  %v6691_v44 = vld [vmem:[#allocation5 + $0x618] sm:$0xff] }
 0xa2a   :  { %6813 = vmatpush1.bf16.msra.mxu0 %v6568_v50  ;;  %6895 = vmatpush1.bf16.msra.mxu1 %v6570_v32  ;;  %v6688_v50 = vld [vmem:[#allocation5 + $0x600] sm:$0xff]  ;;  %v6690_v32 = vld [vmem:[#allocation5 + $0x610] sm:$0xff] }
 0xa2b   :  { %6814 = vmatprep.subr.bf16.mxu0 %v6577_v16  ;;  %6896 = vmatprep.subr.bf16.mxu1 %v6579_v7  ;;  %v6697_v16 = vld [vmem:[#allocation5 + $0x648] sm:$0xff]  ;;  %v6699_v7 = vld [vmem:[#allocation5 + $0x658] sm:$0xff] }
 0xa2e   :  { %6815 = vmatpush1.bf16.msra.mxu0 %v6576_v11  ;;  %6897 = vmatpush1.bf16.msra.mxu1 %v6578_v8  ;;  %v6696_v11 = vld [vmem:[#allocation5 + $0x640] sm:$0xff]  ;;  %v6698_v8 = vld [vmem:[#allocation5 + $0x650] sm:$0xff] }
 0xa2f   :  { %6816 = vmatprep.subr.bf16.mxu0 %v6585_v21  ;;  %6898 = vmatprep.subr.bf16.mxu1 %v6587_v30  ;;  %v6705_v21 = vld [vmem:[#allocation5 + $0x688] sm:$0xff]  ;;  %v6707_v30 = vld [vmem:[#allocation5 + $0x698] sm:$0xff] }
 0xa32   :  { %6817 = vmatpush1.bf16.msra.mxu0 %v6584_v3  ;;  %6899 = vmatpush1.bf16.msra.mxu1 %v6586_v18  ;;  %v6704_v3 = vld [vmem:[#allocation5 + $0x680] sm:$0xff]  ;;  %v6706_v18 = vld [vmem:[#allocation5 + $0x690] sm:$0xff] }
 0xa33   :  { %6818 = vmatprep.subr.bf16.mxu0 %v6593_v45  ;;  %6900 = vmatprep.subr.bf16.mxu1 %v6595_v9  ;;  %v6713_v45 = vld [vmem:[#allocation5 + $0x6c8] sm:$0xff]  ;;  %v6715_v9 = vld [vmem:[#allocation5 + $0x6d8] sm:$0xff] }
 0xa36   :  { %6819 = vmatpush1.bf16.msra.mxu0 %v6592_v53  ;;  %6901 = vmatpush1.bf16.msra.mxu1 %v6594_v54  ;;  %v6712_v53 = vld [vmem:[#allocation5 + $0x6c0] sm:$0xff]  ;;  %v6714_v54 = vld [vmem:[#allocation5 + $0x6d0] sm:$0xff] }
 0xa37   :  { %6820 = vmatprep.subr.bf16.mxu0 %v6601_v36  ;;  %6902 = vmatprep.subr.bf16.mxu1 %v6603_v51  ;;  %v6721_v36 = vld [vmem:[#allocation5 + $0x708] sm:$0xff]  ;;  %v6723_v51 = vld [vmem:[#allocation5 + $0x718] sm:$0xff] }
 0xa3a   :  { %6821 = vmatpush1.bf16.msra.mxu0 %v6600_v37  ;;  %6903 = vmatpush1.bf16.msra.mxu1 %v6602_v4  ;;  %v6720_v37 = vld [vmem:[#allocation5 + $0x700] sm:$0xff]  ;;  %v6722_v4 = vld [vmem:[#allocation5 + $0x710] sm:$0xff] }
 0xa3b   :  { %6822 = vmatprep.subr.bf16.mxu0 %v6609_v52  ;;  %6904 = vmatprep.subr.bf16.mxu1 %v6611_v19  ;;  %v6729_v52 = vld [vmem:[#allocation5 + $0x748] sm:$0xff]  ;;  %v6731_v19 = vld [vmem:[#allocation5 + $0x758] sm:$0xff] }
 0xa3e   :  { %6823 = vmatpush1.bf16.msra.mxu0 %v6608_v28  ;;  %6905 = vmatpush1.bf16.msra.mxu1 %v6610_v38  ;;  %v6728_v28 = vld [vmem:[#allocation5 + $0x740] sm:$0xff]  ;;  %v6730_v38 = vld [vmem:[#allocation5 + $0x750] sm:$0xff] }
 0xa3f   :  { %6824 = vmatprep.subr.bf16.mxu0 %v6617_v56  ;;  %6906 = vmatprep.subr.bf16.mxu1 %v6619_v33  ;;  %v6737_v56 = vld [vmem:[#allocation5 + $0x788] sm:$0xff]  ;;  %v6739_v33 = vld [vmem:[#allocation5 + $0x798] sm:$0xff] }
 0xa42   :  { %6825 = vmatpush1.bf16.msra.mxu0 %v6616_v41  ;;  %6907 = vmatpush1.bf16.msra.mxu1 %v6618_v59  ;;  %v6736_v41 = vld [vmem:[#allocation5 + $0x780] sm:$0xff]  ;;  %v6738_v59 = vld [vmem:[#allocation5 + $0x790] sm:$0xff] }
 0xa43   :  { %6835 = vmatprep.subr.bf16.mxu0 %v6625_v61  ;;  %6917 = vmatprep.subr.bf16.mxu1 %v6627_v62  ;;  %v6745_v61 = vld [vmem:[#allocation5 + $0x7c8] sm:$0xff]  ;;  %v6747_v62 = vld [vmem:[#allocation5 + $0x7d8] sm:$0xff] }
 0xa45   :  { %6827 = vmatmul.mubr.bf16.vlgmr.msra.gmra.mrb[52].mxu0 %v11364_v40  ;;  %6909 = vmatmul.mubr.bf16.vlgmr.msra.gmra.mrb[52].mxu1 %v11364_v40 }
 0xa46   :  { %6836 = vmatpush1.bf16.msra.mxu0 %v6624_v0  ;;  %6918 = vmatpush1.bf16.msra.mxu1 %v6626_v43  ;;  %v6744_v0 = vld [vmem:[#allocation5 + $0x7c0] sm:$0xff]  ;;  %v6746_v43 = vld [vmem:[#allocation5 + $0x7d0] sm:$0xff] }
 0xa47   :  { %6837 = vmatprep.subr.bf16.mxu0 %v6633_v1  ;;  %6919 = vmatprep.subr.bf16.mxu1 %v6635_v20  ;;  %v6501_v1 = vld [vmem:[#allocation5 + $0x28] sm:$0xff]  ;;  %v6503_v20 = vld [vmem:[#allocation5 + $0x38] sm:$0xff] }
 0xa48   :  { %6867 = vmatprep.mubr.bf16.mxu0 %v11114_v48  ;;  %6949 = vmatprep.mubr.bf16.mxu1 %v11114_v48 }
 0xa4a   :  { %6838 = vmatpush1.bf16.msra.mxu0 %v6632_v2  ;;  %6920 = vmatpush1.bf16.msra.mxu1 %v6634_v47  ;;  %v11122_v2 = vpack.c.bf16 %v11104_v14, %v11104_v14  ;;  %v6500_v47 = vld [vmem:[#allocation5 + $0x20] sm:$0xff]  ;;  %v6517_v14 = vld [vmem:[#allocation5 + $0xa8] sm:$0xff] }
 0xa4b   :  { %6839 = vmatprep.subr.bf16.mxu0 %v6641_v5  ;;  %6921 = vmatprep.subr.bf16.mxu1 %v6643_v60  ;;  %v6502_v5 = vld [vmem:[#allocation5 + $0x30] sm:$0xff]  ;;  %v6509_v60 = vld [vmem:[#allocation5 + $0x68] sm:$0xff] }
 0xa4e   :  { %6840 = vmatpush1.bf16.msra.mxu0 %v6640_v27  ;;  %6922 = vmatpush1.bf16.msra.mxu1 %v6642_v6  ;;  %v6511_v27 = vld [vmem:[#allocation5 + $0x78] sm:$0xff]  ;;  %v6508_v6 = vld [vmem:[#allocation5 + $0x60] sm:$0xff] }
 0xa4f   :  { %6841 = vmatprep.subr.bf16.mxu0 %v6649_v63  ;;  %6923 = vmatprep.subr.bf16.mxu1 %v6651_v55  ;;  %v6510_v63 = vld [vmem:[#allocation5 + $0x70] sm:$0xff]  ;;  %v6519_v55 = vld [vmem:[#allocation5 + $0xb8] sm:$0xff] }
 0xa52   :  { %6842 = vmatpush1.bf16.msra.mxu0 %v6648_v34  ;;  %6924 = vmatpush1.bf16.msra.mxu1 %v6650_v17  ;;  %v6516_v34 = vld [vmem:[#allocation5 + $0xa0] sm:$0xff]  ;;  %v6518_v17 = vld [vmem:[#allocation5 + $0xb0] sm:$0xff] }
 0xa53   :  { %6843 = vmatprep.subr.bf16.mxu0 %v6657_v26  ;;  %6925 = vmatprep.subr.bf16.mxu1 %v6659_v13  ;;  %v6525_v26 = vld [vmem:[#allocation5 + $0xe8] sm:$0xff]  ;;  %v6527_v13 = vld [vmem:[#allocation5 + $0xf8] sm:$0xff] }
 0xa56   :  { %6844 = vmatpush1.bf16.msra.mxu0 %v6656_v31  ;;  %6926 = vmatpush1.bf16.msra.mxu1 %v6658_v25  ;;  %v6524_v31 = vld [vmem:[#allocation5 + $0xe0] sm:$0xff]  ;;  %v6526_v25 = vld [vmem:[#allocation5 + $0xf0] sm:$0xff] }
 0xa57   :  { %6845 = vmatprep.subr.bf16.mxu0 %v6665_v46  ;;  %6927 = vmatprep.subr.bf16.mxu1 %v6667_v10  ;;  %v6533_v46 = vld [vmem:[#allocation5 + $0x128] sm:$0xff]  ;;  %v6535_v10 = vld [vmem:[#allocation5 + $0x138] sm:$0xff] }
 0xa5a   :  { %6846 = vmatpush1.bf16.msra.mxu0 %v6664_v29  ;;  %6928 = vmatpush1.bf16.msra.mxu1 %v6666_v15  ;;  %v6534_v29 = vld [vmem:[#allocation5 + $0x130] sm:$0xff]  ;;  %v6541_v15 = vld [vmem:[#allocation5 + $0x168] sm:$0xff] }
 0xa5b   :  { %6847 = vmatprep.subr.bf16.mxu0 %v6673_v39  ;;  %6929 = vmatprep.subr.bf16.mxu1 %v6675_v24  ;;  %v6543_v39 = vld [vmem:[#allocation5 + $0x178] sm:$0xff]  ;;  %v6540_v24 = vld [vmem:[#allocation5 + $0x160] sm:$0xff] }
 0xa5e   :  { %6848 = vmatpush1.bf16.msra.mxu0 %v6672_v57  ;;  %6930 = vmatpush1.bf16.msra.mxu1 %v6674_v58  ;;  %v6542_v57 = vld [vmem:[#allocation5 + $0x170] sm:$0xff]  ;;  %v6549_v58 = vld [vmem:[#allocation5 + $0x1a8] sm:$0xff] }
 0xa5f   :  { %6849 = vmatprep.subr.bf16.mxu0 %v6681_v35  ;;  %6931 = vmatprep.subr.bf16.mxu1 %v6683_v23  ;;  %v6551_v35 = vld [vmem:[#allocation5 + $0x1b8] sm:$0xff]  ;;  %v6548_v23 = vld [vmem:[#allocation5 + $0x1a0] sm:$0xff] }
 0xa62   :  { %6850 = vmatpush1.bf16.msra.mxu0 %v6680_v42  ;;  %6932 = vmatpush1.bf16.msra.mxu1 %v6682_v49  ;;  %v6550_v42 = vld [vmem:[#allocation5 + $0x1b0] sm:$0xff]  ;;  %v6557_v49 = vld [vmem:[#allocation5 + $0x1e8] sm:$0xff] }
 0xa63   :  { %6851 = vmatprep.subr.bf16.mxu0 %v6689_v12  ;;  %6933 = vmatprep.subr.bf16.mxu1 %v6691_v44  ;;  %v6559_v12 = vld [vmem:[#allocation5 + $0x1f8] sm:$0xff]  ;;  %v6556_v44 = vld [vmem:[#allocation5 + $0x1e0] sm:$0xff] }
 0xa66   :  { %6852 = vmatpush1.bf16.msra.mxu0 %v6688_v50  ;;  %6934 = vmatpush1.bf16.msra.mxu1 %v6690_v32  ;;  %v6558_v50 = vld [vmem:[#allocation5 + $0x1f0] sm:$0xff]  ;;  %v6565_v32 = vld [vmem:[#allocation5 + $0x228] sm:$0xff] }
 0xa67   :  { %6853 = vmatprep.subr.bf16.mxu0 %v6697_v16  ;;  %6935 = vmatprep.subr.bf16.mxu1 %v6699_v7  ;;  %v6567_v16 = vld [vmem:[#allocation5 + $0x238] sm:$0xff]  ;;  %v6564_v7 = vld [vmem:[#allocation5 + $0x220] sm:$0xff] }
 0xa6a   :  { %6854 = vmatpush1.bf16.msra.mxu0 %v6696_v11  ;;  %6936 = vmatpush1.bf16.msra.mxu1 %v6698_v8  ;;  %v6566_v11 = vld [vmem:[#allocation5 + $0x230] sm:$0xff]  ;;  %v6573_v8 = vld [vmem:[#allocation5 + $0x268] sm:$0xff] }
 0xa6b   :  { %6855 = vmatprep.subr.bf16.mxu0 %v6705_v21  ;;  %6937 = vmatprep.subr.bf16.mxu1 %v6707_v30  ;;  %v6575_v21 = vld [vmem:[#allocation5 + $0x278] sm:$0xff]  ;;  %v6572_v30 = vld [vmem:[#allocation5 + $0x260] sm:$0xff] }
 0xa6e   :  { %6856 = vmatpush1.bf16.msra.mxu0 %v6704_v3  ;;  %6938 = vmatpush1.bf16.msra.mxu1 %v6706_v18  ;;  %v6574_v3 = vld [vmem:[#allocation5 + $0x270] sm:$0xff]  ;;  %v6581_v18 = vld [vmem:[#allocation5 + $0x2a8] sm:$0xff] }
 0xa6f   :  { %6857 = vmatprep.subr.bf16.mxu0 %v6713_v45  ;;  %6939 = vmatprep.subr.bf16.mxu1 %v6715_v9  ;;  %v6583_v45 = vld [vmem:[#allocation5 + $0x2b8] sm:$0xff]  ;;  %v6580_v9 = vld [vmem:[#allocation5 + $0x2a0] sm:$0xff] }
 0xa72   :  { %6858 = vmatpush1.bf16.msra.mxu0 %v6712_v53  ;;  %6940 = vmatpush1.bf16.msra.mxu1 %v6714_v54  ;;  %v6582_v53 = vld [vmem:[#allocation5 + $0x2b0] sm:$0xff]  ;;  %v6589_v54 = vld [vmem:[#allocation5 + $0x2e8] sm:$0xff] }
 0xa73   :  { %6859 = vmatprep.subr.bf16.mxu0 %v6721_v36  ;;  %6941 = vmatprep.subr.bf16.mxu1 %v6723_v51  ;;  %v6591_v36 = vld [vmem:[#allocation5 + $0x2f8] sm:$0xff]  ;;  %v6588_v51 = vld [vmem:[#allocation5 + $0x2e0] sm:$0xff] }
 0xa76   :  { %6860 = vmatpush1.bf16.msra.mxu0 %v6720_v37  ;;  %6942 = vmatpush1.bf16.msra.mxu1 %v6722_v4  ;;  %v6590_v37 = vld [vmem:[#allocation5 + $0x2f0] sm:$0xff]  ;;  %v6597_v4 = vld [vmem:[#allocation5 + $0x328] sm:$0xff] }
 0xa77   :  { %6861 = vmatprep.subr.bf16.mxu0 %v6729_v52  ;;  %6943 = vmatprep.subr.bf16.mxu1 %v6731_v19  ;;  %v6599_v52 = vld [vmem:[#allocation5 + $0x338] sm:$0xff]  ;;  %v6596_v19 = vld [vmem:[#allocation5 + $0x320] sm:$0xff] }
 0xa7a   :  { %6862 = vmatpush1.bf16.msra.mxu0 %v6728_v28  ;;  %6944 = vmatpush1.bf16.msra.mxu1 %v6730_v38  ;;  %v6598_v28 = vld [vmem:[#allocation5 + $0x330] sm:$0xff]  ;;  %v6605_v38 = vld [vmem:[#allocation5 + $0x368] sm:$0xff] }
 0xa7b   :  { %6863 = vmatprep.subr.bf16.mxu0 %v6737_v56  ;;  %6945 = vmatprep.subr.bf16.mxu1 %v6739_v33  ;;  %v6607_v56 = vld [vmem:[#allocation5 + $0x378] sm:$0xff]  ;;  %v6604_v33 = vld [vmem:[#allocation5 + $0x360] sm:$0xff] }
 0xa7e   :  { %6864 = vmatpush1.bf16.msra.mxu0 %v6736_v41  ;;  %6946 = vmatpush1.bf16.msra.mxu1 %v6738_v59  ;;  %v6606_v41 = vld [vmem:[#allocation5 + $0x370] sm:$0xff]  ;;  %v6613_v59 = vld [vmem:[#allocation5 + $0x3a8] sm:$0xff] }
 0xa7f   :  { %6865 = vmatprep.subr.bf16.mxu0 %v6745_v61  ;;  %6947 = vmatprep.subr.bf16.mxu1 %v6747_v62  ;;  %v6615_v61 = vld [vmem:[#allocation5 + $0x3b8] sm:$0xff]  ;;  %v6612_v62 = vld [vmem:[#allocation5 + $0x3a0] sm:$0xff] }
 0xa82   :  { %6866 = vmatpush1.bf16.msra.mxu0 %v6744_v0  ;;  %6948 = vmatpush1.bf16.msra.mxu1 %v6746_v43  ;;  %v6614_v0 = vld [vmem:[#allocation5 + $0x3b0] sm:$0xff]  ;;  %v6621_v43 = vld [vmem:[#allocation5 + $0x3e8] sm:$0xff] }
 0xa83   :  { %6958 = vmatprep.subr.bf16.mxu0 %v6501_v1  ;;  %7040 = vmatprep.subr.bf16.mxu1 %v6503_v20  ;;  %v6623_v1 = vld [vmem:[#allocation5 + $0x3f8] sm:$0xff]  ;;  %v6620_v20 = vld [vmem:[#allocation5 + $0x3e0] sm:$0xff] }
 0xa85   :  { %6868 = vmatmul.mubr.bf16.vlgmr.msra.gmra.mrb[52].mxu0 %v11122_v2  ;;  %6950 = vmatmul.mubr.bf16.vlgmr.msra.gmra.mrb[52].mxu1 %v11122_v2 }
 0xa86   :  { %6959 = vmatpush1.bf16.msra.mxu0 %v6500_v47  ;;  %7041 = vmatpush1.bf16.msra.mxu1 %v6502_v5  ;;  %v6622_v47 = vld [vmem:[#allocation5 + $0x3f0] sm:$0xff]  ;;  %v6629_v5 = vld [vmem:[#allocation5 + $0x428] sm:$0xff] }
 0xa87   :  { %6960 = vmatprep.subr.bf16.mxu0 %v6509_v60  ;;  %7042 = vmatprep.subr.bf16.mxu1 %v6511_v27  ;;  %v6631_v60 = vld [vmem:[#allocation5 + $0x438] sm:$0xff]  ;;  %v6628_v27 = vld [vmem:[#allocation5 + $0x420] sm:$0xff] }
 0xa88   :  { %6990 = vmatprep.mubr.bf16.mxu0 %v11108_v22  ;;  %7072 = vmatprep.mubr.bf16.mxu1 %v11108_v22  ;;  %v6532_v22 = vld [vmem:[#allocation5 + $0x120] sm:$0xff] }
 0xa8a   :  { %6961 = vmatpush1.bf16.msra.mxu0 %v6508_v6  ;;  %7043 = vmatpush1.bf16.msra.mxu1 %v6510_v63  ;;  %v6630_v6 = vld [vmem:[#allocation5 + $0x430] sm:$0xff]  ;;  %v6637_v63 = vld [vmem:[#allocation5 + $0x468] sm:$0xff] }
 0xa8b   :  { %6962 = vmatprep.subr.bf16.mxu0 %v6517_v14  ;;  %7044 = vmatprep.subr.bf16.mxu1 %v6519_v55  ;;  %v6639_v14 = vld [vmem:[#allocation5 + $0x478] sm:$0xff]  ;;  %v6636_v55 = vld [vmem:[#allocation5 + $0x460] sm:$0xff] }
 0xa8e   :  { %6963 = vmatpush1.bf16.msra.mxu0 %v6516_v34  ;;  %7045 = vmatpush1.bf16.msra.mxu1 %v6518_v17  ;;  %v6638_v34 = vld [vmem:[#allocation5 + $0x470] sm:$0xff]  ;;  %v6645_v17 = vld [vmem:[#allocation5 + $0x4a8] sm:$0xff] }
 0xa8f   :  { %6964 = vmatprep.subr.bf16.mxu0 %v6525_v26  ;;  %7046 = vmatprep.subr.bf16.mxu1 %v6527_v13  ;;  %v6647_v26 = vld [vmem:[#allocation5 + $0x4b8] sm:$0xff]  ;;  %v6644_v13 = vld [vmem:[#allocation5 + $0x4a0] sm:$0xff] }
 0xa92   :  { %6965 = vmatpush1.bf16.msra.mxu0 %v6524_v31  ;;  %7047 = vmatpush1.bf16.msra.mxu1 %v6526_v25  ;;  %v6646_v31 = vld [vmem:[#allocation5 + $0x4b0] sm:$0xff]  ;;  %v6653_v25 = vld [vmem:[#allocation5 + $0x4e8] sm:$0xff] }
 0xa93   :  { %6966 = vmatprep.subr.bf16.mxu0 %v6533_v46  ;;  %7048 = vmatprep.subr.bf16.mxu1 %v6535_v10  ;;  %v6652_v46 = vld [vmem:[#allocation5 + $0x4e0] sm:$0xff]  ;;  %v6654_v10 = vld [vmem:[#allocation5 + $0x4f0] sm:$0xff] }
 0xa96   :  { %6967 = vmatpush1.bf16.msra.mxu0 %v6532_v22  ;;  %7049 = vmatpush1.bf16.msra.mxu1 %v6534_v29  ;;  %v6661_v22 = vld [vmem:[#allocation5 + $0x528] sm:$0xff]  ;;  %v6663_v29 = vld [vmem:[#allocation5 + $0x538] sm:$0xff] }
 0xa97   :  { %6968 = vmatprep.subr.bf16.mxu0 %v6541_v15  ;;  %7050 = vmatprep.subr.bf16.mxu1 %v6543_v39  ;;  %v6662_v15 = vld [vmem:[#allocation5 + $0x530] sm:$0xff]  ;;  %v6669_v39 = vld [vmem:[#allocation5 + $0x568] sm:$0xff] }
 0xa9a   :  { %6969 = vmatpush1.bf16.msra.mxu0 %v6540_v24  ;;  %7051 = vmatpush1.bf16.msra.mxu1 %v6542_v57  ;;  %v6671_v24 = vld [vmem:[#allocation5 + $0x578] sm:$0xff]  ;;  %v6668_v57 = vld [vmem:[#allocation5 + $0x560] sm:$0xff] }
 0xa9b   :  { %6970 = vmatprep.subr.bf16.mxu0 %v6549_v58  ;;  %7052 = vmatprep.subr.bf16.mxu1 %v6551_v35  ;;  %v6670_v58 = vld [vmem:[#allocation5 + $0x570] sm:$0xff]  ;;  %v6677_v35 = vld [vmem:[#allocation5 + $0x5a8] sm:$0xff] }
 0xa9e   :  { %6971 = vmatpush1.bf16.msra.mxu0 %v6548_v23  ;;  %7053 = vmatpush1.bf16.msra.mxu1 %v6550_v42  ;;  %v6679_v23 = vld [vmem:[#allocation5 + $0x5b8] sm:$0xff]  ;;  %v6676_v42 = vld [vmem:[#allocation5 + $0x5a0] sm:$0xff] }
 0xa9f   :  { %6972 = vmatprep.subr.bf16.mxu0 %v6557_v49  ;;  %7054 = vmatprep.subr.bf16.mxu1 %v6559_v12  ;;  %v6678_v49 = vld [vmem:[#allocation5 + $0x5b0] sm:$0xff]  ;;  %v6685_v12 = vld [vmem:[#allocation5 + $0x5e8] sm:$0xff] }
 0xaa2   :  { %6973 = vmatpush1.bf16.msra.mxu0 %v6556_v44  ;;  %7055 = vmatpush1.bf16.msra.mxu1 %v6558_v50  ;;  %v6687_v44 = vld [vmem:[#allocation5 + $0x5f8] sm:$0xff]  ;;  %v6684_v50 = vld [vmem:[#allocation5 + $0x5e0] sm:$0xff] }
 0xaa3   :  { %6974 = vmatprep.subr.bf16.mxu0 %v6565_v32  ;;  %7056 = vmatprep.subr.bf16.mxu1 %v6567_v16  ;;  %v6686_v32 = vld [vmem:[#allocation5 + $0x5f0] sm:$0xff]  ;;  %v6693_v16 = vld [vmem:[#allocation5 + $0x628] sm:$0xff] }
 0xaa6   :  { %6975 = vmatpush1.bf16.msra.mxu0 %v6564_v7  ;;  %7057 = vmatpush1.bf16.msra.mxu1 %v6566_v11  ;;  %v6695_v7 = vld [vmem:[#allocation5 + $0x638] sm:$0xff]  ;;  %v6692_v11 = vld [vmem:[#allocation5 + $0x620] sm:$0xff] }
 0xaa7   :  { %6976 = vmatprep.subr.bf16.mxu0 %v6573_v8  ;;  %7058 = vmatprep.subr.bf16.mxu1 %v6575_v21  ;;  %v6694_v8 = vld [vmem:[#allocation5 + $0x630] sm:$0xff]  ;;  %v6701_v21 = vld [vmem:[#allocation5 + $0x668] sm:$0xff] }
 0xaaa   :  { %6977 = vmatpush1.bf16.msra.mxu0 %v6572_v30  ;;  %7059 = vmatpush1.bf16.msra.mxu1 %v6574_v3  ;;  %v6703_v30 = vld [vmem:[#allocation5 + $0x678] sm:$0xff]  ;;  %v6700_v3 = vld [vmem:[#allocation5 + $0x660] sm:$0xff] }
 0xaab   :  { %6978 = vmatprep.subr.bf16.mxu0 %v6581_v18  ;;  %7060 = vmatprep.subr.bf16.mxu1 %v6583_v45  ;;  %v6702_v18 = vld [vmem:[#allocation5 + $0x670] sm:$0xff]  ;;  %v6709_v45 = vld [vmem:[#allocation5 + $0x6a8] sm:$0xff] }
 0xaae   :  { %6979 = vmatpush1.bf16.msra.mxu0 %v6580_v9  ;;  %7061 = vmatpush1.bf16.msra.mxu1 %v6582_v53  ;;  %v6711_v9 = vld [vmem:[#allocation5 + $0x6b8] sm:$0xff]  ;;  %v6708_v53 = vld [vmem:[#allocation5 + $0x6a0] sm:$0xff] }
 0xaaf   :  { %6980 = vmatprep.subr.bf16.mxu0 %v6589_v54  ;;  %7062 = vmatprep.subr.bf16.mxu1 %v6591_v36  ;;  %v6710_v54 = vld [vmem:[#allocation5 + $0x6b0] sm:$0xff]  ;;  %v6717_v36 = vld [vmem:[#allocation5 + $0x6e8] sm:$0xff] }
 0xab2   :  { %6981 = vmatpush1.bf16.msra.mxu0 %v6588_v51  ;;  %7063 = vmatpush1.bf16.msra.mxu1 %v6590_v37  ;;  %v6719_v51 = vld [vmem:[#allocation5 + $0x6f8] sm:$0xff]  ;;  %v6716_v37 = vld [vmem:[#allocation5 + $0x6e0] sm:$0xff] }
 0xab3   :  { %6982 = vmatprep.subr.bf16.mxu0 %v6597_v4  ;;  %7064 = vmatprep.subr.bf16.mxu1 %v6599_v52  ;;  %v6718_v4 = vld [vmem:[#allocation5 + $0x6f0] sm:$0xff]  ;;  %v6725_v52 = vld [vmem:[#allocation5 + $0x728] sm:$0xff] }
 0xab6   :  { %6983 = vmatpush1.bf16.msra.mxu0 %v6596_v19  ;;  %7065 = vmatpush1.bf16.msra.mxu1 %v6598_v28  ;;  %v6727_v19 = vld [vmem:[#allocation5 + $0x738] sm:$0xff]  ;;  %v6724_v28 = vld [vmem:[#allocation5 + $0x720] sm:$0xff] }
 0xab7   :  { %6984 = vmatprep.subr.bf16.mxu0 %v6605_v38  ;;  %7066 = vmatprep.subr.bf16.mxu1 %v6607_v56  ;;  %v6726_v38 = vld [vmem:[#allocation5 + $0x730] sm:$0xff]  ;;  %v6733_v56 = vld [vmem:[#allocation5 + $0x768] sm:$0xff] }
 0xaba   :  { %6985 = vmatpush1.bf16.msra.mxu0 %v6604_v33  ;;  %7067 = vmatpush1.bf16.msra.mxu1 %v6606_v41  ;;  %v6735_v33 = vld [vmem:[#allocation5 + $0x778] sm:$0xff]  ;;  %v6732_v41 = vld [vmem:[#allocation5 + $0x760] sm:$0xff] }
 0xabb   :  { %6986 = vmatprep.subr.bf16.mxu0 %v6613_v59  ;;  %7068 = vmatprep.subr.bf16.mxu1 %v6615_v61  ;;  %v6734_v59 = vld [vmem:[#allocation5 + $0x770] sm:$0xff]  ;;  %v6741_v61 = vld [vmem:[#allocation5 + $0x7a8] sm:$0xff] }
 0xabe   :  { %6987 = vmatpush1.bf16.msra.mxu0 %v6612_v62  ;;  %7069 = vmatpush1.bf16.msra.mxu1 %v6614_v0  ;;  %v6743_v62 = vld [vmem:[#allocation5 + $0x7b8] sm:$0xff]  ;;  %v6740_v0 = vld [vmem:[#allocation5 + $0x7a0] sm:$0xff] }
 0xabf   :  { %6988 = vmatprep.subr.bf16.mxu0 %v6621_v43  ;;  %7070 = vmatprep.subr.bf16.mxu1 %v6623_v1  ;;  %v6742_v43 = vld [vmem:[#allocation5 + $0x7b0] sm:$0xff]  ;;  %v6749_v1 = vld [vmem:[#allocation5 + $0x7e8] sm:$0xff] }
 0xac2   :  { %6989 = vmatpush1.bf16.msra.mxu0 %v6620_v20  ;;  %7071 = vmatpush1.bf16.msra.mxu1 %v6622_v47  ;;  %v6751_v20 = vld [vmem:[#allocation5 + $0x7f8] sm:$0xff]  ;;  %v6748_v47 = vld [vmem:[#allocation5 + $0x7e0] sm:$0xff] }
 0xac3   :  { %6999 = vmatprep.subr.bf16.mxu0 %v6629_v5  ;;  %7081 = vmatprep.subr.bf16.mxu1 %v6631_v60  ;;  %v6750_v5 = vld [vmem:[#allocation5 + $0x7f0] sm:$0xff]  ;;  %v6752_v60 = vld [vmem:[%s11365_s16] sm:$0xff] }
 0xac5   :  { %6991 = vmatmul.mubr.bf16.vlgmr.msra.gmra.mrb[56].mxu0 %v11364_v40  ;;  %7073 = vmatmul.mubr.bf16.vlgmr.msra.gmra.mrb[56].mxu1 %v11364_v40  ;;  %v6655_v40 = vld [vmem:[#allocation5 + $0x4f8] sm:$0xff] }
 0xac6   :  { %7000 = vmatpush1.bf16.msra.mxu0 %v6628_v27  ;;  %7082 = vmatpush1.bf16.msra.mxu1 %v6630_v6  ;;  %v11366_v27 = vld [vmem:[#allocation41_spill] sm:$0xff] }
 0xac7   :  { %7001 = vmatprep.subr.bf16.mxu0 %v6637_v63  ;;  %7083 = vmatprep.subr.bf16.mxu1 %v6639_v14  ;;  %v6757_v6 = vrot.slane %v6752_v60, %v11366_v27  ;;  %v11367_v63 = vld [vmem:[#allocation42_spill] sm:$0xff] }
 0xac8   :  { %7031 = vmatprep.mubr.bf16.mxu0 %v11114_v48  ;;  %7113 = vmatprep.mubr.bf16.mxu1 %v11114_v48  ;;  %v6660_v48 = vld [vmem:[#allocation5 + $0x520] sm:$0xff]  ;;  %v6765_v14 = vrot.slane %v6752_v60, %v11367_v63 }
 0xaca   :  { %7002 = vmatpush1.bf16.msra.mxu0 %v6636_v55  ;;  %7084 = vmatpush1.bf16.msra.mxu1 %v6638_v34  ;;  %v11368_v55 = vld [vmem:[#allocation43_spill] sm:$0xff] }
 0xacb   :  { %7003 = vmatprep.subr.bf16.mxu0 %v6645_v17  ;;  %7085 = vmatprep.subr.bf16.mxu1 %v6647_v26  ;;  %v6761_v34 = vrot.slane %v6752_v60, %v11368_v55  ;;  %v11369_v17 = vld [vmem:[#allocation44_spill] sm:$0xff] }
 0xacc   :  { %v6769_v26 = vrot.slane %v6752_v60, %v11369_v17 }
 0xace   :  { %7004 = vmatpush1.bf16.msra.mxu0 %v6644_v13  ;;  %7086 = vmatpush1.bf16.msra.mxu1 %v6646_v31  ;;  %v11144_v13 = vld [vmem:[%s11370_s14] sm:$0xff] }
 0xacf   :  { %7005 = vmatprep.subr.bf16.mxu0 %v6653_v25  ;;  %7087 = vmatprep.subr.bf16.mxu1 %v6655_v40 }
 0xad2   :  { %7006 = vmatpush1.bf16.msra.mxu0 %v6652_v46  ;;  %7088 = vmatpush1.bf16.msra.mxu1 %v6654_v10 }
 0xad3   :  { %7007 = vmatprep.subr.bf16.mxu0 %v6661_v22  ;;  %7089 = vmatprep.subr.bf16.mxu1 %v6663_v29  ;;  %v7151_v22 = vrot.slane %v11144_v13, %v11366_v27 }
 0xad6   :  { %7008 = vmatpush1.bf16.msra.mxu0 %v6660_v48  ;;  %7090 = vmatpush1.bf16.msra.mxu1 %v6662_v15  ;;  %v7155_v48 = vrot.slane %v11144_v13, %v11368_v55 }
 0xad7   :  { %7009 = vmatprep.subr.bf16.mxu0 %v6669_v39  ;;  %7091 = vmatprep.subr.bf16.mxu1 %v6671_v24 }
 0xada   :  { %7010 = vmatpush1.bf16.msra.mxu0 %v6668_v57  ;;  %7092 = vmatpush1.bf16.msra.mxu1 %v6670_v58 }
 0xadb   :  { %7011 = vmatprep.subr.bf16.mxu0 %v6677_v35  ;;  %7093 = vmatprep.subr.bf16.mxu1 %v6679_v23 }
 0xade   :  { %7012 = vmatpush1.bf16.msra.mxu0 %v6676_v42  ;;  %7094 = vmatpush1.bf16.msra.mxu1 %v6678_v49  ;;  %v7159_v49 = vrot.slane %v11144_v13, %v11367_v63 }
 0xadf   :  { %7013 = vmatprep.subr.bf16.mxu0 %v6685_v12  ;;  %7095 = vmatprep.subr.bf16.mxu1 %v6687_v44 }
 0xae2   :  { %7014 = vmatpush1.bf16.msra.mxu0 %v6684_v50  ;;  %7096 = vmatpush1.bf16.msra.mxu1 %v6686_v32 }
 0xae3   :  { %7015 = vmatprep.subr.bf16.mxu0 %v6693_v16  ;;  %7097 = vmatprep.subr.bf16.mxu1 %v6695_v7 }
 0xae6   :  { %7016 = vmatpush1.bf16.msra.mxu0 %v6692_v11  ;;  %7098 = vmatpush1.bf16.msra.mxu1 %v6694_v8  ;;  %v7163_v11 = vrot.slane %v11144_v13, %v11369_v17 }
 0xae7   :  { %7017 = vmatprep.subr.bf16.mxu0 %v6701_v21  ;;  %7099 = vmatprep.subr.bf16.mxu1 %v6703_v30 }
 0xaea   :  { %7018 = vmatpush1.bf16.msra.mxu0 %v6700_v3  ;;  %7100 = vmatpush1.bf16.msra.mxu1 %v6702_v18 }
 0xaeb   :  { %7019 = vmatprep.subr.bf16.mxu0 %v6709_v45  ;;  %7101 = vmatprep.subr.bf16.mxu1 %v6711_v9  ;;  %v11371_v9 = vld [vmem:[#allocation40_spill] sm:$0xff] }
 0xaee   :  { %7020 = vmatpush1.bf16.msra.mxu0 %v6708_v53  ;;  %7102 = vmatpush1.bf16.msra.mxu1 %v6710_v54  ;;  %v6772_v53 = vsub.s32 4, %v11371_v9  ;;  %v6780_v54 = vsub.s32 6, %v11371_v9 }
 0xaef   :  { %7021 = vmatprep.subr.bf16.mxu0 %v6717_v36  ;;  %7103 = vmatprep.subr.bf16.mxu1 %v6719_v51  ;;  %v6776_v36 = vsub.s32 5, %v11371_v9  ;;  %v6784_v51 = vsub.s32 7, %v11371_v9 }
 0xaf0   :  { %v7175_v17 = vrot.slane %v11144_v13, %v6780_v54 }
 0xaf2   :  { %7022 = vmatpush1.bf16.msra.mxu0 %v6716_v37  ;;  %7104 = vmatpush1.bf16.msra.mxu1 %v6718_v4  ;;  %v6773_v37 = vrot.slane %v6752_v60, %v6772_v53  ;;  %v6781_v4 = vrot.slane %v6752_v60, %v6780_v54 }
 0xaf3   :  { %7023 = vmatprep.subr.bf16.mxu0 %v6725_v52  ;;  %7105 = vmatprep.subr.bf16.mxu1 %v6727_v19  ;;  %v6777_v52 = vrot.slane %v6752_v60, %v6776_v36  ;;  %v6785_v19 = vrot.slane %v6752_v60, %v6784_v51 }
 0xaf6   :  { %7024 = vmatpush1.bf16.msra.mxu0 %v6724_v28  ;;  %7106 = vmatpush1.bf16.msra.mxu1 %v6726_v38 }
 0xaf7   :  { %7025 = vmatprep.subr.bf16.mxu0 %v6733_v56  ;;  %7107 = vmatprep.subr.bf16.mxu1 %v6735_v33 }
 0xafa   :  { %7026 = vmatpush1.bf16.msra.mxu0 %v6732_v41  ;;  %7108 = vmatpush1.bf16.msra.mxu1 %v6734_v59 }
 0xafb   :  { %7027 = vmatprep.subr.bf16.mxu0 %v6741_v61  ;;  %7109 = vmatprep.subr.bf16.mxu1 %v6743_v62  ;;  %v7167_v61 = vrot.slane %v11144_v13, %v6772_v53 }
 0xafe   :  { %7028 = vmatpush1.bf16.msra.mxu0 %v6740_v0  ;;  %7110 = vmatpush1.bf16.msra.mxu1 %v6742_v43 }
 0xaff   :  { %7029 = vmatprep.subr.bf16.mxu0 %v6749_v1  ;;  %7111 = vmatprep.subr.bf16.mxu1 %v6751_v20 }
 0xb02   :  { %7030 = vmatpush1.bf16.msra.mxu0 %v6748_v47  ;;  %7112 = vmatpush1.bf16.msra.mxu1 %v6750_v5  ;;  %v7171_v5 = vrot.slane %v11144_v13, %v6776_v36 }
 0xb05   :  { %7032 = vmatmul.mubr.bf16.vlgmr.msra.gmra.mrb[56].mxu0 %v11122_v2  ;;  %7114 = vmatmul.mubr.bf16.vlgmr.msra.gmra.mrb[56].mxu1 %v11122_v2 }
 0xb58   :  { %v6869_v31 = vpop.f32.mrb[52].mxu0  ;;  %v6951_v25 = vpop.f32.mrb[52].mxu1 }
 0xb59   :  { %v7588_v2 = vadd.f32 %v6869_v31, %v6757_v6  ;;  %v7590_v40 = vadd.f32 %v6951_v25, %v6765_v14  ;;  %v6871_v46 = vpop.f32.mrb[53].mxu0  ;;  %v6953_v10 = vpop.f32.mrb[53].mxu1  ;;  %v7179_v25 = vrot.slane %v11144_v13, %v6784_v51  ;;  %v7221_v13 = vld [vmem:[%s11372_s25] sm:$0xff] }
 0xb5a   :  { %v7589_v29 = vadd.f32 %v6871_v46, %v6761_v34  ;;  %v7591_v15 = vadd.f32 %v6953_v10, %v6769_v26  ;;  %v6873_v39 = vpop.f32.mrb[54].mxu0  ;;  %v6955_v24 = vpop.f32.mrb[54].mxu1 }
 0xb5b   :  { %vm7122_vm0 = vcmp.ge.f32.partialorder %v7588_v2, 0.0  ;;  %v7130_v57 = vmul.f32 0.01, %v7588_v2  ;;  %vm7124_vm1 = vcmp.ge.f32.partialorder %v7590_v40, 0.0  ;;  %v7132_v58 = vmul.f32 0.01, %v7590_v40 }
 0xb5c   :  { %vm7123_vm2 = vcmp.ge.f32.partialorder %v7589_v29, 0.0  ;;  %v7131_v35 = vmul.f32 0.01, %v7589_v29  ;;  %v7133_v23 = vmul.f32 0.01, %v7591_v15  ;;  %vm7125_vm3 = vcmp.ge.f32.partialorder %v7591_v15, 0.0 }
 0xb5d   :  { %v7138_v42 = vsel %vm7122_vm0, %v7588_v2, %v7130_v57  ;;  %v6874_v12 = vpop.f32.mrb[55].mxu0  ;;  %v6956_v44 = vpop.f32.mrb[55].mxu1  ;;  %v7140_v32 = vsel %vm7124_vm1, %v7590_v40, %v7132_v58 }
 0xb5e   :  { %v7188_v50 = vmul.f32 %v7151_v22, %v7138_v42  ;;  %v7139_v16 = vsel %vm7123_vm2, %v7589_v29, %v7131_v35  ;;  %v7141_v8 = vsel %vm7125_vm3, %v7591_v15, %v7133_v23  ;;  %v7190_v21 = vmul.f32 %v7159_v49, %v7140_v32  ;;  %v7585_v15 = vld [vmem:[#allocation10] ss:$0 sm:$0xff] }
 0xb5f   :  { %v7189_v7 = vmul.f32 %v7155_v48, %v7139_v16  ;;  %v7191_v3 = vmul.f32 %v7163_v11, %v7141_v8  ;;  %v7223_v23 = vsub.f32 1.0, %v7221_v13  ;;  %v7231_v8 = vld [vmem:[%s11374_s0] sm:$0xff] }
 0xb61   :  { %v7196_v30 = vadd.f32 %v7189_v7, %v7188_v50 }
 0xb63   :  { %v7197_v18 = vadd.f32 %v7196_v30, %v7190_v21 }
 0xb65   :  { %v7198_v45 = vadd.f32 %v7197_v18, %v7191_v3 }
 0xbd8   :  { %v7033_v28 = vpop.f32.mrb[56].mxu0  ;;  %v7115_v38 = vpop.f32.mrb[56].mxu1 }
 0xbd9   :  { %v7592_v56 = vadd.f32 %v7033_v28, %v6773_v37  ;;  %v7594_v33 = vadd.f32 %v7115_v38, %v6781_v4  ;;  %v7035_v41 = vpop.f32.mrb[57].mxu0  ;;  %v7117_v59 = vpop.f32.mrb[57].mxu1 }
 0xbda   :  { %v7593_v62 = vadd.f32 %v7035_v41, %v6777_v52  ;;  %v7595_v0 = vadd.f32 %v7117_v59, %v6785_v19  ;;  %v7037_v43 = vpop.f32.mrb[58].mxu0  ;;  %v7119_v1 = vpop.f32.mrb[58].mxu1 }
 0xbdb   :  { %vm7126_vm4 = vcmp.ge.f32.partialorder %v7592_v56, 0.0  ;;  %v7134_v20 = vmul.f32 0.01, %v7592_v56  ;;  %v7136_v47 = vmul.f32 0.01, %v7594_v33  ;;  %vm7128_vm5 = vcmp.ge.f32.partialorder %v7594_v33, 0.0 }
 0xbdc   :  { %vm7127_vm6 = vcmp.ge.f32.partialorder %v7593_v62, 0.0  ;;  %v7135_v60 = vmul.f32 0.01, %v7593_v62  ;;  %v7137_v6 = vmul.f32 0.01, %v7595_v0  ;;  %v7038_v63 = vpop.f32.mrb[59].mxu0 }
 0xbdd   :  { %v7142_v27 = vsel %vm7126_vm4, %v7592_v56, %v7134_v20  ;;  %v7120_v14 = vpop.f32.mrb[59].mxu1  ;;  %vm7129_vm7 = vcmp.ge.f32.partialorder %v7595_v0, 0.0  ;;  %v7144_v26 = vsel %vm7128_vm5, %v7594_v33, %v7136_v47 }
 0xbde   :  { %v7192_v55 = vmul.f32 %v7167_v61, %v7142_v27  ;;  %v7143_v34 = vsel %vm7127_vm6, %v7593_v62, %v7135_v60  ;;  %v7145_v40 = vsel %vm7129_vm7, %v7595_v0, %v7137_v6  ;;  %v7194_v46 = vmul.f32 %v7175_v17, %v7144_v26 }
 0xbdf   :  { %v7193_v31 = vmul.f32 %v7171_v5, %v7143_v34  ;;  %v7195_v22 = vmul.f32 %v7179_v25, %v7145_v40 }
 0xbe0   :  { %v7199_v2 = vadd.f32 %v7198_v45, %v7192_v55 }
 0xbe2   :  { %v7200_v10 = vadd.f32 %v7199_v2, %v7193_v31 }
 0xbe4   :  { %v7201_v29 = vadd.f32 %v7200_v10, %v7194_v46 }
 0xbe6   :  { %v7202_v48 = vadd.f32 %v7201_v29, %v7195_v22 }
 0xbe8   :  { %7203 = vadd.xlane.f32.xlu0 %v7202_v48 }
 0xc75   :  { %v7204_v39 = vpop.xlane.xlu0 %7203 }
 0xc76   :  { %v7212_v24 = vadd.f32 %v7585_v15, %v7204_v39 }
 0xc78   :  { %v7586_v57 = vmul.f32 -1.442695, %v7212_v24 }
 0xc7a   :  { %7925 = vpow2.f32 %v7586_v57 }
 0xc84   :  { %v7926_v58 = vpop.eup %7925 }
 0xc85   :  { %v7216_v35 = vadd.f32 1.0, %v7926_v58 }
 0xc87   :  { %7927 = vrcp.f32 %v7216_v35 }
 0xc91   :  { %v7928_v42 = vpop.eup %7927 }
 0xc92   :  { %v7224_v49 = vsub.f32 1.0, %v7928_v42  ;;  %7220 = vst.msk [vmem:[%s11373_s20] sm:$0xff] %vm7219_vm8, %v7928_v42  ;;  %v7222_v12 = vmul.f32 %v7928_v42, %v7221_v13 }
 0xc94   :  { %v7225_v44 = vmul.f32 %v7224_v49, %v7223_v23 }
 0xc96   :  { %v7226_v50 = vadd.f32 %v7225_v44, %v7222_v12 }
 0xc98   :  { %7929 = vlog2.f32 %v7226_v50  ;;  %v7232_v32 = vsub.f32 1.0, %v7226_v50 }
 0xc9a   :  { %v7233_v11 = vmul.f32 %v7232_v32, %v7232_v32 }
 0xc9c   :  { %v7234_v3 = vmul.f32 %v7233_v11, %v7231_v8 }
 0xca2   :  { %v7930_v16 = vpop.eup %7929 }
 0xca3   :  { %v7228_v7 = vmul.f32 0.6931472, %v7930_v16 }
 0xca5   :  { %v7229_v21 = vmax.f32 %v7228_v7, -100.0 }
 0xca7   :  { %v7230_v30 = vsub.f32 0.0, %v7229_v21 }
 0xca9   :  { %v7235_v18 = vmul.f32 %v7234_v3, %v7230_v30 }
 0xcab   :  { %v7236_v45 = vsel %vm7219_vm8, %v7235_v18, 0.0 }
 0xcac   :  { %7237 = vadd.xlane.f32.xlu0 %v7236_v45 }
 0xd39   :  { %v7238_v9 = vpop.xlane.xlu0 %7237 }
 0xd3a   :  { %v7239_v53 = vrot.slane %v7238_v9, 4 }
 0xd3c   :  { %v7240_v54 = vadd.f32 %v7239_v53, %v7238_v9 }
 0xd3e   :  { %v7241_v36 = vrot.slane %v7240_v54, 2 }
 0xd40   :  { %v7242_v51 = vadd.f32 %v7241_v36, %v7240_v54 }
 0xd42   :  { %v7243_v37 = vrot.slane %v7242_v51, 1 }
 0xd44   :  { %v7244_v4 = vadd.f32 %v7243_v37, %v7242_v51 }
 0xd46   :  { %7612 = vpush %v7244_v4 }
 0xd77   :  { %s7613_s28 = spop %7612 }
 0xd78   :  { %v7246_v52 = vstv %s7613_s28 }
 0xd79   :  { %7248 = vst.msk [vmem:[#allocation11] sm:$0x1] %vm7247_vm9, %v7246_v52 }
 0xd7a   :  { %7966 = shalt.err (!%p7963_p0)
}
 0xd7b   :  { %s11375_s23 = sld [smem:[#allocation72_spill]] }
 0xd81   :  { %s7967_s19 = scalar_lea.hbm %s11375_s23, 16 }
 0xd82   :  { %p7968_p1 = scmp.ne.s32.totalorder %s11375_s23, %s7967_s19  ;;  %p7971_p2 = scmp.lt.u32.totalorder %s7967_s19, %s11375_s23 }
 0xd84   :  { %p7973_p3 = pnand %p7971_p2, %p7968_p1 }
 0xd86   :  { %7976 = shalt.err (!%p7973_p3)
}
 0xd87   :  { %7260 = dma.vmem_to_hbm [thread:$0]  %s7258_s29, 16, %s11375_s23, [#allocation12]  }
 0xd88   :  { %7981 = dma.done.wait [#allocation12], 16  }
 0xd89   :  { %7982 = vsyncadd [#allocation12], 4294967280 }
 0xd8a   :  { %7266 = vsyncpa [#allocation12], 1 }
 0xd8b   :  { %7267 = vsyncmov [#allocation6] }
 0xd8e   :  { %s7268_s15 = vpop.sfrf %7267 }
 0xd8f   :  { %p7587_p4 = scmp.ne.s32.totalorder %s7268_s15, 0 }
 0xd91   :  { %7272 = shalt.err (%p7587_p4)  }

</bundles_post_ra>
